<compile_context>
chip_gen: v6e
topology: v6e:2x2x1
jax: 0.10.0
libtpu: 0.0.40
codegen_flags: <defaults>
</compile_context>

<pallas_src>
import functools
import math

import jax
import jax.numpy as jnp
from jax import lax
from jax.experimental import pallas as pl
from jax.experimental.pallas import tpu as pltpu

GN_GROUPS = 32
GN_EPS = 1e-5


def _vmem_capacity_bytes():
    """Physical VMEM per core; conservative (v7x-sized) fallback if query unavailable."""
    try:
        return int(pltpu.get_tpu_info().vmem_capacity_bytes)
    except Exception:
        return 64 * 1024 * 1024


def _largest_divisor_tile(S, cap):
    """Largest tile <= cap that divides S (multiples of 8); fall back to a single tile of S."""
    best = 0
    for cand in (8, 16, 32, 64, 128, 256, 512):
        if cand <= min(cap, S) and S % cand == 0:
            best = cand
    return best if best > 0 else S


def _choose_tq(S, tq_max):
    tq = _largest_divisor_tile(S, tq_max)
    # Guard against the TQ == S fallback blowing VMEM with an (S, S) f32 score tile.
    assert tq * S * 4 <= 32 * 1024 * 1024, (
        f"score tile ({tq}x{S}) too large for VMEM; pad H*W to a multiple of 8")
    return tq


def _vmem_limit_bytes(S, C, TQ, CH, G):
    """Per-step VMEM footprint estimate with headroom, capped below physical capacity."""
    f32, bf16 = 4, 2
    io = 2 * S * C * f32 + 2 * TQ * C * f32                       # double-buffered x / out tile
    wts = 2 * ((3 * C * C + C * C) * bf16 + (6 * C + C * G + 4 * C) * f32)
    scratch = S * 3 * C * bf16                                    # persistent fused qkv buffer
    inter = (CH * 3 * C * (f32 + bf16) + CH * C * (f32 + bf16)    # chunked projection temps
             + TQ * S * (f32 + bf16)                              # scores f32 + probs bf16
             + TQ * 4 * C * f32)                                  # q tile / attn out / projection
    est = io + wts + scratch + inter
    cap = int(0.85 * _vmem_capacity_bytes())                      # leave headroom for Mosaic
    return int(min(max(2 * est, 32 * 1024 * 1024), cap))


def self_attention_kernel(x_ref, gamma_ref, beta_ref, gmat_ref,
                          w_qkv_ref, b_qkv_ref, w_out_ref, b_out_ref,
                          o_ref, qkv_ref, *, chunk):
    qt = pl.program_id(1)
    S, C3 = qkv_ref.shape
    C = C3 // 3
    TQ = o_ref.shape[1]
    nc = S // chunk

    # ---- GroupNorm(32, C) + fused 1x1 qkv conv: done ONCE per batch element (qt == 0); ----
    # ---- result persists in the bf16 qkv_ref VMEM scratch across the qt grid steps.    ----
    @pl.when(qt == 0)
    def _project():
        gmat = gmat_ref[...]                             # (C, G) one-hot channel->group matrix
        G = gmat.shape[1]
        inv_count = 1.0 / float((C // G) * S)

        # pass 1: per-channel sum / sum-of-squares over S, chunked to bound live temporaries.
        def _stats(i, carry):
            cs, cq = carry
            start = pl.multiple_of(i * chunk, chunk)
            xc = x_ref[0, pl.ds(start, chunk), :]        # (chunk, C) f32
            cs = cs + jnp.sum(xc, axis=0, keepdims=True)
            cq = cq + jnp.sum(xc * xc, axis=0, keepdims=True)
            return cs, cq

        zeros = jnp.zeros((1, C), jnp.float32)
        ch_sum, ch_sq = lax.fori_loop(0, nc, _stats, (zeros, zeros), unroll=nc <= 4)

        grp_mean = jnp.dot(ch_sum, gmat, preferred_element_type=jnp.float32) * inv_count  # (1, G)
        grp_sq = jnp.dot(ch_sq, gmat, preferred_element_type=jnp.float32) * inv_count     # (1, G)
        # TODO(synk): E[x^2]-E[x]^2 can cancel for large-mean activations; clamp only hides it.
        grp_var = jnp.maximum(grp_sq - grp_mean * grp_mean, 0.0)
        contract_g = (((1,), (1,)), ((), ()))            # contract the G axis (no gmat.T)
        mean_c = lax.dot_general(grp_mean, gmat, contract_g, preferred_element_type=jnp.float32)
        var_c = lax.dot_general(grp_var, gmat, contract_g, preferred_element_type=jnp.float32)
        scale_c = lax.rsqrt(var_c + GN_EPS) * gamma_ref[...]       # (1, C)
        shift_c = beta_ref[...] - mean_c * scale_c                 # (1, C)

        # pass 2: chunked normalize -> one (chunk, C) @ (C, 3C) bf16 matmul -> bf16 scratch store.
        def _proj(i, carry):
            start = pl.multiple_of(i * chunk, chunk)
            xc = x_ref[0, pl.ds(start, chunk), :]
            normb = (xc * scale_c + shift_c).astype(jnp.bfloat16)
            qkv = jnp.dot(normb, w_qkv_ref[...],
                          preferred_element_type=jnp.float32) + b_qkv_ref[...]
            qkv_ref[pl.ds(start, chunk), :] = qkv.astype(jnp.bfloat16)
            return carry

        lax.fori_loop(0, nc, _proj, 0, unroll=nc <= 4)

    # ---- spatial attention on this query tile (1/sqrt(C) already folded into q weights) ----
    q_start = pl.multiple_of(qt * TQ, TQ)
    q = qkv_ref[pl.ds(q_start, TQ), pl.ds(0, C)]         # (TQ, C) bf16, direct sub-window read
    k = qkv_ref[:, C:2 * C]                              # (S, C)  bf16
    v = qkv_ref[:, 2 * C:]                               # (S, C)  bf16

    s = lax.dot_general(q, k, (((1,), (1,)), ((), ())),
                        preferred_element_type=jnp.float32)        # (TQ, S) f32
    m = jnp.max(s, axis=-1, keepdims=True)
    p = jnp.exp(s - m)
    denom = jnp.sum(p, axis=-1, keepdims=True)
    p = p * pl.reciprocal(denom, approx=True)

    attn_out = jnp.dot(p.astype(jnp.bfloat16), v,
                       preferred_element_type=jnp.float32)         # (TQ, C) f32

    # ---- 1x1 output conv + residual ----
    proj = jnp.dot(attn_out.astype(jnp.bfloat16), w_out_ref[...],
                   preferred_element_type=jnp.float32) + b_out_ref[...]
    o_ref[0] = proj + x_ref[0, pl.ds(q_start, TQ), :]


def self_attention_pallas(x_nchw, params, *, tq_max=None):
    """x_nchw: (B, C, H, W) float32.  Returns (B, C, H, W) float32."""
    B, C, H, W = x_nchw.shape
    S = H * W
    G = GN_GROUPS
    assert C % G == 0, "GroupNorm(32, C) requires C divisible by 32"

    if tq_max is None:
        # 128-MiB VMEM parts (v5e/v6e) can afford TQ=512; keep 256 on 64-MiB v7x.
        tq_max = 512 if _vmem_capacity_bytes() >= 96 * 1024 * 1024 else 256
    TQ = _choose_tq(S, tq_max)
    n_q = S // TQ
    CH = _largest_divisor_tile(S, 512)                   # QKV projection chunk over S

    # NCHW -> (B, S, C)
    x = jnp.transpose(x_nchw, (0, 2, 3, 1)).reshape(B, S, C)

    # Fused qkv weight: (3C, C) torch conv weight -> (C, 3C) matmul weight, cols = [q | k | v].
    # The attention 1/sqrt(C) scale is folded into the q columns (weight + bias) here, once.
    scale = 1.0 / math.sqrt(C)
    col_scale = jnp.concatenate([jnp.full((C,), scale, jnp.float32),
                                 jnp.ones((2 * C,), jnp.float32)])
    w_qkv = (params["w_qkv"].astype(jnp.float32).T * col_scale[None, :]).astype(jnp.bfloat16)
    b_qkv = (params["b_qkv"].astype(jnp.float32) * col_scale).reshape(1, 3 * C)
    w_out = params["w_out"].T.astype(jnp.bfloat16)       # (C, C) bf16
    b_out = params["b_out"].reshape(1, C).astype(jnp.float32)
    gamma = params["gamma"].reshape(1, C).astype(jnp.float32)
    beta = params["beta"].reshape(1, C).astype(jnp.float32)
    gmat = jnp.eye(G, dtype=jnp.float32)[jnp.arange(C) // (C // G)]   # (C, G) one-hot

    const = lambda r, c: pl.BlockSpec((r, c), lambda b, qt: (0, 0))
    kernel = functools.partial(self_attention_kernel, chunk=CH)

    out = pl.pallas_call(
        kernel,
        out_shape=jax.ShapeDtypeStruct((B, S, C), jnp.float32),
        grid_spec=pltpu.PrefetchScalarGridSpec(
            num_scalar_prefetch=0,
            grid=(B, n_q),
            in_specs=[
                pl.BlockSpec((1, S, C), lambda b, qt: (b, 0, 0)),    # x (full spatial per batch)
                const(1, C),                                         # gamma
                const(1, C),                                         # beta
                const(C, G),                                         # channel->group matrix
                const(C, 3 * C), const(1, 3 * C),                    # fused W_qkv (bf16), b_qkv
                const(C, C), const(1, C),                            # W_out (bf16), b_out
            ],
            out_specs=pl.BlockSpec((1, TQ, C), lambda b, qt: (b, qt, 0)),
            scratch_shapes=[pltpu.VMEM((S, 3 * C), jnp.bfloat16)],   # persistent fused qkv
        ),
        compiler_params=pltpu.CompilerParams(
            # qt MUST be "arbitrary": qkv_ref is filled at qt==0 and carried across qt steps.
            dimension_semantics=("parallel", "arbitrary"),
            vmem_limit_bytes=_vmem_limit_bytes(S, C, TQ, CH, G)),
    )(x, gamma, beta, gmat, w_qkv, b_qkv, w_out, b_out)

    return jnp.transpose(out.reshape(B, H, W, C), (0, 3, 1, 2))


def variance_scaling_uniform(key, shape, fan_in, fan_out, scale=1.0):
    # mode='fan_avg', distribution='uniform' (matches the torch init)
    s = scale / ((fan_in + fan_out) / 2.0)
    bound = math.sqrt(3.0 * s)
    return jax.random.uniform(key, shape, jnp.float32, -bound, bound)


def init_params(key, in_channel):
    C = in_channel
    k1, k2 = jax.random.split(key)
    return {
        "gamma": jnp.ones((C,), jnp.float32),
        "beta": jnp.zeros((C,), jnp.float32),
        # conv weight (out, in) for 1x1 conv; fan_in = C, fan_out = 3C / C
        "w_qkv": variance_scaling_uniform(k1, (3 * C, C), C, 3 * C, scale=1.0),
        "b_qkv": jnp.zeros((3 * C,), jnp.float32),
        "w_out": variance_scaling_uniform(k2, (C, C), C, C, scale=1e-10),
        "b_out": jnp.zeros((C,), jnp.float32),
    }


def reference_jax(x, params):
    """Pure-JAX replica of the torch forward (n_head=1), for correctness checks."""
    B, C, H, W = x.shape
    G = GN_GROUPS
    gamma, beta = params["gamma"], params["beta"]
    w_qkv, b_qkv = params["w_qkv"], params["b_qkv"]
    w_out, b_out = params["w_out"], params["b_out"]

    xg = x.reshape(B, G, C // G, H, W)
    mean = xg.mean(axis=(2, 3, 4), keepdims=True)
    var = xg.var(axis=(2, 3, 4), keepdims=True)
    norm = ((xg - mean) / jnp.sqrt(var + GN_EPS)).reshape(B, C, H, W)
    norm = norm * gamma[None, :, None, None] + beta[None, :, None, None]

    qkv = jnp.einsum("oc,bchw->bohw", w_qkv, norm) + b_qkv[None, :, None, None]
    q, k, v = qkv[:, :C], qkv[:, C:2 * C], qkv[:, 2 * C:]
    attn = jnp.einsum("bchw,bcyx->bhwyx", q, k) / math.sqrt(C)
    attn = jax.nn.softmax(attn.reshape(B, H, W, H * W), axis=-1).reshape(B, H, W, H, W)
    out = jnp.einsum("bhwyx,bcyx->bchw", attn, v)
    out = jnp.einsum("oc,bchw->bohw", w_out, out) + b_out[None, :, None, None]
    return out + x


if __name__ == "__main__":
    key = jax.random.PRNGKey(0)
    k_x, k_p, k_w = jax.random.split(key, 3)

    # C must be divisible by 32 for GroupNorm(32, C); S = 32*32 = 1024 -> multiple query tiles,
    # so the qt==0 projection hoist + scratch carry across grid steps are actually exercised.
    B, C, H, W = 2, 32, 32, 32
    x = jax.random.normal(k_x, (B, C, H, W), jnp.float32)
    params = init_params(k_p, C)

    # Check 1: faithful module init (out-conv scale 1e-10 -> output dominated by residual).
    y = jax.block_until_ready(self_attention_pallas(x, params))
    y_ref = reference_jax(x, params)
    assert y.shape == (B, C, H, W)
    err1 = float(jnp.max(jnp.abs(y - y_ref)))
    assert jnp.allclose(y, y_ref, rtol=1e-4, atol=1e-4), f"mismatch (default init), max err {err1}"

    # Check 2: non-degenerate out-conv so the full attention path is actually exercised
    # (looser tolerance: bf16 matmul operands with f32 accumulation + approx reciprocal).
    params_strong = dict(params)
    params_strong["w_out"] = variance_scaling_uniform(k_w, (C, C), C, C, scale=1.0)
    y2 = jax.block_until_ready(self_attention_pallas(x, params_strong))
    y2_ref = reference_jax(x, params_strong)
    err2 = float(jnp.max(jnp.abs(y2 - y2_ref)))
    assert jnp.allclose(y2, y2_ref, rtol=5e-2, atol=5e-2), f"mismatch (strong init), max err {err2}"

    print("KERNEL_OK")
</pallas_src>

<mosaic_0001>
module attributes {stable_mosaic.version = 11 : i64} {
  func.func @self_attention_kernel(%arg0: i32, %arg1: i32, %arg2: memref<1x1024x32xf32, #tpu.memory_space<vmem>>, %arg3: memref<1x32xf32, #tpu.memory_space<vmem>>, %arg4: memref<1x32xf32, #tpu.memory_space<vmem>>, %arg5: memref<32x32xf32, #tpu.memory_space<vmem>>, %arg6: memref<32x96xbf16, #tpu.memory_space<vmem>>, %arg7: memref<1x96xf32, #tpu.memory_space<vmem>>, %arg8: memref<32x32xbf16, #tpu.memory_space<vmem>>, %arg9: memref<1x32xf32, #tpu.memory_space<vmem>>, %arg10: memref<1x256x32xf32, #tpu.memory_space<vmem>>, %arg11: memref<1024x96xbf16, #tpu.memory_space<vmem>>) attributes {dimension_semantics = [#tpu.dimension_semantics<parallel>, #tpu.dimension_semantics<arbitrary>], iteration_bounds = array<i64: 2, 4>, scalar_prefetch = 0 : i64, scratch_operands = 1 : i64, tpu.core_type = #tpu.core_type<tc>, window_params = [{transform_indices = @transform_0, window_bounds = array<i64: 1, 1024, 32>}, {pipeline_mode = #tpu.pipeline_mode<synchronous>, transform_indices = @transform_1, window_bounds = array<i64: 1, 32>}, {pipeline_mode = #tpu.pipeline_mode<synchronous>, transform_indices = @transform_2, window_bounds = array<i64: 1, 32>}, {pipeline_mode = #tpu.pipeline_mode<synchronous>, transform_indices = @transform_3, window_bounds = array<i64: 32, 32>}, {pipeline_mode = #tpu.pipeline_mode<synchronous>, transform_indices = @transform_4, window_bounds = array<i64: 32, 96>}, {pipeline_mode = #tpu.pipeline_mode<synchronous>, transform_indices = @transform_5, window_bounds = array<i64: 1, 96>}, {pipeline_mode = #tpu.pipeline_mode<synchronous>, transform_indices = @transform_6, window_bounds = array<i64: 32, 32>}, {pipeline_mode = #tpu.pipeline_mode<synchronous>, transform_indices = @transform_7, window_bounds = array<i64: 1, 32>}, {transform_indices = @transform_8, window_bounds = array<i64: 1, 256, 32>}]} {
    %c0_i32 = arith.constant 0 : i32
    %0 = arith.cmpi eq, %arg1, %c0_i32 : i32
    %1 = arith.extui %0 : i1 to i32
    %c0_i32_0 = arith.constant 0 : i32
    %2 = arith.cmpi ne, %1, %c0_i32_0 : i32
    scf.if %2 {
      %c0_16 = arith.constant 0 : index
      %c0_17 = arith.constant 0 : index
      %35 = vector.load %arg5[%c0_16, %c0_17] : memref<32x32xf32, #tpu.memory_space<vmem>>, vector<32x32xf32>
      %cst_18 = arith.constant 0.000000e+00 : f32
      %36 = vector.broadcast %cst_18 : f32 to vector<1x32xf32>
      %c0_i32_19 = arith.constant 0 : i32
      %c512_i32 = arith.constant 512 : i32
      %37 = arith.muli %c0_i32_19, %c512_i32 : i32
      %38 = tpu.assume_multiple %37, 512 : i32
      %c0_20 = arith.constant 0 : index
      %39 = arith.index_cast %38 : i32 to index
      %c0_21 = arith.constant 0 : index
      %40 = vector.load %arg2[%c0_20, %39, %c0_21] : memref<1x1024x32xf32, #tpu.memory_space<vmem>>, vector<1x512x32xf32>
      %41 = vector.shape_cast %40 : vector<1x512x32xf32> to vector<512x32xf32>
      %cst_22 = arith.constant dense<0.000000e+00> : vector<32xf32>
      %42 = vector.multi_reduction <add>, %41, %cst_22 [0] : vector<512x32xf32> to vector<32xf32>
      %43 = vector.shape_cast %42 : vector<32xf32> to vector<1x32xf32>
      %44 = arith.addf %36, %43 : vector<1x32xf32>
      %45 = arith.mulf %41, %41 : vector<512x32xf32>
      %cst_23 = arith.constant dense<0.000000e+00> : vector<32xf32>
      %46 = vector.multi_reduction <add>, %45, %cst_23 [0] : vector<512x32xf32> to vector<32xf32>
      %47 = vector.shape_cast %46 : vector<32xf32> to vector<1x32xf32>
      %48 = arith.addf %36, %47 : vector<1x32xf32>
      %c1_i32 = arith.constant 1 : i32
      %c512_i32_24 = arith.constant 512 : i32
      %49 = arith.muli %c1_i32, %c512_i32_24 : i32
      %50 = tpu.assume_multiple %49, 512 : i32
      %c0_25 = arith.constant 0 : index
      %51 = arith.index_cast %50 : i32 to index
      %c0_26 = arith.constant 0 : index
      %52 = vector.load %arg2[%c0_25, %51, %c0_26] : memref<1x1024x32xf32, #tpu.memory_space<vmem>>, vector<1x512x32xf32>
      %53 = vector.shape_cast %52 : vector<1x512x32xf32> to vector<512x32xf32>
      %cst_27 = arith.constant dense<0.000000e+00> : vector<32xf32>
      %54 = vector.multi_reduction <add>, %53, %cst_27 [0] : vector<512x32xf32> to vector<32xf32>
      %55 = vector.shape_cast %54 : vector<32xf32> to vector<1x32xf32>
      %56 = arith.addf %44, %55 : vector<1x32xf32>
      %57 = arith.mulf %53, %53 : vector<512x32xf32>
      %cst_28 = arith.constant dense<0.000000e+00> : vector<32xf32>
      %58 = vector.multi_reduction <add>, %57, %cst_28 [0] : vector<512x32xf32> to vector<32xf32>
      %59 = vector.shape_cast %58 : vector<32xf32> to vector<1x32xf32>
      %60 = arith.addf %48, %59 : vector<1x32xf32>
      %c2_i32 = arith.constant 2 : i32
      %cst_29 = arith.constant dense<0.000000e+00> : vector<1x32xf32>
      %61 = tpu.matmul %56, %35, %cst_29 {dimension_numbers = #tpu.dot_dimension_numbers<[1], [0], [0], [1], [0, 0, 1, 1], [], []>} : vector<1x32xf32>, vector<32x32xf32>, vector<1x32xf32> -> vector<1x32xf32>
      %cst_30 = arith.constant 9.765625E-4 : f32
      %62 = vector.broadcast %cst_30 : f32 to vector<1x32xf32>
      %63 = arith.mulf %61, %62 : vector<1x32xf32>
      %cst_31 = arith.constant dense<0.000000e+00> : vector<1x32xf32>
      %64 = tpu.matmul %60, %35, %cst_31 {dimension_numbers = #tpu.dot_dimension_numbers<[1], [0], [0], [1], [0, 0, 1, 1], [], []>} : vector<1x32xf32>, vector<32x32xf32>, vector<1x32xf32> -> vector<1x32xf32>
      %cst_32 = arith.constant 9.765625E-4 : f32
      %65 = vector.broadcast %cst_32 : f32 to vector<1x32xf32>
      %66 = arith.mulf %64, %65 : vector<1x32xf32>
      %67 = arith.mulf %63, %63 : vector<1x32xf32>
      %68 = arith.subf %66, %67 : vector<1x32xf32>
      %cst_33 = arith.constant 0.000000e+00 : f32
      %69 = vector.broadcast %cst_33 : f32 to vector<1x32xf32>
      %70 = arith.maximumf %68, %69 : vector<1x32xf32>
      %cst_34 = arith.constant dense<0.000000e+00> : vector<1x32xf32>
      %71 = tpu.matmul %63, %35, %cst_34 {dimension_numbers = #tpu.dot_dimension_numbers<[1], [1], [0], [0], [0, 0, 1, 0], [], []>} : vector<1x32xf32>, vector<32x32xf32>, vector<1x32xf32> -> vector<1x32xf32>
      %cst_35 = arith.constant dense<0.000000e+00> : vector<1x32xf32>
      %72 = tpu.matmul %70, %35, %cst_35 {dimension_numbers = #tpu.dot_dimension_numbers<[1], [1], [0], [0], [0, 0, 1, 0], [], []>} : vector<1x32xf32>, vector<32x32xf32>, vector<1x32xf32> -> vector<1x32xf32>
      %cst_36 = arith.constant 9.99999974E-6 : f32
      %73 = vector.broadcast %cst_36 : f32 to vector<1x32xf32>
      %74 = arith.addf %72, %73 : vector<1x32xf32>
      %75 = math.rsqrt %74 : vector<1x32xf32>
      %c0_37 = arith.constant 0 : index
      %c0_38 = arith.constant 0 : index
      %76 = vector.load %arg3[%c0_37, %c0_38] : memref<1x32xf32, #tpu.memory_space<vmem>>, vector<1x32xf32>
      %77 = arith.mulf %75, %76 : vector<1x32xf32>
      %c0_39 = arith.constant 0 : index
      %c0_40 = arith.constant 0 : index
      %78 = vector.load %arg4[%c0_39, %c0_40] : memref<1x32xf32, #tpu.memory_space<vmem>>, vector<1x32xf32>
      %79 = arith.mulf %71, %77 : vector<1x32xf32>
      %80 = arith.subf %78, %79 : vector<1x32xf32>
      %c0_i32_41 = arith.constant 0 : i32
      %c512_i32_42 = arith.constant 512 : i32
      %81 = arith.muli %c0_i32_41, %c512_i32_42 : i32
      %82 = tpu.assume_multiple %81, 512 : i32
      %c0_43 = arith.constant 0 : index
      %83 = arith.index_cast %82 : i32 to index
      %c0_44 = arith.constant 0 : index
      %84 = vector.load %arg2[%c0_43, %83, %c0_44] : memref<1x1024x32xf32, #tpu.memory_space<vmem>>, vector<1x512x32xf32>
      %85 = vector.shape_cast %84 : vector<1x512x32xf32> to vector<512x32xf32>
      %86 = vector.broadcast %77 : vector<1x32xf32> to vector<512x32xf32>
      %87 = arith.mulf %85, %86 : vector<512x32xf32>
      %88 = vector.broadcast %80 : vector<1x32xf32> to vector<512x32xf32>
      %89 = arith.addf %87, %88 : vector<512x32xf32>
      %90 = arith.truncf %89 : vector<512x32xf32> to vector<512x32xbf16>
      %c0_45 = arith.constant 0 : index
      %c0_46 = arith.constant 0 : index
      %91 = vector.load %arg6[%c0_45, %c0_46] : memref<32x96xbf16, #tpu.memory_space<vmem>>, vector<32x96xbf16>
      %cst_47 = arith.constant dense<0.000000e+00> : vector<512x96xf32>
      %92 = tpu.matmul %90, %91, %cst_47 {dimension_numbers = #tpu.dot_dimension_numbers<[1], [0], [0], [1], [0, 0, 1, 1], [], []>} : vector<512x32xbf16>, vector<32x96xbf16>, vector<512x96xf32> -> vector<512x96xf32>
      %c0_48 = arith.constant 0 : index
      %c0_49 = arith.constant 0 : index
      %93 = vector.load %arg7[%c0_48, %c0_49] : memref<1x96xf32, #tpu.memory_space<vmem>>, vector<1x96xf32>
      %94 = vector.broadcast %93 : vector<1x96xf32> to vector<512x96xf32>
      %95 = arith.addf %92, %94 : vector<512x96xf32>
      %96 = arith.truncf %95 : vector<512x96xf32> to vector<512x96xbf16>
      %97 = arith.index_cast %82 : i32 to index
      %c0_50 = arith.constant 0 : index
      %98 = vector.load %arg11[%97, %c0_50] : memref<1024x96xbf16, #tpu.memory_space<vmem>>, vector<512x96xbf16>
      tpu.vector_store %arg11[%97, %c0_50], %96 {strides = array<i32>} : memref<1024x96xbf16, #tpu.memory_space<vmem>>, vector<512x96xbf16>,
      %c1_i32_51 = arith.constant 1 : i32
      %c512_i32_52 = arith.constant 512 : i32
      %99 = arith.muli %c1_i32_51, %c512_i32_52 : i32
      %100 = tpu.assume_multiple %99, 512 : i32
      %c0_53 = arith.constant 0 : index
      %101 = arith.index_cast %100 : i32 to index
      %c0_54 = arith.constant 0 : index
      %102 = vector.load %arg2[%c0_53, %101, %c0_54] : memref<1x1024x32xf32, #tpu.memory_space<vmem>>, vector<1x512x32xf32>
      %103 = vector.shape_cast %102 : vector<1x512x32xf32> to vector<512x32xf32>
      %104 = vector.broadcast %77 : vector<1x32xf32> to vector<512x32xf32>
      %105 = arith.mulf %103, %104 : vector<512x32xf32>
      %106 = vector.broadcast %80 : vector<1x32xf32> to vector<512x32xf32>
      %107 = arith.addf %105, %106 : vector<512x32xf32>
      %108 = arith.truncf %107 : vector<512x32xf32> to vector<512x32xbf16>
      %c0_55 = arith.constant 0 : index
      %c0_56 = arith.constant 0 : index
      %109 = vector.load %arg6[%c0_55, %c0_56] : memref<32x96xbf16, #tpu.memory_space<vmem>>, vector<32x96xbf16>
      %cst_57 = arith.constant dense<0.000000e+00> : vector<512x96xf32>
      %110 = tpu.matmul %108, %109, %cst_57 {dimension_numbers = #tpu.dot_dimension_numbers<[1], [0], [0], [1], [0, 0, 1, 1], [], []>} : vector<512x32xbf16>, vector<32x96xbf16>, vector<512x96xf32> -> vector<512x96xf32>
      %c0_58 = arith.constant 0 : index
      %c0_59 = arith.constant 0 : index
      %111 = vector.load %arg7[%c0_58, %c0_59] : memref<1x96xf32, #tpu.memory_space<vmem>>, vector<1x96xf32>
      %112 = vector.broadcast %111 : vector<1x96xf32> to vector<512x96xf32>
      %113 = arith.addf %110, %112 : vector<512x96xf32>
      %114 = arith.truncf %113 : vector<512x96xf32> to vector<512x96xbf16>
      %115 = arith.index_cast %100 : i32 to index
      %c0_60 = arith.constant 0 : index
      %116 = vector.load %arg11[%115, %c0_60] : memref<1024x96xbf16, #tpu.memory_space<vmem>>, vector<512x96xbf16>
      tpu.vector_store %arg11[%115, %c0_60], %114 {strides = array<i32>} : memref<1024x96xbf16, #tpu.memory_space<vmem>>, vector<512x96xbf16>,
      %c2_i32_61 = arith.constant 2 : i32
    } else {
    }
    %c256_i32 = arith.constant 256 : i32
    %3 = arith.muli %arg1, %c256_i32 : i32
    %4 = tpu.assume_multiple %3, 256 : i32
    %5 = arith.index_cast %4 : i32 to index
    %c0 = arith.constant 0 : index
    %6 = vector.load %arg11[%5, %c0] : memref<1024x96xbf16, #tpu.memory_space<vmem>>, vector<256x32xbf16>
    %c0_1 = arith.constant 0 : index
    %c32 = arith.constant 32 : index
    %7 = vector.load %arg11[%c0_1, %c32] : memref<1024x96xbf16, #tpu.memory_space<vmem>>, vector<1024x32xbf16>
    %c0_2 = arith.constant 0 : index
    %c64 = arith.constant 64 : index
    %8 = vector.load %arg11[%c0_2, %c64] : memref<1024x96xbf16, #tpu.memory_space<vmem>>, vector<1024x32xbf16>
    %cst = arith.constant dense<0.000000e+00> : vector<256x1024xf32>
    %9 = tpu.matmul %6, %7, %cst {dimension_numbers = #tpu.dot_dimension_numbers<[1], [1], [0], [0], [0, 0, 1, 0], [], []>} : vector<256x32xbf16>, vector<1024x32xbf16>, vector<256x1024xf32> -> vector<256x1024xf32>
    %cst_3 = arith.constant dense<0xFF800000> : vector<256xf32>
    %10 = vector.multi_reduction <maximumf>, %9, %cst_3 [1] : vector<256x1024xf32> to vector<256xf32>
    %11 = vector.shape_cast %10 : vector<256xf32> to vector<256x1xf32>
    %12 = vector.broadcast %11 : vector<256x1xf32> to vector<256x1024xf32>
    %13 = arith.subf %9, %12 : vector<256x1024xf32>
    %14 = math.exp %13 : vector<256x1024xf32>
    %cst_4 = arith.constant dense<0.000000e+00> : vector<256xf32>
    %15 = vector.multi_reduction <add>, %14, %cst_4 [1] : vector<256x1024xf32> to vector<256xf32>
    %16 = vector.shape_cast %15 : vector<256xf32> to vector<256x1xf32>
    %17 = tpu.reciprocal %16 {approx = true} : vector<256x1xf32> -> vector<256x1xf32>
    %18 = vector.broadcast %17 : vector<256x1xf32> to vector<256x1024xf32>
    %19 = arith.mulf %14, %18 : vector<256x1024xf32>
    %20 = arith.truncf %19 : vector<256x1024xf32> to vector<256x1024xbf16>
    %cst_5 = arith.constant dense<0.000000e+00> : vector<256x32xf32>
    %21 = tpu.matmul %20, %8, %cst_5 {dimension_numbers = #tpu.dot_dimension_numbers<[1], [0], [0], [1], [0, 0, 1, 1], [], []>} : vector<256x1024xbf16>, vector<1024x32xbf16>, vector<256x32xf32> -> vector<256x32xf32>
    %22 = arith.truncf %21 : vector<256x32xf32> to vector<256x32xbf16>
    %c0_6 = arith.constant 0 : index
    %c0_7 = arith.constant 0 : index
    %23 = vector.load %arg8[%c0_6, %c0_7] : memref<32x32xbf16, #tpu.memory_space<vmem>>, vector<32x32xbf16>
    %cst_8 = arith.constant dense<0.000000e+00> : vector<256x32xf32>
    %24 = tpu.matmul %22, %23, %cst_8 {dimension_numbers = #tpu.dot_dimension_numbers<[1], [0], [0], [1], [0, 0, 1, 1], [], []>} : vector<256x32xbf16>, vector<32x32xbf16>, vector<256x32xf32> -> vector<256x32xf32>
    %c0_9 = arith.constant 0 : index
    %c0_10 = arith.constant 0 : index
    %25 = vector.load %arg9[%c0_9, %c0_10] : memref<1x32xf32, #tpu.memory_space<vmem>>, vector<1x32xf32>
    %26 = vector.broadcast %25 : vector<1x32xf32> to vector<256x32xf32>
    %27 = arith.addf %24, %26 : vector<256x32xf32>
    %c0_11 = arith.constant 0 : index
    %28 = arith.index_cast %4 : i32 to index
    %c0_12 = arith.constant 0 : index
    %29 = vector.load %arg2[%c0_11, %28, %c0_12] : memref<1x1024x32xf32, #tpu.memory_space<vmem>>, vector<1x256x32xf32>
    %30 = vector.shape_cast %29 : vector<1x256x32xf32> to vector<256x32xf32>
    %31 = arith.addf %27, %30 : vector<256x32xf32>
    %c0_13 = arith.constant 0 : index
    %c0_14 = arith.constant 0 : index
    %c0_15 = arith.constant 0 : index
    %32 = vector.load %arg10[%c0_13, %c0_14, %c0_15] : memref<1x256x32xf32, #tpu.memory_space<vmem>>, vector<1x256x32xf32>
    %33 = vector.shape_cast %32 : vector<1x256x32xf32> to vector<256x32xf32>
    %34 = vector.shape_cast %31 : vector<256x32xf32> to vector<1x256x32xf32>
    tpu.vector_store %arg10[%c0_13, %c0_14, %c0_15], %34 {strides = array<i32>} : memref<1x256x32xf32, #tpu.memory_space<vmem>>, vector<1x256x32xf32>,
    return
  }
  func.func @transform_0(%arg0: i32, %arg1: i32) -> (i32, i32, i32) {
    %c0_i32 = arith.constant 0 : i32
    %c0_i32_0 = arith.constant 0 : i32
    %c0_i32_1 = arith.constant 0 : i32
    return %arg0, %c0_i32, %c0_i32_0 : i32, i32, i32
  }
  func.func @transform_1(%arg0: i32, %arg1: i32) -> (i32, i32) {
    %c0_i32 = arith.constant 0 : i32
    %c0_i32_0 = arith.constant 0 : i32
    %c0_i32_1 = arith.constant 0 : i32
    return %c0_i32, %c0_i32_0 : i32, i32
  }
  func.func @transform_2(%arg0: i32, %arg1: i32) -> (i32, i32) {
    %c0_i32 = arith.constant 0 : i32
    %c0_i32_0 = arith.constant 0 : i32
    %c0_i32_1 = arith.constant 0 : i32
    return %c0_i32, %c0_i32_0 : i32, i32
  }
  func.func @transform_3(%arg0: i32, %arg1: i32) -> (i32, i32) {
    %c0_i32 = arith.constant 0 : i32
    %c0_i32_0 = arith.constant 0 : i32
    %c0_i32_1 = arith.constant 0 : i32
    return %c0_i32, %c0_i32_0 : i32, i32
  }
  func.func @transform_4(%arg0: i32, %arg1: i32) -> (i32, i32) {
    %c0_i32 = arith.constant 0 : i32
    %c0_i32_0 = arith.constant 0 : i32
    %c0_i32_1 = arith.constant 0 : i32
    return %c0_i32, %c0_i32_0 : i32, i32
  }
  func.func @transform_5(%arg0: i32, %arg1: i32) -> (i32, i32) {
    %c0_i32 = arith.constant 0 : i32
    %c0_i32_0 = arith.constant 0 : i32
    %c0_i32_1 = arith.constant 0 : i32
    return %c0_i32, %c0_i32_0 : i32, i32
  }
  func.func @transform_6(%arg0: i32, %arg1: i32) -> (i32, i32) {
    %c0_i32 = arith.constant 0 : i32
    %c0_i32_0 = arith.constant 0 : i32
    %c0_i32_1 = arith.constant 0 : i32
    return %c0_i32, %c0_i32_0 : i32, i32
  }
  func.func @transform_7(%arg0: i32, %arg1: i32) -> (i32, i32) {
    %c0_i32 = arith.constant 0 : i32
    %c0_i32_0 = arith.constant 0 : i32
    %c0_i32_1 = arith.constant 0 : i32
    return %c0_i32, %c0_i32_0 : i32, i32
  }
  func.func @transform_8(%arg0: i32, %arg1: i32) -> (i32, i32, i32) {
    %c0_i32 = arith.constant 0 : i32
    %c0_i32_0 = arith.constant 0 : i32
    return %arg0, %arg1, %c0_i32 : i32, i32, i32
  }
}

</mosaic_0001>

<bundles_post_ra>
// kernel: tpu_custom_call.1
= control target key start
LH: loop header
LB: loop body
LE: loop exit
PB: predicated region body
PF: predicated region fallthrough
CT: control target
= control target key end

     0   :  { %s10604_s27 = smov 0   ;;  %s10606_s28 = smov 0   ;;  %s16985_s0 = inlined_call_operand.vmem [shape: f32[2,1024,32], index: 0, kind: input, shape index: {}]   ;;  %s16986_s1 = inlined_call_operand.vmem [shape: f32[1,32], index: 1, kind: input, shape index: {}]   ;;  %s16987_s2 = inlined_call_operand.vmem [shape: f32[1,32], index: 2, kind: input, shape index: {}]   ;;  %s16988_s3 = inlined_call_operand.vmem [shape: f32[32,32], index: 3, kind: input, shape index: {}]   ;;  %s16989_s4 = inlined_call_operand.vmem [shape: bf16[32,96], index: 4, kind: input, shape index: {}]   ;;  %s16990_s5 = inlined_call_operand.vmem [shape: f32[1,96], index: 5, kind: input, shape index: {}]   ;;  %s16991_s6 = inlined_call_operand.vmem [shape: bf16[32,32], index: 6, kind: input, shape index: {}]   ;;  %s16992_s7 = inlined_call_operand.vmem [shape: f32[1,32], index: 7, kind: input, shape index: {}]   ;;  %s16993_s8 = inlined_call_operand.vmem [shape: f32[2,1024,32], index: 8, kind: output, shape index: {}]  }
   0x1   :  { %s10608_s29 = smov 0   ;;  %s10610_s30 = smov 0  }
   0x2   :  { %s10612_s9 = smov 0  }
   0x3 LB: > { %s27_s10 = sadd.s32 1, %s10545_s29  ;;  %s30_s11 = sadd.s32 1, %s10549_s30  ;;  %s10553_s9 = sphi %s10612_s9, %s18_s9   ;;  %s10549_s30 = sphi %s10610_s30, %s19230_s30   ;;  %s10545_s29 = sphi %s10608_s29, %s19229_s29   ;;  %s10541_s28 = sphi %s10606_s28, %s19228_s28   ;;  %s10537_s27 = sphi %s10604_s27, %s19227_s27  }
   0x4   : > { %p28_p0 = scmp.ge.s32.totalorder %s27_s10, 4  ;;  %p8038_p1 = scmp.ge.s32.totalorder %s10553_s9, 1 }
   0x5   : > { %p276_p2 = scmp.lt.s32.totalorder %s10553_s9, 9 }
   0x6   : > { %s19232_s10 = smov (%p28_p0, %s27_s10), 0  ;;  %s19234_s11 = smov (!%p28_p0, %s30_s11), %s10549_s30 }
   0x7   : > { %p277_p3 = pnand %p8038_p1, %p276_p2  ;;  %p32_p4 = scmp.ge.s32.totalorder %s19234_s11, 2 }
   0x9   : > { %s19236_s11 = smov (%p32_p4, %s19234_s11), 0  ;;  %280 = sbr.rel (%p277_p3) target bundleno = 2745 (0xab9), region = 52 }
   0xe   : > { %p314_p5 = scmp.lt.s32.totalorder %s10541_s28, 1  ;;  %s8041_s12 = sshll.u32 %s10537_s27, 5 }
   0xf   : > { %p322_p6 = scmp.lt.s32.totalorder %s8041_s12, 127  ;;  %p8044_p7 = scmp.ne.s32.totalorder %s10537_s27, 0 }
  0x10   : > { %s19238_s28 = smov (!%p314_p5, %s10541_s28), 1 }
  0x11   : > { %s19240_s12 = smov (!%p322_p6, %s8041_s12), 127  ;;  %s8550_s13 = sshll.u32 %s19238_s28, 10 }
  0x12   : > { %s8042_s14 = sshll.u32 %s19238_s28, 7  ;;  %s10640_s17 = scalar_lea.vmem %s16985_s0, %s8550_s13 }
  0x13   : > { %s325_s18 = sadd.s32 %s8042_s14, %s19240_s12  ;;  %333 = sbr.rel (%p8044_p7) target bundleno = 1023 (0x3ff), region = 56 }
  0x14   : > { %s8043_s19 = sshll.u32 %s325_s18, 3 }
  0x15   : > { %s10645_s22 = scalar_lea.vmem %s16993_s8, %s8043_s19 }
  0x18   : > { %v337_v0 = vld [vmem:[%s16988_s3 + $0x18] sm:$0xff]  ;;  %vm402_vm0 = vcmask 261120   ;;  %v16994_v1 = vmov 0.0   ;;  %v336_v2 = vld [vmem:[%s16988_s3 + $0x10] sm:$0xff]  ;;  %v10657_v3 = vld [vmem:[%s10640_s17] sm:$0xff]  ;;  %vm10556_vm1 = vmmov 0  }
  0x19   : > { %9425 = vmatprep.subr.mxu0 %v16994_v1  ;;  %9436 = vmatprep.subr.mxu1 %v16994_v1  ;;  %v10660_v4 = vld [vmem:[%s10640_s17 + $0x8] sm:$0xff]  ;;  %v10663_v5 = vld [vmem:[%s10640_s17 + $0x10] sm:$0xff]  ;;  %v10666_v6 = vld [vmem:[%s10640_s17 + $0x18] sm:$0xff]  ;;  %v403_v7 = vsel %vm402_vm0, %v10657_v3, 0.0  ;;  %vm2281_vm2 = vcmask 781312  }
  0x1a   : > { %9426 = vmatpush3.msra.mxu0 %v337_v0  ;;  %9437 = vmatpush3.msra.mxu1 %v337_v0  ;;  %v404_v8 = vsel %vm402_vm0, %v10660_v4, 0.0  ;;  %v335_v9 = vld [vmem:[%s16988_s3 + $0x8] sm:$0xff]  ;;  %v10678_v10 = vld [vmem:[%s10640_s17 + $0x20] sm:$0xff]  ;;  %v406_v12 = vsel %vm402_vm0, %v10663_v5, 0.0  ;;  %v408_v13 = vsel %vm402_vm0, %v10666_v6, 0.0  ;;  %v10698_v18 = vld [vmem:[%s10640_s17 + $0x30] sm:$0xff] }
  0x1b   : > { %9427 = vmatprep.subr.mxu0 %v16994_v1  ;;  %9438 = vmatprep.subr.mxu1 %v16994_v1  ;;  %v405_v11 = vadd.f32 %v404_v8, %v403_v7  ;;  %v334_v14 = vld [vmem:[%s16988_s3] sm:$0xff]  ;;  %v10690_v15 = vld [vmem:[%s10640_s17 + $0x28] sm:$0xff]  ;;  %v410_v17 = vsel %vm402_vm0, %v10678_v10, 0.0  ;;  %v10704_v21 = vld [vmem:[%s10640_s17 + $0x38] sm:$0xff]  ;;  %v414_v23 = vsel %vm402_vm0, %v10698_v18, 0.0 }
  0x1c   : > { %9428 = vmatpush3.msra.mxu0 %v336_v2  ;;  %9439 = vmatpush3.msra.mxu1 %v336_v2  ;;  %v412_v20 = vsel %vm402_vm0, %v10690_v15, 0.0  ;;  %v10713_v24 = vld [vmem:[%s10640_s17 + $0x40] sm:$0xff]  ;;  %v416_v26 = vsel %vm402_vm0, %v10704_v21, 0.0  ;;  %v10718_v27 = vld [vmem:[%s10640_s17 + $0x48] sm:$0xff]  ;;  %v10723_v30 = vld [vmem:[%s10640_s17 + $0x50] sm:$0xff] }
  0x1d   : > { %9429 = vmatprep.subr.mxu0 %v16994_v1  ;;  %9440 = vmatprep.subr.mxu1 %v16994_v1  ;;  %v407_v16 = vadd.f32 %v406_v12, %v405_v11  ;;  %v418_v29 = vsel %vm402_vm0, %v10713_v24, 0.0  ;;  %v420_v32 = vsel %vm402_vm0, %v10718_v27, 0.0  ;;  %v10728_v33 = vld [vmem:[%s10640_s17 + $0x58] sm:$0xff]  ;;  %v422_v35 = vsel %vm402_vm0, %v10723_v30, 0.0  ;;  %v10733_v36 = vld [vmem:[%s10640_s17 + $0x60] sm:$0xff]  ;;  %v10738_v39 = vld [vmem:[%s10640_s17 + $0x68] sm:$0xff] }
  0x1e   : > { %9430 = vmatpush3.msra.mxu0 %v335_v9  ;;  %9433 = vmatprep.mubr.msk.f32.mxu0 %vm10556_vm1, %v16994_v1  ;;  %v424_v38 = vsel %vm402_vm0, %v10728_v33, 0.0  ;;  %v10741_v41 = vld [vmem:[%s10640_s17 + $0x70] sm:$0xff]  ;;  %v426_v42 = vsel %vm402_vm0, %v10733_v36, 0.0  ;;  %v10746_v43 = vld [vmem:[%s10640_s17 + $0x200] sm:$0xff]  ;;  %v10749_v45 = vld [vmem:[%s10640_s17 + $0x208] sm:$0xff]  ;;  %v428_v49 = vsel %vm402_vm0, %v10738_v39, 0.0 }
  0x1f   : > { %9431 = vmatprep.subr.mxu0 %v16994_v1  ;;  %9441 = vmatpush3.msra.mxu1 %v335_v9  ;;  %v409_v19 = vadd.f32 %v408_v13, %v407_v16  ;;  %v10752_v46 = vld [vmem:[%s10640_s17 + $0x210] sm:$0xff]  ;;  %v10755_v47 = vld [vmem:[%s10640_s17 + $0x218] sm:$0xff]  ;;  %v800_v48 = vsel %vm402_vm0, %v10746_v43, 0.0  ;;  %v801_v50 = vsel %vm402_vm0, %v10749_v45, 0.0  ;;  %v10769_v54 = vld [vmem:[%s10640_s17 + $0x220] sm:$0xff]  ;;  %v430_v56 = vsel %vm402_vm0, %v10741_v41, 0.0 }
  0x20   : > { %9432 = vmatpush3.msra.mxu0 %v334_v14  ;;  %9442 = vmatprep.subr.mxu1 %v16994_v1  ;;  %v803_v51 = vsel %vm402_vm0, %v10752_v46, 0.0  ;;  %v10766_v52 = vld [vmem:[%s10640_s17 + $0x78] sm:$0xff]  ;;  %v802_v55 = vadd.f32 %v801_v50, %v800_v48  ;;  %v805_v57 = vsel %vm402_vm0, %v10755_v47, 0.0  ;;  %v10776_v58 = vld [vmem:[%s10640_s17 + $0x80] sm:$0xff]  ;;  %v10779_v60 = vld [vmem:[%s10640_s17 + $0x228] sm:$0xff]  ;;  %v807_v63 = vsel %vm402_vm0, %v10769_v54, 0.0 }
  0x21   : > { %v411_v22 = vadd.f32 %v410_v17, %v409_v19  ;;  %9443 = vmatpush3.msra.mxu1 %v334_v14  ;;  %9444 = vmatprep.mubr.msk.f32.mxu1 %vm10556_vm1, %v16994_v1  ;;  %v432_v62 = vsel %vm402_vm0, %v10766_v52, 0.0  ;;  %v10786_v0 = vld [vmem:[%s10640_s17 + $0x88] sm:$0xff]  ;;  %v10789_v7 = vld [vmem:[%s10640_s17 + $0x230] sm:$0xff]  ;;  %v434_v9 = vsel %vm402_vm0, %v10776_v58, 0.0  ;;  %v809_v11 = vsel %vm402_vm0, %v10779_v60, 0.0  ;;  %v10799_v14 = vld [vmem:[%s10640_s17 + $0x238] sm:$0xff] }
  0x22   : > { %9447 = vmatprep.subr.mxu0 %v16994_v1  ;;  %9458 = vmatprep.subr.mxu1 %v16994_v1  ;;  %v804_v61 = vadd.f32 %v803_v51, %v802_v55  ;;  %v10796_v12 = vld [vmem:[%s10640_s17 + $0x90] sm:$0xff]  ;;  %v436_v17 = vsel %vm402_vm0, %v10786_v0, 0.0  ;;  %v811_v19 = vsel %vm402_vm0, %v10789_v7, 0.0  ;;  %v10929_v1 = vld [vmem:[%s10640_s17 + $0x2a0] sm:$0xff] }
  0x23   : > { %v413_v25 = vadd.f32 %v412_v20, %v411_v22  ;;  %v10806_v20 = vld [vmem:[%s10640_s17 + $0x98] sm:$0xff]  ;;  %v10836_v50 = vld [vmem:[%s10640_s17 + $0xb0] sm:$0xff]  ;;  %17671 = vst [vmem:[#allocation12_spill] sm:$0xff] %v10929_v1 }
  0x24   : > { %v806_v8 = vadd.f32 %v805_v57, %v804_v61 }
  0x25   : > { %v415_v28 = vadd.f32 %v414_v23, %v413_v25  ;;  %v10809_v23 = vld [vmem:[%s10640_s17 + $0x240] sm:$0xff] }
  0x26   : > { %v808_v16 = vadd.f32 %v807_v63, %v806_v8 }
  0x27   : > { %v417_v31 = vadd.f32 %v416_v26, %v415_v28  ;;  %v438_v26 = vsel %vm402_vm0, %v10796_v12, 0.0  ;;  %v813_v28 = vsel %vm402_vm0, %v10799_v14, 0.0 }
  0x28   : > { %v810_v25 = vadd.f32 %v809_v11, %v808_v16 }
  0x29   : > { %v419_v34 = vadd.f32 %v418_v29, %v417_v31  ;;  %v10816_v29 = vld [vmem:[%s10640_s17 + $0xa0] sm:$0xff] }
  0x2a   : > { %v442_v48 = vsel %vm402_vm0, %v10816_v29, 0.0 }
  0x2b   : > { %v421_v37 = vadd.f32 %v420_v32, %v419_v34  ;;  %v10819_v32 = vld [vmem:[%s10640_s17 + $0x248] sm:$0xff]  ;;  %v812_v34 = vadd.f32 %v811_v19, %v810_v25 }
  0x2d   : > { %v423_v40 = vadd.f32 %v422_v35, %v421_v37  ;;  %v440_v35 = vsel %vm402_vm0, %v10806_v20, 0.0  ;;  %v815_v37 = vsel %vm402_vm0, %v10809_v23, 0.0 }
  0x2f   : > { %v425_v44 = vadd.f32 %v424_v38, %v423_v40  ;;  %v10826_v38 = vld [vmem:[%s10640_s17 + $0xa8] sm:$0xff] }
  0x31   : > { %v427_v53 = vadd.f32 %v426_v42, %v425_v44  ;;  %v10829_v42 = vld [vmem:[%s10640_s17 + $0x250] sm:$0xff]  ;;  %v814_v44 = vadd.f32 %v813_v28, %v812_v34 }
  0x32   : > { %v819_v57 = vsel %vm402_vm0, %v10829_v42, 0.0 }
  0x33   : > { %v429_v59 = vadd.f32 %v428_v49, %v427_v53  ;;  %v817_v49 = vsel %vm402_vm0, %v10819_v32, 0.0  ;;  %v10839_v53 = vld [vmem:[%s10640_s17 + $0x258] sm:$0xff]  ;;  %v816_v55 = vadd.f32 %v815_v37, %v814_v44 }
  0x34   : > { %17662 = vst [vmem:[#allocation3_spill] sm:$0xff] %v10839_v53  ;;  %v821_v8 = vsel %vm402_vm0, %v10839_v53, 0.0  ;;  %v11048_v53 = vld [vmem:[%s10640_s17 + $0x150] sm:$0xff] }
  0x35   : > { %v431_v2 = vadd.f32 %v430_v56, %v429_v59  ;;  %v444_v56 = vsel %vm402_vm0, %v10826_v38, 0.0  ;;  %v10846_v59 = vld [vmem:[%s10640_s17 + $0xb8] sm:$0xff]  ;;  %v818_v63 = vadd.f32 %v817_v49, %v816_v55  ;;  %17684 = vst [vmem:[#allocation25_spill] sm:$0xff] %v11048_v53 }
  0x36   : > { %v448_v19 = vsel %vm402_vm0, %v10846_v59, 0.0 }
  0x37   : > { %v433_v13 = vadd.f32 %v432_v62, %v431_v2  ;;  %v10849_v62 = vld [vmem:[%s10640_s17 + $0x260] sm:$0xff]  ;;  %v446_v2 = vsel %vm402_vm0, %v10836_v50, 0.0  ;;  %v820_v16 = vadd.f32 %v819_v57, %v818_v63 }
  0x38   : > { %17663 = vst [vmem:[#allocation4_spill] sm:$0xff] %v10849_v62 }
  0x39   : > { %v435_v22 = vadd.f32 %v434_v9, %v433_v13  ;;  %v10856_v9 = vld [vmem:[%s10640_s17 + $0xc0] sm:$0xff]  ;;  %v10859_v13 = vld [vmem:[%s10640_s17 + $0x268] sm:$0xff]  ;;  %v822_v28 = vadd.f32 %v821_v8, %v820_v16 }
  0x3a   : > { %17664 = vst [vmem:[#allocation5_spill] sm:$0xff] %v10859_v13  ;;  %v450_v34 = vsel %vm402_vm0, %v10856_v9, 0.0 }
  0x3b   : > { %v437_v31 = vadd.f32 %v436_v17, %v435_v22  ;;  %v10862_v17 = vld [vmem:[%s10640_s17 + $0xc8] sm:$0xff]  ;;  %v823_v22 = vsel %vm402_vm0, %v10849_v62, 0.0 }
  0x3c   : > { %v824_v44 = vadd.f32 %v823_v22, %v822_v28 }
  0x3d   : > { %v439_v40 = vadd.f32 %v438_v26, %v437_v31  ;;  %v10869_v26 = vld [vmem:[%s10640_s17 + $0x270] sm:$0xff] }
  0x3e   : > { %17665 = vst [vmem:[#allocation6_spill] sm:$0xff] %v10869_v26  ;;  %v10872_v31 = vld [vmem:[%s10640_s17 + $0xd0] sm:$0xff]  ;;  %v827_v49 = vsel %vm402_vm0, %v10869_v26, 0.0 }
  0x3f   : > { %v441_v51 = vadd.f32 %v440_v35, %v439_v40  ;;  %v825_v35 = vsel %vm402_vm0, %v10859_v13, 0.0  ;;  %v10879_v40 = vld [vmem:[%s10640_s17 + $0x278] sm:$0xff] }
  0x40   : > { %17666 = vst [vmem:[#allocation7_spill] sm:$0xff] %v10879_v40  ;;  %v826_v57 = vadd.f32 %v825_v35, %v824_v44  ;;  %v829_v63 = vsel %vm402_vm0, %v10879_v40, 0.0  ;;  %v10954_v40 = vld [vmem:[%s10640_s17 + $0x108] sm:$0xff]  ;;  %v10972_v13 = vld [vmem:[%s10640_s17 + $0x2b8] sm:$0xff] }
  0x41   : > { %v443_v61 = vadd.f32 %v442_v48, %v441_v51  ;;  %v452_v48 = vsel %vm402_vm0, %v10862_v17, 0.0  ;;  %v10886_v51 = vld [vmem:[%s10640_s17 + $0xd8] sm:$0xff]  ;;  %17674 = vst [vmem:[#allocation15_spill] sm:$0xff] %v10972_v13 }
  0x42   : > { %v828_v16 = vadd.f32 %v827_v49, %v826_v57 }
  0x43   : > { %v445_v11 = vadd.f32 %v444_v56, %v443_v61  ;;  %v10889_v56 = vld [vmem:[%s10640_s17 + $0x280] sm:$0xff]  ;;  %v454_v61 = vsel %vm402_vm0, %v10872_v31, 0.0 }
  0x44   : > { %17667 = vst [vmem:[#allocation8_spill] sm:$0xff] %v10889_v56  ;;  %v831_v22 = vsel %vm402_vm0, %v10889_v56, 0.0  ;;  %v830_v35 = vadd.f32 %v829_v63, %v828_v16  ;;  %v10926_v63 = vld [vmem:[%s10640_s17 + $0xf8] sm:$0xff]  ;;  %v839_v56 = vsel %vm402_vm0, %v10929_v1, 0.0 }
  0x45   : > { %v447_v25 = vadd.f32 %v446_v2, %v445_v11  ;;  %v10896_v2 = vld [vmem:[%s10640_s17 + $0xe0] sm:$0xff]  ;;  %v10899_v11 = vld [vmem:[%s10640_s17 + $0x288] sm:$0xff] }
  0x46   : > { %17668 = vst [vmem:[#allocation9_spill] sm:$0xff] %v10899_v11  ;;  %v833_v44 = vsel %vm402_vm0, %v10899_v11, 0.0  ;;  %v832_v57 = vadd.f32 %v831_v22, %v830_v35 }
  0x47   : > { %v449_v37 = vadd.f32 %v448_v19, %v447_v25  ;;  %v456_v19 = vsel %vm402_vm0, %v10886_v51, 0.0  ;;  %v10906_v25 = vld [vmem:[%s10640_s17 + $0xe8] sm:$0xff] }
  0x48   : > { %v834_v11 = vadd.f32 %v833_v44, %v832_v57  ;;  %v10945_v44 = vld [vmem:[%s10640_s17 + $0x2a8] sm:$0xff] }
  0x49   : > { %v451_v55 = vadd.f32 %v450_v34, %v449_v37  ;;  %v10909_v34 = vld [vmem:[%s10640_s17 + $0x290] sm:$0xff]  ;;  %v458_v37 = vsel %vm402_vm0, %v10896_v2, 0.0  ;;  %17672 = vst [vmem:[#allocation13_spill] sm:$0xff] %v10945_v44 }
  0x4a   : > { %17669 = vst [vmem:[#allocation10_spill] sm:$0xff] %v10909_v34 }
  0x4b   : > { %v453_v8 = vadd.f32 %v452_v48, %v451_v55  ;;  %v10916_v48 = vld [vmem:[%s10640_s17 + $0xf0] sm:$0xff]  ;;  %v10919_v55 = vld [vmem:[%s10640_s17 + $0x298] sm:$0xff] }
  0x4c   : > { %17670 = vst [vmem:[#allocation11_spill] sm:$0xff] %v10919_v55  ;;  %v462_v22 = vsel %vm402_vm0, %v10916_v48, 0.0  ;;  %v837_v35 = vsel %vm402_vm0, %v10919_v55, 0.0  ;;  %v540_v55 = vmul.f32 %v10666_v6, %v10666_v6 }
  0x4d   : > { %v455_v28 = vadd.f32 %v454_v61, %v453_v8  ;;  %v460_v61 = vsel %vm402_vm0, %v10906_v25, 0.0  ;;  %v835_v8 = vsel %vm402_vm0, %v10909_v34, 0.0  ;;  %v538_v34 = vmul.f32 %v10660_v4, %v10660_v4 }
  0x4e   : > { %v836_v57 = vadd.f32 %v835_v8, %v834_v11  ;;  %v541_v8 = vmul.f32 %v10678_v10, %v10678_v10  ;;  %v468_v10 = vsel %vm402_vm0, %v10954_v40, 0.0 }
  0x4f   : > { %v457_v49 = vadd.f32 %v456_v19, %v455_v28  ;;  %v537_v19 = vmul.f32 %v10657_v3, %v10657_v3  ;;  %v10934_v28 = vld [vmem:[%s10640_s17 + $0x100] sm:$0xff]  ;;  %v464_v3 = vsel %vm402_vm0, %v10926_v63, 0.0  ;;  %v602_v6 = vsel %vm402_vm0, %v538_v34, 0.0 }
  0x50   : > { %v838_v11 = vadd.f32 %v837_v35, %v836_v57  ;;  %v542_v34 = vmul.f32 %v10690_v15, %v10690_v15  ;;  %v543_v15 = vmul.f32 %v10698_v18, %v10698_v18  ;;  %v544_v18 = vmul.f32 %v10704_v21, %v10704_v21 }
  0x51   : > { %v459_v16 = vadd.f32 %v458_v37, %v457_v49  ;;  %v539_v37 = vmul.f32 %v10663_v5, %v10663_v5  ;;  %v466_v5 = vsel %vm402_vm0, %v10934_v28, 0.0  ;;  %v601_v1 = vsel %vm402_vm0, %v537_v19, 0.0 }
  0x52   : > { %v840_v35 = vadd.f32 %v839_v56, %v838_v11  ;;  %v603_v57 = vadd.f32 %v602_v6, %v601_v1  ;;  %v606_v19 = vsel %vm402_vm0, %v540_v55, 0.0  ;;  %v845_v6 = vsel %vm402_vm0, %v10972_v13, 0.0  ;;  %v11008_v13 = vld [vmem:[%s10640_s17 + $0x128] sm:$0xff] }
  0x53   : > { %v461_v49 = vadd.f32 %v460_v61, %v459_v16  ;;  %v10959_v61 = vld [vmem:[%s10640_s17 + $0x2b0] sm:$0xff]  ;;  %v841_v16 = vsel %vm402_vm0, %v10945_v44, 0.0  ;;  %v608_v55 = vsel %vm402_vm0, %v541_v8, 0.0  ;;  %v610_v8 = vsel %vm402_vm0, %v542_v34, 0.0 }
  0x54   : > { %17673 = vst [vmem:[#allocation14_spill] sm:$0xff] %v10959_v61  ;;  %v843_v44 = vsel %vm402_vm0, %v10959_v61, 0.0  ;;  %v842_v56 = vadd.f32 %v841_v16, %v840_v35  ;;  %v10995_v61 = vld [vmem:[%s10640_s17 + $0x120] sm:$0xff]  ;;  %v545_v21 = vmul.f32 %v10713_v24, %v10713_v24  ;;  %v612_v34 = vsel %vm402_vm0, %v543_v15, 0.0 }
  0x55   : > { %v463_v4 = vadd.f32 %v462_v22, %v461_v49  ;;  %v604_v22 = vsel %vm402_vm0, %v539_v37, 0.0  ;;  %v10969_v49 = vld [vmem:[%s10640_s17 + $0x110] sm:$0xff]  ;;  %v10982_v37 = vld [vmem:[%s10640_s17 + $0x118] sm:$0xff]  ;;  %v546_v24 = vmul.f32 %v10718_v27, %v10718_v27  ;;  %v614_v15 = vsel %vm402_vm0, %v544_v18, 0.0 }
  0x56   : > { %v605_v1 = vadd.f32 %v604_v22, %v603_v57  ;;  %v470_v11 = vsel %vm402_vm0, %v10969_v49, 0.0  ;;  %v844_v16 = vadd.f32 %v843_v44, %v842_v56  ;;  %v472_v35 = vsel %vm402_vm0, %v10982_v37, 0.0  ;;  %v11014_v56 = vld [vmem:[%s10640_s17 + $0x130] sm:$0xff] }
  0x57   : > { %v465_v26 = vadd.f32 %v464_v3, %v463_v4  ;;  %v10985_v4 = vld [vmem:[%s10640_s17 + $0x2c0] sm:$0xff]  ;;  %17678 = vst [vmem:[#allocation19_spill] sm:$0xff] %v11014_v56 }
  0x58   : > { %17675 = vst [vmem:[#allocation16_spill] sm:$0xff] %v10985_v4  ;;  %v607_v22 = vadd.f32 %v606_v19, %v605_v1  ;;  %v847_v57 = vsel %vm402_vm0, %v10985_v4, 0.0  ;;  %v846_v44 = vadd.f32 %v845_v6, %v844_v16  ;;  %v474_v1 = vsel %vm402_vm0, %v10995_v61, 0.0 }
  0x59   : > { %v467_v3 = vadd.f32 %v466_v5, %v465_v26  ;;  %v10998_v5 = vld [vmem:[%s10640_s17 + $0x2c8] sm:$0xff] }
  0x5a   : > { %17676 = vst [vmem:[#allocation17_spill] sm:$0xff] %v10998_v5  ;;  %v609_v19 = vadd.f32 %v608_v55, %v607_v22  ;;  %v849_v4 = vsel %vm402_vm0, %v10998_v5, 0.0  ;;  %v11027_v55 = vld [vmem:[%s10640_s17 + $0x2d8] sm:$0xff]  ;;  %v11030_v22 = vld [vmem:[%s10640_s17 + $0x140] sm:$0xff]  ;;  %v476_v5 = vsel %vm402_vm0, %v11008_v13, 0.0 }
  0x5b   : > { %v469_v26 = vadd.f32 %v468_v10, %v467_v3  ;;  %v11011_v3 = vld [vmem:[%s10640_s17 + $0x2d0] sm:$0xff]  ;;  %17680 = vst [vmem:[#allocation21_spill] sm:$0xff] %v11027_v55  ;;  %17681 = vst [vmem:[#allocation22_spill] sm:$0xff] %v11030_v22  ;;  %v853_v18 = vsel %vm402_vm0, %v11027_v55, 0.0  ;;  %v11076_v55 = vld [vmem:[%s10640_s17 + $0x168] sm:$0xff] }
  0x5c   : > { %17677 = vst [vmem:[#allocation18_spill] sm:$0xff] %v11011_v3  ;;  %v611_v16 = vadd.f32 %v610_v8, %v609_v19  ;;  %v851_v62 = vsel %vm402_vm0, %v11011_v3, 0.0  ;;  %v11045_v8 = vld [vmem:[%s10640_s17 + $0x2e0] sm:$0xff]  ;;  %v11058_v3 = vld [vmem:[%s10640_s17 + $0x158] sm:$0xff]  ;;  %17688 = vst [vmem:[#allocation29_spill] sm:$0xff] %v11076_v55 }
  0x5d   : > { %v471_v10 = vadd.f32 %v470_v11, %v469_v26  ;;  %v11024_v11 = vld [vmem:[%s10640_s17 + $0x138] sm:$0xff]  ;;  %v848_v26 = vadd.f32 %v847_v57, %v846_v44  ;;  %v478_v57 = vsel %vm402_vm0, %v11014_v56, 0.0  ;;  %17683 = vst [vmem:[#allocation24_spill] sm:$0xff] %v11045_v8  ;;  %17685 = vst [vmem:[#allocation26_spill] sm:$0xff] %v11058_v3 }
  0x5e   : > { %17679 = vst [vmem:[#allocation20_spill] sm:$0xff] %v11024_v11  ;;  %v613_v19 = vadd.f32 %v612_v34, %v611_v16  ;;  %v480_v27 = vsel %vm402_vm0, %v11024_v11, 0.0  ;;  %v11063_v34 = vld [vmem:[%s10640_s17 + $0x2e8] sm:$0xff]  ;;  %v11066_v11 = vld [vmem:[%s10640_s17 + $0x160] sm:$0xff] }
  0x5f   : > { %v473_v6 = vadd.f32 %v472_v35, %v471_v10  ;;  %v11040_v35 = vld [vmem:[%s10640_s17 + $0x148] sm:$0xff]  ;;  %v850_v44 = vadd.f32 %v849_v4, %v848_v26  ;;  %v482_v4 = vsel %vm402_vm0, %v11030_v22, 0.0  ;;  %17686 = vst [vmem:[#allocation27_spill] sm:$0xff] %v11063_v34  ;;  %17687 = vst [vmem:[#allocation28_spill] sm:$0xff] %v11066_v11 }
  0x60   : > { %17682 = vst [vmem:[#allocation23_spill] sm:$0xff] %v11040_v35  ;;  %v615_v16 = vadd.f32 %v614_v15, %v613_v19  ;;  %v11081_v15 = vld [vmem:[%s10640_s17 + $0x2f0] sm:$0xff] }
  0x61   : > { %v475_v10 = vadd.f32 %v474_v1, %v473_v6  ;;  %v547_v1 = vmul.f32 %v10723_v30, %v10723_v30  ;;  %v616_v6 = vsel %vm402_vm0, %v545_v21, 0.0  ;;  %v852_v26 = vadd.f32 %v851_v62, %v850_v44  ;;  %17689 = vst [vmem:[#allocation30_spill] sm:$0xff] %v11081_v15 }
  0x62   : > { %v484_v30 = vsel %vm402_vm0, %v11040_v35, 0.0  ;;  %v855_v21 = vsel %vm402_vm0, %v11045_v8, 0.0  ;;  %v486_v62 = vsel %vm402_vm0, %v11048_v53, 0.0  ;;  %v617_v19 = vadd.f32 %v616_v6, %v615_v16  ;;  %v11084_v35 = vld [vmem:[%s10640_s17 + $0x170] sm:$0xff]  ;;  %v11094_v8 = vld [vmem:[%s10640_s17 + $0x178] sm:$0xff] }
  0x63   : > { %v477_v56 = vadd.f32 %v476_v5, %v475_v10  ;;  %v548_v5 = vmul.f32 %v10728_v33, %v10728_v33  ;;  %v618_v10 = vsel %vm402_vm0, %v546_v24, 0.0  ;;  %v854_v44 = vadd.f32 %v853_v18, %v852_v26  ;;  %17690 = vst [vmem:[#allocation31_spill] sm:$0xff] %v11084_v35  ;;  %17691 = vst [vmem:[#allocation32_spill] sm:$0xff] %v11094_v8  ;;  %v11099_v6 = vld [vmem:[%s10640_s17 + $0x2f8] sm:$0xff] }
  0x64   : > { %v488_v33 = vsel %vm402_vm0, %v11058_v3, 0.0  ;;  %v857_v24 = vsel %vm402_vm0, %v11063_v34, 0.0  ;;  %v490_v18 = vsel %vm402_vm0, %v11066_v11, 0.0  ;;  %17692 = vst [vmem:[#allocation33_spill] sm:$0xff] %v11099_v6  ;;  %v619_v16 = vadd.f32 %v618_v10, %v617_v19  ;;  %v11102_v3 = vld [vmem:[%s10640_s17 + $0x180] sm:$0xff]  ;;  %v11112_v34 = vld [vmem:[%s10640_s17 + $0x188] sm:$0xff] }
  0x65   : > { %v479_v22 = vadd.f32 %v478_v57, %v477_v56  ;;  %v549_v56 = vmul.f32 %v10733_v36, %v10733_v36  ;;  %v620_v57 = vsel %vm402_vm0, %v547_v1, 0.0  ;;  %v856_v26 = vadd.f32 %v855_v21, %v854_v44  ;;  %17693 = vst [vmem:[#allocation34_spill] sm:$0xff] %v11102_v3  ;;  %17694 = vst [vmem:[#allocation35_spill] sm:$0xff] %v11112_v34  ;;  %v11119_v10 = vld [vmem:[%s10640_s17 + $0x300] sm:$0xff] }
  0x66   : > { %v492_v36 = vsel %vm402_vm0, %v11076_v55, 0.0  ;;  %v859_v1 = vsel %vm402_vm0, %v11081_v15, 0.0  ;;  %v11116_v21 = vsel %vm402_vm0, %v11084_v35, 0.0  ;;  %17695 = vst [vmem:[#allocation36_spill] sm:$0xff] %v11119_v10  ;;  %v621_v19 = vadd.f32 %v620_v57, %v619_v16  ;;  %v11122_v55 = vld [vmem:[%s10640_s17 + $0x190] sm:$0xff]  ;;  %v11134_v15 = vld [vmem:[%s10640_s17 + $0x198] sm:$0xff] }
  0x67   : > { %v481_v53 = vadd.f32 %v480_v27, %v479_v22  ;;  %v550_v22 = vmul.f32 %v10738_v39, %v10738_v39  ;;  %v622_v27 = vsel %vm402_vm0, %v548_v5, 0.0  ;;  %v858_v44 = vadd.f32 %v857_v24, %v856_v26  ;;  %17696 = vst [vmem:[#allocation37_spill] sm:$0xff] %v11122_v55  ;;  %17697 = vst [vmem:[#allocation38_spill] sm:$0xff] %v11134_v15  ;;  %v11141_v26 = vld [vmem:[%s10640_s17 + $0x308] sm:$0xff]  ;;  %v11144_v35 = vld [vmem:[%s10640_s17 + $0x1a0] sm:$0xff] }
  0x68   : > { %v11126_v39 = vsel %vm402_vm0, %v11094_v8, 0.0  ;;  %v861_v5 = vsel %vm402_vm0, %v11099_v6, 0.0  ;;  %v11138_v57 = vsel %vm402_vm0, %v11102_v3, 0.0  ;;  %17698 = vst [vmem:[#allocation39_spill] sm:$0xff] %v11141_v26  ;;  %v623_v8 = vadd.f32 %v622_v27, %v621_v19  ;;  %17699 = vst [vmem:[#allocation40_spill] sm:$0xff] %v11144_v35  ;;  %v11156_v6 = vld [vmem:[%s10640_s17 + $0x1a8] sm:$0xff] }
  0x69   : > { %v483_v11 = vadd.f32 %v482_v4, %v481_v53  ;;  %v551_v53 = vmul.f32 %v10741_v41, %v10741_v41  ;;  %v624_v4 = vsel %vm402_vm0, %v549_v56, 0.0  ;;  %v860_v16 = vadd.f32 %v859_v1, %v858_v44  ;;  %17700 = vst [vmem:[#allocation41_spill] sm:$0xff] %v11156_v6  ;;  %v11163_v44 = vld [vmem:[%s10640_s17 + $0x310] sm:$0xff] }
  0x6a   : > { %v11148_v41 = vsel %vm402_vm0, %v11112_v34, 0.0  ;;  %v863_v56 = vsel %vm402_vm0, %v11119_v10, 0.0  ;;  %v11160_v27 = vsel %vm402_vm0, %v11122_v55, 0.0  ;;  %17701 = vst [vmem:[#allocation42_spill] sm:$0xff] %v11163_v44  ;;  %v625_v34 = vadd.f32 %v624_v4, %v623_v8  ;;  %v11166_v3 = vld [vmem:[%s10640_s17 + $0x1b0] sm:$0xff]  ;;  %v11178_v10 = vld [vmem:[%s10640_s17 + $0x1b8] sm:$0xff] }
  0x6b   : > { %v485_v24 = vadd.f32 %v484_v30, %v483_v11  ;;  %v552_v11 = vmul.f32 %v10766_v52, %v10766_v52  ;;  %v626_v30 = vsel %vm402_vm0, %v550_v22, 0.0  ;;  %v862_v19 = vadd.f32 %v861_v5, %v860_v16  ;;  %17702 = vst [vmem:[#allocation43_spill] sm:$0xff] %v11166_v3  ;;  %17703 = vst [vmem:[#allocation44_spill] sm:$0xff] %v11178_v10  ;;  %v11185_v4 = vld [vmem:[%s10640_s17 + $0x318] sm:$0xff]  ;;  %v11188_v55 = vld [vmem:[%s10640_s17 + $0x1c0] sm:$0xff] }
  0x6c   : > { %v11170_v52 = vsel %vm402_vm0, %v11134_v15, 0.0  ;;  %v865_v22 = vsel %vm402_vm0, %v11141_v26, 0.0  ;;  %v11182_v8 = vsel %vm402_vm0, %v11144_v35, 0.0  ;;  %17704 = vst [vmem:[#allocation45_spill] sm:$0xff] %v11185_v4  ;;  %v627_v15 = vadd.f32 %v626_v30, %v625_v34  ;;  %17705 = vst [vmem:[#allocation46_spill] sm:$0xff] %v11188_v55  ;;  %v11200_v35 = vld [vmem:[%s10640_s17 + $0x1c8] sm:$0xff] }
  0x6d   : > { %v487_v1 = vadd.f32 %v486_v62, %v485_v24  ;;  %v553_v62 = vmul.f32 %v10776_v58, %v10776_v58  ;;  %v628_v24 = vsel %vm402_vm0, %v551_v53, 0.0  ;;  %v864_v16 = vadd.f32 %v863_v56, %v862_v19  ;;  %17706 = vst [vmem:[#allocation47_spill] sm:$0xff] %v11200_v35  ;;  %v11207_v30 = vld [vmem:[%s10640_s17 + $0x320] sm:$0xff]  ;;  %v11210_v26 = vld [vmem:[%s10640_s17 + $0x1d0] sm:$0xff] }
  0x6e   : > { %v11192_v58 = vsel %vm402_vm0, %v11156_v6, 0.0  ;;  %v867_v53 = vsel %vm402_vm0, %v11163_v44, 0.0  ;;  %v11204_v34 = vsel %vm402_vm0, %v11166_v3, 0.0  ;;  %17707 = vst [vmem:[#allocation48_spill] sm:$0xff] %v11207_v30  ;;  %v629_v6 = vadd.f32 %v628_v24, %v627_v15  ;;  %17708 = vst [vmem:[#allocation49_spill] sm:$0xff] %v11210_v26  ;;  %v11222_v3 = vld [vmem:[%s10640_s17 + $0x1d8] sm:$0xff] }
  0x6f   : > { %v489_v5 = vadd.f32 %v488_v33, %v487_v1  ;;  %v554_v33 = vmul.f32 %v10786_v0, %v10786_v0  ;;  %v630_v1 = vsel %vm402_vm0, %v552_v11, 0.0  ;;  %v866_v19 = vadd.f32 %v865_v22, %v864_v16  ;;  %17709 = vst [vmem:[#allocation50_spill] sm:$0xff] %v11222_v3  ;;  %v11229_v24 = vld [vmem:[%s10640_s17 + $0x328] sm:$0xff]  ;;  %v11232_v44 = vld [vmem:[%s10640_s17 + $0x1e0] sm:$0xff] }
  0x70   : > { %v11214_v0 = vsel %vm402_vm0, %v11178_v10, 0.0  ;;  %v869_v11 = vsel %vm402_vm0, %v11185_v4, 0.0  ;;  %v11226_v15 = vsel %vm402_vm0, %v11188_v55, 0.0  ;;  %17710 = vst [vmem:[#allocation51_spill] sm:$0xff] %v11229_v24  ;;  %v631_v10 = vadd.f32 %v630_v1, %v629_v6  ;;  %17711 = vst [vmem:[#allocation52_spill] sm:$0xff] %v11232_v44  ;;  %v11244_v55 = vld [vmem:[%s10640_s17 + $0x1e8] sm:$0xff] }
  0x71   : > { %v491_v56 = vadd.f32 %v490_v18, %v489_v5  ;;  %v555_v18 = vmul.f32 %v10796_v12, %v10796_v12  ;;  %v632_v5 = vsel %vm402_vm0, %v553_v62, 0.0  ;;  %v868_v16 = vadd.f32 %v867_v53, %v866_v19  ;;  %17712 = vst [vmem:[#allocation53_spill] sm:$0xff] %v11244_v55  ;;  %v11252_v1 = vld [vmem:[%s10640_s17 + $0x330] sm:$0xff] }
  0x72   : > { %v11236_v12 = vsel %vm402_vm0, %v11200_v35, 0.0  ;;  %v871_v62 = vsel %vm402_vm0, %v11207_v30, 0.0  ;;  %v11249_v53 = vsel %vm402_vm0, %v11210_v26, 0.0  ;;  %17713 = vst [vmem:[#allocation54_spill] sm:$0xff] %v11252_v1  ;;  %v633_v35 = vadd.f32 %v632_v5, %v631_v10  ;;  %v11255_v30 = vld [vmem:[%s10640_s17 + $0x1f0] sm:$0xff]  ;;  %v11267_v26 = vld [vmem:[%s10640_s17 + $0x1f8] sm:$0xff] }
  0x73   : > { %v493_v22 = vadd.f32 %v492_v36, %v491_v56  ;;  %v556_v36 = vmul.f32 %v10806_v20, %v10806_v20  ;;  %v634_v56 = vsel %vm402_vm0, %v554_v33, 0.0  ;;  %v870_v19 = vadd.f32 %v869_v11, %v868_v16  ;;  %17714 = vst [vmem:[#allocation55_spill] sm:$0xff] %v11255_v30  ;;  %17715 = vst [vmem:[#allocation56_spill] sm:$0xff] %v11267_v26  ;;  %v11275_v5 = vld [vmem:[%s10640_s17 + $0x338] sm:$0xff]  ;;  %v11322_v4 = vld [vmem:[%s10640_s17 + $0x370] sm:$0xff] }
  0x74   : > { %v11259_v20 = vsel %vm402_vm0, %v11222_v3, 0.0  ;;  %v873_v33 = vsel %vm402_vm0, %v11229_v24, 0.0  ;;  %v11272_v11 = vsel %vm402_vm0, %v11232_v44, 0.0  ;;  %17716 = vst [vmem:[#allocation57_spill] sm:$0xff] %v11275_v5  ;;  %v635_v3 = vadd.f32 %v634_v56, %v633_v35  ;;  %v11298_v56 = vld [vmem:[%s10640_s17 + $0x350] sm:$0xff] }
  0x75   : > { %v495_v6 = vadd.f32 %v11116_v21, %v493_v22  ;;  %v557_v21 = vmul.f32 %v10816_v29, %v10816_v29  ;;  %v636_v22 = vsel %vm402_vm0, %v555_v18, 0.0  ;;  %v872_v16 = vadd.f32 %v871_v62, %v870_v19  ;;  %v11282_v29 = vld [vmem:[%s10640_s17 + $0x340] sm:$0xff]  ;;  %v11295_v62 = vld [vmem:[%s10640_s17 + $0x348] sm:$0xff]  ;;  %17719 = vst [vmem:[#allocation60_spill] sm:$0xff] %v11298_v56 }
  0x76   : > { %v11279_v24 = vsel %vm402_vm0, %v11244_v55, 0.0  ;;  %17717 = vst [vmem:[#allocation58_spill] sm:$0xff] %v11282_v29  ;;  %v875_v18 = vsel %vm402_vm0, %v11252_v1, 0.0  ;;  %v11292_v35 = vsel %vm402_vm0, %v11255_v30, 0.0  ;;  %17718 = vst [vmem:[#allocation59_spill] sm:$0xff] %v11295_v62  ;;  %v637_v55 = vadd.f32 %v636_v22, %v635_v3  ;;  %v11317_v3 = vld [vmem:[%s10640_s17 + $0x368] sm:$0xff] }
  0x77   : > { %v497_v10 = vadd.f32 %v11126_v39, %v495_v6  ;;  %v558_v39 = vmul.f32 %v10826_v38, %v10826_v38  ;;  %v638_v6 = vsel %vm402_vm0, %v556_v36, 0.0  ;;  %v874_v19 = vadd.f32 %v873_v33, %v872_v16  ;;  %v11305_v38 = vld [vmem:[%s10640_s17 + $0x358] sm:$0xff]  ;;  %v11314_v33 = vld [vmem:[%s10640_s17 + $0x360] sm:$0xff]  ;;  %17722 = vst [vmem:[#allocation63_spill] sm:$0xff] %v11317_v3 }
  0x78   : > { %v11302_v1 = vsel %vm402_vm0, %v11267_v26, 0.0  ;;  %17720 = vst [vmem:[#allocation61_spill] sm:$0xff] %v11305_v38  ;;  %v559_v36 = vmul.f32 %v10836_v50, %v10836_v50  ;;  %17721 = vst [vmem:[#allocation62_spill] sm:$0xff] %v11314_v33  ;;  %v879_v16 = vsel %vm402_vm0, %v11282_v29, 0.0  ;;  %v639_v26 = vadd.f32 %v638_v6, %v637_v55  ;;  %v11336_v55 = vld [vmem:[%s10640_s17 + $0x380] sm:$0xff]  ;;  %v11341_v29 = vld [vmem:[%s10640_s17 + $0x388] sm:$0xff] }
  0x79   : > { %v499_v44 = vadd.f32 %v11138_v57, %v497_v10  ;;  %v877_v57 = vsel %vm402_vm0, %v11275_v5, 0.0  ;;  %v640_v10 = vsel %vm402_vm0, %v557_v21, 0.0  ;;  %v876_v22 = vadd.f32 %v875_v18, %v874_v19  ;;  %v11333_v18 = vld [vmem:[%s10640_s17 + $0x378] sm:$0xff]  ;;  %17724 = vst [vmem:[#allocation65_spill] sm:$0xff] %v11336_v55 }
  0x7a   : > { %v881_v5 = vsel %vm402_vm0, %v11295_v62, 0.0  ;;  %v883_v50 = vsel %vm402_vm0, %v11298_v56, 0.0  ;;  %17723 = vst [vmem:[#allocation64_spill] sm:$0xff] %v11333_v18  ;;  %v885_v19 = vsel %vm402_vm0, %v11305_v38, 0.0  ;;  %v641_v62 = vadd.f32 %v640_v10, %v639_v26  ;;  %v11355_v26 = vld [vmem:[%s10640_s17 + $0x398] sm:$0xff]  ;;  %v11360_v38 = vld [vmem:[%s10640_s17 + $0x3a0] sm:$0xff] }
  0x7b   : > { %v501_v30 = vadd.f32 %v11148_v41, %v499_v44  ;;  %v560_v41 = vmul.f32 %v10846_v59, %v10846_v59  ;;  %v642_v44 = vsel %vm402_vm0, %v558_v39, 0.0  ;;  %v878_v6 = vadd.f32 %v877_v57, %v876_v22  ;;  %v11352_v57 = vld [vmem:[%s10640_s17 + $0x390] sm:$0xff]  ;;  %17726 = vst [vmem:[#allocation67_spill] sm:$0xff] %v11355_v26 }
  0x7c   : > { %v887_v56 = vsel %vm402_vm0, %v11314_v33, 0.0  ;;  %v889_v59 = vsel %vm402_vm0, %v11317_v3, 0.0  ;;  %17725 = vst [vmem:[#allocation66_spill] sm:$0xff] %v11352_v57  ;;  %v891_v22 = vsel %vm402_vm0, %v11322_v4, 0.0  ;;  %v643_v33 = vadd.f32 %v642_v44, %v641_v62  ;;  %v11376_v62 = vld [vmem:[%s10640_s17 + $0x3b0] sm:$0xff] }
  0x7d   : > { %v503_v21 = vadd.f32 %v11160_v27, %v501_v30  ;;  %v561_v27 = vmul.f32 %v10856_v9, %v10856_v9  ;;  %v644_v30 = vsel %vm402_vm0, %v559_v36, 0.0  ;;  %v880_v10 = vadd.f32 %v879_v16, %v878_v6  ;;  %17728 = vst [vmem:[#allocation69_spill] sm:$0xff] %v11376_v62 }
  0x7e   : > { %v893_v3 = vsel %vm402_vm0, %v11333_v18, 0.0  ;;  %v11366_v9 = vsel %vm402_vm0, %v11336_v55, 0.0  ;;  %v646_v36 = vsel %vm402_vm0, %v560_v41, 0.0  ;;  %v11380_v6 = vsel %vm402_vm0, %v11341_v29, 0.0 }
  0x7f   : > { %v505_v39 = vadd.f32 %v11170_v52, %v503_v21  ;;  %v562_v52 = vmul.f32 %v10862_v17, %v10862_v17  ;;  %v11373_v21 = vld [vmem:[%s10640_s17 + $0x3a8] sm:$0xff]  ;;  %v882_v44 = vadd.f32 %v881_v5, %v880_v10  ;;  %v645_v18 = vadd.f32 %v644_v30, %v643_v33  ;;  %v11399_v30 = vld [vmem:[%s10640_s17 + $0x3b8] sm:$0xff] }
  0x80   : > { %17727 = vst [vmem:[#allocation68_spill] sm:$0xff] %v11373_v21  ;;  %v11384_v55 = vsel %vm402_vm0, %v11352_v57, 0.0  ;;  %v11388_v17 = vsel %vm402_vm0, %v11355_v26, 0.0  ;;  %v648_v41 = vsel %vm402_vm0, %v561_v27, 0.0  ;;  %v11396_v10 = vsel %vm402_vm0, %v11360_v38, 0.0 }
  0x81   : > { %v507_v16 = vadd.f32 %v11182_v8, %v505_v39  ;;  %v563_v8 = vmul.f32 %v10872_v31, %v10872_v31  ;;  %v884_v39 = vadd.f32 %v883_v50, %v882_v44  ;;  %v647_v33 = vadd.f32 %v646_v36, %v645_v18 }
  0x82   : > { %v11403_v57 = vsel %vm402_vm0, %v11373_v21, 0.0  ;;  %v11407_v26 = vsel %vm402_vm0, %v11376_v62, 0.0  ;;  %v564_v31 = vmul.f32 %v10886_v51, %v10886_v51  ;;  %v934_v18 = vmul.f32 %v10746_v43, %v10746_v43 }
  0x83   : > { %v509_v5 = vadd.f32 %v11192_v58, %v507_v16  ;;  %v650_v58 = vsel %vm402_vm0, %v562_v52, 0.0  ;;  %v886_v27 = vadd.f32 %v885_v19, %v884_v39  ;;  %v649_v16 = vadd.f32 %v648_v41, %v647_v33 }
  0x84   : > { %v565_v36 = vmul.f32 %v10896_v2, %v10896_v2  ;;  %v652_v44 = vsel %vm402_vm0, %v563_v8, 0.0  ;;  %v935_v62 = vmul.f32 %v10749_v45, %v10749_v45  ;;  %v936_v51 = vmul.f32 %v10752_v46, %v10752_v46 }
  0x85   : > { %v511_v50 = vadd.f32 %v11204_v34, %v509_v5  ;;  %v888_v21 = vadd.f32 %v887_v56, %v886_v27  ;;  %v11425_v34 = vsel %vm402_vm0, %v11399_v30, 0.0  ;;  %v651_v19 = vadd.f32 %v650_v58, %v649_v16 }
  0x86   : > { %v566_v43 = vmul.f32 %v10906_v25, %v10906_v25  ;;  %v567_v2 = vmul.f32 %v10916_v48, %v10916_v48  ;;  %v654_v8 = vsel %vm402_vm0, %v564_v31, 0.0  ;;  %v937_v45 = vmul.f32 %v10755_v47, %v10755_v47 }
  0x87   : > { %v513_v52 = vadd.f32 %v11214_v0, %v511_v50  ;;  %v890_v0 = vadd.f32 %v889_v59, %v888_v21  ;;  %v653_v56 = vadd.f32 %v652_v44, %v651_v19  ;;  %v998_v41 = vsel %vm402_vm0, %v934_v18, 0.0  ;;  %v11450_v18 = vld [vmem:[%s10640_s17 + $0x3c0] sm:$0xff] }
  0x88   : > { %v656_v5 = vsel %vm402_vm0, %v565_v36, 0.0  ;;  %v938_v25 = vmul.f32 %v10769_v54, %v10769_v54  ;;  %v999_v39 = vsel %vm402_vm0, %v935_v62, 0.0  ;;  %v1001_v48 = vsel %vm402_vm0, %v936_v51, 0.0 }
  0x89   : > { %v515_v46 = vadd.f32 %v11226_v15, %v513_v52  ;;  %v892_v31 = vadd.f32 %v891_v22, %v890_v0  ;;  %v655_v47 = vadd.f32 %v654_v8, %v653_v56  ;;  %v1000_v58 = vadd.f32 %v999_v39, %v998_v41 }
  0x8a   : > { %v568_v15 = vmul.f32 %v10926_v63, %v10926_v63  ;;  %v658_v59 = vsel %vm402_vm0, %v566_v43, 0.0  ;;  %v939_v21 = vmul.f32 %v10779_v60, %v10779_v60  ;;  %v1003_v50 = vsel %vm402_vm0, %v937_v45, 0.0 }
  0x8b   : > { %v517_v33 = vadd.f32 %v11236_v12, %v515_v46  ;;  %v894_v62 = vadd.f32 %v893_v3, %v892_v31  ;;  %v657_v27 = vadd.f32 %v656_v5, %v655_v47  ;;  %v1002_v16 = vadd.f32 %v1001_v48, %v1000_v58 }
  0x8c   : > { %v569_v12 = vmul.f32 %v10934_v28, %v10934_v28  ;;  %v660_v63 = vsel %vm402_vm0, %v567_v2, 0.0  ;;  %v940_v22 = vmul.f32 %v10789_v7, %v10789_v7  ;;  %v1005_v60 = vsel %vm402_vm0, %v938_v25, 0.0 }
  0x8d   : > { %v519_v54 = vadd.f32 %v11249_v53, %v517_v33  ;;  %v896_v53 = vadd.f32 %v11366_v9, %v894_v62  ;;  %v659_v3 = vadd.f32 %v658_v59, %v657_v27  ;;  %v1004_v44 = vadd.f32 %v1003_v50, %v1002_v16  ;;  %v11470_v9 = vld [vmem:[%s10640_s17 + $0x3c8] sm:$0xff]  ;;  %v17730_v16 = vld [vmem:[#allocation19_spill] sm:$0xff] }
  0x8e   : > { %v570_v51 = vmul.f32 %v10954_v40, %v10954_v40  ;;  %v662_v52 = vsel %vm402_vm0, %v568_v15, 0.0  ;;  %v941_v28 = vmul.f32 %v10799_v14, %v10799_v14  ;;  %v1007_v19 = vsel %vm402_vm0, %v939_v21, 0.0 }
  0x8f   : > { %v521_v36 = vadd.f32 %v11259_v20, %v519_v54  ;;  %v898_v7 = vadd.f32 %v11380_v6, %v896_v53  ;;  %v911_v43 = vsel %vm402_vm0, %v11450_v18, 0.0  ;;  %v661_v20 = vadd.f32 %v660_v63, %v659_v3  ;;  %v17731_v63 = vld [vmem:[#allocation4_spill] sm:$0xff] }
  0x90   : > { %v1006_v2 = vadd.f32 %v1005_v60, %v1004_v44  ;;  %v571_v8 = vmul.f32 %v10969_v49, %v10969_v49  ;;  %v664_v40 = vsel %vm402_vm0, %v569_v12, 0.0  ;;  %v942_v14 = vmul.f32 %v10809_v23, %v10809_v23  ;;  %v17732_v44 = vld [vmem:[#allocation20_spill] sm:$0xff] }
  0x91   : > { %v1009_v45 = vsel %vm402_vm0, %v940_v22, 0.0  ;;  %v523_v6 = vadd.f32 %v11272_v11, %v521_v36  ;;  %v900_v46 = vadd.f32 %v11384_v55, %v898_v7  ;;  %v663_v0 = vadd.f32 %v662_v52, %v661_v20  ;;  %v11490_v55 = vld [vmem:[%s10640_s17 + $0x3d0] sm:$0xff] }
  0x92   : > { %v1008_v56 = vadd.f32 %v1007_v19, %v1006_v2  ;;  %v572_v41 = vmul.f32 %v10982_v37, %v10982_v37  ;;  %v666_v5 = vsel %vm402_vm0, %v570_v51, 0.0  ;;  %v943_v49 = vmul.f32 %v10819_v32, %v10819_v32 }
  0x93   : > { %v1011_v25 = vsel %vm402_vm0, %v941_v28, 0.0  ;;  %v902_v23 = vadd.f32 %v11388_v17, %v900_v46  ;;  %v913_v39 = vsel %vm402_vm0, %v11470_v9, 0.0  ;;  %v665_v11 = vadd.f32 %v664_v40, %v663_v0  ;;  %v17733_v28 = vld [vmem:[#allocation5_spill] sm:$0xff]  ;;  %v17734_v40 = vld [vmem:[#allocation22_spill] sm:$0xff] }
  0x94   : > { %v1010_v48 = vadd.f32 %v1009_v45, %v1008_v56  ;;  %v573_v33 = vmul.f32 %v10995_v61, %v10995_v61  ;;  %v668_v37 = vsel %vm402_vm0, %v571_v8, 0.0  ;;  %v944_v32 = vmul.f32 %v10829_v42, %v10829_v42  ;;  %v17729_v61 = vld [vmem:[#allocation3_spill] sm:$0xff] }
  0x95   : > { %v1013_v31 = vsel %vm402_vm0, %v942_v14, 0.0  ;;  %v525_v17 = vadd.f32 %v11279_v24, %v523_v6  ;;  %v904_v47 = vadd.f32 %v11396_v10, %v902_v23  ;;  %v667_v58 = vadd.f32 %v666_v5, %v665_v11  ;;  %v11510_v10 = vld [vmem:[%s10640_s17 + $0x3d8] sm:$0xff]  ;;  %v17737_v11 = vld [vmem:[#allocation7_spill] sm:$0xff] }
  0x96   : > { %v1012_v15 = vadd.f32 %v1011_v25, %v1010_v48  ;;  %v574_v59 = vmul.f32 %v11008_v13, %v11008_v13  ;;  %v670_v21 = vsel %vm402_vm0, %v572_v41, 0.0  ;;  %v945_v50 = vmul.f32 %v17729_v61, %v17729_v61  ;;  %v17735_v6 = vld [vmem:[#allocation6_spill] sm:$0xff] }
  0x97   : > { %v1015_v54 = vsel %vm402_vm0, %v943_v49, 0.0  ;;  %v906_v42 = vadd.f32 %v11403_v57, %v904_v47  ;;  %v915_v62 = vsel %vm402_vm0, %v11490_v55, 0.0  ;;  %v669_v24 = vadd.f32 %v668_v37, %v667_v58  ;;  %v17736_v49 = vld [vmem:[#allocation23_spill] sm:$0xff] }
  0x98   : > { %v1014_v27 = vadd.f32 %v1013_v31, %v1012_v15  ;;  %v575_v12 = vmul.f32 %v17730_v16, %v17730_v16  ;;  %v672_v13 = vsel %vm402_vm0, %v573_v33, 0.0  ;;  %v946_v22 = vmul.f32 %v17731_v63, %v17731_v63  ;;  %v17739_v15 = vld [vmem:[#allocation8_spill] sm:$0xff]  ;;  %v17741_v16 = vld [vmem:[#allocation9_spill] sm:$0xff] }
  0x99   : > { %v1017_v60 = vsel %vm402_vm0, %v944_v32, 0.0  ;;  %v527_v57 = vadd.f32 %v11292_v35, %v525_v17  ;;  %v908_v36 = vadd.f32 %v11407_v26, %v906_v42  ;;  %v671_v53 = vadd.f32 %v670_v21, %v669_v24  ;;  %v11530_v26 = vld [vmem:[%s10640_s17 + $0x3e0] sm:$0xff]  ;;  %v17738_v17 = vld [vmem:[#allocation25_spill] sm:$0xff]  ;;  %v17740_v42 = vld [vmem:[#allocation26_spill] sm:$0xff] }
  0x9a   : > { %v1016_v3 = vadd.f32 %v1015_v54, %v1014_v27  ;;  %v576_v51 = vmul.f32 %v17732_v44, %v17732_v44  ;;  %v674_v52 = vsel %vm402_vm0, %v574_v59, 0.0  ;;  %v947_v19 = vmul.f32 %v17733_v28, %v17733_v28  ;;  %v11563_v63 = vld [vmem:[%s10640_s17 + $0x3f0] sm:$0xff] }
  0x9b   : > { %v1019_v7 = vsel %vm402_vm0, %v945_v50, 0.0  ;;  %v910_v20 = vadd.f32 %v11425_v34, %v908_v36  ;;  %v917_v2 = vsel %vm402_vm0, %v11510_v10, 0.0  ;;  %v673_v35 = vadd.f32 %v672_v13, %v671_v53  ;;  %v11568_v36 = vld [vmem:[%s10640_s17 + $0x3f8] sm:$0xff]  ;;  %v17742_v53 = vld [vmem:[#allocation28_spill] sm:$0xff] }
  0x9c   : > { %v1018_v8 = vadd.f32 %v1017_v60, %v1016_v3  ;;  %v577_v14 = vmul.f32 %v17734_v40, %v17734_v40  ;;  %v676_v45 = vsel %vm402_vm0, %v575_v12, 0.0  ;;  %v948_v46 = vmul.f32 %v17735_v6, %v17735_v6  ;;  %v17744_v40 = vld [vmem:[#allocation11_spill] sm:$0xff] }
  0x9d   : > { %v1021_v0 = vsel %vm402_vm0, %v946_v22, 0.0  ;;  %v529_v34 = vadd.f32 %v11302_v1, %v527_v57  ;;  %v912_v56 = vadd.f32 %v911_v43, %v910_v20  ;;  %v675_v41 = vadd.f32 %v674_v52, %v673_v35  ;;  %v11548_v43 = vld [vmem:[%s10640_s17 + $0x3e8] sm:$0xff] }
  0x9e   : > { %v1020_v5 = vadd.f32 %v1019_v7, %v1018_v8  ;;  %v578_v25 = vmul.f32 %v17736_v49, %v17736_v49  ;;  %v678_v23 = vsel %vm402_vm0, %v576_v51, 0.0  ;;  %v949_v48 = vmul.f32 %v17737_v11, %v17737_v11  ;;  %v17743_v51 = vld [vmem:[#allocation10_spill] sm:$0xff]  ;;  %v17746_v49 = vld [vmem:[#allocation12_spill] sm:$0xff] }
  0x9f   : > { %v1023_v33 = vsel %vm402_vm0, %v947_v19, 0.0  ;;  %v914_v37 = vadd.f32 %v913_v39, %v912_v56  ;;  %v919_v32 = vsel %vm402_vm0, %v11530_v26, 0.0  ;;  %v677_v31 = vadd.f32 %v676_v45, %v675_v41 }
  0xa0   : > { %v1022_v1 = vadd.f32 %v1021_v0, %v1020_v5  ;;  %v579_v47 = vmul.f32 %v17738_v17, %v17738_v17  ;;  %v680_v58 = vsel %vm402_vm0, %v577_v14, 0.0  ;;  %v950_v59 = vmul.f32 %v17739_v15, %v17739_v15  ;;  %v17748_v15 = vld [vmem:[#allocation31_spill] sm:$0xff] }
  0xa1   : > { %v1025_v21 = vsel %vm402_vm0, %v948_v46, 0.0  ;;  %v530_v39 = vrot.slane %v529_v34, 4  ;;  %v916_v61 = vadd.f32 %v915_v62, %v914_v37  ;;  %v679_v50 = vadd.f32 %v678_v23, %v677_v31 }
  0xa2   : > { %v1024_v54 = vadd.f32 %v1023_v33, %v1022_v1  ;;  %v580_v24 = vmul.f32 %v17740_v42, %v17740_v42  ;;  %v682_v27 = vsel %vm402_vm0, %v578_v25, 0.0  ;;  %v951_v12 = vmul.f32 %v17741_v16, %v17741_v16 }
  0xa3   : > { %v1027_v13 = vsel %vm402_vm0, %v949_v48, 0.0  ;;  %v918_v22 = vadd.f32 %v917_v2, %v916_v61  ;;  %v921_v60 = vsel %vm402_vm0, %v11548_v43, 0.0  ;;  %v681_v57 = vadd.f32 %v680_v58, %v679_v50 }
  0xa4   : > { %v1026_v62 = vadd.f32 %v1025_v21, %v1024_v54  ;;  %v581_v3 = vmul.f32 %v17742_v53, %v17742_v53  ;;  %v684_v44 = vsel %vm402_vm0, %v579_v47, 0.0  ;;  %v952_v52 = vmul.f32 %v17743_v51, %v17743_v51 }
  0xa5   : > { %v1029_v28 = vsel %vm402_vm0, %v950_v59, 0.0  ;;  %v531_v19 = vadd.f32 %v530_v39, %v529_v34  ;;  %v920_v7 = vadd.f32 %v919_v32, %v918_v22  ;;  %v683_v20 = vadd.f32 %v682_v27, %v681_v57  ;;  %v17745_v34 = vld [vmem:[#allocation29_spill] sm:$0xff]  ;;  %v17749_v39 = vld [vmem:[#allocation14_spill] sm:$0xff]  ;;  %v17750_v27 = vld [vmem:[#allocation15_spill] sm:$0xff] }
  0xa6   : > { %v1028_v2 = vadd.f32 %v1027_v13, %v1026_v62  ;;  %v923_v35 = vsel %vm402_vm0, %v11563_v63, 0.0  ;;  %v686_v8 = vsel %vm402_vm0, %v580_v24, 0.0  ;;  %v953_v14 = vmul.f32 %v17744_v40, %v17744_v40  ;;  %v17747_v32 = vld [vmem:[#allocation13_spill] sm:$0xff]  ;;  %v17751_v57 = vld [vmem:[#allocation32_spill] sm:$0xff] }
  0xa7   : > { %v1031_v45 = vsel %vm402_vm0, %v951_v12, 0.0  ;;  %v922_v6 = vadd.f32 %v921_v60, %v920_v7  ;;  %v925_v46 = vsel %vm402_vm0, %v11568_v36, 0.0  ;;  %v685_v0 = vadd.f32 %v684_v44, %v683_v20  ;;  %v17753_v7 = vld [vmem:[#allocation17_spill] sm:$0xff] }
  0xa8   : > { %v1030_v56 = vadd.f32 %v1029_v28, %v1028_v2  ;;  %v582_v41 = vmul.f32 %v17745_v34, %v17745_v34  ;;  %v688_v5 = vsel %vm402_vm0, %v581_v3, 0.0  ;;  %v954_v25 = vmul.f32 %v17746_v49, %v17746_v49  ;;  %v17752_v3 = vld [vmem:[#allocation16_spill] sm:$0xff]  ;;  %v17756_v49 = vld [vmem:[#allocation21_spill] sm:$0xff] }
  0xa9   : > { %v1033_v23 = vsel %vm402_vm0, %v952_v52, 0.0  ;;  %v532_v11 = vrot.slane %v531_v19, 2  ;;  %v924_v48 = vadd.f32 %v923_v35, %v922_v6  ;;  %v687_v33 = vadd.f32 %v686_v8, %v685_v0 }
  0xaa   : > { %v1032_v37 = vadd.f32 %v1031_v45, %v1030_v56  ;;  %v955_v31 = vmul.f32 %v17747_v32, %v17747_v32  ;;  %v1035_v1 = vsel %vm402_vm0, %v953_v14, 0.0  ;;  %v583_v59 = vmul.f32 %v17748_v15, %v17748_v15  ;;  %v17754_v14 = vld [vmem:[#allocation34_spill] sm:$0xff] }
  0xab   : > { %v926_v17 = vadd.f32 %v925_v46, %v924_v48  ;;  %v689_v47 = vadd.f32 %v688_v5, %v687_v33  ;;  %v690_v21 = vsel %vm402_vm0, %v582_v41, 0.0  ;;  %v956_v61 = vmul.f32 %v17749_v39, %v17749_v39  ;;  %v17755_v46 = vld [vmem:[#allocation18_spill] sm:$0xff] }
  0xac   : > { %v1034_v58 = vadd.f32 %v1033_v23, %v1032_v37  ;;  %v1037_v50 = vsel %vm402_vm0, %v954_v25, 0.0  ;;  %v533_v54 = vadd.f32 %v532_v11, %v531_v19  ;;  %v957_v16 = vmul.f32 %v17750_v27, %v17750_v27  ;;  %v17757_v37 = vld [vmem:[#allocation35_spill] sm:$0xff]  ;;  %v17761_v27 = vld [vmem:[#allocation30_spill] sm:$0xff] }
  0xad   : > { %v927_v42 = vrot.slane %v926_v17, 4  ;;  %v1039_v12 = vsel %vm402_vm0, %v955_v31, 0.0  ;;  %v691_v22 = vadd.f32 %v690_v21, %v689_v47  ;;  %v584_v62 = vmul.f32 %v17751_v57, %v17751_v57  ;;  %v17763_v57 = vld [vmem:[#allocation33_spill] sm:$0xff] }
  0xae   : > { %v1036_v24 = vadd.f32 %v1035_v1, %v1034_v58  ;;  %v692_v53 = vsel %vm402_vm0, %v583_v59, 0.0  ;;  %v958_v44 = vmul.f32 %v17752_v3, %v17752_v3  ;;  %v1041_v51 = vsel %vm402_vm0, %v956_v61, 0.0  ;;  %v17758_v1 = vld [vmem:[#allocation24_spill] sm:$0xff]  ;;  %v17759_v59 = vld [vmem:[#allocation27_spill] sm:$0xff] }
  0xaf   : > { %v928_v13 = vadd.f32 %v927_v42, %v926_v17  ;;  %v534_v52 = vrot.slane %v533_v54, 1  ;;  %v959_v20 = vmul.f32 %v17753_v7, %v17753_v7  ;;  %v1043_v2 = vsel %vm402_vm0, %v957_v16, 0.0 }
  0xb0   : > { %v1038_v60 = vadd.f32 %v1037_v50, %v1036_v24  ;;  %v693_v8 = vadd.f32 %v692_v53, %v691_v22  ;;  %v585_v45 = vmul.f32 %v17754_v14, %v17754_v14  ;;  %v694_v6 = vsel %vm402_vm0, %v584_v62, 0.0 }
  0xb1   : > { %v929_v28 = vrot.slane %v928_v13, 2  ;;  %v960_v0 = vmul.f32 %v17755_v46, %v17755_v46  ;;  %v1045_v56 = vsel %vm402_vm0, %v958_v44, 0.0  ;;  %v535_v34 = vadd.f32 %v534_v52, %v533_v54  ;;  %v17760_v54 = vld [vmem:[#allocation37_spill] sm:$0xff]  ;;  %v17767_v46 = vld [vmem:[#allocation40_spill] sm:$0xff] }
  0xb2   : > { %v1040_v19 = vadd.f32 %v1039_v12, %v1038_v60  ;;  %v961_v25 = vmul.f32 %v17756_v49, %v17756_v49  ;;  %v1047_v23 = vsel %vm402_vm0, %v959_v20, 0.0  ;;  %v695_v48 = vadd.f32 %v694_v6, %v693_v8  ;;  %v17766_v8 = vld [vmem:[#allocation39_spill] sm:$0xff]  ;;  %v11675_v49 = vld [vmem:[%s16988_s3 + $0x8] sm:$0xff] }
  0xb3   : > { %v930_v35 = vadd.f32 %v929_v28, %v928_v13  ;;  %v586_v32 = vmul.f32 %v17757_v37, %v17757_v37  ;;  %v696_v31 = vsel %vm402_vm0, %v585_v45, 0.0  ;;  %v962_v17 = vmul.f32 %v17758_v1, %v17758_v1  ;;  %v11639_v13 = vld [vmem:[%s16988_s3 + $0x18] sm:$0xff] }
  0xb4   : > { %v1042_v40 = vadd.f32 %v1041_v51, %v1040_v19  ;;  %v1049_v47 = vsel %vm402_vm0, %v960_v0, 0.0  ;;  %v963_v21 = vmul.f32 %v17759_v59, %v17759_v59  ;;  %v1051_v39 = vsel %vm402_vm0, %v961_v25, 0.0  ;;  %v17764_v51 = vld [vmem:[#allocation38_spill] sm:$0xff]  ;;  %v17765_v19 = vld [vmem:[#allocation36_spill] sm:$0xff] }
  0xb5   : > { %v931_v41 = vrot.slane %v930_v35, 1  ;;  %v697_v61 = vadd.f32 %v696_v31, %v695_v48  ;;  %v587_v42 = vmul.f32 %v17760_v54, %v17760_v54  ;;  %v698_v24 = vsel %vm402_vm0, %v586_v32, 0.0  ;;  %v17770_v32 = vld [vmem:[#allocation41_spill] sm:$0xff] }
  0xb6   : > { %v1044_v5 = vadd.f32 %v1043_v2, %v1042_v40  ;;  %v964_v16 = vmul.f32 %v17761_v27, %v17761_v27  ;;  %v1053_v12 = vsel %vm402_vm0, %v962_v17, 0.0  ;;  %v17762_v22 = vmov 0.0   ;;  %v11658_v2 = vld [vmem:[%s16988_s3 + $0x10] sm:$0xff]  ;;  %v17771_v17 = vld [vmem:[#allocation48_spill] sm:$0xff] }
  0xb7   : > { %v932_v11 = vadd.f32 %v931_v41, %v930_v35  ;;  %v965_v62 = vmul.f32 %v17763_v57, %v17763_v57  ;;  %v1055_v53 = vsel %vm402_vm0, %v963_v21, 0.0  ;;  %v699_v3 = vadd.f32 %v698_v24, %v697_v61  ;;  %v17772_v21 = vld [vmem:[#allocation51_spill] sm:$0xff] }
  0xb8   : > { %v1046_v33 = vadd.f32 %v1045_v56, %v1044_v5  ;;  %v588_v52 = vmul.f32 %v17764_v51, %v17764_v51  ;;  %v700_v28 = vsel %vm402_vm0, %v587_v42, 0.0  ;;  %v966_v7 = vmul.f32 %v17765_v19, %v17765_v19  ;;  %v17773_v42 = vld [vmem:[#allocation43_spill] sm:$0xff] }
  0xb9   : > { %v933_v58 = vadd.f32 %v932_v11, %v535_v34  ;;  %v1057_v20 = vsel %vm402_vm0, %v964_v16, 0.0  ;;  %v967_v40 = vmul.f32 %v17766_v8, %v17766_v8  ;;  %v1059_v14 = vsel %vm402_vm0, %v965_v62, 0.0  ;;  %v17768_v34 = vld [vmem:[#allocation42_spill] sm:$0xff]  ;;  %v17775_v62 = vld [vmem:[#allocation57_spill] sm:$0xff] }
  0xba   : > { %v1048_v15 = vadd.f32 %v1047_v23, %v1046_v33  ;;  %v701_v45 = vadd.f32 %v700_v28, %v699_v3  ;;  %v589_v0 = vmul.f32 %v17767_v46, %v17767_v46  ;;  %v702_v56 = vsel %vm402_vm0, %v588_v52, 0.0  ;;  %v17769_v23 = vld [vmem:[#allocation45_spill] sm:$0xff]  ;;  %v17774_v16 = vld [vmem:[#allocation54_spill] sm:$0xff]  ;;  %v17776_v52 = vld [vmem:[#allocation44_spill] sm:$0xff] }
  0xbb   : > { %9434 = vmatmul.mubr.msk.f32.vlgmr.msra.gmra.mxu0 %vm402_vm0, %v933_v58  ;;  %v968_v41 = vmul.f32 %v17768_v34, %v17768_v34  ;;  %v1061_v5 = vsel %vm402_vm0, %v966_v7, 0.0  ;;  %v969_v11 = vmul.f32 %v17769_v23, %v17769_v23  ;;  %v1063_v48 = vsel %vm402_vm0, %v967_v40, 0.0  ;;  %v17777_v7 = vld [vmem:[#allocation58_spill] sm:$0xff]  ;;  %v17778_v40 = vld [vmem:[#allocation59_spill] sm:$0xff] }
  0xbc   : > { %v1050_v50 = vadd.f32 %v1049_v47, %v1048_v15  ;;  %9448 = vmatpush3.xpose.msk.msra.mxu0 %vm402_vm0, %v11639_v13  ;;  %9455 = vmatprep.mubr.msk.f32.mxu0 %vm10556_vm1, %v17762_v22  ;;  %v703_v33 = vadd.f32 %v702_v56, %v701_v45  ;;  %v590_v31 = vmul.f32 %v17770_v32, %v17770_v32  ;;  %v704_v1 = vsel %vm402_vm0, %v589_v0, 0.0  ;;  %v11692_v15 = vld [vmem:[%s16988_s3] sm:$0xff]  ;;  %v17779_v0 = vld [vmem:[#allocation46_spill] sm:$0xff] }
  0xbd   : > { %9449 = vmatprep.subr.mxu0 %v17762_v22  ;;  %v970_v47 = vmul.f32 %v17771_v17, %v17771_v17  ;;  %v1065_v58 = vsel %vm402_vm0, %v968_v41, 0.0  ;;  %v1067_v61 = vsel %vm402_vm0, %v969_v11, 0.0  ;;  %v591_v24 = vmul.f32 %v17773_v42, %v17773_v42  ;;  %v17780_v41 = vld [vmem:[#allocation60_spill] sm:$0xff]  ;;  %v17781_v11 = vld [vmem:[#allocation61_spill] sm:$0xff] }
  0xbe   : > { %v1052_v60 = vadd.f32 %v1051_v39, %v1050_v50  ;;  %v971_v39 = vmul.f32 %v17772_v21, %v17772_v21  ;;  %v705_v50 = vadd.f32 %v704_v1, %v703_v33  ;;  %v706_v27 = vsel %vm402_vm0, %v590_v31, 0.0  ;;  %v17782_v31 = vld [vmem:[#allocation47_spill] sm:$0xff] }
  0xbf   : > { %v592_v28 = vmul.f32 %v17776_v52, %v17776_v52  ;;  %v708_v19 = vsel %vm402_vm0, %v591_v24, 0.0  ;;  %v593_v56 = vmul.f32 %v17779_v0, %v17779_v0  ;;  %v594_v1 = vmul.f32 %v17782_v31, %v17782_v31  ;;  %v17785_v24 = vld [vmem:[#allocation49_spill] sm:$0xff]  ;;  %v17787_v52 = vld [vmem:[#allocation50_spill] sm:$0xff] }
  0xc0   : > { %v1054_v44 = vadd.f32 %v1053_v12, %v1052_v60  ;;  %9450 = vmatpush3.xpose.msk.msra.mxu0 %vm402_vm0, %v11658_v2  ;;  %v972_v12 = vmul.f32 %v17774_v16, %v17774_v16  ;;  %v1069_v60 = vsel %vm402_vm0, %v970_v47, 0.0  ;;  %v1071_v3 = vsel %vm402_vm0, %v971_v39, 0.0  ;;  %v17783_v47 = vld [vmem:[#allocation62_spill] sm:$0xff]  ;;  %v17784_v39 = vld [vmem:[#allocation63_spill] sm:$0xff] }
  0xc1   : > { %9451 = vmatprep.subr.mxu0 %v17762_v22  ;;  %v710_v34 = vsel %vm402_vm0, %v592_v28, 0.0  ;;  %v712_v17 = vsel %vm402_vm0, %v593_v56, 0.0  ;;  %v714_v16 = vsel %vm402_vm0, %v594_v1, 0.0  ;;  %v596_v28 = vmul.f32 %v17787_v52, %v17787_v52  ;;  %v17790_v56 = vld [vmem:[#allocation66_spill] sm:$0xff] }
  0xc2   : > { %v1056_v35 = vadd.f32 %v1055_v53, %v1054_v44  ;;  %v973_v53 = vmul.f32 %v17775_v62, %v17775_v62  ;;  %v707_v44 = vadd.f32 %v706_v27, %v705_v50  ;;  %v595_v27 = vmul.f32 %v17785_v24, %v17785_v24  ;;  %v17786_v62 = vld [vmem:[#allocation64_spill] sm:$0xff] }
  0xc3   : > { %v718_v0 = vsel %vm402_vm0, %v596_v28, 0.0  ;;  %v986_v31 = vmul.f32 %v11360_v38, %v11360_v38  ;;  %v991_v28 = vmul.f32 %v11470_v9, %v11470_v9  ;;  %v994_v9 = vmul.f32 %v11530_v26, %v11530_v26 }
  0xc4   : > { %v1058_v6 = vadd.f32 %v1057_v20, %v1056_v35  ;;  %9452 = vmatpush3.xpose.msk.msra.mxu0 %vm402_vm0, %v11675_v49  ;;  %v974_v20 = vmul.f32 %v17777_v7, %v17777_v7  ;;  %v1073_v35 = vsel %vm402_vm0, %v972_v12, 0.0  ;;  %v1075_v45 = vsel %vm402_vm0, %v973_v53, 0.0  ;;  %v17788_v7 = vld [vmem:[#allocation65_spill] sm:$0xff] }
  0xc5   : > { %9453 = vmatprep.subr.mxu0 %v17762_v22  ;;  %v980_v12 = vmul.f32 %v11322_v4, %v11322_v4  ;;  %v981_v53 = vmul.f32 %v17786_v62, %v17786_v62  ;;  %v1101_v38 = vsel %vm402_vm0, %v986_v31, 0.0  ;;  %v17796_v62 = vld [vmem:[#allocation56_spill] sm:$0xff] }
  0xc6   : > { %v1060_v25 = vadd.f32 %v1059_v14, %v1058_v6  ;;  %v975_v14 = vmul.f32 %v17778_v40, %v17778_v40  ;;  %v709_v6 = vadd.f32 %v708_v19, %v707_v44  ;;  %v716_v19 = vsel %vm402_vm0, %v595_v27, 0.0 }
  0xc7   : > { %v1089_v4 = vsel %vm402_vm0, %v980_v12, 0.0  ;;  %v1091_v40 = vsel %vm402_vm0, %v981_v53, 0.0  ;;  %v600_v53 = vmul.f32 %v17796_v62, %v17796_v62 }
  0xc8   : > { %v1062_v37 = vadd.f32 %v1061_v5, %v1060_v25  ;;  %9454 = vmatpush3.xpose.msk.msra.mxu0 %vm402_vm0, %v11692_v15  ;;  %v976_v5 = vmul.f32 %v17780_v41, %v17780_v41  ;;  %v1077_v25 = vsel %vm402_vm0, %v974_v20, 0.0  ;;  %v1079_v33 = vsel %vm402_vm0, %v975_v14, 0.0 }
  0xc9   : > { %v982_v20 = vmul.f32 %v17788_v7, %v17788_v7 }
  0xca   : > { %v1064_v59 = vadd.f32 %v1063_v48, %v1062_v37  ;;  %v977_v48 = vmul.f32 %v17781_v11, %v17781_v11  ;;  %v711_v37 = vadd.f32 %v710_v34, %v709_v6  ;;  %v17789_v6 = vld [vmem:[#allocation52_spill] sm:$0xff]  ;;  %v984_v34 = vmul.f32 %v17790_v56, %v17790_v56 }
  0xcb   : > { %v1093_v41 = vsel %vm402_vm0, %v982_v20, 0.0  ;;  %v726_v20 = vsel %vm402_vm0, %v600_v53, 0.0 }
  0xcc   : > { %v1066_v54 = vadd.f32 %v1065_v58, %v1064_v59  ;;  %v978_v58 = vmul.f32 %v17783_v47, %v17783_v47  ;;  %v1081_v59 = vsel %vm402_vm0, %v976_v5, 0.0  ;;  %v1083_v50 = vsel %vm402_vm0, %v977_v48, 0.0  ;;  %v17793_v47 = vld [vmem:[#allocation68_spill] sm:$0xff] }
  0xcd   : > { %v1097_v1 = vsel %vm402_vm0, %v984_v34, 0.0 }
  0xce   : > { %v1068_v57 = vadd.f32 %v1067_v61, %v1066_v54  ;;  %v979_v61 = vmul.f32 %v17784_v39, %v17784_v39  ;;  %v713_v54 = vadd.f32 %v712_v17, %v711_v37 }
  0xd0   : > { %v1070_v51 = vadd.f32 %v1069_v60, %v1068_v57  ;;  %v1085_v60 = vsel %vm402_vm0, %v978_v58, 0.0  ;;  %v715_v44 = vadd.f32 %v714_v16, %v713_v54  ;;  %v987_v58 = vmul.f32 %v17793_v47, %v17793_v47 }
  0xd1   : > { %v989_v16 = vmul.f32 %v11399_v30, %v11399_v30 }
  0xd2   : > { %v1072_v8 = vadd.f32 %v1071_v3, %v1070_v51  ;;  %v1087_v3 = vsel %vm402_vm0, %v979_v61, 0.0  ;;  %v717_v14 = vadd.f32 %v716_v19, %v715_v44  ;;  %v17794_v61 = vld [vmem:[#allocation55_spill] sm:$0xff]  ;;  %v1103_v12 = vsel %vm402_vm0, %v987_v58, 0.0 }
  0xd3   : > { %v990_v44 = vmul.f32 %v11450_v18, %v11450_v18  ;;  %v1107_v30 = vsel %vm402_vm0, %v989_v16, 0.0  ;;  %v993_v18 = vmul.f32 %v11510_v10, %v11510_v10  ;;  %v996_v10 = vmul.f32 %v11563_v63, %v11563_v63  ;;  %v9736_v16 = vld [vmem:[%s16989_s4] sm:$0xff]  }
  0xd4   : > { %v1074_v46 = vadd.f32 %v1073_v35, %v1072_v8  ;;  %v983_v8 = vmul.f32 %v11341_v29, %v11341_v29  ;;  %v719_v11 = vadd.f32 %v718_v0, %v717_v14  ;;  %v995_v0 = vmul.f32 %v11548_v43, %v11548_v43 }
  0xd6   : > { %v1076_v23 = vadd.f32 %v1075_v45, %v1074_v46  ;;  %v597_v46 = vmul.f32 %v17789_v6, %v17789_v6  ;;  %v1095_v29 = vsel %vm402_vm0, %v983_v8, 0.0  ;;  %v1119_v26 = vsel %vm402_vm0, %v995_v0, 0.0 }
  0xd8   : > { %v1078_v32 = vadd.f32 %v1077_v25, %v1076_v23  ;;  %v17791_v25 = vld [vmem:[#allocation67_spill] sm:$0xff] }
  0xd9   : > { %v985_v23 = vmul.f32 %v17791_v25, %v17791_v25  ;;  %v997_v25 = vmul.f32 %v11568_v36, %v11568_v36 }
  0xda   : > { %v1080_v21 = vadd.f32 %v1079_v33, %v1078_v32  ;;  %v17792_v33 = vld [vmem:[#allocation53_spill] sm:$0xff]  ;;  %v720_v32 = vsel %vm402_vm0, %v597_v46, 0.0 }
  0xdb   : > { %v598_v37 = vmul.f32 %v17792_v33, %v17792_v33 }
  0xdc   : > { %v1082_v42 = vadd.f32 %v1081_v59, %v1080_v21  ;;  %v1099_v59 = vsel %vm402_vm0, %v985_v23, 0.0  ;;  %v721_v21 = vadd.f32 %v720_v32, %v719_v11  ;;  %v1121_v11 = vsel %vm402_vm0, %v996_v10, 0.0 }
  0xdd   : > { %v722_v54 = vsel %vm402_vm0, %v598_v37, 0.0 }
  0xde   : > { %v1084_v57 = vadd.f32 %v1083_v50, %v1082_v42  ;;  %v599_v50 = vmul.f32 %v17794_v61, %v17794_v61  ;;  %v17795_v42 = vld [vmem:[#allocation69_spill] sm:$0xff] }
  0xdf   : > { %v988_v24 = vmul.f32 %v17795_v42, %v17795_v42 }
  0xe0   : > { %v1086_v51 = vadd.f32 %v1085_v60, %v1084_v57  ;;  %v723_v60 = vadd.f32 %v722_v54, %v721_v21 }
  0xe2   : > { %v1088_v35 = vadd.f32 %v1087_v3, %v1086_v51  ;;  %v724_v3 = vsel %vm402_vm0, %v599_v50, 0.0  ;;  %v1105_v51 = vsel %vm402_vm0, %v988_v24, 0.0 }
  0xe3   : > { %v725_v19 = vadd.f32 %v724_v3, %v723_v60  ;;  %v1447_v3 = vlaneseq }
  0xe4   : > { %v1090_v45 = vadd.f32 %v1089_v4, %v1088_v35  ;;  %v992_v4 = vmul.f32 %v11490_v55, %v11490_v55  ;;  %v1109_v35 = vsel %vm402_vm0, %v990_v44, 0.0  ;;  %v1115_v55 = vsel %vm402_vm0, %v993_v18, 0.0  ;;  %v8223_v18 = vld [vmem:[%s10640_s17 + $0x218] sm:$0xff] }
  0xe5   : > { %v727_v14 = vadd.f32 %v726_v20, %v725_v19  ;;  %v1448_v44 = vshrl.u32 %v1447_v3, 7  ;;  %v1444_v19 = vld [vmem:[%s16987_s2] sm:$0x1] }
  0xe6   : > { %v1092_v5 = vadd.f32 %v1091_v40, %v1090_v45  ;;  %v1111_v40 = vsel %vm402_vm0, %v991_v28, 0.0  ;;  %v1113_v6 = vsel %vm402_vm0, %v992_v4, 0.0  ;;  %v8220_v4 = vld [vmem:[%s10640_s17 + $0x200] sm:$0xff] }
  0xe7   : > { %v728_v56 = vrot.slane %v727_v14, 4  ;;  %v9751_v3 = vld [vmem:[%s10640_s17 + $0x40] sm:$0xff] }
  0xe8   : > { %v1094_v48 = vadd.f32 %v1093_v41, %v1092_v5  ;;  %v1117_v41 = vsel %vm402_vm0, %v994_v9, 0.0  ;;  %v8224_v9 = vld [vmem:[%s10640_s17 + $0x220] sm:$0xff] }
  0xe9   : > { %v729_v23 = vadd.f32 %v728_v56, %v727_v14  ;;  %v9743_v14 = vld [vmem:[%s10640_s17] sm:$0xff] }
  0xea   : > { %v1096_v17 = vadd.f32 %v1095_v29, %v1094_v48  ;;  %v1123_v48 = vsel %vm402_vm0, %v997_v25, 0.0 }
  0xeb   : > { %v730_v33 = vrot.slane %v729_v23, 2 }
  0xec   : > { %v1098_v39 = vadd.f32 %v1097_v1, %v1096_v17 }
  0xed   : > { %v731_v31 = vadd.f32 %v730_v33, %v729_v23 }
  0xee   : > { %v1100_v27 = vadd.f32 %v1099_v59, %v1098_v39 }
  0xef   : > { %v732_v17 = vrot.slane %v731_v31, 1 }
  0xf0   : > { %v1102_v57 = vadd.f32 %v1101_v38, %v1100_v27 }
  0xf1   : > { %v733_v59 = vadd.f32 %v732_v17, %v731_v31 }
  0xf2   : > { %v1104_v52 = vadd.f32 %v1103_v12, %v1102_v57 }
  0xf4   : > { %v1106_v7 = vadd.f32 %v1105_v51, %v1104_v52  ;;  %v1442_v51 = vld [vmem:[%s16986_s1] sm:$0x1]  ;;  %v1449_v52 = vsub.s32 0, %v1448_v44 }
  0xf6   : > { %v1108_v8 = vadd.f32 %v1107_v30, %v1106_v7 }
  0xf8   : > { %v1110_v45 = vadd.f32 %v1109_v35, %v1108_v8  ;;  %v8221_v35 = vld [vmem:[%s10640_s17 + $0x208] sm:$0xff]  ;;  %v8222_v8 = vld [vmem:[%s10640_s17 + $0x210] sm:$0xff] }
  0xfa   : > { %v1112_v46 = vadd.f32 %v1111_v40, %v1110_v45 }
  0xfc   : > { %v1114_v34 = vadd.f32 %v1113_v6, %v1112_v46  ;;  %v8225_v6 = vld [vmem:[%s10640_s17 + $0x228] sm:$0xff] }
  0xfd   : > { %v9744_v46 = vld [vmem:[%s10640_s17 + $0x8] sm:$0xff] }
  0xfe   : > { %v1116_v5 = vadd.f32 %v1115_v55, %v1114_v34  ;;  %v9745_v34 = vld [vmem:[%s10640_s17 + $0x10] sm:$0xff] }
 0x100   : > { %v1118_v29 = vadd.f32 %v1117_v41, %v1116_v5  ;;  %v9746_v5 = vld [vmem:[%s10640_s17 + $0x18] sm:$0xff] }
 0x102   : > { %v1120_v43 = vadd.f32 %v1119_v26, %v1118_v29  ;;  %v9747_v29 = vld [vmem:[%s10640_s17 + $0x20] sm:$0xff] }
 0x104   : > { %v1122_v37 = vadd.f32 %v1121_v11, %v1120_v43  ;;  %v9748_v43 = vld [vmem:[%s10640_s17 + $0x28] sm:$0xff] }
 0x106   : > { %v1124_v32 = vadd.f32 %v1123_v48, %v1122_v37 }
 0x108   : > { %v1125_v63 = vrot.slane %v1124_v32, 4 }
 0x10a   : > { %v1126_v1 = vadd.f32 %v1125_v63, %v1124_v32 }
 0x10c   : > { %v1127_v47 = vrot.slane %v1126_v1, 2 }
 0x10e   : > { %v1128_v58 = vadd.f32 %v1127_v47, %v1126_v1 }
 0x110   : > { %v1129_v36 = vrot.slane %v1128_v58, 1 }
 0x112   : > { %v1130_v21 = vadd.f32 %v1129_v36, %v1128_v58 }
 0x114   : > { %v1131_v39 = vadd.f32 %v1130_v21, %v733_v59 }
 0x116   : > { %9445 = vmatmul.mubr.msk.f32.vlgmr.msra.gmra.mxu1 %vm402_vm0, %v1131_v39 }
 0x117   : > { %9459 = vmatpush3.xpose.msk.msra.mxu1 %vm402_vm0, %v11639_v13  ;;  %9466 = vmatprep.mubr.msk.f32.mxu1 %vm10556_vm1, %v17762_v22 }
 0x118   : > { %9460 = vmatprep.subr.mxu1 %v17762_v22 }
 0x11b   : > { %9461 = vmatpush3.xpose.msk.msra.mxu1 %vm402_vm0, %v11658_v2 }
 0x11c   : > { %9462 = vmatprep.subr.mxu1 %v17762_v22 }
 0x11f   : > { %9463 = vmatpush3.xpose.msk.msra.mxu1 %vm402_vm0, %v11675_v49  ;;  %v9734_v49 = vld [vmem:[%s16989_s4 + $0x8] sm:$0xff]  }
 0x120   : > { %9464 = vmatprep.subr.mxu1 %v17762_v22  ;;  %v9733_v22 = vld [vmem:[%s16989_s4 + $0x8] sm:$0xff]  }
 0x121   : > { %9469 = vmatprep.subr.bf16.mxu0 %v9733_v22 }
 0x123   : > { %9465 = vmatpush3.xpose.msk.msra.mxu1 %vm402_vm0, %v11692_v15  ;;  %v9735_v15 = vld [vmem:[%s16989_s4] sm:$0xff]  }
 0x124   : > { %9537 = vmatprep.subr.bf16.mxu1 %v9734_v49 }
 0x17b   : > { %v1201_v61 = vpop.f32.mrf.mxu0 }
 0x17c   : > { %v1205_v13 = vmul.f32 0.0009765625, %v1201_v61 }
 0x17d   : > { %v9435_v50 = vpop.f32.mrf.mxu0 }
 0x17e   : > { %9456 = vmatmul.mubr.msk.f32.vlgmr.msra.gmra.mxu0 %vm402_vm0, %v1205_v13  ;;  %v1280_v54 = vmul.f32 %v1205_v13, %v1205_v13  ;;  %v8226_v13 = vld [vmem:[%s10640_s17 + $0x230] sm:$0xff]  ;;  %v8227_v50 = vld [vmem:[%s10640_s17 + $0x238] sm:$0xff] }
 0x17f   : > { %9470 = vmatpush3.bf16.msra.mxu0 %v9733_v22  ;;  %v9749_v22 = vld [vmem:[%s10640_s17 + $0x30] sm:$0xff] }
 0x180   : > { %9471 = vmatprep.subr.bf16.mxu0 %v9735_v15 }
 0x183   : > { %9472 = vmatpush3.bf16.msra.mxu0 %v9735_v15  ;;  %v9750_v15 = vld [vmem:[%s10640_s17 + $0x38] sm:$0xff] }
 0x1d6   : > { %v1275_v42 = vpop.f32.mrf.mxu1 }
 0x1d7   : > { %v1279_v24 = vmul.f32 0.0009765625, %v1275_v42 }
 0x1d8   : > { %v9446_v38 = vpop.f32.mrf.mxu1 }
 0x1d9   : > { %v1281_v2 = vsub.f32 %v1279_v24, %v1280_v54 }
 0x1db   : > { %v1282_v27 = vmax.f32 %v1281_v2, 0.0  ;;  %v8228_v2 = vld [vmem:[%s10640_s17 + $0x240] sm:$0xff] }
 0x1dd   : > { %9467 = vmatmul.mubr.msk.f32.vlgmr.msra.gmra.mxu1 %vm402_vm0, %v1282_v27 }
 0x1de   : > { %9538 = vmatpush3.bf16.msra.mxu1 %v9734_v49 }
 0x1df   : > { %9539 = vmatprep.subr.bf16.mxu1 %v9736_v16 }
 0x1e2   : > { %9540 = vmatpush3.bf16.msra.mxu1 %v9736_v16 }
 0x23e   : > { %v1364_v12 = vpop.f32.mrf.mxu0 }
 0x240   : > { %v9457_v60 = vpop.f32.mrf.mxu0 }
 0x29d   : > { %v1437_v57 = vpop.f32.mrf.mxu1 }
 0x29e   : > { %v1438_v62 = vadd.f32 1e-05, %v1437_v57 }
 0x29f   : > { %v9468_v53 = vpop.f32.mrf.mxu1 }
 0x2a0   : > { %9737 = vrsqrt.f32 %v1438_v62 }
 0x2ad   : > { %v9738_v28 = vpop.eup %9737 }
 0x2ae   : > { %v1443_v30 = vmul.f32 %v9738_v28, %v1442_v51  ;;  %v9752_v51 = vld [vmem:[%s10640_s17 + $0x48] sm:$0xff] }
 0x2b0   : > { %v1445_v7 = vmul.f32 %v1443_v30, %v1364_v12  ;;  %v11844_v20 = vrot.slane %v1443_v30, %v1449_v52  ;;  %v8229_v12 = vld [vmem:[%s10640_s17 + $0x248] sm:$0xff] }
 0x2b2   : > { %v1446_v40 = vsub.f32 %v1444_v19, %v1445_v7  ;;  %v1451_v45 = vmul.f32 %v9743_v14, %v11844_v20  ;;  %v1452_v0 = vmul.f32 %v9744_v46, %v11844_v20  ;;  %v2410_v55 = vmul.f32 %v8220_v4, %v11844_v20  ;;  %v8230_v14 = vld [vmem:[%s10640_s17 + $0x250] sm:$0xff]  ;;  %v8232_v46 = vld [vmem:[%s10640_s17 + $0x260] sm:$0xff] }
 0x2b3   : > { %v2411_v56 = vmul.f32 %v8221_v35, %v11844_v20  ;;  %v1453_v10 = vmul.f32 %v9745_v34, %v11844_v20  ;;  %v1454_v25 = vmul.f32 %v9746_v5, %v11844_v20  ;;  %v2412_v26 = vmul.f32 %v8222_v8, %v11844_v20  ;;  %v9753_v34 = vld [vmem:[%s10640_s17 + $0x50] sm:$0xff]  ;;  %v9754_v5 = vld [vmem:[%s10640_s17 + $0x58] sm:$0xff] }
 0x2b4   : > { %v11860_v41 = vrot.slane %v1446_v40, %v1449_v52  ;;  %v2413_v23 = vmul.f32 %v8223_v18, %v11844_v20  ;;  %v1455_v11 = vmul.f32 %v9747_v29, %v11844_v20  ;;  %v1456_v48 = vmul.f32 %v9748_v43, %v11844_v20  ;;  %v9755_v29 = vld [vmem:[%s10640_s17 + $0x60] sm:$0xff]  ;;  %v9756_v43 = vld [vmem:[%s10640_s17 + $0x68] sm:$0xff] }
 0x2b5   : > { %v2414_v33 = vmul.f32 %v8224_v9, %v11844_v20  ;;  %v2415_v37 = vmul.f32 %v8225_v6, %v11844_v20  ;;  %v1457_v49 = vmul.f32 %v9749_v22, %v11844_v20  ;;  %v1458_v16 = vmul.f32 %v9750_v15, %v11844_v20  ;;  %v9759_v15 = vld [vmem:[%s10640_s17 + $0x80] sm:$0xff] }
 0x2b6   : > { %v1521_v32 = vadd.f32 %v11860_v41, %v1451_v45  ;;  %v1522_v31 = vadd.f32 %v11860_v41, %v1452_v0  ;;  %v2474_v63 = vadd.f32 %v2410_v55, %v11860_v41  ;;  %v2475_v1 = vadd.f32 %v2411_v56, %v11860_v41  ;;  %v8231_v45 = vld [vmem:[%s10640_s17 + $0x258] sm:$0xff]  ;;  %v8233_v0 = vld [vmem:[%s10640_s17 + $0x268] sm:$0xff] }
 0x2b7   : > { %v1523_v17 = vadd.f32 %v11860_v41, %v1453_v10  ;;  %v1524_v47 = vadd.f32 %v11860_v41, %v1454_v25  ;;  %v2476_v58 = vadd.f32 %v2412_v26, %v11860_v41  ;;  %v2477_v59 = vadd.f32 %v2413_v23, %v11860_v41 }
 0x2b8   : > { %v1585_v36 = vpack.c.bf16 %v1522_v31, %v1521_v32  ;;  %v2538_v21 = vpack.c.bf16 %v2475_v1, %v2474_v63  ;;  %v1525_v39 = vadd.f32 %v11860_v41, %v1455_v11  ;;  %v1526_v61 = vadd.f32 %v11860_v41, %v1456_v48 }
 0x2b9   : > { %v1586_v54 = vpack.c.bf16 %v1524_v47, %v1523_v17  ;;  %v2539_v42 = vpack.c.bf16 %v2477_v59, %v2476_v58  ;;  %v2478_v24 = vadd.f32 %v2414_v33, %v11860_v41  ;;  %v2479_v38 = vadd.f32 %v2415_v37, %v11860_v41 }
 0x2ba   : > { %9473 = vmatprep.mubr.msk.bf16.mxu0 %vm402_vm0, %v1585_v36  ;;  %9541 = vmatprep.mubr.msk.bf16.mxu1 %vm402_vm0, %v2538_v21  ;;  %v1587_v27 = vpack.c.bf16 %v1526_v61, %v1525_v39  ;;  %v2416_v57 = vmul.f32 %v8226_v13, %v11844_v20  ;;  %v2417_v62 = vmul.f32 %v8227_v50, %v11844_v20  ;;  %v8234_v36 = vld [vmem:[%s10640_s17 + $0x270] sm:$0xff]  ;;  %v8235_v21 = vld [vmem:[%s10640_s17 + $0x278] sm:$0xff]  ;;  %v8236_v13 = vld [vmem:[%s10640_s17 + $0x280] sm:$0xff] }
 0x2bb   : > { %9474 = vmatmul.mubr.msk.bf16.vlgmr.msra.gmra.mxu0 %vm402_vm0, %v1586_v54  ;;  %9542 = vmatmul.mubr.msk.bf16.vlgmr.msra.gmra.mxu1 %vm402_vm0, %v2539_v42  ;;  %v2540_v60 = vpack.c.bf16 %v2479_v38, %v2478_v24  ;;  %v1527_v53 = vadd.f32 %v11860_v41, %v1457_v49  ;;  %v1459_v44 = vmul.f32 %v9751_v3, %v11844_v20  ;;  %v8237_v50 = vld [vmem:[%s10640_s17 + $0x288] sm:$0xff]  ;;  %v9757_v24 = vld [vmem:[%s10640_s17 + $0x70] sm:$0xff] }
 0x2bc   : > { %9477 = vmatprep.mubr.msk.bf16.mxu0 %vm402_vm0, %v1587_v27  ;;  %v1460_v52 = vmul.f32 %v9752_v51, %v11844_v20  ;;  %v2418_v28 = vmul.f32 %v8228_v2, %v11844_v20  ;;  %v1528_v30 = vadd.f32 %v11860_v41, %v1458_v16  ;;  %v2480_v19 = vadd.f32 %v2416_v57, %v11860_v41  ;;  %v9758_v2 = vld [vmem:[%s10640_s17 + $0x78] sm:$0xff] }
 0x2bd   : > { %9545 = vmatprep.mubr.msk.bf16.mxu1 %vm402_vm0, %v2540_v60  ;;  %v2481_v7 = vadd.f32 %v2417_v62, %v11860_v41  ;;  %v2419_v4 = vmul.f32 %v8229_v12, %v11844_v20  ;;  %v1529_v35 = vadd.f32 %v11860_v41, %v1459_v44  ;;  %v1461_v10 = vmul.f32 %v9753_v34, %v11844_v20  ;;  %v9760_v12 = vld [vmem:[%s10640_s17 + $0x88] sm:$0xff]  ;;  %v9763_v34 = vld [vmem:[%s10640_s17 + $0xa0] sm:$0xff] }
 0x2be   : > { %v1530_v8 = vadd.f32 %v11860_v41, %v1460_v52  ;;  %v2482_v18 = vadd.f32 %v2418_v28, %v11860_v41  ;;  %v1588_v9 = vpack.c.bf16 %v1528_v30, %v1527_v53  ;;  %v1462_v25 = vmul.f32 %v9754_v5, %v11844_v20  ;;  %v9764_v5 = vld [vmem:[%s10640_s17 + $0xa8] sm:$0xff] }
 0x2bf   : > { %v2483_v40 = vadd.f32 %v2419_v4, %v11860_v41  ;;  %v2541_v6 = vpack.c.bf16 %v2481_v7, %v2480_v19  ;;  %v2420_v26 = vmul.f32 %v8230_v14, %v11844_v20  ;;  %v2421_v23 = vmul.f32 %v8231_v45, %v11844_v20  ;;  %v8238_v7 = vld [vmem:[%s10640_s17 + $0x290] sm:$0xff]  ;;  %v8239_v4 = vld [vmem:[%s10640_s17 + $0x298] sm:$0xff] }
 0x2c0   : > { %v1589_v55 = vpack.c.bf16 %v1530_v8, %v1529_v35  ;;  %v1463_v11 = vmul.f32 %v9755_v29, %v11844_v20  ;;  %v1464_v48 = vmul.f32 %v9756_v43, %v11844_v20  ;;  %v2422_v33 = vmul.f32 %v8232_v46, %v11844_v20  ;;  %v9762_v46 = vld [vmem:[%s10640_s17 + $0x98] sm:$0xff] }
 0x2c1   : > { %v2542_v56 = vpack.c.bf16 %v2483_v40, %v2482_v18  ;;  %v2423_v37 = vmul.f32 %v8233_v0, %v11844_v20  ;;  %v1531_v32 = vadd.f32 %v11860_v41, %v1461_v10  ;;  %v1532_v31 = vadd.f32 %v11860_v41, %v1462_v25  ;;  %v8240_v18 = vld [vmem:[%s10640_s17 + $0x2a0] sm:$0xff]  ;;  %v8241_v40 = vld [vmem:[%s10640_s17 + $0x2a8] sm:$0xff] }
 0x2c2   : > { %v2484_v63 = vadd.f32 %v2420_v26, %v11860_v41  ;;  %v2485_v1 = vadd.f32 %v2421_v23, %v11860_v41  ;;  %v1533_v17 = vadd.f32 %v11860_v41, %v1463_v11  ;;  %v1534_v47 = vadd.f32 %v11860_v41, %v1464_v48 }
 0x2c3   : > { %9478 = vmatmul.mubr.msk.bf16.gmra.mxu0 %vm402_vm0, %v1588_v9  ;;  %9546 = vmatmul.mubr.msk.bf16.gmra.mxu1 %vm402_vm0, %v2541_v6  ;;  %v2486_v58 = vadd.f32 %v2422_v33, %v11860_v41  ;;  %v2487_v59 = vadd.f32 %v2423_v37, %v11860_v41  ;;  %v1590_v39 = vpack.c.bf16 %v1532_v31, %v1531_v32  ;;  %v9761_v9 = vld [vmem:[%s10640_s17 + $0x90] sm:$0xff] }
 0x2c4   : > { %9481 = vmatprep.mubr.msk.bf16.mxu0 %vm402_vm0, %v1589_v55  ;;  %9549 = vmatprep.mubr.msk.bf16.mxu1 %vm402_vm0, %v2542_v56  ;;  %v2543_v61 = vpack.c.bf16 %v2485_v1, %v2484_v63  ;;  %v1591_v54 = vpack.c.bf16 %v1534_v47, %v1533_v17  ;;  %v1465_v38 = vmul.f32 %v9757_v24, %v11844_v20  ;;  %v8242_v63 = vld [vmem:[%s10640_s17 + $0x2b0] sm:$0xff]  ;;  %v8243_v1 = vld [vmem:[%s10640_s17 + $0x2b8] sm:$0xff]  ;;  %v9767_v24 = vld [vmem:[%s10640_s17 + $0xc0] sm:$0xff] }
 0x2c5   : > { %v2544_v42 = vpack.c.bf16 %v2487_v59, %v2486_v58  ;;  %v1466_v27 = vmul.f32 %v9758_v2, %v11844_v20  ;;  %v2424_v22 = vmul.f32 %v8234_v36, %v11844_v20  ;;  %v2425_v49 = vmul.f32 %v8235_v21, %v11844_v20  ;;  %v8244_v58 = vld [vmem:[%s10640_s17 + $0x2c0] sm:$0xff]  ;;  %v8245_v59 = vld [vmem:[%s10640_s17 + $0x2c8] sm:$0xff] }
 0x2c6   : > { %v1467_v16 = vmul.f32 %v9759_v15, %v11844_v20  ;;  %v1468_v60 = vmul.f32 %v9760_v12, %v11844_v20  ;;  %v2426_v57 = vmul.f32 %v8236_v13, %v11844_v20  ;;  %v2427_v62 = vmul.f32 %v8237_v50, %v11844_v20  ;;  %v9766_v13 = vld [vmem:[%s10640_s17 + $0xb8] sm:$0xff]  ;;  %v9768_v2 = vld [vmem:[%s10640_s17 + $0xc8] sm:$0xff] }
 0x2c7   : > { %v1535_v53 = vadd.f32 %v11860_v41, %v1465_v38  ;;  %v1536_v3 = vadd.f32 %v11860_v41, %v1466_v27  ;;  %v2488_v44 = vadd.f32 %v2424_v22, %v11860_v41  ;;  %v2489_v51 = vadd.f32 %v2425_v49, %v11860_v41 }
 0x2c8   : > { %v1537_v52 = vadd.f32 %v11860_v41, %v1467_v16  ;;  %v1538_v28 = vadd.f32 %v11860_v41, %v1468_v60  ;;  %v2490_v30 = vadd.f32 %v2426_v57, %v11860_v41  ;;  %v2491_v19 = vadd.f32 %v2427_v62, %v11860_v41 }
 0x2c9   : > { %v1592_v35 = vpack.c.bf16 %v1536_v3, %v1535_v53  ;;  %v2545_v8 = vpack.c.bf16 %v2489_v51, %v2488_v44  ;;  %v1469_v6 = vmul.f32 %v9761_v9, %v11844_v20  ;;  %v1470_v0 = vmul.f32 %v9762_v46, %v11844_v20  ;;  %v8246_v44 = vld [vmem:[%s10640_s17 + $0x2d0] sm:$0xff]  ;;  %v8247_v51 = vld [vmem:[%s10640_s17 + $0x2d8] sm:$0xff]  ;;  %v9771_v9 = vld [vmem:[%s10640_s17 + $0xe0] sm:$0xff] }
 0x2ca   : > { %v1593_v14 = vpack.c.bf16 %v1538_v28, %v1537_v52  ;;  %v2546_v45 = vpack.c.bf16 %v2491_v19, %v2490_v30  ;;  %v2428_v55 = vmul.f32 %v8238_v7, %v11844_v20  ;;  %v2429_v56 = vmul.f32 %v8239_v4, %v11844_v20  ;;  %v8248_v30 = vld [vmem:[%s10640_s17 + $0x2e0] sm:$0xff]  ;;  %v8249_v19 = vld [vmem:[%s10640_s17 + $0x2e8] sm:$0xff] }
 0x2cb   : > { %9482 = vmatmul.mubr.msk.bf16.gmra.mxu0 %vm402_vm0, %v1590_v39  ;;  %9550 = vmatmul.mubr.msk.bf16.gmra.mxu1 %vm402_vm0, %v2543_v61  ;;  %v1471_v10 = vmul.f32 %v9763_v34, %v11844_v20  ;;  %v1472_v25 = vmul.f32 %v9764_v5, %v11844_v20  ;;  %v2430_v26 = vmul.f32 %v8240_v18, %v11844_v20  ;;  %v9765_v39 = vld [vmem:[%s10640_s17 + $0xb0] sm:$0xff]  ;;  %v9770_v18 = vld [vmem:[%s10640_s17 + $0xd8] sm:$0xff]  ;;  %v9772_v46 = vld [vmem:[%s10640_s17 + $0xe8] sm:$0xff] }
 0x2cc   : > { %9485 = vmatprep.mubr.msk.bf16.mxu0 %vm402_vm0, %v1591_v54  ;;  %9553 = vmatprep.mubr.msk.bf16.mxu1 %vm402_vm0, %v2544_v42  ;;  %v2431_v23 = vmul.f32 %v8241_v40, %v11844_v20  ;;  %v1539_v29 = vadd.f32 %v11860_v41, %v1469_v6  ;;  %v1540_v11 = vadd.f32 %v11860_v41, %v1470_v0 }
 0x2cd   : > { %v2492_v43 = vadd.f32 %v2428_v55, %v11860_v41  ;;  %v2493_v48 = vadd.f32 %v2429_v56, %v11860_v41  ;;  %v1541_v33 = vadd.f32 %v11860_v41, %v1471_v10  ;;  %v1542_v37 = vadd.f32 %v11860_v41, %v1472_v25 }
 0x2ce   : > { %v2494_v32 = vadd.f32 %v2430_v26, %v11860_v41  ;;  %v2495_v31 = vadd.f32 %v2431_v23, %v11860_v41  ;;  %v1594_v17 = vpack.c.bf16 %v1540_v11, %v1539_v29  ;;  %v1473_v61 = vmul.f32 %v9765_v39, %v11844_v20  ;;  %v9775_v39 = vld [vmem:[%s10640_s17 + $0x100] sm:$0xff] }
 0x2cf   : > { %v2547_v47 = vpack.c.bf16 %v2493_v48, %v2492_v43  ;;  %v1595_v36 = vpack.c.bf16 %v1542_v37, %v1541_v33  ;;  %v1474_v50 = vmul.f32 %v9766_v13, %v11844_v20  ;;  %v2432_v54 = vmul.f32 %v8242_v63, %v11844_v20  ;;  %v8250_v43 = vld [vmem:[%s10640_s17 + $0x2f0] sm:$0xff]  ;;  %v8251_v48 = vld [vmem:[%s10640_s17 + $0x2f8] sm:$0xff]  ;;  %v9776_v13 = vld [vmem:[%s10640_s17 + $0x108] sm:$0xff] }
 0x2d0   : > { %v2548_v21 = vpack.c.bf16 %v2495_v31, %v2494_v32  ;;  %v2433_v42 = vmul.f32 %v8243_v1, %v11844_v20  ;;  %v1475_v38 = vmul.f32 %v9767_v24, %v11844_v20  ;;  %v1476_v27 = vmul.f32 %v9768_v2, %v11844_v20  ;;  %v8252_v32 = vld [vmem:[%s10640_s17 + $0x300] sm:$0xff]  ;;  %v8253_v31 = vld [vmem:[%s10640_s17 + $0x308] sm:$0xff] }
 0x2d1   : > { %v2434_v22 = vmul.f32 %v8244_v58, %v11844_v20  ;;  %v2435_v49 = vmul.f32 %v8245_v59, %v11844_v20  ;;  %v1543_v15 = vadd.f32 %v11860_v41, %v1473_v61  ;;  %v1544_v16 = vadd.f32 %v11860_v41, %v1474_v50  ;;  %v9774_v58 = vld [vmem:[%s10640_s17 + $0xf8] sm:$0xff] }
 0x2d2   : > { %v2496_v12 = vadd.f32 %v2432_v54, %v11860_v41  ;;  %v2497_v60 = vadd.f32 %v2433_v42, %v11860_v41  ;;  %v1545_v57 = vadd.f32 %v11860_v41, %v1475_v38  ;;  %v1546_v62 = vadd.f32 %v11860_v41, %v1476_v27 }
 0x2d3   : > { %9486 = vmatmul.mubr.msk.bf16.gmra.mxu0 %vm402_vm0, %v1592_v35  ;;  %9554 = vmatmul.mubr.msk.bf16.gmra.mxu1 %vm402_vm0, %v2545_v8  ;;  %v2498_v53 = vadd.f32 %v2434_v22, %v11860_v41  ;;  %v2499_v3 = vadd.f32 %v2435_v49, %v11860_v41  ;;  %v1596_v52 = vpack.c.bf16 %v1544_v16, %v1543_v15  ;;  %v9769_v35 = vld [vmem:[%s10640_s17 + $0xd0] sm:$0xff] }
 0x2d4   : > { %9489 = vmatprep.mubr.msk.bf16.mxu0 %vm402_vm0, %v1593_v14  ;;  %9557 = vmatprep.mubr.msk.bf16.mxu1 %vm402_vm0, %v2546_v45  ;;  %v2549_v28 = vpack.c.bf16 %v2497_v60, %v2496_v12  ;;  %v1597_v7 = vpack.c.bf16 %v1546_v62, %v1545_v57  ;;  %v1477_v8 = vmul.f32 %v9769_v35, %v11844_v20  ;;  %v8254_v12 = vld [vmem:[%s10640_s17 + $0x310] sm:$0xff]  ;;  %v8255_v60 = vld [vmem:[%s10640_s17 + $0x318] sm:$0xff]  ;;  %v9779_v35 = vld [vmem:[%s10640_s17 + $0x120] sm:$0xff] }
 0x2d5   : > { %v2550_v4 = vpack.c.bf16 %v2499_v3, %v2498_v53  ;;  %v1478_v40 = vmul.f32 %v9770_v18, %v11844_v20  ;;  %v2436_v14 = vmul.f32 %v8246_v44, %v11844_v20  ;;  %v2437_v45 = vmul.f32 %v8247_v51, %v11844_v20  ;;  %v8256_v53 = vld [vmem:[%s10640_s17 + $0x320] sm:$0xff]  ;;  %v8257_v3 = vld [vmem:[%s10640_s17 + $0x328] sm:$0xff] }
 0x2d6   : > { %v1479_v6 = vmul.f32 %v9771_v9, %v11844_v20  ;;  %v1480_v0 = vmul.f32 %v9772_v46, %v11844_v20  ;;  %v2438_v55 = vmul.f32 %v8248_v30, %v11844_v20  ;;  %v2439_v56 = vmul.f32 %v8249_v19, %v11844_v20  ;;  %v9778_v30 = vld [vmem:[%s10640_s17 + $0x118] sm:$0xff]  ;;  %v9780_v18 = vld [vmem:[%s10640_s17 + $0x128] sm:$0xff] }
 0x2d7   : > { %v1547_v34 = vadd.f32 %v11860_v41, %v1477_v8  ;;  %v1548_v10 = vadd.f32 %v11860_v41, %v1478_v40  ;;  %v2500_v5 = vadd.f32 %v2436_v14, %v11860_v41  ;;  %v2501_v25 = vadd.f32 %v2437_v45, %v11860_v41 }
 0x2d8   : > { %v1549_v26 = vadd.f32 %v11860_v41, %v1479_v6  ;;  %v1550_v23 = vadd.f32 %v11860_v41, %v1480_v0  ;;  %v2502_v29 = vadd.f32 %v2438_v55, %v11860_v41  ;;  %v2503_v11 = vadd.f32 %v2439_v56, %v11860_v41 }
 0x2d9   : > { %v1598_v33 = vpack.c.bf16 %v1548_v10, %v1547_v34  ;;  %v2551_v37 = vpack.c.bf16 %v2501_v25, %v2500_v5  ;;  %v1482_v59 = vmul.f32 %v9774_v58, %v11844_v20  ;;  %v1483_v61 = vmul.f32 %v9775_v39, %v11844_v20  ;;  %v8258_v5 = vld [vmem:[%s10640_s17 + $0x330] sm:$0xff]  ;;  %v8259_v25 = vld [vmem:[%s10640_s17 + $0x338] sm:$0xff]  ;;  %v9784_v58 = vld [vmem:[%s10640_s17 + $0x148] sm:$0xff] }
 0x2da   : > { %v1599_v63 = vpack.c.bf16 %v1550_v23, %v1549_v26  ;;  %v2552_v1 = vpack.c.bf16 %v2503_v11, %v2502_v29  ;;  %v1484_v50 = vmul.f32 %v9776_v13, %v11844_v20  ;;  %v2442_v54 = vmul.f32 %v8252_v32, %v11844_v20  ;;  %v8260_v29 = vld [vmem:[%s10640_s17 + $0x340] sm:$0xff]  ;;  %v8261_v11 = vld [vmem:[%s10640_s17 + $0x348] sm:$0xff]  ;;  %v9782_v32 = vld [vmem:[%s10640_s17 + $0x138] sm:$0xff] }
 0x2db   : > { %9490 = vmatmul.mubr.msk.bf16.gmra.mxu0 %vm402_vm0, %v1594_v17  ;;  %9558 = vmatmul.mubr.msk.bf16.gmra.mxu1 %vm402_vm0, %v2547_v47  ;;  %v9773_v17 = vld [vmem:[%s10640_s17 + $0xf0] sm:$0xff]  ;;  %v2443_v42 = vmul.f32 %v8253_v31, %v11844_v20  ;;  %v1552_v38 = vadd.f32 %v11860_v41, %v1482_v59  ;;  %v1553_v22 = vadd.f32 %v11860_v41, %v1483_v61 }
 0x2dc   : > { %9493 = vmatprep.mubr.msk.bf16.mxu0 %vm402_vm0, %v1595_v36  ;;  %9561 = vmatprep.mubr.msk.bf16.mxu1 %vm402_vm0, %v2548_v21  ;;  %v1481_v47 = vmul.f32 %v9773_v17, %v11844_v20  ;;  %v2440_v36 = vmul.f32 %v8250_v43, %v11844_v20  ;;  %v2441_v21 = vmul.f32 %v8251_v48, %v11844_v20  ;;  %v9783_v17 = vld [vmem:[%s10640_s17 + $0x140] sm:$0xff] }
 0x2dd   : > { %v1554_v49 = vadd.f32 %v11860_v41, %v1484_v50  ;;  %v2506_v15 = vadd.f32 %v2442_v54, %v11860_v41  ;;  %v2507_v16 = vadd.f32 %v2443_v42, %v11860_v41  ;;  %v1486_v19 = vmul.f32 %v9778_v30, %v11844_v20  ;;  %v9788_v30 = vld [vmem:[%s10640_s17 + $0x168] sm:$0xff] }
 0x2de   : > { %v1551_v24 = vadd.f32 %v11860_v41, %v1481_v47  ;;  %v2504_v2 = vadd.f32 %v2440_v36, %v11860_v41  ;;  %v2505_v27 = vadd.f32 %v2441_v21, %v11860_v41  ;;  %v1487_v8 = vmul.f32 %v9779_v35, %v11844_v20 }
 0x2df   : > { %v1601_v44 = vpack.c.bf16 %v1554_v49, %v1553_v22  ;;  %v2554_v51 = vpack.c.bf16 %v2507_v16, %v2506_v15  ;;  %v1488_v40 = vmul.f32 %v9780_v18, %v11844_v20  ;;  %v2446_v14 = vmul.f32 %v8256_v53, %v11844_v20  ;;  %v8264_v15 = vld [vmem:[%s10640_s17 + $0x360] sm:$0xff]  ;;  %v8265_v16 = vld [vmem:[%s10640_s17 + $0x368] sm:$0xff]  ;;  %v9786_v53 = vld [vmem:[%s10640_s17 + $0x158] sm:$0xff] }
 0x2e0   : > { %v1600_v57 = vpack.c.bf16 %v1552_v38, %v1551_v24  ;;  %v2553_v62 = vpack.c.bf16 %v2505_v27, %v2504_v2  ;;  %v2447_v45 = vmul.f32 %v8257_v3, %v11844_v20  ;;  %v1556_v6 = vadd.f32 %v11860_v41, %v1486_v19  ;;  %v8262_v2 = vld [vmem:[%s10640_s17 + $0x350] sm:$0xff]  ;;  %v8263_v27 = vld [vmem:[%s10640_s17 + $0x358] sm:$0xff] }
 0x2e1   : > { %v1557_v55 = vadd.f32 %v11860_v41, %v1487_v8  ;;  %v1558_v56 = vadd.f32 %v11860_v41, %v1488_v40  ;;  %v2510_v34 = vadd.f32 %v2446_v14, %v11860_v41  ;;  %v1490_v31 = vmul.f32 %v9782_v32, %v11844_v20  ;;  %v9792_v32 = vld [vmem:[%s10640_s17 + $0x188] sm:$0xff] }
 0x2e2   : > { %v2511_v10 = vadd.f32 %v2447_v45, %v11860_v41  ;;  %v1491_v47 = vmul.f32 %v9783_v17, %v11844_v20  ;;  %v1492_v59 = vmul.f32 %v9784_v58, %v11844_v20  ;;  %v2450_v36 = vmul.f32 %v8260_v29, %v11844_v20  ;;  %v9790_v29 = vld [vmem:[%s10640_s17 + $0x178] sm:$0xff] }
 0x2e3   : > { %9494 = vmatmul.mubr.msk.bf16.gmra.mxu0 %vm402_vm0, %v1596_v52  ;;  %9562 = vmatmul.mubr.msk.bf16.gmra.mxu1 %vm402_vm0, %v2549_v28  ;;  %v9777_v52 = vld [vmem:[%s10640_s17 + $0x110] sm:$0xff]  ;;  %v1603_v43 = vpack.c.bf16 %v1558_v56, %v1557_v55  ;;  %v2451_v21 = vmul.f32 %v8261_v11, %v11844_v20  ;;  %v1560_v61 = vadd.f32 %v11860_v41, %v1490_v31 }
 0x2e4   : > { %9497 = vmatprep.mubr.msk.bf16.mxu0 %vm402_vm0, %v1597_v7  ;;  %9565 = vmatprep.mubr.msk.bf16.mxu1 %vm402_vm0, %v2550_v4  ;;  %v1485_v28 = vmul.f32 %v9777_v52, %v11844_v20  ;;  %v2444_v7 = vmul.f32 %v8254_v12, %v11844_v20  ;;  %v2445_v4 = vmul.f32 %v8255_v60, %v11844_v20  ;;  %v9787_v52 = vld [vmem:[%s10640_s17 + $0x160] sm:$0xff] }
 0x2e5   : > { %v2556_v48 = vpack.c.bf16 %v2511_v10, %v2510_v34  ;;  %v1561_v54 = vadd.f32 %v11860_v41, %v1491_v47  ;;  %v1562_v42 = vadd.f32 %v11860_v41, %v1492_v59  ;;  %v2514_v24 = vadd.f32 %v2450_v36, %v11860_v41  ;;  %v8268_v34 = vld [vmem:[%s10640_s17 + $0x380] sm:$0xff]  ;;  %v8269_v10 = vld [vmem:[%s10640_s17 + $0x388] sm:$0xff] }
 0x2e6   : > { %v1555_v9 = vadd.f32 %v11860_v41, %v1485_v28  ;;  %v2508_v46 = vadd.f32 %v2444_v7, %v11860_v41  ;;  %v2509_v0 = vadd.f32 %v2445_v4, %v11860_v41  ;;  %v2515_v38 = vadd.f32 %v2451_v21, %v11860_v41 }
 0x2e7   : > { %v1605_v12 = vpack.c.bf16 %v1562_v42, %v1561_v54  ;;  %v1494_v3 = vmul.f32 %v9786_v53, %v11844_v20  ;;  %v1495_v28 = vmul.f32 %v9787_v52, %v11844_v20  ;;  %v1496_v19 = vmul.f32 %v9788_v30, %v11844_v20  ;;  %v9796_v53 = vld [vmem:[%s10640_s17 + $0x1a8] sm:$0xff] }
 0x2e8   : > { %v1602_v26 = vpack.c.bf16 %v1556_v6, %v1555_v9  ;;  %v2555_v23 = vpack.c.bf16 %v2509_v0, %v2508_v46  ;;  %v2558_v60 = vpack.c.bf16 %v2515_v38, %v2514_v24  ;;  %v2454_v7 = vmul.f32 %v8264_v15, %v11844_v20  ;;  %v8266_v46 = vld [vmem:[%s10640_s17 + $0x370] sm:$0xff]  ;;  %v8267_v0 = vld [vmem:[%s10640_s17 + $0x378] sm:$0xff]  ;;  %v8272_v24 = vld [vmem:[%s10640_s17 + $0x3a0] sm:$0xff] }
 0x2e9   : > { %v2455_v4 = vmul.f32 %v8265_v16, %v11844_v20  ;;  %v1564_v8 = vadd.f32 %v11860_v41, %v1494_v3  ;;  %v1565_v14 = vadd.f32 %v11860_v41, %v1495_v28  ;;  %v1566_v45 = vadd.f32 %v11860_v41, %v1496_v19  ;;  %v8273_v38 = vld [vmem:[%s10640_s17 + $0x3a8] sm:$0xff]  ;;  %v9794_v15 = vld [vmem:[%s10640_s17 + $0x198] sm:$0xff] }
 0x2ea   : > { %v2518_v9 = vadd.f32 %v2454_v7, %v11860_v41  ;;  %v1498_v11 = vmul.f32 %v9790_v29, %v11844_v20  ;;  %v1500_v31 = vmul.f32 %v9792_v32, %v11844_v20  ;;  %v1502_v16 = vmul.f32 %v9794_v15, %v11844_v20  ;;  %v9800_v29 = vld [vmem:[%s10640_s17 + $0x1c8] sm:$0xff] }
 0x2eb   : > { %9498 = vmatmul.mubr.msk.bf16.gmra.mxu0 %vm402_vm0, %v1598_v33  ;;  %9566 = vmatmul.mubr.msk.bf16.gmra.mxu1 %vm402_vm0, %v2551_v37  ;;  %v9781_v33 = vld [vmem:[%s10640_s17 + $0x130] sm:$0xff]  ;;  %v2519_v6 = vadd.f32 %v2455_v4, %v11860_v41  ;;  %v1504_v3 = vmul.f32 %v9796_v53, %v11844_v20  ;;  %v9804_v15 = vld [vmem:[%s10640_s17 + $0x1e8] sm:$0xff] }
 0x2ec   : > { %9501 = vmatprep.mubr.msk.bf16.mxu0 %vm402_vm0, %v1599_v63  ;;  %9569 = vmatprep.mubr.msk.bf16.mxu1 %vm402_vm0, %v2552_v1  ;;  %v1489_v37 = vmul.f32 %v9781_v33, %v11844_v20  ;;  %v2448_v63 = vmul.f32 %v8258_v5, %v11844_v20  ;;  %v2449_v1 = vmul.f32 %v8259_v25, %v11844_v20  ;;  %v9791_v33 = vld [vmem:[%s10640_s17 + $0x180] sm:$0xff] }
 0x2ed   : > { %v1607_v5 = vpack.c.bf16 %v1566_v45, %v1565_v14  ;;  %v2560_v25 = vpack.c.bf16 %v2519_v6, %v2518_v9  ;;  %v1568_v47 = vadd.f32 %v11860_v41, %v1498_v11  ;;  %v1570_v21 = vadd.f32 %v11860_v41, %v1500_v31  ;;  %v8276_v9 = vld [vmem:[%s10640_s17 + $0x3c0] sm:$0xff]  ;;  %v8277_v6 = vld [vmem:[%s10640_s17 + $0x3c8] sm:$0xff] }
 0x2ee   : > { %v1559_v39 = vadd.f32 %v11860_v41, %v1489_v37  ;;  %v2512_v13 = vadd.f32 %v2448_v63, %v11860_v41  ;;  %v2513_v50 = vadd.f32 %v2449_v1, %v11860_v41  ;;  %v1499_v37 = vmul.f32 %v9791_v33, %v11844_v20 }
 0x2ef   : > { %v2458_v63 = vmul.f32 %v8268_v34, %v11844_v20  ;;  %v2459_v1 = vmul.f32 %v8269_v10, %v11844_v20  ;;  %v1572_v28 = vadd.f32 %v11860_v41, %v1502_v16  ;;  %v1574_v4 = vadd.f32 %v11860_v41, %v1504_v3  ;;  %v9798_v34 = vld [vmem:[%s10640_s17 + $0x1b8] sm:$0xff] }
 0x2f0   : > { %v1604_v22 = vpack.c.bf16 %v1560_v61, %v1559_v39  ;;  %v2557_v49 = vpack.c.bf16 %v2513_v50, %v2512_v13  ;;  %v1569_v36 = vadd.f32 %v11860_v41, %v1499_v37  ;;  %v8270_v13 = vld [vmem:[%s10640_s17 + $0x390] sm:$0xff]  ;;  %v8271_v50 = vld [vmem:[%s10640_s17 + $0x398] sm:$0xff]  ;;  %v1506_v10 = vmul.f32 %v9798_v34, %v11844_v20 }
 0x2f1   : > { %v2522_v39 = vadd.f32 %v2458_v63, %v11860_v41  ;;  %v2523_v61 = vadd.f32 %v2459_v1, %v11860_v41  ;;  %v1508_v11 = vmul.f32 %v9800_v29, %v11844_v20  ;;  %v1512_v16 = vmul.f32 %v9804_v15, %v11844_v20 }
 0x2f2   : > { %v1576_v37 = vadd.f32 %v11860_v41, %v1506_v10 }
 0x2f3   : > { %9502 = vmatmul.mubr.msk.bf16.gmra.mxu0 %vm402_vm0, %v1600_v57  ;;  %9570 = vmatmul.mubr.msk.bf16.gmra.mxu1 %vm402_vm0, %v2553_v62  ;;  %v9785_v57 = vld [vmem:[%s10640_s17 + $0x150] sm:$0xff]  ;;  %v1578_v1 = vadd.f32 %v11860_v41, %v1508_v11 }
 0x2f4   : > { %9505 = vmatprep.mubr.msk.bf16.mxu0 %vm402_vm0, %v1601_v44  ;;  %9573 = vmatprep.mubr.msk.bf16.mxu1 %vm402_vm0, %v2554_v51  ;;  %v1493_v62 = vmul.f32 %v9785_v57, %v11844_v20  ;;  %v2452_v44 = vmul.f32 %v8262_v2, %v11844_v20  ;;  %v2453_v51 = vmul.f32 %v8263_v27, %v11844_v20  ;;  %v9795_v57 = vld [vmem:[%s10640_s17 + $0x1a0] sm:$0xff] }
 0x2f5   : > { %v1609_v2 = vpack.c.bf16 %v1570_v21, %v1569_v36  ;;  %v2562_v27 = vpack.c.bf16 %v2523_v61, %v2522_v39  ;;  %v8280_v39 = vld [vmem:[%s10640_s17 + $0x3e0] sm:$0xff]  ;;  %v8281_v61 = vld [vmem:[%s10640_s17 + $0x3e8] sm:$0xff] }
 0x2f6   : > { %v1563_v35 = vadd.f32 %v11860_v41, %v1493_v62  ;;  %v2516_v18 = vadd.f32 %v2452_v44, %v11860_v41  ;;  %v2517_v40 = vadd.f32 %v2453_v51, %v11860_v41  ;;  %v1503_v62 = vmul.f32 %v9795_v57, %v11844_v20 }
 0x2f7   : > { %v2462_v44 = vmul.f32 %v8272_v24, %v11844_v20  ;;  %v2463_v51 = vmul.f32 %v8273_v38, %v11844_v20  ;;  %v9802_v24 = vld [vmem:[%s10640_s17 + $0x1d8] sm:$0xff] }
 0x2f8   : > { %v1606_v55 = vpack.c.bf16 %v1564_v8, %v1563_v35  ;;  %v2559_v56 = vpack.c.bf16 %v2517_v40, %v2516_v18  ;;  %v1573_v7 = vadd.f32 %v11860_v41, %v1503_v62  ;;  %v8274_v18 = vld [vmem:[%s10640_s17 + $0x3b0] sm:$0xff]  ;;  %v8275_v40 = vld [vmem:[%s10640_s17 + $0x3b8] sm:$0xff]  ;;  %v1510_v38 = vmul.f32 %v9802_v24, %v11844_v20 }
 0x2f9   : > { %v2526_v35 = vadd.f32 %v2462_v44, %v11860_v41  ;;  %v2527_v8 = vadd.f32 %v2463_v51, %v11860_v41  ;;  %v1582_v51 = vadd.f32 %v11860_v41, %v1512_v16 }
 0x2fa   : > { %v1580_v62 = vadd.f32 %v11860_v41, %v1510_v38 }
 0x2fb   : > { %9506 = vmatmul.mubr.msk.bf16.gmra.mxu0 %vm402_vm0, %v1602_v26  ;;  %9574 = vmatmul.mubr.msk.bf16.gmra.mxu1 %vm402_vm0, %v2555_v23  ;;  %v9789_v26 = vld [vmem:[%s10640_s17 + $0x170] sm:$0xff] }
 0x2fc   : > { %9509 = vmatprep.mubr.msk.bf16.mxu0 %vm402_vm0, %v1603_v43  ;;  %9577 = vmatprep.mubr.msk.bf16.mxu1 %vm402_vm0, %v2556_v48  ;;  %v1497_v23 = vmul.f32 %v9789_v26, %v11844_v20  ;;  %v2456_v43 = vmul.f32 %v8266_v46, %v11844_v20  ;;  %v2457_v48 = vmul.f32 %v8267_v0, %v11844_v20  ;;  %v9799_v26 = vld [vmem:[%s10640_s17 + $0x1c0] sm:$0xff] }
 0x2fd   : > { %v1611_v46 = vpack.c.bf16 %v1574_v4, %v1573_v7  ;;  %v2564_v0 = vpack.c.bf16 %v2527_v8, %v2526_v35 }
 0x2fe   : > { %v1567_v17 = vadd.f32 %v11860_v41, %v1497_v23  ;;  %v2520_v58 = vadd.f32 %v2456_v43, %v11860_v41  ;;  %v2521_v59 = vadd.f32 %v2457_v48, %v11860_v41  ;;  %v1507_v23 = vmul.f32 %v9799_v26, %v11844_v20 }
 0x2ff   : > { %v2466_v43 = vmul.f32 %v8276_v9, %v11844_v20  ;;  %v2467_v48 = vmul.f32 %v8277_v6, %v11844_v20 }
 0x300   : > { %v1608_v54 = vpack.c.bf16 %v1568_v47, %v1567_v17  ;;  %v2561_v42 = vpack.c.bf16 %v2521_v59, %v2520_v58  ;;  %v1577_v63 = vadd.f32 %v11860_v41, %v1507_v23  ;;  %v8278_v58 = vld [vmem:[%s10640_s17 + $0x3d0] sm:$0xff]  ;;  %v8279_v59 = vld [vmem:[%s10640_s17 + $0x3d8] sm:$0xff] }
 0x301   : > { %v2530_v17 = vadd.f32 %v2466_v43, %v11860_v41  ;;  %v2531_v47 = vadd.f32 %v2467_v48, %v11860_v41 }
 0x303   : > { %9510 = vmatmul.mubr.msk.bf16.gmra.mxu0 %vm402_vm0, %v1604_v22  ;;  %9578 = vmatmul.mubr.msk.bf16.gmra.mxu1 %vm402_vm0, %v2557_v49  ;;  %v9793_v22 = vld [vmem:[%s10640_s17 + $0x190] sm:$0xff] }
 0x304   : > { %9513 = vmatprep.mubr.msk.bf16.mxu0 %vm402_vm0, %v1605_v12  ;;  %9581 = vmatprep.mubr.msk.bf16.mxu1 %vm402_vm0, %v2558_v60  ;;  %v1501_v49 = vmul.f32 %v9793_v22, %v11844_v20  ;;  %v2460_v12 = vmul.f32 %v8270_v13, %v11844_v20  ;;  %v2461_v60 = vmul.f32 %v8271_v50, %v11844_v20  ;;  %v9803_v22 = vld [vmem:[%s10640_s17 + $0x1e0] sm:$0xff] }
 0x305   : > { %v1613_v13 = vpack.c.bf16 %v1578_v1, %v1577_v63  ;;  %v2566_v50 = vpack.c.bf16 %v2531_v47, %v2530_v17 }
 0x306   : > { %v1571_v52 = vadd.f32 %v11860_v41, %v1501_v49  ;;  %v2524_v30 = vadd.f32 %v2460_v12, %v11860_v41  ;;  %v2525_v19 = vadd.f32 %v2461_v60, %v11860_v41  ;;  %v1511_v49 = vmul.f32 %v9803_v22, %v11844_v20 }
 0x307   : > { %v2470_v12 = vmul.f32 %v8280_v39, %v11844_v20  ;;  %v2471_v60 = vmul.f32 %v8281_v61, %v11844_v20 }
 0x308   : > { %v1610_v14 = vpack.c.bf16 %v1572_v28, %v1571_v52  ;;  %v2563_v45 = vpack.c.bf16 %v2525_v19, %v2524_v30  ;;  %v1581_v44 = vadd.f32 %v11860_v41, %v1511_v49  ;;  %v8282_v30 = vld [vmem:[%s10640_s17 + $0x3f0] sm:$0xff]  ;;  %v8283_v19 = vld [vmem:[%s10640_s17 + $0x3f8] sm:$0xff] }
 0x309   : > { %v2534_v52 = vadd.f32 %v2470_v12, %v11860_v41  ;;  %v2535_v28 = vadd.f32 %v2471_v60, %v11860_v41  ;;  %v2472_v9 = vmul.f32 %v8282_v30, %v11844_v20  ;;  %v2473_v6 = vmul.f32 %v8283_v19, %v11844_v20 }
 0x30a   : > { %v1615_v35 = vpack.c.bf16 %v1582_v51, %v1581_v44 }
 0x30b   : > { %9514 = vmatmul.mubr.msk.bf16.gmra.mxu0 %vm402_vm0, %v1606_v55  ;;  %9582 = vmatmul.mubr.msk.bf16.gmra.mxu1 %vm402_vm0, %v2559_v56  ;;  %v9797_v55 = vld [vmem:[%s10640_s17 + $0x1b0] sm:$0xff]  ;;  %v2568_v8 = vpack.c.bf16 %v2535_v28, %v2534_v52 }
 0x30c   : > { %9517 = vmatprep.mubr.msk.bf16.mxu0 %vm402_vm0, %v1607_v5  ;;  %9585 = vmatprep.mubr.msk.bf16.mxu1 %vm402_vm0, %v2560_v25  ;;  %v1505_v56 = vmul.f32 %v9797_v55, %v11844_v20  ;;  %v2464_v5 = vmul.f32 %v8274_v18, %v11844_v20  ;;  %v2465_v25 = vmul.f32 %v8275_v40, %v11844_v20  ;;  %v9805_v18 = vld [vmem:[%s10640_s17 + $0x1f0] sm:$0xff] }
 0x30d   : > { %v1513_v40 = vmul.f32 %v9805_v18, %v11844_v20  ;;  %v2536_v55 = vadd.f32 %v2472_v9, %v11860_v41 }
 0x30e   : > { %v1575_v33 = vadd.f32 %v11860_v41, %v1505_v56  ;;  %v2528_v32 = vadd.f32 %v2464_v5, %v11860_v41  ;;  %v2529_v31 = vadd.f32 %v2465_v25, %v11860_v41  ;;  %v2537_v56 = vadd.f32 %v2473_v6, %v11860_v41 }
 0x310   : > { %v1612_v36 = vpack.c.bf16 %v1576_v37, %v1575_v33  ;;  %v2565_v21 = vpack.c.bf16 %v2529_v31, %v2528_v32  ;;  %v2569_v10 = vpack.c.bf16 %v2537_v56, %v2536_v55 }
 0x313   : > { %9518 = vmatmul.mubr.msk.bf16.gmra.mxu0 %vm402_vm0, %v1608_v54  ;;  %9586 = vmatmul.mubr.msk.bf16.gmra.mxu1 %vm402_vm0, %v2561_v42  ;;  %v9801_v54 = vld [vmem:[%s10640_s17 + $0x1d0] sm:$0xff] }
 0x314   : > { %9521 = vmatprep.mubr.msk.bf16.mxu0 %vm402_vm0, %v1609_v2  ;;  %9589 = vmatprep.mubr.msk.bf16.mxu1 %vm402_vm0, %v2562_v27  ;;  %v1509_v42 = vmul.f32 %v9801_v54, %v11844_v20  ;;  %v2468_v2 = vmul.f32 %v8278_v58, %v11844_v20  ;;  %v2469_v27 = vmul.f32 %v8279_v59, %v11844_v20 }
 0x316   : > { %v1579_v57 = vadd.f32 %v11860_v41, %v1509_v42  ;;  %v2532_v53 = vadd.f32 %v2468_v2, %v11860_v41  ;;  %v2533_v3 = vadd.f32 %v2469_v27, %v11860_v41 }
 0x318   : > { %v1614_v7 = vpack.c.bf16 %v1580_v62, %v1579_v57  ;;  %v2567_v4 = vpack.c.bf16 %v2533_v3, %v2532_v53 }
 0x31b   : > { %9522 = vmatmul.mubr.msk.bf16.gmra.mxu0 %vm402_vm0, %v1610_v14  ;;  %9590 = vmatmul.mubr.msk.bf16.gmra.mxu1 %vm402_vm0, %v2563_v45  ;;  %v9806_v14 = vld [vmem:[%s10640_s17 + $0x1f8] sm:$0xff] }
 0x31c   : > { %9525 = vmatprep.mubr.msk.bf16.mxu0 %vm402_vm0, %v1611_v46  ;;  %9593 = vmatprep.mubr.msk.bf16.mxu1 %vm402_vm0, %v2564_v0  ;;  %v1514_v45 = vmul.f32 %v9806_v14, %v11844_v20  ;;  %v1583_v46 = vadd.f32 %v11860_v41, %v1513_v40  ;;  %v12299_v20 = vld [vmem:[%s16990_s5] ss:$0 sm:$0xff] }
 0x31e   : > { %v1584_v0 = vadd.f32 %v11860_v41, %v1514_v45 }
 0x320   : > { %v1616_v34 = vpack.c.bf16 %v1584_v0, %v1583_v46 }
 0x323   : > { %9526 = vmatmul.mubr.msk.bf16.gmra.mxu0 %vm402_vm0, %v1612_v36  ;;  %9594 = vmatmul.mubr.msk.bf16.gmra.mxu1 %vm402_vm0, %v2565_v21 }
 0x324   : > { %9529 = vmatprep.mubr.msk.bf16.mxu0 %vm402_vm0, %v1613_v13  ;;  %9597 = vmatprep.mubr.msk.bf16.mxu1 %vm402_vm0, %v2566_v50 }
 0x32b   : > { %9530 = vmatmul.mubr.msk.bf16.gmra.mxu0 %vm402_vm0, %v1614_v7  ;;  %9598 = vmatmul.mubr.msk.bf16.gmra.mxu1 %vm402_vm0, %v2567_v4 }
 0x32c   : > { %9533 = vmatprep.mubr.msk.bf16.mxu0 %vm402_vm0, %v1615_v35  ;;  %9601 = vmatprep.mubr.msk.bf16.mxu1 %vm402_vm0, %v2568_v8 }
 0x333   : > { %9534 = vmatmul.mubr.msk.bf16.gmra.mxu0 %vm402_vm0, %v1616_v34  ;;  %9602 = vmatmul.mubr.msk.bf16.gmra.mxu1 %vm402_vm0, %v2569_v10 }
 0x37b   : > { %v9475_v5 = vpop.f32.mrf.mxu0  ;;  %v9543_v25 = vpop.f32.mrf.mxu1 }
 0x37c   : > { %v1779_v26 = vadd.f32 %v9475_v5, %v12299_v20  ;;  %v2732_v23 = vadd.f32 %v9543_v25, %v12299_v20 }
 0x37d   : > { %v1770_v29 = vpop.f32.mrf.mxu0  ;;  %v2723_v41 = vpop.f32.mrf.mxu1 }
 0x37e   : > { %v8553_v11 = vpack.c.bf16 %v1779_v26, %v1779_v26  ;;  %v8617_v43 = vpack.c.bf16 %v2732_v23, %v2732_v23  ;;  %v1771_v48 = vadd.f32 %v12299_v20, %v1770_v29  ;;  %v2724_v33 = vadd.f32 %v12299_v20, %v2723_v41 }
 0x37f   : > { %v9476_v37 = vpop.f32.mrf.mxu0  ;;  %v9544_v32 = vpop.f32.mrf.mxu1 }
 0x380   : > { %2284 = vst.msk [vmem:[#allocation2 + $0x8] sm:$0xf] %vm2281_vm2, %v8553_v11  ;;  %3237 = vst.msk [vmem:[#allocation2 + $0x108] sm:$0xf] %vm2281_vm2, %v8617_v43  ;;  %v8551_v31 = vpack.c.bf16 %v1771_v48, %v1771_v48  ;;  %v8615_v63 = vpack.c.bf16 %v2724_v33, %v2724_v33  ;;  %v1782_v1 = vadd.f32 %v9476_v37, %v12299_v20 }
 0x381   : > { %v2735_v17 = vadd.f32 %v9544_v32, %v12299_v20  ;;  %v1773_v47 = vpop.f32.mrf.mxu0  ;;  %v2726_v58 = vpop.f32.mrf.mxu1 }
 0x382   : > { %2282 = vst.msk [vmem:[#allocation2] sm:$0xf] %vm2281_vm2, %v8551_v31  ;;  %3235 = vst.msk [vmem:[#allocation2 + $0x100] sm:$0xf] %vm2281_vm2, %v8615_v63  ;;  %v8554_v59 = vpack.c.bf16 %v1782_v1, %v1782_v1  ;;  %v1774_v21 = vadd.f32 %v12299_v20, %v1773_v47  ;;  %v2727_v39 = vadd.f32 %v12299_v20, %v2726_v58 }
 0x383   : > { %v8618_v36 = vpack.c.bf16 %v2735_v17, %v2735_v17  ;;  %v9479_v61 = vpop.f32.mrf.mxu0  ;;  %v9547_v13 = vpop.f32.mrf.mxu1 }
 0x384   : > { %2285 = vst.msk [vmem:[#allocation2 + $0xc] sm:$0xf] %vm2281_vm2, %v8554_v59  ;;  %v8552_v50 = vpack.c.bf16 %v1774_v21, %v1774_v21  ;;  %v8616_v54 = vpack.c.bf16 %v2727_v39, %v2727_v39  ;;  %v1795_v42 = vadd.f32 %v9479_v61, %v12299_v20  ;;  %v2748_v24 = vadd.f32 %v9547_v13, %v12299_v20 }
 0x385   : > { %3238 = vst.msk [vmem:[#allocation2 + $0x10c] sm:$0xf] %vm2281_vm2, %v8618_v36  ;;  %v1786_v38 = vpop.f32.mrf.mxu0  ;;  %v2739_v2 = vpop.f32.mrf.mxu1 }
 0x386   : > { %2283 = vst.msk [vmem:[#allocation2 + $0x4] sm:$0xf] %vm2281_vm2, %v8552_v50  ;;  %3236 = vst.msk [vmem:[#allocation2 + $0x104] sm:$0xf] %vm2281_vm2, %v8616_v54  ;;  %v8557_v27 = vpack.c.bf16 %v1795_v42, %v1795_v42  ;;  %v8621_v22 = vpack.c.bf16 %v2748_v24, %v2748_v24  ;;  %v1787_v49 = vadd.f32 %v12299_v20, %v1786_v38 }
 0x387   : > { %v2740_v15 = vadd.f32 %v12299_v20, %v2739_v2  ;;  %v9480_v16 = vpop.f32.mrf.mxu0  ;;  %v9548_v12 = vpop.f32.mrf.mxu1 }
 0x388   : > { %2288 = vst.msk [vmem:[#allocation2 + $0x18] sm:$0xf] %vm2281_vm2, %v8557_v27  ;;  %3241 = vst.msk [vmem:[#allocation2 + $0x118] sm:$0xf] %vm2281_vm2, %v8621_v22  ;;  %v8555_v60 = vpack.c.bf16 %v1787_v49, %v1787_v49  ;;  %v1798_v62 = vadd.f32 %v9480_v16, %v12299_v20  ;;  %v2751_v53 = vadd.f32 %v9548_v12, %v12299_v20 }
 0x389   : > { %v8619_v57 = vpack.c.bf16 %v2740_v15, %v2740_v15  ;;  %v1789_v3 = vpop.f32.mrf.mxu0  ;;  %v2742_v44 = vpop.f32.mrf.mxu1 }
 0x38a   : > { %2286 = vst.msk [vmem:[#allocation2 + $0x10] sm:$0xf] %vm2281_vm2, %v8555_v60  ;;  %v8558_v51 = vpack.c.bf16 %v1798_v62, %v1798_v62  ;;  %v8622_v52 = vpack.c.bf16 %v2751_v53, %v2751_v53  ;;  %v1790_v28 = vadd.f32 %v12299_v20, %v1789_v3  ;;  %v2743_v30 = vadd.f32 %v12299_v20, %v2742_v44 }
 0x38b   : > { %3239 = vst.msk [vmem:[#allocation2 + $0x110] sm:$0xf] %vm2281_vm2, %v8619_v57  ;;  %v9483_v19 = vpop.f32.mrf.mxu0  ;;  %v9551_v7 = vpop.f32.mrf.mxu1 }
 0x38c   : > { %2289 = vst.msk [vmem:[#allocation2 + $0x1c] sm:$0xf] %vm2281_vm2, %v8558_v51  ;;  %3242 = vst.msk [vmem:[#allocation2 + $0x11c] sm:$0xf] %vm2281_vm2, %v8622_v52  ;;  %v8556_v4 = vpack.c.bf16 %v1790_v28, %v1790_v28  ;;  %v8620_v35 = vpack.c.bf16 %v2743_v30, %v2743_v30  ;;  %v1811_v8 = vadd.f32 %v9483_v19, %v12299_v20 }
 0x38d   : > { %v2764_v18 = vadd.f32 %v9551_v7, %v12299_v20  ;;  %v1802_v40 = vpop.f32.mrf.mxu0  ;;  %v2755_v14 = vpop.f32.mrf.mxu1 }
 0x38e   : > { %2287 = vst.msk [vmem:[#allocation2 + $0x14] sm:$0xf] %vm2281_vm2, %v8556_v4  ;;  %3240 = vst.msk [vmem:[#allocation2 + $0x114] sm:$0xf] %vm2281_vm2, %v8620_v35  ;;  %v8561_v45 = vpack.c.bf16 %v1811_v8, %v1811_v8  ;;  %v1803_v6 = vadd.f32 %v12299_v20, %v1802_v40  ;;  %v2756_v46 = vadd.f32 %v12299_v20, %v2755_v14 }
 0x38f   : > { %v8625_v9 = vpack.c.bf16 %v2764_v18, %v2764_v18  ;;  %v9484_v0 = vpop.f32.mrf.mxu0  ;;  %v9552_v55 = vpop.f32.mrf.mxu1 }
 0x390   : > { %2292 = vst.msk [vmem:[#allocation2 + $0x28] sm:$0xf] %vm2281_vm2, %v8561_v45  ;;  %v8559_v56 = vpack.c.bf16 %v1803_v6, %v1803_v6  ;;  %v8623_v34 = vpack.c.bf16 %v2756_v46, %v2756_v46  ;;  %v1814_v10 = vadd.f32 %v9484_v0, %v12299_v20  ;;  %v2767_v5 = vadd.f32 %v9552_v55, %v12299_v20 }
 0x391   : > { %3245 = vst.msk [vmem:[#allocation2 + $0x128] sm:$0xf] %vm2281_vm2, %v8625_v9  ;;  %v1805_v25 = vpop.f32.mrf.mxu0  ;;  %v2758_v26 = vpop.f32.mrf.mxu1 }
 0x392   : > { %2290 = vst.msk [vmem:[#allocation2 + $0x20] sm:$0xf] %vm2281_vm2, %v8559_v56  ;;  %3243 = vst.msk [vmem:[#allocation2 + $0x120] sm:$0xf] %vm2281_vm2, %v8623_v34  ;;  %v8562_v23 = vpack.c.bf16 %v1814_v10, %v1814_v10  ;;  %v8626_v29 = vpack.c.bf16 %v2767_v5, %v2767_v5  ;;  %v1806_v41 = vadd.f32 %v12299_v20, %v1805_v25 }
 0x393   : > { %v2759_v11 = vadd.f32 %v12299_v20, %v2758_v26  ;;  %v9487_v43 = vpop.f32.mrf.mxu0  ;;  %v9555_v48 = vpop.f32.mrf.mxu1 }
 0x394   : > { %2293 = vst.msk [vmem:[#allocation2 + $0x2c] sm:$0xf] %vm2281_vm2, %v8562_v23  ;;  %3246 = vst.msk [vmem:[#allocation2 + $0x12c] sm:$0xf] %vm2281_vm2, %v8626_v29  ;;  %v8560_v33 = vpack.c.bf16 %v1806_v41, %v1806_v41  ;;  %v1827_v32 = vadd.f32 %v9487_v43, %v12299_v20  ;;  %v2780_v31 = vadd.f32 %v9555_v48, %v12299_v20 }
 0x395   : > { %v8624_v37 = vpack.c.bf16 %v2759_v11, %v2759_v11  ;;  %v1818_v63 = vpop.f32.mrf.mxu0  ;;  %v2771_v1 = vpop.f32.mrf.mxu1 }
 0x396   : > { %2291 = vst.msk [vmem:[#allocation2 + $0x24] sm:$0xf] %vm2281_vm2, %v8560_v33  ;;  %v8565_v17 = vpack.c.bf16 %v1827_v32, %v1827_v32  ;;  %v8629_v47 = vpack.c.bf16 %v2780_v31, %v2780_v31  ;;  %v1819_v58 = vadd.f32 %v12299_v20, %v1818_v63  ;;  %v2772_v59 = vadd.f32 %v12299_v20, %v2771_v1 }
 0x397   : > { %3244 = vst.msk [vmem:[#allocation2 + $0x124] sm:$0xf] %vm2281_vm2, %v8624_v37  ;;  %v9488_v36 = vpop.f32.mrf.mxu0  ;;  %v9556_v21 = vpop.f32.mrf.mxu1 }
 0x398   : > { %2296 = vst.msk [vmem:[#allocation2 + $0x38] sm:$0xf] %vm2281_vm2, %v8565_v17  ;;  %3249 = vst.msk [vmem:[#allocation2 + $0x138] sm:$0xf] %vm2281_vm2, %v8629_v47  ;;  %v8563_v39 = vpack.c.bf16 %v1819_v58, %v1819_v58  ;;  %v8627_v61 = vpack.c.bf16 %v2772_v59, %v2772_v59  ;;  %v1830_v13 = vadd.f32 %v9488_v36, %v12299_v20 }
 0x399   : > { %v2783_v50 = vadd.f32 %v9556_v21, %v12299_v20  ;;  %v1821_v54 = vpop.f32.mrf.mxu0  ;;  %v2774_v42 = vpop.f32.mrf.mxu1 }
 0x39a   : > { %2294 = vst.msk [vmem:[#allocation2 + $0x30] sm:$0xf] %vm2281_vm2, %v8563_v39  ;;  %3247 = vst.msk [vmem:[#allocation2 + $0x130] sm:$0xf] %vm2281_vm2, %v8627_v61  ;;  %v8566_v24 = vpack.c.bf16 %v1830_v13, %v1830_v13  ;;  %v1822_v2 = vadd.f32 %v12299_v20, %v1821_v54  ;;  %v2775_v27 = vadd.f32 %v12299_v20, %v2774_v42 }
 0x39b   : > { %v8630_v38 = vpack.c.bf16 %v2783_v50, %v2783_v50  ;;  %v9491_v22 = vpop.f32.mrf.mxu0  ;;  %v9559_v49 = vpop.f32.mrf.mxu1 }
 0x39c   : > { %2297 = vst.msk [vmem:[#allocation2 + $0x3c] sm:$0xf] %vm2281_vm2, %v8566_v24  ;;  %v8564_v15 = vpack.c.bf16 %v1822_v2, %v1822_v2  ;;  %v8628_v16 = vpack.c.bf16 %v2775_v27, %v2775_v27  ;;  %v1843_v12 = vadd.f32 %v9491_v22, %v12299_v20  ;;  %v2796_v60 = vadd.f32 %v9559_v49, %v12299_v20 }
 0x39d   : > { %3250 = vst.msk [vmem:[#allocation2 + $0x13c] sm:$0xf] %vm2281_vm2, %v8630_v38  ;;  %v1834_v57 = vpop.f32.mrf.mxu0  ;;  %v2787_v62 = vpop.f32.mrf.mxu1 }
 0x39e   : > { %2295 = vst.msk [vmem:[#allocation2 + $0x34] sm:$0xf] %vm2281_vm2, %v8564_v15  ;;  %3248 = vst.msk [vmem:[#allocation2 + $0x134] sm:$0xf] %vm2281_vm2, %v8628_v16  ;;  %v8569_v53 = vpack.c.bf16 %v1843_v12, %v1843_v12  ;;  %v8633_v3 = vpack.c.bf16 %v2796_v60, %v2796_v60  ;;  %v1835_v44 = vadd.f32 %v12299_v20, %v1834_v57 }
 0x39f   : > { %v2788_v51 = vadd.f32 %v12299_v20, %v2787_v62  ;;  %v9492_v52 = vpop.f32.mrf.mxu0  ;;  %v9560_v28 = vpop.f32.mrf.mxu1 }
 0x3a0   : > { %2300 = vst.msk [vmem:[#allocation2 + $0x48] sm:$0xf] %vm2281_vm2, %v8569_v53  ;;  %3253 = vst.msk [vmem:[#allocation2 + $0x148] sm:$0xf] %vm2281_vm2, %v8633_v3  ;;  %v8567_v30 = vpack.c.bf16 %v1835_v44, %v1835_v44  ;;  %v1846_v7 = vadd.f32 %v9492_v52, %v12299_v20  ;;  %v2799_v4 = vadd.f32 %v9560_v28, %v12299_v20 }
 0x3a1   : > { %v8631_v19 = vpack.c.bf16 %v2788_v51, %v2788_v51  ;;  %v1837_v35 = vpop.f32.mrf.mxu0  ;;  %v2790_v8 = vpop.f32.mrf.mxu1 }
 0x3a2   : > { %2298 = vst.msk [vmem:[#allocation2 + $0x40] sm:$0xf] %vm2281_vm2, %v8567_v30  ;;  %v8570_v18 = vpack.c.bf16 %v1846_v7, %v1846_v7  ;;  %v8634_v40 = vpack.c.bf16 %v2799_v4, %v2799_v4  ;;  %v1838_v14 = vadd.f32 %v12299_v20, %v1837_v35  ;;  %v2791_v45 = vadd.f32 %v12299_v20, %v2790_v8 }
 0x3a3   : > { %3251 = vst.msk [vmem:[#allocation2 + $0x140] sm:$0xf] %vm2281_vm2, %v8631_v19  ;;  %v9495_v9 = vpop.f32.mrf.mxu0  ;;  %v9563_v6 = vpop.f32.mrf.mxu1 }
 0x3a4   : > { %2301 = vst.msk [vmem:[#allocation2 + $0x4c] sm:$0xf] %vm2281_vm2, %v8570_v18  ;;  %3254 = vst.msk [vmem:[#allocation2 + $0x14c] sm:$0xf] %vm2281_vm2, %v8634_v40  ;;  %v8568_v46 = vpack.c.bf16 %v1838_v14, %v1838_v14  ;;  %v8632_v0 = vpack.c.bf16 %v2791_v45, %v2791_v45  ;;  %v1859_v55 = vadd.f32 %v9495_v9, %v12299_v20 }
 0x3a5   : > { %v2812_v56 = vadd.f32 %v9563_v6, %v12299_v20  ;;  %v1850_v34 = vpop.f32.mrf.mxu0  ;;  %v2803_v10 = vpop.f32.mrf.mxu1 }
 0x3a6   : > { %2299 = vst.msk [vmem:[#allocation2 + $0x44] sm:$0xf] %vm2281_vm2, %v8568_v46  ;;  %3252 = vst.msk [vmem:[#allocation2 + $0x144] sm:$0xf] %vm2281_vm2, %v8632_v0  ;;  %v8573_v5 = vpack.c.bf16 %v1859_v55, %v1859_v55  ;;  %v1851_v26 = vadd.f32 %v12299_v20, %v1850_v34  ;;  %v2804_v23 = vadd.f32 %v12299_v20, %v2803_v10 }
 0x3a7   : > { %v8637_v25 = vpack.c.bf16 %v2812_v56, %v2812_v56  ;;  %v9496_v29 = vpop.f32.mrf.mxu0  ;;  %v9564_v41 = vpop.f32.mrf.mxu1 }
 0x3a8   : > { %2304 = vst.msk [vmem:[#allocation2 + $0x58] sm:$0xf] %vm2281_vm2, %v8573_v5  ;;  %v8571_v11 = vpack.c.bf16 %v1851_v26, %v1851_v26  ;;  %v8635_v43 = vpack.c.bf16 %v2804_v23, %v2804_v23  ;;  %v1862_v48 = vadd.f32 %v9496_v29, %v12299_v20  ;;  %v2815_v33 = vadd.f32 %v9564_v41, %v12299_v20 }
 0x3a9   : > { %3257 = vst.msk [vmem:[#allocation2 + $0x158] sm:$0xf] %vm2281_vm2, %v8637_v25  ;;  %v1853_v37 = vpop.f32.mrf.mxu0  ;;  %v2806_v32 = vpop.f32.mrf.mxu1 }
 0x3aa   : > { %2302 = vst.msk [vmem:[#allocation2 + $0x50] sm:$0xf] %vm2281_vm2, %v8571_v11  ;;  %3255 = vst.msk [vmem:[#allocation2 + $0x150] sm:$0xf] %vm2281_vm2, %v8635_v43  ;;  %v8574_v31 = vpack.c.bf16 %v1862_v48, %v1862_v48  ;;  %v8638_v63 = vpack.c.bf16 %v2815_v33, %v2815_v33  ;;  %v1854_v1 = vadd.f32 %v12299_v20, %v1853_v37 }
 0x3ab   : > { %v2807_v17 = vadd.f32 %v12299_v20, %v2806_v32  ;;  %v9499_v47 = vpop.f32.mrf.mxu0  ;;  %v9567_v58 = vpop.f32.mrf.mxu1 }
 0x3ac   : > { %2305 = vst.msk [vmem:[#allocation2 + $0x5c] sm:$0xf] %vm2281_vm2, %v8574_v31  ;;  %3258 = vst.msk [vmem:[#allocation2 + $0x15c] sm:$0xf] %vm2281_vm2, %v8638_v63  ;;  %v8572_v59 = vpack.c.bf16 %v1854_v1, %v1854_v1  ;;  %v1875_v21 = vadd.f32 %v9499_v47, %v12299_v20  ;;  %v2828_v39 = vadd.f32 %v9567_v58, %v12299_v20 }
 0x3ad   : > { %v8636_v36 = vpack.c.bf16 %v2807_v17, %v2807_v17  ;;  %v1866_v61 = vpop.f32.mrf.mxu0  ;;  %v2819_v13 = vpop.f32.mrf.mxu1 }
 0x3ae   : > { %2303 = vst.msk [vmem:[#allocation2 + $0x54] sm:$0xf] %vm2281_vm2, %v8572_v59  ;;  %v8577_v50 = vpack.c.bf16 %v1875_v21, %v1875_v21  ;;  %v8641_v54 = vpack.c.bf16 %v2828_v39, %v2828_v39  ;;  %v1867_v42 = vadd.f32 %v12299_v20, %v1866_v61  ;;  %v2820_v24 = vadd.f32 %v12299_v20, %v2819_v13 }
 0x3af   : > { %3256 = vst.msk [vmem:[#allocation2 + $0x154] sm:$0xf] %vm2281_vm2, %v8636_v36  ;;  %v9500_v38 = vpop.f32.mrf.mxu0  ;;  %v9568_v2 = vpop.f32.mrf.mxu1 }
 0x3b0   : > { %2308 = vst.msk [vmem:[#allocation2 + $0x68] sm:$0xf] %vm2281_vm2, %v8577_v50  ;;  %3261 = vst.msk [vmem:[#allocation2 + $0x168] sm:$0xf] %vm2281_vm2, %v8641_v54  ;;  %v8575_v27 = vpack.c.bf16 %v1867_v42, %v1867_v42  ;;  %v8639_v22 = vpack.c.bf16 %v2820_v24, %v2820_v24  ;;  %v1878_v49 = vadd.f32 %v9500_v38, %v12299_v20 }
 0x3b1   : > { %v2831_v15 = vadd.f32 %v9568_v2, %v12299_v20  ;;  %v1869_v16 = vpop.f32.mrf.mxu0  ;;  %v2822_v12 = vpop.f32.mrf.mxu1 }
 0x3b2   : > { %2306 = vst.msk [vmem:[#allocation2 + $0x60] sm:$0xf] %vm2281_vm2, %v8575_v27  ;;  %3259 = vst.msk [vmem:[#allocation2 + $0x160] sm:$0xf] %vm2281_vm2, %v8639_v22  ;;  %v8578_v60 = vpack.c.bf16 %v1878_v49, %v1878_v49  ;;  %v1870_v62 = vadd.f32 %v12299_v20, %v1869_v16  ;;  %v2823_v53 = vadd.f32 %v12299_v20, %v2822_v12 }
 0x3b3   : > { %v8642_v57 = vpack.c.bf16 %v2831_v15, %v2831_v15  ;;  %v9503_v3 = vpop.f32.mrf.mxu0  ;;  %v9571_v44 = vpop.f32.mrf.mxu1 }
 0x3b4   : > { %2309 = vst.msk [vmem:[#allocation2 + $0x6c] sm:$0xf] %vm2281_vm2, %v8578_v60  ;;  %v8576_v51 = vpack.c.bf16 %v1870_v62, %v1870_v62  ;;  %v8640_v52 = vpack.c.bf16 %v2823_v53, %v2823_v53  ;;  %v1891_v28 = vadd.f32 %v9503_v3, %v12299_v20  ;;  %v2844_v30 = vadd.f32 %v9571_v44, %v12299_v20 }
 0x3b5   : > { %3262 = vst.msk [vmem:[#allocation2 + $0x16c] sm:$0xf] %vm2281_vm2, %v8642_v57  ;;  %v1882_v19 = vpop.f32.mrf.mxu0  ;;  %v2835_v7 = vpop.f32.mrf.mxu1 }
 0x3b6   : > { %2307 = vst.msk [vmem:[#allocation2 + $0x64] sm:$0xf] %vm2281_vm2, %v8576_v51  ;;  %3260 = vst.msk [vmem:[#allocation2 + $0x164] sm:$0xf] %vm2281_vm2, %v8640_v52  ;;  %v8581_v4 = vpack.c.bf16 %v1891_v28, %v1891_v28  ;;  %v8645_v35 = vpack.c.bf16 %v2844_v30, %v2844_v30  ;;  %v1883_v8 = vadd.f32 %v12299_v20, %v1882_v19 }
 0x3b7   : > { %v2836_v18 = vadd.f32 %v12299_v20, %v2835_v7  ;;  %v9504_v40 = vpop.f32.mrf.mxu0  ;;  %v9572_v14 = vpop.f32.mrf.mxu1 }
 0x3b8   : > { %2312 = vst.msk [vmem:[#allocation2 + $0x78] sm:$0xf] %vm2281_vm2, %v8581_v4  ;;  %3265 = vst.msk [vmem:[#allocation2 + $0x178] sm:$0xf] %vm2281_vm2, %v8645_v35  ;;  %v8579_v45 = vpack.c.bf16 %v1883_v8, %v1883_v8  ;;  %v1894_v6 = vadd.f32 %v9504_v40, %v12299_v20  ;;  %v2847_v46 = vadd.f32 %v9572_v14, %v12299_v20 }
 0x3b9   : > { %v8643_v9 = vpack.c.bf16 %v2836_v18, %v2836_v18  ;;  %v1885_v0 = vpop.f32.mrf.mxu0  ;;  %v2838_v55 = vpop.f32.mrf.mxu1 }
 0x3ba   : > { %2310 = vst.msk [vmem:[#allocation2 + $0x70] sm:$0xf] %vm2281_vm2, %v8579_v45  ;;  %v8582_v56 = vpack.c.bf16 %v1894_v6, %v1894_v6  ;;  %v8646_v34 = vpack.c.bf16 %v2847_v46, %v2847_v46  ;;  %v1886_v10 = vadd.f32 %v12299_v20, %v1885_v0  ;;  %v2839_v5 = vadd.f32 %v12299_v20, %v2838_v55 }
 0x3bb   : > { %3263 = vst.msk [vmem:[#allocation2 + $0x170] sm:$0xf] %vm2281_vm2, %v8643_v9  ;;  %v9507_v25 = vpop.f32.mrf.mxu0  ;;  %v9575_v26 = vpop.f32.mrf.mxu1 }
 0x3bc   : > { %2313 = vst.msk [vmem:[#allocation2 + $0x7c] sm:$0xf] %vm2281_vm2, %v8582_v56  ;;  %3266 = vst.msk [vmem:[#allocation2 + $0x17c] sm:$0xf] %vm2281_vm2, %v8646_v34  ;;  %v8580_v23 = vpack.c.bf16 %v1886_v10, %v1886_v10  ;;  %v8644_v29 = vpack.c.bf16 %v2839_v5, %v2839_v5  ;;  %v1907_v41 = vadd.f32 %v9507_v25, %v12299_v20 }
 0x3bd   : > { %v2860_v11 = vadd.f32 %v9575_v26, %v12299_v20  ;;  %v1898_v43 = vpop.f32.mrf.mxu0  ;;  %v2851_v48 = vpop.f32.mrf.mxu1 }
 0x3be   : > { %2311 = vst.msk [vmem:[#allocation2 + $0x74] sm:$0xf] %vm2281_vm2, %v8580_v23  ;;  %3264 = vst.msk [vmem:[#allocation2 + $0x174] sm:$0xf] %vm2281_vm2, %v8644_v29  ;;  %v8585_v33 = vpack.c.bf16 %v1907_v41, %v1907_v41  ;;  %v1899_v32 = vadd.f32 %v12299_v20, %v1898_v43  ;;  %v2852_v31 = vadd.f32 %v12299_v20, %v2851_v48 }
 0x3bf   : > { %v8649_v37 = vpack.c.bf16 %v2860_v11, %v2860_v11  ;;  %v9508_v63 = vpop.f32.mrf.mxu0  ;;  %v9576_v1 = vpop.f32.mrf.mxu1 }
 0x3c0   : > { %2316 = vst.msk [vmem:[#allocation2 + $0x88] sm:$0xf] %vm2281_vm2, %v8585_v33  ;;  %v8583_v17 = vpack.c.bf16 %v1899_v32, %v1899_v32  ;;  %v8647_v47 = vpack.c.bf16 %v2852_v31, %v2852_v31  ;;  %v1910_v58 = vadd.f32 %v9508_v63, %v12299_v20  ;;  %v2863_v59 = vadd.f32 %v9576_v1, %v12299_v20 }
 0x3c1   : > { %3269 = vst.msk [vmem:[#allocation2 + $0x188] sm:$0xf] %vm2281_vm2, %v8649_v37  ;;  %v1901_v36 = vpop.f32.mrf.mxu0  ;;  %v2854_v21 = vpop.f32.mrf.mxu1 }
 0x3c2   : > { %2314 = vst.msk [vmem:[#allocation2 + $0x80] sm:$0xf] %vm2281_vm2, %v8583_v17  ;;  %3267 = vst.msk [vmem:[#allocation2 + $0x180] sm:$0xf] %vm2281_vm2, %v8647_v47  ;;  %v8586_v39 = vpack.c.bf16 %v1910_v58, %v1910_v58  ;;  %v8650_v61 = vpack.c.bf16 %v2863_v59, %v2863_v59  ;;  %v1902_v13 = vadd.f32 %v12299_v20, %v1901_v36 }
 0x3c3   : > { %v2855_v50 = vadd.f32 %v12299_v20, %v2854_v21  ;;  %v9511_v54 = vpop.f32.mrf.mxu0  ;;  %v9579_v42 = vpop.f32.mrf.mxu1 }
 0x3c4   : > { %2317 = vst.msk [vmem:[#allocation2 + $0x8c] sm:$0xf] %vm2281_vm2, %v8586_v39  ;;  %3270 = vst.msk [vmem:[#allocation2 + $0x18c] sm:$0xf] %vm2281_vm2, %v8650_v61  ;;  %v8584_v24 = vpack.c.bf16 %v1902_v13, %v1902_v13  ;;  %v1923_v2 = vadd.f32 %v9511_v54, %v12299_v20  ;;  %v2876_v27 = vadd.f32 %v9579_v42, %v12299_v20 }
 0x3c5   : > { %v8648_v38 = vpack.c.bf16 %v2855_v50, %v2855_v50  ;;  %v1914_v22 = vpop.f32.mrf.mxu0  ;;  %v2867_v49 = vpop.f32.mrf.mxu1 }
 0x3c6   : > { %2315 = vst.msk [vmem:[#allocation2 + $0x84] sm:$0xf] %vm2281_vm2, %v8584_v24  ;;  %v8589_v15 = vpack.c.bf16 %v1923_v2, %v1923_v2  ;;  %v8653_v16 = vpack.c.bf16 %v2876_v27, %v2876_v27  ;;  %v1915_v12 = vadd.f32 %v12299_v20, %v1914_v22  ;;  %v2868_v60 = vadd.f32 %v12299_v20, %v2867_v49 }
 0x3c7   : > { %3268 = vst.msk [vmem:[#allocation2 + $0x184] sm:$0xf] %vm2281_vm2, %v8648_v38  ;;  %v9512_v57 = vpop.f32.mrf.mxu0  ;;  %v9580_v62 = vpop.f32.mrf.mxu1 }
 0x3c8   : > { %2320 = vst.msk [vmem:[#allocation2 + $0x98] sm:$0xf] %vm2281_vm2, %v8589_v15  ;;  %3273 = vst.msk [vmem:[#allocation2 + $0x198] sm:$0xf] %vm2281_vm2, %v8653_v16  ;;  %v8587_v53 = vpack.c.bf16 %v1915_v12, %v1915_v12  ;;  %v8651_v3 = vpack.c.bf16 %v2868_v60, %v2868_v60  ;;  %v1926_v44 = vadd.f32 %v9512_v57, %v12299_v20 }
 0x3c9   : > { %v2879_v51 = vadd.f32 %v9580_v62, %v12299_v20  ;;  %v1917_v52 = vpop.f32.mrf.mxu0  ;;  %v2870_v28 = vpop.f32.mrf.mxu1 }
 0x3ca   : > { %2318 = vst.msk [vmem:[#allocation2 + $0x90] sm:$0xf] %vm2281_vm2, %v8587_v53  ;;  %3271 = vst.msk [vmem:[#allocation2 + $0x190] sm:$0xf] %vm2281_vm2, %v8651_v3  ;;  %v8590_v30 = vpack.c.bf16 %v1926_v44, %v1926_v44  ;;  %v1918_v7 = vadd.f32 %v12299_v20, %v1917_v52  ;;  %v2871_v4 = vadd.f32 %v12299_v20, %v2870_v28 }
 0x3cb   : > { %v8654_v19 = vpack.c.bf16 %v2879_v51, %v2879_v51  ;;  %v9515_v35 = vpop.f32.mrf.mxu0  ;;  %v9583_v8 = vpop.f32.mrf.mxu1 }
 0x3cc   : > { %2321 = vst.msk [vmem:[#allocation2 + $0x9c] sm:$0xf] %vm2281_vm2, %v8590_v30  ;;  %v8588_v18 = vpack.c.bf16 %v1918_v7, %v1918_v7  ;;  %v8652_v40 = vpack.c.bf16 %v2871_v4, %v2871_v4  ;;  %v1939_v14 = vadd.f32 %v9515_v35, %v12299_v20  ;;  %v2892_v45 = vadd.f32 %v9583_v8, %v12299_v20 }
 0x3cd   : > { %3274 = vst.msk [vmem:[#allocation2 + $0x19c] sm:$0xf] %vm2281_vm2, %v8654_v19  ;;  %v1930_v9 = vpop.f32.mrf.mxu0  ;;  %v2883_v6 = vpop.f32.mrf.mxu1 }
 0x3ce   : > { %2319 = vst.msk [vmem:[#allocation2 + $0x94] sm:$0xf] %vm2281_vm2, %v8588_v18  ;;  %3272 = vst.msk [vmem:[#allocation2 + $0x194] sm:$0xf] %vm2281_vm2, %v8652_v40  ;;  %v8593_v46 = vpack.c.bf16 %v1939_v14, %v1939_v14  ;;  %v8657_v0 = vpack.c.bf16 %v2892_v45, %v2892_v45  ;;  %v1931_v55 = vadd.f32 %v12299_v20, %v1930_v9 }
 0x3cf   : > { %v2884_v56 = vadd.f32 %v12299_v20, %v2883_v6  ;;  %v9516_v34 = vpop.f32.mrf.mxu0  ;;  %v9584_v10 = vpop.f32.mrf.mxu1 }
 0x3d0   : > { %2324 = vst.msk [vmem:[#allocation2 + $0xa8] sm:$0xf] %vm2281_vm2, %v8593_v46  ;;  %3277 = vst.msk [vmem:[#allocation2 + $0x1a8] sm:$0xf] %vm2281_vm2, %v8657_v0  ;;  %v8591_v5 = vpack.c.bf16 %v1931_v55, %v1931_v55  ;;  %v1942_v26 = vadd.f32 %v9516_v34, %v12299_v20  ;;  %v2895_v23 = vadd.f32 %v9584_v10, %v12299_v20 }
 0x3d1   : > { %v8655_v25 = vpack.c.bf16 %v2884_v56, %v2884_v56  ;;  %v1933_v29 = vpop.f32.mrf.mxu0  ;;  %v2886_v41 = vpop.f32.mrf.mxu1 }
 0x3d2   : > { %2322 = vst.msk [vmem:[#allocation2 + $0xa0] sm:$0xf] %vm2281_vm2, %v8591_v5  ;;  %v8594_v11 = vpack.c.bf16 %v1942_v26, %v1942_v26  ;;  %v8658_v43 = vpack.c.bf16 %v2895_v23, %v2895_v23  ;;  %v1934_v48 = vadd.f32 %v12299_v20, %v1933_v29  ;;  %v2887_v33 = vadd.f32 %v12299_v20, %v2886_v41 }
 0x3d3   : > { %3275 = vst.msk [vmem:[#allocation2 + $0x1a0] sm:$0xf] %vm2281_vm2, %v8655_v25  ;;  %v9519_v37 = vpop.f32.mrf.mxu0  ;;  %v9587_v32 = vpop.f32.mrf.mxu1 }
 0x3d4   : > { %2325 = vst.msk [vmem:[#allocation2 + $0xac] sm:$0xf] %vm2281_vm2, %v8594_v11  ;;  %3278 = vst.msk [vmem:[#allocation2 + $0x1ac] sm:$0xf] %vm2281_vm2, %v8658_v43  ;;  %v8592_v31 = vpack.c.bf16 %v1934_v48, %v1934_v48  ;;  %v8656_v63 = vpack.c.bf16 %v2887_v33, %v2887_v33  ;;  %v1955_v1 = vadd.f32 %v9519_v37, %v12299_v20 }
 0x3d5   : > { %v2908_v17 = vadd.f32 %v9587_v32, %v12299_v20  ;;  %v1946_v47 = vpop.f32.mrf.mxu0  ;;  %v2899_v58 = vpop.f32.mrf.mxu1 }
 0x3d6   : > { %2323 = vst.msk [vmem:[#allocation2 + $0xa4] sm:$0xf] %vm2281_vm2, %v8592_v31  ;;  %3276 = vst.msk [vmem:[#allocation2 + $0x1a4] sm:$0xf] %vm2281_vm2, %v8656_v63  ;;  %v8597_v59 = vpack.c.bf16 %v1955_v1, %v1955_v1  ;;  %v1947_v21 = vadd.f32 %v12299_v20, %v1946_v47  ;;  %v2900_v39 = vadd.f32 %v12299_v20, %v2899_v58 }
 0x3d7   : > { %v8661_v36 = vpack.c.bf16 %v2908_v17, %v2908_v17  ;;  %v9520_v61 = vpop.f32.mrf.mxu0  ;;  %v9588_v13 = vpop.f32.mrf.mxu1 }
 0x3d8   : > { %2328 = vst.msk [vmem:[#allocation2 + $0xb8] sm:$0xf] %vm2281_vm2, %v8597_v59  ;;  %v8595_v50 = vpack.c.bf16 %v1947_v21, %v1947_v21  ;;  %v8659_v54 = vpack.c.bf16 %v2900_v39, %v2900_v39  ;;  %v1958_v42 = vadd.f32 %v9520_v61, %v12299_v20  ;;  %v2911_v24 = vadd.f32 %v9588_v13, %v12299_v20 }
 0x3d9   : > { %3281 = vst.msk [vmem:[#allocation2 + $0x1b8] sm:$0xf] %vm2281_vm2, %v8661_v36  ;;  %v1949_v38 = vpop.f32.mrf.mxu0  ;;  %v2902_v2 = vpop.f32.mrf.mxu1 }
 0x3da   : > { %2326 = vst.msk [vmem:[#allocation2 + $0xb0] sm:$0xf] %vm2281_vm2, %v8595_v50  ;;  %3279 = vst.msk [vmem:[#allocation2 + $0x1b0] sm:$0xf] %vm2281_vm2, %v8659_v54  ;;  %v8598_v27 = vpack.c.bf16 %v1958_v42, %v1958_v42  ;;  %v8662_v22 = vpack.c.bf16 %v2911_v24, %v2911_v24  ;;  %v1950_v49 = vadd.f32 %v12299_v20, %v1949_v38 }
 0x3db   : > { %v2903_v15 = vadd.f32 %v12299_v20, %v2902_v2  ;;  %v9523_v16 = vpop.f32.mrf.mxu0  ;;  %v9591_v12 = vpop.f32.mrf.mxu1 }
 0x3dc   : > { %2329 = vst.msk [vmem:[#allocation2 + $0xbc] sm:$0xf] %vm2281_vm2, %v8598_v27  ;;  %3282 = vst.msk [vmem:[#allocation2 + $0x1bc] sm:$0xf] %vm2281_vm2, %v8662_v22  ;;  %v8596_v60 = vpack.c.bf16 %v1950_v49, %v1950_v49  ;;  %v1971_v62 = vadd.f32 %v9523_v16, %v12299_v20  ;;  %v2924_v53 = vadd.f32 %v9591_v12, %v12299_v20 }
 0x3dd   : > { %v8660_v57 = vpack.c.bf16 %v2903_v15, %v2903_v15  ;;  %v1962_v3 = vpop.f32.mrf.mxu0  ;;  %v2915_v44 = vpop.f32.mrf.mxu1 }
 0x3de   : > { %2327 = vst.msk [vmem:[#allocation2 + $0xb4] sm:$0xf] %vm2281_vm2, %v8596_v60  ;;  %v8601_v51 = vpack.c.bf16 %v1971_v62, %v1971_v62  ;;  %v8665_v52 = vpack.c.bf16 %v2924_v53, %v2924_v53  ;;  %v1963_v28 = vadd.f32 %v12299_v20, %v1962_v3  ;;  %v2916_v30 = vadd.f32 %v12299_v20, %v2915_v44 }
 0x3df   : > { %3280 = vst.msk [vmem:[#allocation2 + $0x1b4] sm:$0xf] %vm2281_vm2, %v8660_v57  ;;  %v9524_v19 = vpop.f32.mrf.mxu0  ;;  %v9592_v7 = vpop.f32.mrf.mxu1 }
 0x3e0   : > { %2332 = vst.msk [vmem:[#allocation2 + $0xc8] sm:$0xf] %vm2281_vm2, %v8601_v51  ;;  %3285 = vst.msk [vmem:[#allocation2 + $0x1c8] sm:$0xf] %vm2281_vm2, %v8665_v52  ;;  %v8599_v4 = vpack.c.bf16 %v1963_v28, %v1963_v28  ;;  %v8663_v35 = vpack.c.bf16 %v2916_v30, %v2916_v30  ;;  %v1974_v8 = vadd.f32 %v9524_v19, %v12299_v20 }
 0x3e1   : > { %v2927_v18 = vadd.f32 %v9592_v7, %v12299_v20  ;;  %v1965_v40 = vpop.f32.mrf.mxu0  ;;  %v2918_v14 = vpop.f32.mrf.mxu1 }
 0x3e2   : > { %2330 = vst.msk [vmem:[#allocation2 + $0xc0] sm:$0xf] %vm2281_vm2, %v8599_v4  ;;  %3283 = vst.msk [vmem:[#allocation2 + $0x1c0] sm:$0xf] %vm2281_vm2, %v8663_v35  ;;  %v8602_v45 = vpack.c.bf16 %v1974_v8, %v1974_v8  ;;  %v1966_v6 = vadd.f32 %v12299_v20, %v1965_v40  ;;  %v2919_v46 = vadd.f32 %v12299_v20, %v2918_v14 }
 0x3e3   : > { %v8666_v9 = vpack.c.bf16 %v2927_v18, %v2927_v18  ;;  %v9527_v0 = vpop.f32.mrf.mxu0  ;;  %v9595_v55 = vpop.f32.mrf.mxu1 }
 0x3e4   : > { %2333 = vst.msk [vmem:[#allocation2 + $0xcc] sm:$0xf] %vm2281_vm2, %v8602_v45  ;;  %v8600_v56 = vpack.c.bf16 %v1966_v6, %v1966_v6  ;;  %v8664_v34 = vpack.c.bf16 %v2919_v46, %v2919_v46  ;;  %v1987_v10 = vadd.f32 %v9527_v0, %v12299_v20  ;;  %v2940_v5 = vadd.f32 %v9595_v55, %v12299_v20 }
 0x3e5   : > { %3286 = vst.msk [vmem:[#allocation2 + $0x1cc] sm:$0xf] %vm2281_vm2, %v8666_v9  ;;  %v1978_v25 = vpop.f32.mrf.mxu0  ;;  %v2931_v26 = vpop.f32.mrf.mxu1 }
 0x3e6   : > { %2331 = vst.msk [vmem:[#allocation2 + $0xc4] sm:$0xf] %vm2281_vm2, %v8600_v56  ;;  %3284 = vst.msk [vmem:[#allocation2 + $0x1c4] sm:$0xf] %vm2281_vm2, %v8664_v34  ;;  %v8605_v23 = vpack.c.bf16 %v1987_v10, %v1987_v10  ;;  %v8669_v29 = vpack.c.bf16 %v2940_v5, %v2940_v5  ;;  %v1979_v41 = vadd.f32 %v12299_v20, %v1978_v25 }
 0x3e7   : > { %v2932_v11 = vadd.f32 %v12299_v20, %v2931_v26  ;;  %v9528_v43 = vpop.f32.mrf.mxu0  ;;  %v9596_v48 = vpop.f32.mrf.mxu1 }
 0x3e8   : > { %2336 = vst.msk [vmem:[#allocation2 + $0xd8] sm:$0xf] %vm2281_vm2, %v8605_v23  ;;  %3289 = vst.msk [vmem:[#allocation2 + $0x1d8] sm:$0xf] %vm2281_vm2, %v8669_v29  ;;  %v8603_v33 = vpack.c.bf16 %v1979_v41, %v1979_v41  ;;  %v1990_v32 = vadd.f32 %v9528_v43, %v12299_v20  ;;  %v2943_v31 = vadd.f32 %v9596_v48, %v12299_v20 }
 0x3e9   : > { %v8667_v37 = vpack.c.bf16 %v2932_v11, %v2932_v11  ;;  %v1981_v63 = vpop.f32.mrf.mxu0  ;;  %v2934_v1 = vpop.f32.mrf.mxu1 }
 0x3ea   : > { %2334 = vst.msk [vmem:[#allocation2 + $0xd0] sm:$0xf] %vm2281_vm2, %v8603_v33  ;;  %v8606_v17 = vpack.c.bf16 %v1990_v32, %v1990_v32  ;;  %v8670_v47 = vpack.c.bf16 %v2943_v31, %v2943_v31  ;;  %v1982_v58 = vadd.f32 %v12299_v20, %v1981_v63  ;;  %v2935_v59 = vadd.f32 %v12299_v20, %v2934_v1 }
 0x3eb   : > { %3287 = vst.msk [vmem:[#allocation2 + $0x1d0] sm:$0xf] %vm2281_vm2, %v8667_v37  ;;  %v9531_v36 = vpop.f32.mrf.mxu0  ;;  %v9599_v21 = vpop.f32.mrf.mxu1 }
 0x3ec   : > { %2337 = vst.msk [vmem:[#allocation2 + $0xdc] sm:$0xf] %vm2281_vm2, %v8606_v17  ;;  %3290 = vst.msk [vmem:[#allocation2 + $0x1dc] sm:$0xf] %vm2281_vm2, %v8670_v47  ;;  %v8604_v39 = vpack.c.bf16 %v1982_v58, %v1982_v58  ;;  %v8668_v61 = vpack.c.bf16 %v2935_v59, %v2935_v59  ;;  %v2003_v13 = vadd.f32 %v9531_v36, %v12299_v20 }
 0x3ed   : > { %v2956_v50 = vadd.f32 %v9599_v21, %v12299_v20  ;;  %v1994_v54 = vpop.f32.mrf.mxu0  ;;  %v2947_v42 = vpop.f32.mrf.mxu1 }
 0x3ee   : > { %2335 = vst.msk [vmem:[#allocation2 + $0xd4] sm:$0xf] %vm2281_vm2, %v8604_v39  ;;  %3288 = vst.msk [vmem:[#allocation2 + $0x1d4] sm:$0xf] %vm2281_vm2, %v8668_v61  ;;  %v8609_v24 = vpack.c.bf16 %v2003_v13, %v2003_v13  ;;  %v1995_v2 = vadd.f32 %v12299_v20, %v1994_v54  ;;  %v2948_v27 = vadd.f32 %v12299_v20, %v2947_v42 }
 0x3ef   : > { %v8673_v38 = vpack.c.bf16 %v2956_v50, %v2956_v50  ;;  %v9532_v22 = vpop.f32.mrf.mxu0  ;;  %v9600_v49 = vpop.f32.mrf.mxu1 }
 0x3f0   : > { %2340 = vst.msk [vmem:[#allocation2 + $0xe8] sm:$0xf] %vm2281_vm2, %v8609_v24  ;;  %v8607_v15 = vpack.c.bf16 %v1995_v2, %v1995_v2  ;;  %v8671_v16 = vpack.c.bf16 %v2948_v27, %v2948_v27  ;;  %v2006_v12 = vadd.f32 %v9532_v22, %v12299_v20  ;;  %v2959_v60 = vadd.f32 %v9600_v49, %v12299_v20 }
 0x3f1   : > { %3293 = vst.msk [vmem:[#allocation2 + $0x1e8] sm:$0xf] %vm2281_vm2, %v8673_v38  ;;  %v1997_v57 = vpop.f32.mrf.mxu0  ;;  %v2950_v62 = vpop.f32.mrf.mxu1 }
 0x3f2   : > { %2338 = vst.msk [vmem:[#allocation2 + $0xe0] sm:$0xf] %vm2281_vm2, %v8607_v15  ;;  %3291 = vst.msk [vmem:[#allocation2 + $0x1e0] sm:$0xf] %vm2281_vm2, %v8671_v16  ;;  %v8610_v53 = vpack.c.bf16 %v2006_v12, %v2006_v12  ;;  %v8674_v3 = vpack.c.bf16 %v2959_v60, %v2959_v60  ;;  %v1998_v44 = vadd.f32 %v12299_v20, %v1997_v57 }
 0x3f3   : > { %v2951_v51 = vadd.f32 %v12299_v20, %v2950_v62  ;;  %v9535_v52 = vpop.f32.mrf.mxu0  ;;  %v9603_v28 = vpop.f32.mrf.mxu1 }
 0x3f4   : > { %2341 = vst.msk [vmem:[#allocation2 + $0xec] sm:$0xf] %vm2281_vm2, %v8610_v53  ;;  %3294 = vst.msk [vmem:[#allocation2 + $0x1ec] sm:$0xf] %vm2281_vm2, %v8674_v3  ;;  %v8608_v30 = vpack.c.bf16 %v1998_v44, %v1998_v44  ;;  %v2019_v7 = vadd.f32 %v9535_v52, %v12299_v20  ;;  %v2972_v4 = vadd.f32 %v9603_v28, %v12299_v20 }
 0x3f5   : > { %v8672_v19 = vpack.c.bf16 %v2951_v51, %v2951_v51  ;;  %v2010_v35 = vpop.f32.mrf.mxu0  ;;  %v2963_v8 = vpop.f32.mrf.mxu1 }
 0x3f6   : > { %2339 = vst.msk [vmem:[#allocation2 + $0xe4] sm:$0xf] %vm2281_vm2, %v8608_v30  ;;  %v8613_v18 = vpack.c.bf16 %v2019_v7, %v2019_v7  ;;  %v8677_v40 = vpack.c.bf16 %v2972_v4, %v2972_v4  ;;  %v2011_v14 = vadd.f32 %v12299_v20, %v2010_v35  ;;  %v2964_v45 = vadd.f32 %v12299_v20, %v2963_v8 }
 0x3f7   : > { %3292 = vst.msk [vmem:[#allocation2 + $0x1e4] sm:$0xf] %vm2281_vm2, %v8672_v19  ;;  %v9536_v9 = vpop.f32.mrf.mxu0  ;;  %v9604_v6 = vpop.f32.mrf.mxu1 }
 0x3f8   : > { %2344 = vst.msk [vmem:[#allocation2 + $0xf8] sm:$0xf] %vm2281_vm2, %v8613_v18  ;;  %3297 = vst.msk [vmem:[#allocation2 + $0x1f8] sm:$0xf] %vm2281_vm2, %v8677_v40  ;;  %v8611_v46 = vpack.c.bf16 %v2011_v14, %v2011_v14  ;;  %v8675_v0 = vpack.c.bf16 %v2964_v45, %v2964_v45  ;;  %v2022_v55 = vadd.f32 %v9536_v9, %v12299_v20 }
 0x3f9   : > { %v2975_v56 = vadd.f32 %v9604_v6, %v12299_v20  ;;  %v2013_v34 = vpop.f32.mrf.mxu0  ;;  %v2966_v10 = vpop.f32.mrf.mxu1 }
 0x3fa   : > { %2342 = vst.msk [vmem:[#allocation2 + $0xf0] sm:$0xf] %vm2281_vm2, %v8611_v46  ;;  %3295 = vst.msk [vmem:[#allocation2 + $0x1f0] sm:$0xf] %vm2281_vm2, %v8675_v0  ;;  %v8614_v5 = vpack.c.bf16 %v2022_v55, %v2022_v55  ;;  %v2014_v26 = vadd.f32 %v12299_v20, %v2013_v34  ;;  %v2967_v23 = vadd.f32 %v12299_v20, %v2966_v10 }
 0x3fb   : > { %v8678_v25 = vpack.c.bf16 %v2975_v56, %v2975_v56 }
 0x3fc   : > { %2345 = vst.msk [vmem:[#allocation2 + $0xfc] sm:$0xf] %vm2281_vm2, %v8614_v5  ;;  %v8612_v29 = vpack.c.bf16 %v2014_v26, %v2014_v26  ;;  %v8676_v41 = vpack.c.bf16 %v2967_v23, %v2967_v23 }
 0x3fd   : > { %3298 = vst.msk [vmem:[#allocation2 + $0x1fc] sm:$0xf] %vm2281_vm2, %v8678_v25 }
 0x3fe   : > { %2343 = vst.msk [vmem:[#allocation2 + $0xf4] sm:$0xf] %vm2281_vm2, %v8612_v29  ;;  %3296 = vst.msk [vmem:[#allocation2 + $0x1f4] sm:$0xf] %vm2281_vm2, %v8676_v41 }
 0x3ff PF: > { %v9807_v11 = vld [vmem:[#allocation2 + $0xb8] sm:$0xff]   ;;  %s10557_s25 = smov 96   ;;  %v9811_v33 = vld [vmem:[#allocation2 + $0x70] sm:$0xff]   ;;  %v12564_v63 = vld [vmem:[#allocation2 + $0x68] sm:$0xff]   ;;  %s8383_s26 = sshll.u32 %s10537_s27, 8  ;;  %vm3992_vm3 = vcmask 261120  }
 0x400   : > { %v9808_v43 = vld [vmem:[#allocation2 + $0x38] sm:$0xff]   ;;  %3910 = vrot.lane.b32.xlu1 %v9807_v11, %s10557_s25  ;;  %v9812_v37 = vld [vmem:[#allocation2 + $0x30] sm:$0xff]   ;;  %v12567_v1 = vld [vmem:[#allocation2 + $0x28] sm:$0xff]   ;;  %s3300_s28 = sshra.s32 %s8383_s26, 3  ;;  %s10558_s14 = smov 64  }
 0x401   : > { %3878 = vrot.lane.b32.xlu0 %v9808_v43, %s10557_s25  ;;  %v9810_v20 = vld [vmem:[#allocation2 + $0x78] sm:$0xff]   ;;  %v9814_v31 = vld [vmem:[#allocation2 + $0xb0] sm:$0xff]   ;;  %v12571_v17 = vld [vmem:[#allocation2 + $0xe8] sm:$0xff]   ;;  %s8384_s12 = sshll.u32 %s3300_s28, 2  ;;  %s16835_s20 = scalar_lea.vmem %s10640_s17, %s8383_s26 }
 0x402   : > { %v12575_v47 = vld [vmem:[#allocation2 + $0xa8] sm:$0xff]   ;;  %v12579_v58 = vld [vmem:[#allocation2 + $0x60] sm:$0xff]   ;;  %v12590_v39 = vld [vmem:[#allocation2 + $0x58] sm:$0xff]   ;;  %s12632_s13 = scalar_lea.vmem [#allocation2], %s8384_s12 }
 0x403   : > { %v9809_v48 = vld [vmem:[#allocation2 + $0xf8] sm:$0xff]   ;;  %v12583_v59 = vld [vmem:[#allocation2 + $0x20] sm:$0xff]   ;;  %v12600_v54 = vld [vmem:[#allocation2 + $0x50] sm:$0xff]  }
 0x404   : > { %3926 = vrot.lane.b32.xlu1 %v9809_v48, %s10557_s25  ;;  %v9821_v36 = vld [vmem:[#allocation2 + $0xe0] sm:$0xff]   ;;  %v12593_v61 = vld [vmem:[#allocation2 + $0x18] sm:$0xff]   ;;  %v12603_v42 = vld [vmem:[#allocation2 + $0x10] sm:$0xff]  }
 0x405   : > { %3894 = vrot.lane.b32.xlu0 %v9810_v20, %s10557_s25  ;;  %v9813_v32 = vld [vmem:[#allocation2 + $0xf0] sm:$0xff]   ;;  %v9822_v21 = vld [vmem:[#allocation2 + $0xa0] sm:$0xff]   ;;  %v9825_v13 = vld [vmem:[#allocation2 + $0xd8] sm:$0xff]  }
 0x406   : > { %v9826_v50 = vld [vmem:[#allocation2 + $0x98] sm:$0xff]   ;;  %v9829_v24 = vld [vmem:[#allocation2 + $0xd0] sm:$0xff]   ;;  %v12610_v2 = vld [vmem:[#allocation2 + $0x48] sm:$0xff]  }
 0x407   : > { %v9830_v38 = vld [vmem:[#allocation2 + $0x90] sm:$0xff]   ;;  %v12613_v27 = vld [vmem:[#allocation2 + $0x8] sm:$0xff]   ;;  %v12623_v15 = vld [vmem:[#allocation2 + $0x40] sm:$0xff]  }
 0x408   : > { %3892 = vrot.lane.b32.xlu1 %v9811_v33, %s10557_s25  ;;  %v9833_v22 = vld [vmem:[#allocation2 + $0xc8] sm:$0xff]   ;;  %v12626_v16 = vld [vmem:[#allocation2] sm:$0xff]   ;;  %v9839_v62 = vld [vmem:[#allocation2 + $0x178] sm:$0xff]  }
 0x409   : > { %3876 = vrot.lane.b32.xlu0 %v9812_v37, %s10557_s25  ;;  %v9834_v49 = vld [vmem:[#allocation2 + $0x88] sm:$0xff]   ;;  %v9837_v12 = vld [vmem:[#allocation2 + $0xc0] sm:$0xff]   ;;  %v9840_v53 = vld [vmem:[#allocation2 + $0x138] sm:$0xff]  }
 0x40a   : > { %v9838_v60 = vld [vmem:[#allocation2 + $0x80] sm:$0xff]   ;;  %v9841_v3 = vld [vmem:[#allocation2 + $0x1f8] sm:$0xff]   ;;  %v9843_v51 = vld [vmem:[#allocation2 + $0x170] sm:$0xff]  }
 0x40b   : > { %v12635_v57 = vld [vmem:[%s12632_s13] sm:$0xff]   ;;  %v9842_v44 = vld [vmem:[#allocation2 + $0x1b8] sm:$0xff]   ;;  %v9844_v52 = vld [vmem:[#allocation2 + $0x130] sm:$0xff]  }
 0x40c   : > { %3924 = vrot.lane.b32.xlu1 %v9813_v32, %s10557_s25  ;;  %8783 = vmatprep.mubr.msk.bf16.mxu0 %vm3992_vm3, %v12635_v57  ;;  %v9845_v28 = vld [vmem:[#allocation2 + $0x1f0] sm:$0xff]   ;;  %v9847_v19 = vld [vmem:[#allocation2 + $0x168] sm:$0xff]   ;;  %v9851_v8 = vld [vmem:[#allocation2 + $0x160] sm:$0xff]  }
 0x40d   : > { %3908 = vrot.lane.b32.xlu0 %v9814_v31, %s10557_s25  ;;  %8831 = vmatprep.mubr.msk.bf16.mxu1 %vm3992_vm3, %v12635_v57  ;;  %v9846_v30 = vld [vmem:[#allocation2 + $0x1b0] sm:$0xff]   ;;  %v9848_v7 = vld [vmem:[#allocation2 + $0x128] sm:$0xff]   ;;  %v9852_v18 = vld [vmem:[#allocation2 + $0x120] sm:$0xff]  }
 0x40e   : > { %v9849_v4 = vld [vmem:[#allocation2 + $0x1e8] sm:$0xff]   ;;  %v9853_v40 = vld [vmem:[#allocation2 + $0x1e0] sm:$0xff]   ;;  %v9855_v45 = vld [vmem:[#allocation2 + $0x158] sm:$0xff]  }
 0x40f   : > { %v9850_v35 = vld [vmem:[#allocation2 + $0x1a8] sm:$0xff]   ;;  %v9854_v14 = vld [vmem:[#allocation2 + $0x1a0] sm:$0xff]   ;;  %v9856_v9 = vld [vmem:[#allocation2 + $0x118] sm:$0xff]  }
 0x410   : > { %3890 = vrot.lane.b32.xlu1 %v12564_v63, %s10557_s25  ;;  %v9857_v6 = vld [vmem:[#allocation2 + $0x1d8] sm:$0xff]   ;;  %v9859_v0 = vld [vmem:[#allocation2 + $0x150] sm:$0xff]   ;;  %v9863_v10 = vld [vmem:[#allocation2 + $0x148] sm:$0xff]  }
 0x411   : > { %3874 = vrot.lane.b32.xlu0 %v12567_v1, %s10557_s25  ;;  %v9858_v46 = vld [vmem:[#allocation2 + $0x198] sm:$0xff]   ;;  %v9860_v55 = vld [vmem:[#allocation2 + $0x110] sm:$0xff]   ;;  %v9864_v5 = vld [vmem:[#allocation2 + $0x108] sm:$0xff]  }
 0x412   : > { %v9861_v56 = vld [vmem:[#allocation2 + $0x1d0] sm:$0xff]   ;;  %v9865_v25 = vld [vmem:[#allocation2 + $0x1c8] sm:$0xff]   ;;  %v9868_v11 = vld [vmem:[#allocation2 + $0x140] sm:$0xff]  }
 0x413   : > { %v9862_v34 = vld [vmem:[#allocation2 + $0x190] sm:$0xff]   ;;  %v9866_v26 = vld [vmem:[#allocation2 + $0x188] sm:$0xff]   ;;  %v9869_v48 = vld [vmem:[#allocation2 + $0x100] sm:$0xff]  }
 0x414   : > { %3922 = vrot.lane.b32.xlu1 %v12571_v17, %s10557_s25  ;;  %v9870_v37 = vld [vmem:[#allocation2 + $0x1c0] sm:$0xff]  }
 0x415   : > { %3906 = vrot.lane.b32.xlu0 %v12575_v47, %s10557_s25  ;;  %v9871_v31 = vld [vmem:[#allocation2 + $0x180] sm:$0xff]  }
 0x418   : > { %3888 = vrot.lane.b32.xlu1 %v12579_v58, %s10557_s25 }
 0x419   : > { %3872 = vrot.lane.b32.xlu0 %v12583_v59, %s10557_s25 }
 0x41c   : > { %3920 = vrot.lane.b32.xlu1 %v9821_v36, %s10557_s25 }
 0x41d   : > { %3904 = vrot.lane.b32.xlu0 %v9822_v21, %s10557_s25 }
 0x420   : > { %3886 = vrot.lane.b32.xlu1 %v12590_v39, %s10557_s25 }
 0x421   : > { %3870 = vrot.lane.b32.xlu0 %v12593_v61, %s10557_s25 }
 0x424   : > { %3918 = vrot.lane.b32.xlu1 %v9825_v13, %s10557_s25 }
 0x425   : > { %3902 = vrot.lane.b32.xlu0 %v9826_v50, %s10557_s25 }
 0x428   : > { %3884 = vrot.lane.b32.xlu1 %v12600_v54, %s10557_s25 }
 0x429   : > { %3868 = vrot.lane.b32.xlu0 %v12603_v42, %s10557_s25 }
 0x42c   : > { %3916 = vrot.lane.b32.xlu1 %v9829_v24, %s10557_s25 }
 0x42d   : > { %3900 = vrot.lane.b32.xlu0 %v9830_v38, %s10557_s25 }
 0x430   : > { %3882 = vrot.lane.b32.xlu1 %v12610_v2, %s10557_s25 }
 0x431   : > { %3866 = vrot.lane.b32.xlu0 %v12613_v27, %s10557_s25 }
 0x434   : > { %3914 = vrot.lane.b32.xlu1 %v9833_v22, %s10557_s25 }
 0x435   : > { %3898 = vrot.lane.b32.xlu0 %v9834_v49, %s10557_s25 }
 0x438   : > { %3880 = vrot.lane.b32.xlu1 %v12623_v15, %s10557_s25 }
 0x439   : > { %3864 = vrot.lane.b32.xlu0 %v12626_v16, %s10557_s25 }
 0x43c   : > { %3912 = vrot.lane.b32.xlu1 %v9837_v12, %s10557_s25 }
 0x43d   : > { %3896 = vrot.lane.b32.xlu0 %v9838_v60, %s10557_s25 }
 0x440   : > { %3958 = vrot.lane.b32.xlu1 %v9839_v62, %s10557_s25 }
 0x441   : > { %3942 = vrot.lane.b32.xlu0 %v9840_v53, %s10557_s25 }
 0x444   : > { %3990 = vrot.lane.b32.xlu1 %v9841_v3, %s10557_s25 }
 0x445   : > { %3974 = vrot.lane.b32.xlu0 %v9842_v44, %s10557_s25 }
 0x448   : > { %3956 = vrot.lane.b32.xlu1 %v9843_v51, %s10557_s25 }
 0x449   : > { %3940 = vrot.lane.b32.xlu0 %v9844_v52, %s10557_s25 }
 0x44c   : > { %3988 = vrot.lane.b32.xlu1 %v9845_v28, %s10557_s25 }
 0x44d   : > { %3972 = vrot.lane.b32.xlu0 %v9846_v30, %s10557_s25 }
 0x450   : > { %3954 = vrot.lane.b32.xlu1 %v9847_v19, %s10557_s25 }
 0x451   : > { %3938 = vrot.lane.b32.xlu0 %v9848_v7, %s10557_s25 }
 0x454   : > { %3986 = vrot.lane.b32.xlu1 %v9849_v4, %s10557_s25 }
 0x455   : > { %3970 = vrot.lane.b32.xlu0 %v9850_v35, %s10557_s25 }
 0x458   : > { %3952 = vrot.lane.b32.xlu1 %v9851_v8, %s10557_s25 }
 0x459   : > { %3936 = vrot.lane.b32.xlu0 %v9852_v18, %s10557_s25 }
 0x45c   : > { %3984 = vrot.lane.b32.xlu1 %v9853_v40, %s10557_s25 }
 0x45d   : > { %3968 = vrot.lane.b32.xlu0 %v9854_v14, %s10557_s25 }
 0x460   : > { %3950 = vrot.lane.b32.xlu1 %v9855_v45, %s10557_s25 }
 0x461   : > { %3934 = vrot.lane.b32.xlu0 %v9856_v9, %s10557_s25 }
 0x464   : > { %3982 = vrot.lane.b32.xlu1 %v9857_v6, %s10557_s25 }
 0x465   : > { %3966 = vrot.lane.b32.xlu0 %v9858_v46, %s10557_s25 }
 0x468   : > { %3948 = vrot.lane.b32.xlu1 %v9859_v0, %s10557_s25 }
 0x469   : > { %3932 = vrot.lane.b32.xlu0 %v9860_v55, %s10557_s25 }
 0x46c   : > { %3980 = vrot.lane.b32.xlu1 %v9861_v56, %s10557_s25 }
 0x46d   : > { %3964 = vrot.lane.b32.xlu0 %v9862_v34, %s10557_s25 }
 0x470   : > { %3946 = vrot.lane.b32.xlu1 %v9863_v10, %s10557_s25 }
 0x471   : > { %3930 = vrot.lane.b32.xlu0 %v9864_v5, %s10557_s25 }
 0x472   : > { %v3911_v23 = vpop.permute.xlu1 %3910 }
 0x473   : > { %v3879_v29 = vpop.permute.xlu0 %3878  ;;  %v4111_v41 = vsel %vm3992_vm3, %v3911_v23, 0 }
 0x474   : > { %3978 = vrot.lane.b32.xlu1 %v9865_v25, %s10557_s25  ;;  %v4063_v33 = vsel %vm3992_vm3, %v3879_v29, 0 }
 0x475   : > { %3962 = vrot.lane.b32.xlu0 %v9866_v26, %s10557_s25 }
 0x476   : > { %v3927_v43 = vpop.permute.xlu1 %3926 }
 0x477   : > { %v3895_v20 = vpop.permute.xlu0 %3894  ;;  %9665 = vmatprep.subr.msk.bf16.mxu1 %vm3992_vm3, %v3927_v43 }
 0x478   : > { %9657 = vmatprep.subr.msk.bf16.mxu0 %vm3992_vm3, %v3895_v20  ;;  %8816 = vmatpush3.bf16.xpose.msra.mxu1 %v4111_v41 }
 0x479   : > { %8768 = vmatpush3.bf16.xpose.msra.mxu0 %v4063_v33  ;;  %3944 = vrot.lane.b32.xlu1 %v9868_v11, %s10557_s25 }
 0x47a   : > { %v3893_v32 = vpop.permute.xlu1 %3892  ;;  %3928 = vrot.lane.b32.xlu0 %v9869_v48, %s10557_s25  ;;  %v12709_v48 = vld [vmem:[%s12632_s13 + $0x8] sm:$0xff]  }
 0x47b   : > { %v3877_v36 = vpop.permute.xlu0 %3876  ;;  %9658 = vmatprep.subr.msk.bf16.mxu0 %vm3992_vm3, %v3893_v32 }
 0x47c   : > { %v4060_v13 = vsel %vm3992_vm3, %v3877_v36, 0 }
 0x47d   : > { %3976 = vrot.lane.b32.xlu1 %v9870_v37, %s10557_s25 }
 0x47e   : > { %v3925_v21 = vpop.permute.xlu1 %3924  ;;  %3960 = vrot.lane.b32.xlu0 %v9871_v31, %s10557_s25 }
 0x47f   : > { %v3909_v50 = vpop.permute.xlu0 %3908  ;;  %9666 = vmatprep.subr.msk.bf16.mxu1 %vm3992_vm3, %v3925_v21  ;;  %v12724_v21 = vld [vmem:[%s12632_s13 + $0x10] sm:$0xff]  }
 0x480   : > { %v4108_v24 = vsel %vm3992_vm3, %v3909_v50, 0 }
 0x481   : > { %8770 = vmatpush3.bf16.xpose.msra.mxu0 %v4060_v13  ;;  %8818 = vmatpush3.bf16.xpose.msra.mxu1 %v4108_v24 }
 0x482   : > { %v3891_v38 = vpop.permute.xlu1 %3890 }
 0x483   : > { %v3875_v22 = vpop.permute.xlu0 %3874  ;;  %9659 = vmatprep.subr.msk.bf16.mxu0 %vm3992_vm3, %v3891_v38 }
 0x484   : > { %v4057_v12 = vsel %vm3992_vm3, %v3875_v22, 0 }
 0x486   : > { %v3923_v49 = vpop.permute.xlu1 %3922 }
 0x487   : > { %v3907_v60 = vpop.permute.xlu0 %3906  ;;  %9667 = vmatprep.subr.msk.bf16.mxu1 %vm3992_vm3, %v3923_v49 }
 0x488   : > { %v4105_v62 = vsel %vm3992_vm3, %v3907_v60, 0 }
 0x489   : > { %8772 = vmatpush3.bf16.xpose.msra.mxu0 %v4057_v12  ;;  %8820 = vmatpush3.bf16.xpose.msra.mxu1 %v4105_v62  ;;  %v12739_v12 = vld [vmem:[%s12632_s13 + $0x18] sm:$0xff]  }
 0x48a   : > { %v3889_v53 = vpop.permute.xlu1 %3888 }
 0x48b   : > { %v3873_v3 = vpop.permute.xlu0 %3872  ;;  %9660 = vmatprep.subr.msk.bf16.mxu0 %vm3992_vm3, %v3889_v53 }
 0x48c   : > { %v4054_v51 = vsel %vm3992_vm3, %v3873_v3, 0 }
 0x48e   : > { %v3921_v44 = vpop.permute.xlu1 %3920 }
 0x48f   : > { %v3905_v52 = vpop.permute.xlu0 %3904  ;;  %9668 = vmatprep.subr.msk.bf16.mxu1 %vm3992_vm3, %v3921_v44 }
 0x490   : > { %v4102_v28 = vsel %vm3992_vm3, %v3905_v52, 0  ;;  %v12754_v52 = vld [vmem:[%s12632_s13 + $0x20] sm:$0xff]  }
 0x491   : > { %8774 = vmatpush3.bf16.xpose.msra.mxu0 %v4054_v51  ;;  %8822 = vmatpush3.bf16.xpose.msra.mxu1 %v4102_v28 }
 0x492   : > { %v3887_v30 = vpop.permute.xlu1 %3886 }
 0x493   : > { %v3871_v19 = vpop.permute.xlu0 %3870  ;;  %9661 = vmatprep.subr.msk.bf16.mxu0 %vm3992_vm3, %v3887_v30 }
 0x494   : > { %v4051_v4 = vsel %vm3992_vm3, %v3871_v19, 0 }
 0x496   : > { %v3919_v7 = vpop.permute.xlu1 %3918 }
 0x497   : > { %v3903_v35 = vpop.permute.xlu0 %3902  ;;  %9669 = vmatprep.subr.msk.bf16.mxu1 %vm3992_vm3, %v3919_v7 }
 0x498   : > { %v4099_v8 = vsel %vm3992_vm3, %v3903_v35, 0 }
 0x499   : > { %8776 = vmatpush3.bf16.xpose.msra.mxu0 %v4051_v4  ;;  %8824 = vmatpush3.bf16.xpose.msra.mxu1 %v4099_v8  ;;  %v12769_v8 = vld [vmem:[%s12632_s13 + $0x28] sm:$0xff]  }
 0x49a   : > { %v3885_v18 = vpop.permute.xlu1 %3884 }
 0x49b   : > { %v3869_v40 = vpop.permute.xlu0 %3868  ;;  %9662 = vmatprep.subr.msk.bf16.mxu0 %vm3992_vm3, %v3885_v18 }
 0x49c   : > { %v4048_v45 = vsel %vm3992_vm3, %v3869_v40, 0 }
 0x49e   : > { %v3917_v14 = vpop.permute.xlu1 %3916 }
 0x49f   : > { %v3901_v9 = vpop.permute.xlu0 %3900  ;;  %9670 = vmatprep.subr.msk.bf16.mxu1 %vm3992_vm3, %v3917_v14 }
 0x4a0   : > { %v4096_v6 = vsel %vm3992_vm3, %v3901_v9, 0 }
 0x4a1   : > { %8778 = vmatpush3.bf16.xpose.msra.mxu0 %v4048_v45  ;;  %8826 = vmatpush3.bf16.xpose.msra.mxu1 %v4096_v6 }
 0x4a2   : > { %v3883_v46 = vpop.permute.xlu1 %3882 }
 0x4a3   : > { %v3867_v0 = vpop.permute.xlu0 %3866  ;;  %9663 = vmatprep.subr.msk.bf16.mxu0 %vm3992_vm3, %v3883_v46  ;;  %v12784_v46 = vld [vmem:[%s12632_s13 + $0x30] sm:$0xff]  }
 0x4a4   : > { %v4045_v56 = vsel %vm3992_vm3, %v3867_v0, 0 }
 0x4a6   : > { %v3915_v55 = vpop.permute.xlu1 %3914 }
 0x4a7   : > { %v3899_v34 = vpop.permute.xlu0 %3898  ;;  %9671 = vmatprep.subr.msk.bf16.mxu1 %vm3992_vm3, %v3915_v55 }
 0x4a8   : > { %v4093_v10 = vsel %vm3992_vm3, %v3899_v34, 0 }
 0x4a9   : > { %8780 = vmatpush3.bf16.xpose.msra.mxu0 %v4045_v56  ;;  %8828 = vmatpush3.bf16.xpose.msra.mxu1 %v4093_v10 }
 0x4aa   : > { %v3881_v5 = vpop.permute.xlu1 %3880 }
 0x4ab   : > { %v3865_v25 = vpop.permute.xlu0 %3864  ;;  %9664 = vmatprep.subr.msk.bf16.mxu0 %vm3992_vm3, %v3881_v5 }
 0x4ac   : > { %v4042_v23 = vsel %vm3992_vm3, %v3865_v25, 0  ;;  %v12799_v25 = vld [vmem:[%s12632_s13 + $0x38] sm:$0xff]  }
 0x4ae   : > { %v3913_v26 = vpop.permute.xlu1 %3912 }
 0x4af   : > { %v3897_v29 = vpop.permute.xlu0 %3896  ;;  %9672 = vmatprep.subr.msk.bf16.mxu1 %vm3992_vm3, %v3913_v26 }
 0x4b0   : > { %v4090_v41 = vsel %vm3992_vm3, %v3897_v29, 0 }
 0x4b1   : > { %8782 = vmatpush3.bf16.xpose.msra.mxu0 %v4042_v23  ;;  %8830 = vmatpush3.bf16.xpose.msra.mxu1 %v4090_v41 }
 0x4b2   : > { %v3959_v11 = vpop.permute.xlu1 %3958 }
 0x4b3   : > { %v3943_v43 = vpop.permute.xlu0 %3942  ;;  %9673 = vmatprep.subr.msk.bf16.mxu0 %vm3992_vm3, %v3959_v11 }
 0x4b4   : > { %v4159_v33 = vsel %vm3992_vm3, %v3943_v43, 0 }
 0x4b6   : > { %v3991_v20 = vpop.permute.xlu1 %3990 }
 0x4b7   : > { %v3975_v37 = vpop.permute.xlu0 %3974  ;;  %9681 = vmatprep.subr.msk.bf16.mxu1 %vm3992_vm3, %v3991_v20  ;;  %v12814_v20 = vld [vmem:[%s12632_s13 + $0x40] sm:$0xff]  }
 0x4b8   : > { %8784 = vmatmul.mubr.msk.bf16.vlgmr.msra.gmra.mxu0 %vm3992_vm3, %v12635_v57  ;;  %8832 = vmatmul.mubr.msk.bf16.vlgmr.msra.gmra.mxu1 %vm3992_vm3, %v12635_v57  ;;  %v4207_v32 = vsel %vm3992_vm3, %v3975_v37, 0 }
 0x4b9   : > { %8785 = vmatprep.mubr.msk.bf16.mxu0 %vm3992_vm3, %v12709_v48  ;;  %8833 = vmatprep.mubr.msk.bf16.mxu1 %vm3992_vm3, %v12709_v48 }
 0x4ba   : > { %8864 = vmatpush3.bf16.xpose.msra.mxu0 %v4159_v33  ;;  %8912 = vmatpush3.bf16.xpose.msra.mxu1 %v4207_v32  ;;  %v3957_v31 = vpop.permute.xlu1 %3956 }
 0x4bb   : > { %v3941_v36 = vpop.permute.xlu0 %3940  ;;  %9674 = vmatprep.subr.msk.bf16.mxu0 %vm3992_vm3, %v3957_v31 }
 0x4bc   : > { %v4156_v50 = vsel %vm3992_vm3, %v3941_v36, 0  ;;  %v12828_v36 = vld [vmem:[%s12632_s13 + $0x48] sm:$0xff]  }
 0x4be   : > { %v3989_v13 = vpop.permute.xlu1 %3988 }
 0x4bf   : > { %v3973_v24 = vpop.permute.xlu0 %3972  ;;  %9682 = vmatprep.subr.msk.bf16.mxu1 %vm3992_vm3, %v3989_v13  ;;  %v12839_v13 = vld [vmem:[%s12632_s13 + $0x50] sm:$0xff]  }
 0x4c0   : > { %8786 = vmatmul.mubr.msk.bf16.gmra.mxu0 %vm3992_vm3, %v12709_v48  ;;  %8834 = vmatmul.mubr.msk.bf16.gmra.mxu1 %vm3992_vm3, %v12709_v48  ;;  %v4204_v38 = vsel %vm3992_vm3, %v3973_v24, 0  ;;  %v12861_v24 = vld [vmem:[%s12632_s13 + $0x60] sm:$0xff]  }
 0x4c1   : > { %8787 = vmatprep.mubr.msk.bf16.mxu0 %vm3992_vm3, %v12724_v21  ;;  %8835 = vmatprep.mubr.msk.bf16.mxu1 %vm3992_vm3, %v12724_v21 }
 0x4c2   : > { %8866 = vmatpush3.bf16.xpose.msra.mxu0 %v4156_v50  ;;  %8914 = vmatpush3.bf16.xpose.msra.mxu1 %v4204_v38  ;;  %v3955_v22 = vpop.permute.xlu1 %3954  ;;  %v12850_v50 = vld [vmem:[%s12632_s13 + $0x58] sm:$0xff]   ;;  %v12872_v38 = vld [vmem:[%s12632_s13 + $0x68] sm:$0xff]  }
 0x4c3   : > { %v3939_v49 = vpop.permute.xlu0 %3938  ;;  %9675 = vmatprep.subr.msk.bf16.mxu0 %vm3992_vm3, %v3955_v22  ;;  %v12883_v22 = vld [vmem:[%s12632_s13 + $0x70] sm:$0xff]  }
 0x4c4   : > { %v4153_v62 = vsel %vm3992_vm3, %v3939_v49, 0  ;;  %v12894_v49 = vld [vmem:[%s12632_s13 + $0x78] sm:$0xff]  }
 0x4c6   : > { %v3987_v60 = vpop.permute.xlu1 %3986 }
 0x4c7   : > { %v3971_v53 = vpop.permute.xlu0 %3970  ;;  %9683 = vmatprep.subr.msk.bf16.mxu1 %vm3992_vm3, %v3987_v60  ;;  %v10465_v60 = vld [vmem:[#allocation2 + $0x78] sm:$0xff]  }
 0x4c8   : > { %8788 = vmatmul.mubr.msk.bf16.gmra.mxu0 %vm3992_vm3, %v12724_v21  ;;  %8836 = vmatmul.mubr.msk.bf16.gmra.mxu1 %vm3992_vm3, %v12724_v21  ;;  %v4201_v3 = vsel %vm3992_vm3, %v3971_v53, 0  ;;  %v10467_v53 = vld [vmem:[#allocation2 + $0x70] sm:$0xff]  }
 0x4c9   : > { %8789 = vmatprep.mubr.msk.bf16.mxu0 %vm3992_vm3, %v12739_v12  ;;  %8837 = vmatprep.mubr.msk.bf16.mxu1 %vm3992_vm3, %v12739_v12 }
 0x4ca   : > { %8868 = vmatpush3.bf16.xpose.msra.mxu0 %v4153_v62  ;;  %8916 = vmatpush3.bf16.xpose.msra.mxu1 %v4201_v3  ;;  %v3953_v44 = vpop.permute.xlu1 %3952  ;;  %v10466_v62 = vld [vmem:[#allocation2 + $0x38] sm:$0xff]   ;;  %v10468_v3 = vld [vmem:[#allocation2 + $0x30] sm:$0xff]  }
 0x4cb   : > { %v3937_v51 = vpop.permute.xlu0 %3936  ;;  %9676 = vmatprep.subr.msk.bf16.mxu0 %vm3992_vm3, %v3953_v44  ;;  %6795 = vrot.lane.b32.xlu1 %v10465_v60, %s10558_s14 }
 0x4cc   : > { %v4150_v30 = vsel %vm3992_vm3, %v3937_v51, 0  ;;  %6779 = vrot.lane.b32.xlu0 %v10466_v62, %s10558_s14 }
 0x4ce   : > { %v3985_v28 = vpop.permute.xlu1 %3984 }
 0x4cf   : > { %v3969_v19 = vpop.permute.xlu0 %3968  ;;  %9684 = vmatprep.subr.msk.bf16.mxu1 %vm3992_vm3, %v3985_v28  ;;  %6793 = vrot.lane.b32.xlu1 %v10467_v53, %s10558_s14 }
 0x4d0   : > { %8790 = vmatmul.mubr.msk.bf16.gmra.mxu0 %vm3992_vm3, %v12739_v12  ;;  %8838 = vmatmul.mubr.msk.bf16.gmra.mxu1 %vm3992_vm3, %v12739_v12  ;;  %v4198_v7 = vsel %vm3992_vm3, %v3969_v19, 0 }
 0x4d1   : > { %8791 = vmatprep.mubr.msk.bf16.mxu0 %vm3992_vm3, %v12754_v52  ;;  %8839 = vmatprep.mubr.msk.bf16.mxu1 %vm3992_vm3, %v12754_v52 }
 0x4d2   : > { %8870 = vmatpush3.bf16.xpose.msra.mxu0 %v4150_v30  ;;  %8918 = vmatpush3.bf16.xpose.msra.mxu1 %v4198_v7  ;;  %v3951_v4 = vpop.permute.xlu1 %3950 }
 0x4d3   : > { %v3935_v35 = vpop.permute.xlu0 %3934  ;;  %9677 = vmatprep.subr.msk.bf16.mxu0 %vm3992_vm3, %v3951_v4  ;;  %6777 = vrot.lane.b32.xlu0 %v10468_v3, %s10558_s14 }
 0x4d4   : > { %v4147_v40 = vsel %vm3992_vm3, %v3935_v35, 0  ;;  %6791 = vrot.lane.b32.xlu1 %v12564_v63, %s10558_s14  ;;  %v10469_v63 = vld [vmem:[#allocation2 + $0xb8] sm:$0xff]  }
 0x4d6   : > { %v3983_v18 = vpop.permute.xlu1 %3982 }
 0x4d7   : > { %v3967_v14 = vpop.permute.xlu0 %3966  ;;  %9685 = vmatprep.subr.msk.bf16.mxu1 %vm3992_vm3, %v3983_v18  ;;  %6789 = vrot.lane.b32.xlu0 %v12579_v58, %s10558_s14 }
 0x4d8   : > { %8792 = vmatmul.mubr.msk.bf16.gmra.mxu0 %vm3992_vm3, %v12754_v52  ;;  %8840 = vmatmul.mubr.msk.bf16.gmra.mxu1 %vm3992_vm3, %v12754_v52  ;;  %v4195_v45 = vsel %vm3992_vm3, %v3967_v14, 0 }
 0x4d9   : > { %8793 = vmatprep.mubr.msk.bf16.mxu0 %vm3992_vm3, %v12769_v8  ;;  %8841 = vmatprep.mubr.msk.bf16.mxu1 %vm3992_vm3, %v12769_v8 }
 0x4da   : > { %8872 = vmatpush3.bf16.xpose.msra.mxu0 %v4147_v40  ;;  %8920 = vmatpush3.bf16.xpose.msra.mxu1 %v4195_v45  ;;  %v3949_v9 = vpop.permute.xlu1 %3948 }
 0x4db   : > { %v3933_v6 = vpop.permute.xlu0 %3932  ;;  %9678 = vmatprep.subr.msk.bf16.mxu0 %vm3992_vm3, %v3949_v9  ;;  %6775 = vrot.lane.b32.xlu1 %v12567_v1, %s10558_s14  ;;  %v10470_v1 = vld [vmem:[#allocation2 + $0xf8] sm:$0xff]  }
 0x4dc   : > { %v4144_v55 = vsel %vm3992_vm3, %v3933_v6, 0  ;;  %6785 = vrot.lane.b32.xlu0 %v12600_v54, %s10558_s14 }
 0x4de   : > { %v3981_v0 = vpop.permute.xlu1 %3980 }
 0x4df   : > { %v3965_v56 = vpop.permute.xlu0 %3964  ;;  %9686 = vmatprep.subr.msk.bf16.mxu1 %vm3992_vm3, %v3981_v0  ;;  %6773 = vrot.lane.b32.xlu1 %v12583_v59, %s10558_s14 }
 0x4e0   : > { %8794 = vmatmul.mubr.msk.bf16.gmra.mxu0 %vm3992_vm3, %v12769_v8  ;;  %8842 = vmatmul.mubr.msk.bf16.gmra.mxu1 %vm3992_vm3, %v12769_v8  ;;  %v4192_v34 = vsel %vm3992_vm3, %v3965_v56, 0 }
 0x4e1   : > { %8795 = vmatprep.mubr.msk.bf16.mxu0 %vm3992_vm3, %v12784_v46  ;;  %8843 = vmatprep.mubr.msk.bf16.mxu1 %vm3992_vm3, %v12784_v46 }
 0x4e2   : > { %8874 = vmatpush3.bf16.xpose.msra.mxu0 %v4144_v55  ;;  %8922 = vmatpush3.bf16.xpose.msra.mxu1 %v4192_v34  ;;  %v3947_v10 = vpop.permute.xlu1 %3946 }
 0x4e3   : > { %v3931_v5 = vpop.permute.xlu0 %3930  ;;  %9679 = vmatprep.subr.msk.bf16.mxu0 %vm3992_vm3, %v3947_v10  ;;  %6781 = vrot.lane.b32.xlu0 %v12623_v15, %s10558_s14 }
 0x4e4   : > { %v4141_v23 = vsel %vm3992_vm3, %v3931_v5, 0  ;;  %6787 = vrot.lane.b32.xlu1 %v12590_v39, %s10558_s14 }
 0x4e6   : > { %v3979_v26 = vpop.permute.xlu1 %3978 }
 0x4e7   : > { %v3963_v29 = vpop.permute.xlu0 %3962  ;;  %9687 = vmatprep.subr.msk.bf16.mxu1 %vm3992_vm3, %v3979_v26  ;;  %6811 = vrot.lane.b32.xlu0 %v10469_v63, %s10558_s14 }
 0x4e8   : > { %8796 = vmatmul.mubr.msk.bf16.gmra.mxu0 %vm3992_vm3, %v12784_v46  ;;  %8844 = vmatmul.mubr.msk.bf16.gmra.mxu1 %vm3992_vm3, %v12784_v46  ;;  %v4189_v41 = vsel %vm3992_vm3, %v3963_v29, 0 }
 0x4e9   : > { %8797 = vmatprep.mubr.msk.bf16.mxu0 %vm3992_vm3, %v12799_v25  ;;  %8845 = vmatprep.mubr.msk.bf16.mxu1 %vm3992_vm3, %v12799_v25 }
 0x4ea   : > { %8876 = vmatpush3.bf16.xpose.msra.mxu0 %v4141_v23  ;;  %8924 = vmatpush3.bf16.xpose.msra.mxu1 %v4189_v41 }
 0x4eb   : > { %v3945_v11 = vpop.permute.xlu1 %3944  ;;  %6771 = vrot.lane.b32.xlu1 %v12593_v61, %s10558_s14  ;;  %6823 = vrot.lane.b32.xlu0 %v12571_v17, %s10558_s14  ;;  %v10471_v17 = vld [vmem:[#allocation2 + $0xf0] sm:$0xff]  }
 0x4ec   : > { %v3929_v43 = vpop.permute.xlu0 %3928  ;;  %9680 = vmatprep.subr.msk.bf16.mxu0 %vm3992_vm3, %v3945_v11 }
 0x4ed   : > { %v4138_v33 = vsel %vm3992_vm3, %v3929_v43, 0 }
 0x4ef   : > { %v3977_v37 = vpop.permute.xlu1 %3976  ;;  %6769 = vrot.lane.b32.xlu1 %v12603_v42, %s10558_s14  ;;  %6807 = vrot.lane.b32.xlu0 %v12575_v47, %s10558_s14  ;;  %v10472_v47 = vld [vmem:[#allocation2 + $0xb0] sm:$0xff]  }
 0x4f0   : > { %8798 = vmatmul.mubr.msk.bf16.gmra.mxu0 %vm3992_vm3, %v12799_v25  ;;  %8846 = vmatmul.mubr.msk.bf16.gmra.mxu1 %vm3992_vm3, %v12799_v25  ;;  %v3961_v32 = vpop.permute.xlu0 %3960 }
 0x4f1   : > { %8799 = vmatprep.mubr.msk.bf16.mxu0 %vm3992_vm3, %v12814_v20  ;;  %8847 = vmatprep.mubr.msk.bf16.mxu1 %vm3992_vm3, %v12814_v20  ;;  %v4186_v31 = vsel %vm3992_vm3, %v3961_v32, 0 }
 0x4f2   : > { %9688 = vmatprep.subr.msk.bf16.mxu1 %vm3992_vm3, %v3977_v37  ;;  %8878 = vmatpush3.bf16.xpose.msra.mxu0 %v4138_v33 }
 0x4f3   : > { %8926 = vmatpush3.bf16.xpose.msra.mxu1 %v4186_v31  ;;  %6783 = vrot.lane.b32.xlu1 %v12610_v2, %s10558_s14 }
 0x4f7   : > { %6767 = vrot.lane.b32.xlu1 %v12613_v27, %s10558_s14 }
 0x4f8   : > { %8800 = vmatmul.mubr.msk.bf16.gmra.mxu0 %vm3992_vm3, %v12814_v20  ;;  %8848 = vmatmul.mubr.msk.bf16.gmra.mxu1 %vm3992_vm3, %v12814_v20 }
 0x4f9   : > { %8801 = vmatprep.mubr.msk.bf16.mxu0 %vm3992_vm3, %v12828_v36  ;;  %8849 = vmatprep.mubr.msk.bf16.mxu1 %vm3992_vm3, %v12828_v36 }
 0x4fb   : > { %6765 = vrot.lane.b32.xlu1 %v12626_v16, %s10558_s14 }
 0x4ff   : > { %6827 = vrot.lane.b32.xlu1 %v10470_v1, %s10558_s14 }
 0x500   : > { %8802 = vmatmul.mubr.msk.bf16.gmra.mxu0 %vm3992_vm3, %v12828_v36  ;;  %8850 = vmatmul.mubr.msk.bf16.gmra.mxu1 %vm3992_vm3, %v12828_v36 }
 0x501   : > { %8803 = vmatprep.mubr.msk.bf16.mxu0 %vm3992_vm3, %v12839_v13  ;;  %8851 = vmatprep.mubr.msk.bf16.mxu1 %vm3992_vm3, %v12839_v13 }
 0x503   : > { %6825 = vrot.lane.b32.xlu1 %v10471_v17, %s10558_s14 }
 0x507   : > { %6809 = vrot.lane.b32.xlu1 %v10472_v47, %s10558_s14 }
 0x508   : > { %8804 = vmatmul.mubr.msk.bf16.gmra.mxu0 %vm3992_vm3, %v12839_v13  ;;  %8852 = vmatmul.mubr.msk.bf16.gmra.mxu1 %vm3992_vm3, %v12839_v13 }
 0x509   : > { %8805 = vmatprep.mubr.msk.bf16.mxu0 %vm3992_vm3, %v12850_v50  ;;  %8853 = vmatprep.mubr.msk.bf16.mxu1 %vm3992_vm3, %v12850_v50 }
 0x510   : > { %8806 = vmatmul.mubr.msk.bf16.gmra.mxu0 %vm3992_vm3, %v12850_v50  ;;  %8854 = vmatmul.mubr.msk.bf16.gmra.mxu1 %vm3992_vm3, %v12850_v50 }
 0x511   : > { %8807 = vmatprep.mubr.msk.bf16.mxu0 %vm3992_vm3, %v12861_v24  ;;  %8855 = vmatprep.mubr.msk.bf16.mxu1 %vm3992_vm3, %v12861_v24 }
 0x518   : > { %8808 = vmatmul.mubr.msk.bf16.gmra.mxu0 %vm3992_vm3, %v12861_v24  ;;  %8856 = vmatmul.mubr.msk.bf16.gmra.mxu1 %vm3992_vm3, %v12861_v24 }
 0x519   : > { %8809 = vmatprep.mubr.msk.bf16.mxu0 %vm3992_vm3, %v12872_v38  ;;  %8857 = vmatprep.mubr.msk.bf16.mxu1 %vm3992_vm3, %v12872_v38 }
 0x520   : > { %8810 = vmatmul.mubr.msk.bf16.gmra.mxu0 %vm3992_vm3, %v12872_v38  ;;  %8858 = vmatmul.mubr.msk.bf16.gmra.mxu1 %vm3992_vm3, %v12872_v38 }
 0x521   : > { %8811 = vmatprep.mubr.msk.bf16.mxu0 %vm3992_vm3, %v12883_v22  ;;  %8859 = vmatprep.mubr.msk.bf16.mxu1 %vm3992_vm3, %v12883_v22 }
 0x528   : > { %8812 = vmatmul.mubr.msk.bf16.gmra.mxu0 %vm3992_vm3, %v12883_v22  ;;  %8860 = vmatmul.mubr.msk.bf16.gmra.mxu1 %vm3992_vm3, %v12883_v22 }
 0x529   : > { %8813 = vmatprep.mubr.msk.bf16.mxu0 %vm3992_vm3, %v12894_v49  ;;  %8861 = vmatprep.mubr.msk.bf16.mxu1 %vm3992_vm3, %v12894_v49 }
 0x530   : > { %8814 = vmatmul.mubr.msk.bf16.gmra.mxu0 %vm3992_vm3, %v12894_v49  ;;  %8862 = vmatmul.mubr.msk.bf16.gmra.mxu1 %vm3992_vm3, %v12894_v49 }
 0x531   : > { %8879 = vmatprep.mubr.msk.bf16.mxu0 %vm3992_vm3, %v12635_v57  ;;  %8927 = vmatprep.mubr.msk.bf16.mxu1 %vm3992_vm3, %v12635_v57 }
 0x538   : > { %8880 = vmatmul.mubr.msk.bf16.vlgmr.msra.gmra.mxu0 %vm3992_vm3, %v12635_v57  ;;  %8928 = vmatmul.mubr.msk.bf16.vlgmr.msra.gmra.mxu1 %vm3992_vm3, %v12635_v57 }
 0x539   : > { %8881 = vmatprep.mubr.msk.bf16.mxu0 %vm3992_vm3, %v12709_v48  ;;  %8929 = vmatprep.mubr.msk.bf16.mxu1 %vm3992_vm3, %v12709_v48 }
 0x540   : > { %8882 = vmatmul.mubr.msk.bf16.gmra.mxu0 %vm3992_vm3, %v12709_v48  ;;  %8930 = vmatmul.mubr.msk.bf16.gmra.mxu1 %vm3992_vm3, %v12709_v48 }
 0x541   : > { %8883 = vmatprep.mubr.msk.bf16.mxu0 %vm3992_vm3, %v12724_v21  ;;  %8931 = vmatprep.mubr.msk.bf16.mxu1 %vm3992_vm3, %v12724_v21 }
 0x548   : > { %8884 = vmatmul.mubr.msk.bf16.gmra.mxu0 %vm3992_vm3, %v12724_v21  ;;  %8932 = vmatmul.mubr.msk.bf16.gmra.mxu1 %vm3992_vm3, %v12724_v21 }
 0x549   : > { %8885 = vmatprep.mubr.msk.bf16.mxu0 %vm3992_vm3, %v12739_v12  ;;  %8933 = vmatprep.mubr.msk.bf16.mxu1 %vm3992_vm3, %v12739_v12 }
 0x550   : > { %8886 = vmatmul.mubr.msk.bf16.gmra.mxu0 %vm3992_vm3, %v12739_v12  ;;  %8934 = vmatmul.mubr.msk.bf16.gmra.mxu1 %vm3992_vm3, %v12739_v12 }
 0x551   : > { %8887 = vmatprep.mubr.msk.bf16.mxu0 %vm3992_vm3, %v12754_v52  ;;  %8935 = vmatprep.mubr.msk.bf16.mxu1 %vm3992_vm3, %v12754_v52 }
 0x558   : > { %8888 = vmatmul.mubr.msk.bf16.gmra.mxu0 %vm3992_vm3, %v12754_v52  ;;  %8936 = vmatmul.mubr.msk.bf16.gmra.mxu1 %vm3992_vm3, %v12754_v52 }
 0x559   : > { %8889 = vmatprep.mubr.msk.bf16.mxu0 %vm3992_vm3, %v12769_v8  ;;  %8937 = vmatprep.mubr.msk.bf16.mxu1 %vm3992_vm3, %v12769_v8 }
 0x560   : > { %8890 = vmatmul.mubr.msk.bf16.gmra.mxu0 %vm3992_vm3, %v12769_v8  ;;  %8938 = vmatmul.mubr.msk.bf16.gmra.mxu1 %vm3992_vm3, %v12769_v8 }
 0x561   : > { %8891 = vmatprep.mubr.msk.bf16.mxu0 %vm3992_vm3, %v12784_v46  ;;  %8939 = vmatprep.mubr.msk.bf16.mxu1 %vm3992_vm3, %v12784_v46 }
 0x568   : > { %8892 = vmatmul.mubr.msk.bf16.gmra.mxu0 %vm3992_vm3, %v12784_v46  ;;  %8940 = vmatmul.mubr.msk.bf16.gmra.mxu1 %vm3992_vm3, %v12784_v46 }
 0x569   : > { %8893 = vmatprep.mubr.msk.bf16.mxu0 %vm3992_vm3, %v12799_v25  ;;  %8941 = vmatprep.mubr.msk.bf16.mxu1 %vm3992_vm3, %v12799_v25 }
 0x570   : > { %8894 = vmatmul.mubr.msk.bf16.gmra.mxu0 %vm3992_vm3, %v12799_v25  ;;  %8942 = vmatmul.mubr.msk.bf16.gmra.mxu1 %vm3992_vm3, %v12799_v25 }
 0x571   : > { %8895 = vmatprep.mubr.msk.bf16.mxu0 %vm3992_vm3, %v12814_v20  ;;  %8943 = vmatprep.mubr.msk.bf16.mxu1 %vm3992_vm3, %v12814_v20 }
 0x578   : > { %v13012_v58 = vpop.f32.mrf.mxu0  ;;  %v13014_v59 = vpop.f32.mrf.mxu1  ;;  %8896 = vmatmul.mubr.msk.bf16.gmra.mxu0 %vm3992_vm3, %v12814_v20  ;;  %8944 = vmatmul.mubr.msk.bf16.gmra.mxu1 %vm3992_vm3, %v12814_v20 }
 0x579   : > { %17797 = vst [vmem:[#allocation70_spill] sm:$0xff] %v13012_v58  ;;  %17798 = vst [vmem:[#allocation71_spill] sm:$0xff] %v13014_v59  ;;  %8897 = vmatprep.mubr.msk.bf16.mxu0 %vm3992_vm3, %v12828_v36  ;;  %8945 = vmatprep.mubr.msk.bf16.mxu1 %vm3992_vm3, %v12828_v36 }
 0x57a   : > { %v13024_v39 = vpop.f32.mrf.mxu0  ;;  %v13026_v61 = vpop.f32.mrf.mxu1 }
 0x57b   : > { %17799 = vst [vmem:[#allocation72_spill] sm:$0xff] %v13024_v39 }
 0x57c   : > { %v13028_v54 = vpop.f32.mrf.mxu0  ;;  %v13030_v42 = vpop.f32.mrf.mxu1 }
 0x57d   : > { %17800 = vst [vmem:[#allocation73_spill] sm:$0xff] %v13028_v54  ;;  %17801 = vst [vmem:[#allocation74_spill] sm:$0xff] %v13030_v42 }
 0x57e   : > { %v13032_v2 = vpop.f32.mrf.mxu0  ;;  %v13034_v27 = vpop.f32.mrf.mxu1 }
 0x57f   : > { %17802 = vst [vmem:[#allocation75_spill] sm:$0xff] %v13032_v2 }
 0x580   : > { %v13036_v15 = vpop.f32.mrf.mxu0  ;;  %v13038_v16 = vpop.f32.mrf.mxu1  ;;  %8898 = vmatmul.mubr.msk.bf16.gmra.mxu0 %vm3992_vm3, %v12828_v36  ;;  %8946 = vmatmul.mubr.msk.bf16.gmra.mxu1 %vm3992_vm3, %v12828_v36 }
 0x581   : > { %17803 = vst [vmem:[#allocation76_spill] sm:$0xff] %v13036_v15  ;;  %17804 = vst [vmem:[#allocation77_spill] sm:$0xff] %v13038_v16  ;;  %8899 = vmatprep.mubr.msk.bf16.mxu0 %vm3992_vm3, %v12839_v13  ;;  %8947 = vmatprep.mubr.msk.bf16.mxu1 %vm3992_vm3, %v12839_v13 }
 0x582   : > { %v13048_v57 = vpop.f32.mrf.mxu0  ;;  %v13050_v48 = vpop.f32.mrf.mxu1 }
 0x583   : > { %17805 = vst [vmem:[#allocation78_spill] sm:$0xff] %v13048_v57 }
 0x584   : > { %v13052_v21 = vpop.f32.mrf.mxu0  ;;  %v13054_v12 = vpop.f32.mrf.mxu1 }
 0x585   : > { %17806 = vst [vmem:[#allocation79_spill] sm:$0xff] %v13052_v21 }
 0x586   : > { %v13056_v44 = vpop.f32.mrf.mxu0  ;;  %v13058_v51 = vpop.f32.mrf.mxu1 }
 0x587   : > { %17807 = vst [vmem:[#allocation80_spill] sm:$0xff] %v13056_v44 }
 0x588   : > { %v13060_v52 = vpop.f32.mrf.mxu0  ;;  %v13062_v28 = vpop.f32.mrf.mxu1  ;;  %8900 = vmatmul.mubr.msk.bf16.gmra.mxu0 %vm3992_vm3, %v12839_v13  ;;  %8948 = vmatmul.mubr.msk.bf16.gmra.mxu1 %vm3992_vm3, %v12839_v13 }
 0x589   : > { %8901 = vmatprep.mubr.msk.bf16.mxu0 %vm3992_vm3, %v12850_v50  ;;  %8949 = vmatprep.mubr.msk.bf16.mxu1 %vm3992_vm3, %v12850_v50 }
 0x58a   : > { %v13072_v30 = vpop.f32.mrf.mxu0  ;;  %v13074_v19 = vpop.f32.mrf.mxu1 }
 0x58b   : > { %17808 = vst [vmem:[#allocation81_spill] sm:$0xff] %v13072_v30 }
 0x58c   : > { %v13076_v7 = vpop.f32.mrf.mxu0  ;;  %v13078_v4 = vpop.f32.mrf.mxu1 }
 0x58d   : > { %17809 = vst [vmem:[#allocation82_spill] sm:$0xff] %v13076_v7 }
 0x58e   : > { %v13080_v35 = vpop.f32.mrf.mxu0  ;;  %v13082_v8 = vpop.f32.mrf.mxu1 }
 0x58f   : > { %17810 = vst [vmem:[#allocation83_spill] sm:$0xff] %v13080_v35 }
 0x590   : > { %v13084_v18 = vpop.f32.mrf.mxu0  ;;  %v13086_v40 = vpop.f32.mrf.mxu1  ;;  %8902 = vmatmul.mubr.msk.bf16.gmra.mxu0 %vm3992_vm3, %v12850_v50  ;;  %8950 = vmatmul.mubr.msk.bf16.gmra.mxu1 %vm3992_vm3, %v12850_v50 }
 0x591   : > { %8903 = vmatprep.mubr.msk.bf16.mxu0 %vm3992_vm3, %v12861_v24  ;;  %8951 = vmatprep.mubr.msk.bf16.mxu1 %vm3992_vm3, %v12861_v24 }
 0x592   : > { %v13096_v14 = vpop.f32.mrf.mxu0  ;;  %v13098_v45 = vpop.f32.mrf.mxu1 }
 0x594   : > { %v13100_v9 = vpop.f32.mrf.mxu0  ;;  %v13102_v6 = vpop.f32.mrf.mxu1 }
 0x595   : > { %17811 = vst [vmem:[#allocation84_spill] sm:$0xff] %v13100_v9 }
 0x596   : > { %v13104_v46 = vpop.f32.mrf.mxu0  ;;  %v13106_v0 = vpop.f32.mrf.mxu1 }
 0x597   : > { %17812 = vst [vmem:[#allocation85_spill] sm:$0xff] %v13104_v46 }
 0x598   : > { %v13108_v55 = vpop.f32.mrf.mxu0  ;;  %v13110_v56 = vpop.f32.mrf.mxu1  ;;  %8904 = vmatmul.mubr.msk.bf16.gmra.mxu0 %vm3992_vm3, %v12861_v24  ;;  %8952 = vmatmul.mubr.msk.bf16.gmra.mxu1 %vm3992_vm3, %v12861_v24 }
 0x599   : > { %8905 = vmatprep.mubr.msk.bf16.mxu0 %vm3992_vm3, %v12872_v38  ;;  %8953 = vmatprep.mubr.msk.bf16.mxu1 %vm3992_vm3, %v12872_v38 }
 0x59a   : > { %v13120_v34 = vpop.f32.mrf.mxu0  ;;  %v13122_v10 = vpop.f32.mrf.mxu1 }
 0x59c   : > { %v13124_v5 = vpop.f32.mrf.mxu0  ;;  %v13126_v25 = vpop.f32.mrf.mxu1 }
 0x59d   : > { %17813 = vst [vmem:[#allocation86_spill] sm:$0xff] %v13124_v5 }
 0x59e   : > { %v13128_v26 = vpop.f32.mrf.mxu0  ;;  %v13130_v23 = vpop.f32.mrf.mxu1 }
 0x59f   : > { %17814 = vst [vmem:[#allocation87_spill] sm:$0xff] %v13128_v26 }
 0x5a0   : > { %v13132_v29 = vpop.f32.mrf.mxu0  ;;  %v13134_v41 = vpop.f32.mrf.mxu1  ;;  %8906 = vmatmul.mubr.msk.bf16.gmra.mxu0 %vm3992_vm3, %v12872_v38  ;;  %8954 = vmatmul.mubr.msk.bf16.gmra.mxu1 %vm3992_vm3, %v12872_v38 }
 0x5a1   : > { %8907 = vmatprep.mubr.msk.bf16.mxu0 %vm3992_vm3, %v12883_v22  ;;  %8955 = vmatprep.mubr.msk.bf16.mxu1 %vm3992_vm3, %v12883_v22 }
 0x5a2   : > { %v13144_v11 = vpop.f32.mrf.mxu0  ;;  %v13146_v43 = vpop.f32.mrf.mxu1 }
 0x5a4   : > { %v13148_v20 = vpop.f32.mrf.mxu0  ;;  %v13150_v33 = vpop.f32.mrf.mxu1 }
 0x5a5   : > { %17815 = vst [vmem:[#allocation88_spill] sm:$0xff] %v13148_v20  ;;  %17816 = vst [vmem:[#allocation89_spill] sm:$0xff] %v13150_v33 }
 0x5a6   : > { %v13152_v37 = vpop.f32.mrf.mxu0  ;;  %v13154_v32 = vpop.f32.mrf.mxu1 }
 0x5a7   : > { %17817 = vst [vmem:[#allocation90_spill] sm:$0xff] %v13152_v37  ;;  %17818 = vst [vmem:[#allocation91_spill] sm:$0xff] %v13154_v32 }
 0x5a8   : > { %v13156_v31 = vpop.f32.mrf.mxu0  ;;  %v13158_v36 = vpop.f32.mrf.mxu1  ;;  %8908 = vmatmul.mubr.msk.bf16.gmra.mxu0 %vm3992_vm3, %v12883_v22  ;;  %8956 = vmatmul.mubr.msk.bf16.gmra.mxu1 %vm3992_vm3, %v12883_v22 }
 0x5a9   : > { %17819 = vst [vmem:[#allocation92_spill] sm:$0xff] %v13156_v31  ;;  %17820 = vst [vmem:[#allocation93_spill] sm:$0xff] %v13158_v36  ;;  %8909 = vmatprep.mubr.msk.bf16.mxu0 %vm3992_vm3, %v12894_v49  ;;  %8957 = vmatprep.mubr.msk.bf16.mxu1 %vm3992_vm3, %v12894_v49 }
 0x5aa   : > { %v13168_v13 = vpop.f32.mrf.mxu0  ;;  %v13170_v50 = vpop.f32.mrf.mxu1 }
 0x5ab   : > { %17821 = vst [vmem:[#allocation94_spill] sm:$0xff] %v13168_v13  ;;  %17822 = vst [vmem:[#allocation95_spill] sm:$0xff] %v13170_v50 }
 0x5ac   : > { %v13172_v24 = vpop.f32.mrf.mxu0  ;;  %v13174_v38 = vpop.f32.mrf.mxu1 }
 0x5ad   : > { %17823 = vst [vmem:[#allocation96_spill] sm:$0xff] %v13172_v24  ;;  %17824 = vst [vmem:[#allocation97_spill] sm:$0xff] %v13174_v38 }
 0x5ae   : > { %v13176_v60 = vpop.f32.mrf.mxu0  ;;  %v13178_v62 = vpop.f32.mrf.mxu1 }
 0x5af   : > { %17825 = vst [vmem:[#allocation98_spill] sm:$0xff] %v13176_v60  ;;  %17826 = vst [vmem:[#allocation99_spill] sm:$0xff] %v13178_v62 }
 0x5b0   : > { %v13180_v53 = vpop.f32.mrf.mxu0  ;;  %v13182_v22 = vpop.f32.mrf.mxu1  ;;  %8910 = vmatmul.mubr.msk.bf16.gmra.mxu0 %vm3992_vm3, %v12894_v49  ;;  %8958 = vmatmul.mubr.msk.bf16.gmra.mxu1 %vm3992_vm3, %v12894_v49 }
 0x5b1   : > { %17827 = vst [vmem:[#allocation100_spill] sm:$0xff] %v13180_v53  ;;  %17828 = vst [vmem:[#allocation101_spill] sm:$0xff] %v13182_v22 }
 0x5b2   : > { %v13188_v3 = vpop.f32.mrf.mxu0  ;;  %v13190_v63 = vpop.f32.mrf.mxu1 }
 0x5b3   : > { %17829 = vst [vmem:[#allocation102_spill] sm:$0xff] %v13188_v3  ;;  %17830 = vst [vmem:[#allocation103_spill] sm:$0xff] %v13190_v63 }
 0x5b4   : > { %v13192_v1 = vpop.f32.mrf.mxu0  ;;  %v13194_v17 = vpop.f32.mrf.mxu1 }
 0x5b5   : > { %17831 = vst [vmem:[#allocation104_spill] sm:$0xff] %v13192_v1  ;;  %17832 = vst [vmem:[#allocation105_spill] sm:$0xff] %v13194_v17 }
 0x5b6   : > { %v13196_v47 = vpop.f32.mrf.mxu0  ;;  %v13198_v62 = vpop.f32.mrf.mxu1 }
 0x5b7   : > { %17833 = vst [vmem:[#allocation106_spill] sm:$0xff] %v13196_v47  ;;  %17834 = vst [vmem:[#allocation107_spill] sm:$0xff] %v13198_v62 }
 0x5b8   : > { %v13200_v53 = vpop.f32.mrf.mxu0  ;;  %v13202_v22 = vpop.f32.mrf.mxu1 }
 0x5b9   : > { %17835 = vst [vmem:[#allocation108_spill] sm:$0xff] %v13200_v53  ;;  %17836 = vst [vmem:[#allocation109_spill] sm:$0xff] %v13202_v22 }
 0x5ba   : > { %v13204_v38 = vpop.f32.mrf.mxu0  ;;  %v13206_v50 = vpop.f32.mrf.mxu1 }
 0x5bb   : > { %17837 = vst [vmem:[#allocation110_spill] sm:$0xff] %v13204_v38  ;;  %17838 = vst [vmem:[#allocation111_spill] sm:$0xff] %v13206_v50 }
 0x5bc   : > { %v13208_v49 = vpop.f32.mrf.mxu0  ;;  %v13210_v3 = vpop.f32.mrf.mxu1 }
 0x5bd   : > { %17839 = vst [vmem:[#allocation112_spill] sm:$0xff] %v13208_v49  ;;  %17840 = vst [vmem:[#allocation113_spill] sm:$0xff] %v13210_v3 }
 0x5be   : > { %v13212_v63 = vpop.f32.mrf.mxu0  ;;  %v13214_v1 = vpop.f32.mrf.mxu1 }
 0x5bf   : > { %17841 = vst [vmem:[#allocation114_spill] sm:$0xff] %v13212_v63  ;;  %17842 = vst [vmem:[#allocation115_spill] sm:$0xff] %v13214_v1 }
 0x5c0   : > { %v13216_v17 = vpop.f32.mrf.mxu0  ;;  %v13218_v47 = vpop.f32.mrf.mxu1 }
 0x5c1   : > { %17843 = vst [vmem:[#allocation116_spill] sm:$0xff] %v13216_v17  ;;  %17844 = vst [vmem:[#allocation117_spill] sm:$0xff] %v13218_v47 }
 0x5c2   : > { %v13220_v62 = vpop.f32.mrf.mxu0  ;;  %v13222_v53 = vpop.f32.mrf.mxu1 }
 0x5c3   : > { %17845 = vst [vmem:[#allocation118_spill] sm:$0xff] %v13220_v62  ;;  %17846 = vst [vmem:[#allocation119_spill] sm:$0xff] %v13222_v53 }
 0x5c4   : > { %v13224_v22 = vpop.f32.mrf.mxu0  ;;  %v13226_v38 = vpop.f32.mrf.mxu1 }
 0x5c5   : > { %17847 = vst [vmem:[#allocation120_spill] sm:$0xff] %v13224_v22  ;;  %17848 = vst [vmem:[#allocation121_spill] sm:$0xff] %v13226_v38 }
 0x5c6   : > { %v13228_v50 = vpop.f32.mrf.mxu0  ;;  %v13230_v49 = vpop.f32.mrf.mxu1 }
 0x5c7   : > { %17849 = vst [vmem:[#allocation122_spill] sm:$0xff] %v13228_v50  ;;  %17850 = vst [vmem:[#allocation123_spill] sm:$0xff] %v13230_v49 }
 0x5c8   : > { %v13232_v3 = vpop.f32.mrf.mxu0  ;;  %v13234_v63 = vpop.f32.mrf.mxu1 }
 0x5c9   : > { %17851 = vst [vmem:[#allocation124_spill] sm:$0xff] %v13232_v3  ;;  %17852 = vst [vmem:[#allocation125_spill] sm:$0xff] %v13234_v63  ;;  %v6796_v63 = vpop.permute.xlu1 %6795 }
 0x5ca   : > { %v13236_v1 = vpop.f32.mrf.mxu0  ;;  %v13238_v17 = vpop.f32.mrf.mxu1  ;;  %8959 = vmatprep.subr.bf16.mxu0 %v6796_v63  ;;  %9641 = vmatprep.subr.bf16.mxu1 %v6796_v63 }
 0x5cb   : > { %17853 = vst [vmem:[#allocation126_spill] sm:$0xff] %v13236_v1  ;;  %17854 = vst [vmem:[#allocation127_spill] sm:$0xff] %v13238_v17 }
 0x5cc   : > { %v13240_v47 = vpop.f32.mrf.mxu0  ;;  %v13242_v62 = vpop.f32.mrf.mxu1 }
 0x5cd   : > { %17855 = vst [vmem:[#allocation128_spill] sm:$0xff] %v13240_v47  ;;  %17856 = vst [vmem:[#allocation129_spill] sm:$0xff] %v13242_v62 }
 0x5ce   : > { %v13244_v53 = vpop.f32.mrf.mxu0  ;;  %v13246_v22 = vpop.f32.mrf.mxu1 }
 0x5cf   : > { %17857 = vst [vmem:[#allocation130_spill] sm:$0xff] %v13244_v53  ;;  %17858 = vst [vmem:[#allocation131_spill] sm:$0xff] %v13246_v22  ;;  %v6794_v22 = vpop.permute.xlu1 %6793 }
 0x5d0   : > { %v13248_v38 = vpop.f32.mrf.mxu0  ;;  %v13250_v50 = vpop.f32.mrf.mxu1 }
 0x5d1   : > { %17859 = vst [vmem:[#allocation132_spill] sm:$0xff] %v13248_v38  ;;  %17860 = vst [vmem:[#allocation133_spill] sm:$0xff] %v13250_v50 }
 0x5d2   : > { %v13252_v49 = vpop.f32.mrf.mxu0  ;;  %v13254_v3 = vpop.f32.mrf.mxu1 }
 0x5d3   : > { %17861 = vst [vmem:[#allocation134_spill] sm:$0xff] %v13252_v49  ;;  %17862 = vst [vmem:[#allocation135_spill] sm:$0xff] %v13254_v3  ;;  %v6792_v3 = vpop.permute.xlu1 %6791 }
 0x5d4   : > { %v13256_v1 = vpop.f32.mrf.mxu0  ;;  %v13258_v17 = vpop.f32.mrf.mxu1 }
 0x5d5   : > { %17863 = vst [vmem:[#allocation136_spill] sm:$0xff] %v13256_v1  ;;  %17864 = vst [vmem:[#allocation137_spill] sm:$0xff] %v13258_v17 }
 0x5d6   : > { %v13260_v62 = vpop.f32.mrf.mxu0  ;;  %v13262_v47 = vpop.f32.mrf.mxu1 }
 0x5d7   : > { %17865 = vst [vmem:[#allocation138_spill] sm:$0xff] %v13260_v62  ;;  %17866 = vst [vmem:[#allocation139_spill] sm:$0xff] %v13262_v47  ;;  %v6776_v62 = vpop.permute.xlu1 %6775  ;;  %v6780_v47 = vpop.permute.xlu0 %6779 }
 0x5d8   : > { %v13264_v53 = vpop.f32.mrf.mxu0  ;;  %v13266_v38 = vpop.f32.mrf.mxu1  ;;  %8960 = vmatpush3.bf16.msra.mxu0 %v6780_v47  ;;  %9649 = vmatpush3.bf16.msra.mxu1 %v6780_v47 }
 0x5d9   : > { %17867 = vst [vmem:[#allocation140_spill] sm:$0xff] %v13264_v53  ;;  %17868 = vst [vmem:[#allocation141_spill] sm:$0xff] %v13266_v38  ;;  %8961 = vmatprep.subr.bf16.mxu0 %v6794_v22  ;;  %9642 = vmatprep.subr.bf16.mxu1 %v6794_v22 }
 0x5da   : > { %v13268_v50 = vpop.f32.mrf.mxu0  ;;  %v13270_v49 = vpop.f32.mrf.mxu1 }
 0x5db   : > { %17869 = vst [vmem:[#allocation142_spill] sm:$0xff] %v13268_v50  ;;  %17870 = vst [vmem:[#allocation143_spill] sm:$0xff] %v13270_v49 }
 0x5dc   : > { %v13272_v24 = vpop.f32.mrf.mxu0  ;;  %v13274_v1 = vpop.f32.mrf.mxu1 }
 0x5dd   : > { %17871 = vst [vmem:[#allocation144_spill] sm:$0xff] %v13272_v24  ;;  %17872 = vst [vmem:[#allocation145_spill] sm:$0xff] %v13274_v1  ;;  %v6774_v24 = vpop.permute.xlu1 %6773  ;;  %v6778_v1 = vpop.permute.xlu0 %6777 }
 0x5de   : > { %v13276_v17 = vpop.f32.mrf.mxu0  ;;  %v13278_v63 = vpop.f32.mrf.mxu1  ;;  %8962 = vmatpush3.bf16.msra.mxu0 %v6778_v1  ;;  %9650 = vmatpush3.bf16.msra.mxu1 %v6778_v1 }
 0x5df   : > { %17873 = vst [vmem:[#allocation146_spill] sm:$0xff] %v13276_v17  ;;  %17874 = vst [vmem:[#allocation147_spill] sm:$0xff] %v13278_v63  ;;  %8963 = vmatprep.subr.bf16.mxu0 %v6792_v3  ;;  %9643 = vmatprep.subr.bf16.mxu1 %v6792_v3 }
 0x5e0   : > { %v13280_v60 = vpop.f32.mrf.mxu0  ;;  %v13282_v53 = vpop.f32.mrf.mxu1 }
 0x5e1   : > { %17875 = vst [vmem:[#allocation148_spill] sm:$0xff] %v13280_v60  ;;  %17876 = vst [vmem:[#allocation149_spill] sm:$0xff] %v13282_v53  ;;  %v6788_v47 = vpop.permute.xlu1 %6787 }
 0x5e2   : > { %v13284_v49 = vpop.f32.mrf.mxu0  ;;  %v13286_v38 = vpop.f32.mrf.mxu1  ;;  %8964 = vmatpush3.bf16.msra.mxu0 %v6776_v62  ;;  %9651 = vmatpush3.bf16.msra.mxu1 %v6776_v62  ;;  %v5005_v62 = vmax.f32 %v13012_v58, %v13024_v39 }
 0x5e3   : > { %17877 = vst [vmem:[#allocation150_spill] sm:$0xff] %v13284_v49  ;;  %17878 = vst [vmem:[#allocation151_spill] sm:$0xff] %v13286_v38  ;;  %v6790_v49 = vpop.permute.xlu0 %6789 }
 0x5e4   : > { %v13288_v50 = vpop.f32.mrf.mxu0  ;;  %v13290_v17 = vpop.f32.mrf.mxu1  ;;  %8965 = vmatprep.subr.bf16.mxu0 %v6790_v49  ;;  %9644 = vmatprep.subr.bf16.mxu1 %v6790_v49 }
 0x5e5   : > { %17879 = vst [vmem:[#allocation152_spill] sm:$0xff] %v13288_v50  ;;  %17880 = vst [vmem:[#allocation153_spill] sm:$0xff] %v13290_v17  ;;  %v6772_v17 = vpop.permute.xlu1 %6771 }
 0x5e6   : > { %v13292_v63 = vpop.f32.mrf.mxu0  ;;  %v13294_v53 = vpop.f32.mrf.mxu1  ;;  %8966 = vmatpush3.bf16.msra.mxu0 %v6774_v24  ;;  %9652 = vmatpush3.bf16.msra.mxu1 %v6774_v24  ;;  %v5006_v24 = vmax.f32 %v5005_v62, %v13014_v59 }
 0x5e7   : > { %17881 = vst [vmem:[#allocation154_spill] sm:$0xff] %v13292_v63  ;;  %17882 = vst [vmem:[#allocation155_spill] sm:$0xff] %v13294_v53  ;;  %8967 = vmatprep.subr.bf16.mxu0 %v6788_v47  ;;  %9645 = vmatprep.subr.bf16.mxu1 %v6788_v47 }
 0x5e8   : > { %v13296_v22 = vpop.f32.mrf.mxu0  ;;  %v13298_v60 = vpop.f32.mrf.mxu1  ;;  %v5007_v62 = vmax.f32 %v5006_v24, %v13026_v61 }
 0x5e9   : > { %17883 = vst [vmem:[#allocation156_spill] sm:$0xff] %v13296_v22  ;;  %17884 = vst [vmem:[#allocation157_spill] sm:$0xff] %v13298_v60 }
 0x5ea   : > { %v13300_v38 = vpop.f32.mrf.mxu0  ;;  %v13302_v50 = vpop.f32.mrf.mxu1  ;;  %8968 = vmatpush3.bf16.msra.mxu0 %v6772_v17  ;;  %9653 = vmatpush3.bf16.msra.mxu1 %v6772_v17 }
 0x5eb   : > { %17885 = vst [vmem:[#allocation158_spill] sm:$0xff] %v13300_v38  ;;  %17886 = vst [vmem:[#allocation159_spill] sm:$0xff] %v13302_v50  ;;  %v6770_v50 = vpop.permute.xlu1 %6769 }
 0x5ec   : > { %v13304_v1 = vpop.f32.mrf.mxu0  ;;  %v13306_v3 = vpop.f32.mrf.mxu1 }
 0x5ed   : > { %17887 = vst [vmem:[#allocation160_spill] sm:$0xff] %v13304_v1  ;;  %17888 = vst [vmem:[#allocation161_spill] sm:$0xff] %v13306_v3  ;;  %v6786_v1 = vpop.permute.xlu0 %6785 }
 0x5ee   : > { %v13308_v53 = vpop.f32.mrf.mxu0  ;;  %v13310_v22 = vpop.f32.mrf.mxu1  ;;  %8969 = vmatprep.subr.bf16.mxu0 %v6786_v1  ;;  %9646 = vmatprep.subr.bf16.mxu1 %v6786_v1 }
 0x5ef   : > { %17889 = vst [vmem:[#allocation162_spill] sm:$0xff] %v13308_v53  ;;  %17890 = vst [vmem:[#allocation163_spill] sm:$0xff] %v13310_v22  ;;  %v5014_v22 = vmax.f32 %v13028_v54, %v13032_v2  ;;  %v6784_v47 = vpop.permute.xlu1 %6783  ;;  %8970 = vmatpush3.bf16.msra.mxu0 %v6770_v50  ;;  %9654 = vmatpush3.bf16.msra.mxu1 %v6770_v50  ;;  %v5023_v54 = vmax.f32 %v13036_v15, %v13048_v57 }
 0x5f0   : > { %v13314_v60 = vpop.f32.mrf.mxu0  ;;  %v13316_v38 = vpop.f32.mrf.mxu1  ;;  %8971 = vmatprep.subr.bf16.mxu0 %v6784_v47  ;;  %9647 = vmatprep.subr.bf16.mxu1 %v6784_v47  ;;  %v5032_v47 = vmax.f32 %v13052_v21, %v13056_v44 }
 0x5f1   : > { %17891 = vst [vmem:[#allocation164_spill] sm:$0xff] %v13314_v60  ;;  %17892 = vst [vmem:[#allocation165_spill] sm:$0xff] %v13316_v38  ;;  %v5015_v2 = vmax.f32 %v5014_v22, %v13030_v42  ;;  %v6782_v1 = vpop.permute.xlu0 %6781  ;;  %v5024_v57 = vmax.f32 %v5023_v54, %v13038_v16 }
 0x5f2   : > { %v13318_v3 = vpop.f32.mrf.mxu0  ;;  %v13320_v49 = vpop.f32.mrf.mxu1  ;;  %v5033_v21 = vmax.f32 %v5032_v47, %v13054_v12 }
 0x5f3   : > { %17893 = vst [vmem:[#allocation166_spill] sm:$0xff] %v13318_v3  ;;  %17894 = vst [vmem:[#allocation167_spill] sm:$0xff] %v13320_v49  ;;  %v6768_v59 = vpop.permute.xlu1 %6767  ;;  %v5016_v22 = vmax.f32 %v5015_v2, %v13034_v27  ;;  %v5025_v54 = vmax.f32 %v5024_v57, %v13050_v48 }
 0x5f4   : > { %v13325_v53 = vpop.f32.mrf.mxu0  ;;  %v13327_v39 = vpop.f32.mrf.mxu1  ;;  %8972 = vmatpush3.bf16.msra.mxu0 %v6768_v59  ;;  %9655 = vmatpush3.bf16.msra.mxu1 %v6768_v59  ;;  %v5034_v57 = vmax.f32 %v5033_v21, %v13058_v51 }
 0x5f5   : > { %17895 = vst [vmem:[#allocation168_spill] sm:$0xff] %v13325_v53  ;;  %17896 = vst [vmem:[#allocation169_spill] sm:$0xff] %v13327_v39  ;;  %8973 = vmatprep.subr.bf16.mxu0 %v6782_v1  ;;  %9648 = vmatprep.subr.bf16.mxu1 %v6782_v1 }
 0x5f6   : > { %v13329_v17 = vpop.f32.mrf.mxu0  ;;  %v13331_v58 = vpop.f32.mrf.mxu1 }
 0x5f7   : > { %17897 = vst [vmem:[#allocation170_spill] sm:$0xff] %v13329_v17  ;;  %17898 = vst [vmem:[#allocation171_spill] sm:$0xff] %v13331_v58  ;;  %v6766_v42 = vpop.permute.xlu1 %6765 }
 0x5f8   : > { %v13337_v49 = vpop.f32.mrf.mxu0  ;;  %v13339_v39 = vpop.f32.mrf.mxu1  ;;  %8974 = vmatpush3.bf16.msra.mxu0 %v6766_v42  ;;  %9656 = vmatpush3.bf16.msra.mxu1 %v6766_v42 }
 0x5f9   : > { %17899 = vst [vmem:[#allocation172_spill] sm:$0xff] %v13337_v49  ;;  %17900 = vst [vmem:[#allocation173_spill] sm:$0xff] %v13339_v39  ;;  %v5008_v50 = vmax.f32 %v5007_v62, %v13337_v49 }
 0x5fa   : > { %v13344_v58 = vpop.f32.mrf.mxu0  ;;  %v13346_v24 = vpop.f32.mrf.mxu1 }
 0x5fb   : > { %17901 = vst [vmem:[#allocation174_spill] sm:$0xff] %v13344_v58  ;;  %17902 = vst [vmem:[#allocation175_spill] sm:$0xff] %v13346_v24  ;;  %v5009_v15 = vmax.f32 %v5008_v50, %v13344_v58  ;;  %v5041_v50 = vmax.f32 %v13060_v52, %v13072_v30 }
 0x5fc   : > { %v13351_v62 = vpop.f32.mrf.mxu0  ;;  %v13353_v49 = vpop.f32.mrf.mxu1 }
 0x5fd   : > { %17903 = vst [vmem:[#allocation176_spill] sm:$0xff] %v13351_v62  ;;  %17904 = vst [vmem:[#allocation177_spill] sm:$0xff] %v13353_v49  ;;  %v5017_v59 = vmax.f32 %v5016_v22, %v13351_v62  ;;  %v5010_v44 = vmax.f32 %v5009_v15, %v13339_v39  ;;  %v6828_v22 = vpop.permute.xlu1 %6827 }
 0x5fe   : > { %v13358_v1 = vpop.f32.mrf.mxu0  ;;  %v13360_v2 = vpop.f32.mrf.mxu1  ;;  %9071 = vmatprep.subr.bf16.mxu1 %v6828_v22 }
 0x5ff   : > { %17905 = vst [vmem:[#allocation178_spill] sm:$0xff] %v13358_v1  ;;  %17906 = vst [vmem:[#allocation179_spill] sm:$0xff] %v13360_v2  ;;  %v5018_v58 = vmax.f32 %v5017_v59, %v13358_v1  ;;  %v5011_v16 = vmax.f32 %v5010_v44, %v13346_v24  ;;  %v5042_v59 = vmax.f32 %v5041_v50, %v13062_v28 }
 0x600   : > { %v13367_v62 = vpop.f32.mrf.mxu0  ;;  %v13369_v15 = vpop.f32.mrf.mxu1  ;;  %v5050_v44 = vmax.f32 %v13076_v7, %v13080_v35 }
 0x601   : > { %17907 = vst [vmem:[#allocation180_spill] sm:$0xff] %v13369_v15  ;;  %v5026_v42 = vmax.f32 %v5025_v54, %v13367_v62  ;;  %5012 = vmax.xlane.f32.xlu1 %v5011_v16  ;;  %v5019_v47 = vmax.f32 %v5018_v58, %v13353_v49  ;;  %v5059_v54 = vmax.f32 %v13084_v18, %v13096_v14 }
 0x602   : > { %v13374_v39 = vpop.f32.mrf.mxu0  ;;  %v13376_v30 = vpop.f32.mrf.mxu1 }
 0x603   : > { %17908 = vst [vmem:[#allocation181_spill] sm:$0xff] %v13376_v30  ;;  %v5027_v1 = vmax.f32 %v5026_v42, %v13374_v39  ;;  %v5020_v22 = vmax.f32 %v5019_v47, %v13360_v2  ;;  %v5043_v42 = vmax.f32 %v5042_v59, %v13074_v19  ;;  %v5051_v47 = vmax.f32 %v5050_v44, %v13078_v4 }
 0x604   : > { %v13383_v24 = vpop.f32.mrf.mxu0  ;;  %v13385_v16 = vpop.f32.mrf.mxu1 }
 0x605   : > { %17909 = vst [vmem:[#allocation182_spill] sm:$0xff] %v13383_v24  ;;  %17910 = vst [vmem:[#allocation183_spill] sm:$0xff] %v13385_v16  ;;  %v5035_v58 = vmax.f32 %v5034_v57, %v13383_v24  ;;  %5021 = vmax.xlane.f32.xlu0 %v5020_v22  ;;  %v5028_v21 = vmax.f32 %v5027_v1, %v13369_v15  ;;  %v5060_v24 = vmax.f32 %v5059_v54, %v13086_v40 }
 0x606   : > { %v13391_v50 = vpop.f32.mrf.mxu0  ;;  %v13393_v49 = vpop.f32.mrf.mxu1  ;;  %v5052_v44 = vmax.f32 %v5051_v47, %v13082_v8 }
 0x607   : > { %17911 = vst [vmem:[#allocation184_spill] sm:$0xff] %v13391_v50  ;;  %17912 = vst [vmem:[#allocation185_spill] sm:$0xff] %v13393_v49  ;;  %v5036_v2 = vmax.f32 %v5035_v58, %v13391_v50  ;;  %v5029_v35 = vmax.f32 %v5028_v21, %v13376_v30  ;;  %v5068_v58 = vmax.f32 %v13100_v9, %v13104_v46 }
 0x608   : > { %v13399_v7 = vpop.f32.mrf.mxu0  ;;  %v13401_v57 = vpop.f32.mrf.mxu1 }
 0x609   : > { %17913 = vst [vmem:[#allocation186_spill] sm:$0xff] %v13401_v57  ;;  %v5044_v1 = vmax.f32 %v5043_v42, %v13399_v7  ;;  %5030 = vmax.xlane.f32.xlu1 %v5029_v35  ;;  %v5037_v22 = vmax.f32 %v5036_v2, %v13385_v16  ;;  %v5061_v42 = vmax.f32 %v5060_v24, %v13098_v45 }
 0x60a   : > { %v13406_v15 = vpop.f32.mrf.mxu0  ;;  %v13408_v59 = vpop.f32.mrf.mxu1  ;;  %v5069_v46 = vmax.f32 %v5068_v58, %v13102_v6 }
 0x60b   : > { %17914 = vst [vmem:[#allocation187_spill] sm:$0xff] %v13408_v59  ;;  %v5045_v21 = vmax.f32 %v5044_v1, %v13406_v15  ;;  %v5038_v50 = vmax.f32 %v5037_v22, %v13393_v49  ;;  %v5077_v1 = vmax.f32 %v13108_v55, %v13120_v34 }
 0x60c   : > { %v13415_v30 = vpop.f32.mrf.mxu0  ;;  %v13417_v35 = vpop.f32.mrf.mxu1 }
 0x60d   : > { %17915 = vst [vmem:[#allocation188_spill] sm:$0xff] %v13415_v30  ;;  %17916 = vst [vmem:[#allocation189_spill] sm:$0xff] %v13417_v35  ;;  %v5053_v2 = vmax.f32 %v5052_v44, %v13415_v30  ;;  %5039 = vmax.xlane.f32.xlu0 %v5038_v50  ;;  %v5046_v54 = vmax.f32 %v5045_v21, %v13401_v57  ;;  %v5086_v21 = vmax.f32 %v13124_v5, %v13128_v26 }
 0x60e   : > { %v13422_v16 = vpop.f32.mrf.mxu0  ;;  %v13424_v47 = vpop.f32.mrf.mxu1 }
 0x60f   : > { %17917 = vst [vmem:[#allocation190_spill] sm:$0xff] %v13422_v16  ;;  %17918 = vst [vmem:[#allocation191_spill] sm:$0xff] %v13424_v47  ;;  %v5054_v22 = vmax.f32 %v5053_v2, %v13422_v16  ;;  %v5047_v49 = vmax.f32 %v5046_v54, %v13408_v59  ;;  %v5070_v2 = vmax.f32 %v5069_v46, %v13106_v0 }
 0x610   : > { %v13431_v9 = vpop.f32.mrf.mxu0  ;;  %v13433_v50 = vpop.f32.mrf.mxu1  ;;  %v5078_v54 = vmax.f32 %v5077_v1, %v13110_v56 }
 0x611   : > { %17919 = vst [vmem:[#allocation192_spill] sm:$0xff] %v13433_v50  ;;  %v5062_v44 = vmax.f32 %v5061_v42, %v13431_v9  ;;  %5048 = vmax.xlane.f32.xlu1 %v5047_v49  ;;  %v5055_v24 = vmax.f32 %v5054_v22, %v13417_v35  ;;  %v5087_v35 = vmax.f32 %v5086_v21, %v13126_v25 }
 0x612   : > { %v13439_v58 = vpop.f32.mrf.mxu0  ;;  %v13441_v30 = vpop.f32.mrf.mxu1  ;;  %v5079_v1 = vmax.f32 %v5078_v54, %v13122_v10 }
 0x613   : > { %17920 = vst [vmem:[#allocation193_spill] sm:$0xff] %v13441_v30  ;;  %v5063_v16 = vmax.f32 %v5062_v44, %v13439_v58  ;;  %v5056_v59 = vmax.f32 %v5055_v24, %v13424_v47  ;;  %v5095_v44 = vmax.f32 %v13132_v29, %v13144_v11 }
 0x614   : > { %v13447_v57 = vpop.f32.mrf.mxu0  ;;  %v13449_v49 = vpop.f32.mrf.mxu1 }
 0x615   : > { %17921 = vst [vmem:[#allocation194_spill] sm:$0xff] %v13447_v57  ;;  %17922 = vst [vmem:[#allocation195_spill] sm:$0xff] %v13449_v49  ;;  %v5064_v42 = vmax.f32 %v5063_v16, %v13433_v50  ;;  %v5071_v22 = vmax.f32 %v5070_v2, %v13447_v57  ;;  %5057 = vmax.xlane.f32.xlu0 %v5056_v59  ;;  %v5088_v2 = vmax.f32 %v5087_v35, %v13130_v23 }
 0x616   : > { %v13454_v26 = vpop.f32.mrf.mxu0  ;;  %v13456_v46 = vpop.f32.mrf.mxu1  ;;  %v5096_v50 = vmax.f32 %v5095_v44, %v13134_v41 }
 0x617   : > { %17923 = vst [vmem:[#allocation196_spill] sm:$0xff] %v13454_v26  ;;  %17924 = vst [vmem:[#allocation197_spill] sm:$0xff] %v13456_v46  ;;  %v5065_v24 = vmax.f32 %v5064_v42, %v13441_v30  ;;  %v5072_v47 = vmax.f32 %v5071_v22, %v13454_v26  ;;  %v5104_v42 = vmax.f32 %v13148_v20, %v13152_v37 }
 0x618   : > { %v13463_v5 = vpop.f32.mrf.mxu0  ;;  %v13465_v16 = vpop.f32.mrf.mxu1 }
 0x619   : > { %17925 = vst [vmem:[#allocation198_spill] sm:$0xff] %v13465_v16  ;;  %v5080_v59 = vmax.f32 %v5079_v1, %v13463_v5  ;;  %5066 = vmax.xlane.f32.xlu1 %v5065_v24  ;;  %v5073_v21 = vmax.f32 %v5072_v47, %v13449_v49  ;;  %v5113_v24 = vmax.f32 %v13156_v31, %v13168_v13 }
 0x61a   : > { %v13470_v57 = vpop.f32.mrf.mxu0  ;;  %v13472_v54 = vpop.f32.mrf.mxu1 }
 0x61b   : > { %17926 = vst [vmem:[#allocation199_spill] sm:$0xff] %v13472_v54  ;;  %v5081_v22 = vmax.f32 %v5080_v59, %v13470_v57  ;;  %v5074_v26 = vmax.f32 %v5073_v21, %v13456_v46  ;;  %v5097_v59 = vmax.f32 %v5096_v50, %v13146_v43  ;;  %v5105_v21 = vmax.f32 %v5104_v42, %v13150_v33 }
 0x61c   : > { %v13479_v30 = vpop.f32.mrf.mxu0  ;;  %v13481_v1 = vpop.f32.mrf.mxu1 }
 0x61d   : > { %17927 = vst [vmem:[#allocation200_spill] sm:$0xff] %v13479_v30  ;;  %17928 = vst [vmem:[#allocation201_spill] sm:$0xff] %v13481_v1  ;;  %v5082_v47 = vmax.f32 %v5081_v22, %v13465_v16  ;;  %v5089_v35 = vmax.f32 %v5088_v2, %v13479_v30  ;;  %5075 = vmax.xlane.f32.xlu0 %v5074_v26  ;;  %v5114_v30 = vmax.f32 %v5113_v24, %v13158_v36 }
 0x61e   : > { %v13487_v44 = vpop.f32.mrf.mxu0  ;;  %v13489_v49 = vpop.f32.mrf.mxu1  ;;  %v5106_v42 = vmax.f32 %v5105_v21, %v13154_v32  ;;  %v17943_v32 = vld [vmem:[#allocation100_spill] sm:$0xff] }
 0x61f   : > { %17929 = vst [vmem:[#allocation202_spill] sm:$0xff] %v13487_v44  ;;  %17930 = vst [vmem:[#allocation203_spill] sm:$0xff] %v13489_v49  ;;  %v5083_v46 = vmax.f32 %v5082_v47, %v13472_v54  ;;  %v5090_v37 = vmax.f32 %v5089_v35, %v13487_v44  ;;  %v17934_v47 = vld [vmem:[#allocation98_spill] sm:$0xff]  ;;  %v17935_v54 = vld [vmem:[#allocation96_spill] sm:$0xff] }
 0x620   : > { %v13495_v20 = vpop.f32.mrf.mxu0  ;;  %v13497_v22 = vpop.f32.mrf.mxu1  ;;  %v5122_v35 = vmax.f32 %v17935_v54, %v17934_v47  ;;  %v17941_v47 = vld [vmem:[#allocation97_spill] sm:$0xff] }
 0x621   : > { %17931 = vst [vmem:[#allocation204_spill] sm:$0xff] %v13497_v22  ;;  %v5098_v26 = vmax.f32 %v5097_v59, %v13495_v20  ;;  %5084 = vmax.xlane.f32.xlu1 %v5083_v46  ;;  %v5091_v2 = vmax.f32 %v5090_v37, %v13481_v1  ;;  %v17938_v59 = vld [vmem:[#allocation95_spill] sm:$0xff] }
 0x622   : > { %v13502_v16 = vpop.f32.mrf.mxu0  ;;  %v13504_v50 = vpop.f32.mrf.mxu1  ;;  %v5115_v1 = vmax.f32 %v5114_v30, %v17938_v59  ;;  %v5123_v54 = vmax.f32 %v5122_v35, %v17941_v47 }
 0x623   : > { %17932 = vst [vmem:[#allocation205_spill] sm:$0xff] %v13502_v16  ;;  %17933 = vst [vmem:[#allocation206_spill] sm:$0xff] %v13504_v50  ;;  %v5099_v44 = vmax.f32 %v5098_v26, %v13502_v16  ;;  %v5092_v13 = vmax.f32 %v5091_v2, %v13489_v49  ;;  %v17942_v26 = vld [vmem:[#allocation102_spill] sm:$0xff] }
 0x624   : > { %v13511_v31 = vpop.f32.mrf.mxu0  ;;  %v13513_v46 = vpop.f32.mrf.mxu1  ;;  %v5131_v2 = vmax.f32 %v17943_v32, %v17942_v26  ;;  %v17950_v26 = vld [vmem:[#allocation99_spill] sm:$0xff] }
 0x625   : > { %17936 = vst [vmem:[#allocation207_spill] sm:$0xff] %v13511_v31  ;;  %17937 = vst [vmem:[#allocation208_spill] sm:$0xff] %v13513_v46  ;;  %v5100_v37 = vmax.f32 %v5099_v44, %v13497_v22  ;;  %v5107_v24 = vmax.f32 %v5106_v42, %v13511_v31  ;;  %5093 = vmax.xlane.f32.xlu0 %v5092_v13  ;;  %v17946_v42 = vld [vmem:[#allocation106_spill] sm:$0xff]  ;;  %v17947_v31 = vld [vmem:[#allocation104_spill] sm:$0xff] }
 0x626   : > { %v13518_v36 = vpop.f32.mrf.mxu0  ;;  %v13520_v21 = vpop.f32.mrf.mxu1  ;;  %v5140_v22 = vmax.f32 %v17947_v31, %v17946_v42 }
 0x627   : > { %17939 = vst [vmem:[#allocation209_spill] sm:$0xff] %v13518_v36  ;;  %17940 = vst [vmem:[#allocation210_spill] sm:$0xff] %v13520_v21  ;;  %v5101_v49 = vmax.f32 %v5100_v37, %v13504_v50  ;;  %v5108_v33 = vmax.f32 %v5107_v24, %v13518_v36  ;;  %v5124_v37 = vmax.f32 %v5123_v54, %v17950_v26  ;;  %v17951_v50 = vld [vmem:[#allocation101_spill] sm:$0xff]  ;;  %v17959_v26 = vld [vmem:[#allocation108_spill] sm:$0xff] }
 0x628   : > { %v13527_v16 = vpop.f32.mrf.mxu0  ;;  %v13529_v44 = vpop.f32.mrf.mxu1  ;;  %v5132_v24 = vmax.f32 %v5131_v2, %v17951_v50  ;;  %v17957_v2 = vld [vmem:[#allocation103_spill] sm:$0xff] }
 0x629   : > { %17944 = vst [vmem:[#allocation211_spill] sm:$0xff] %v13527_v16  ;;  %17945 = vst [vmem:[#allocation212_spill] sm:$0xff] %v13529_v44  ;;  %v5116_v13 = vmax.f32 %v5115_v1, %v13527_v16  ;;  %5102 = vmax.xlane.f32.xlu1 %v5101_v49  ;;  %v5109_v30 = vmax.f32 %v5108_v33, %v13513_v46  ;;  %v17954_v46 = vld [vmem:[#allocation105_spill] sm:$0xff] }
 0x62a   : > { %v13535_v35 = vpop.f32.mrf.mxu0  ;;  %v13537_v47 = vpop.f32.mrf.mxu1  ;;  %v5141_v42 = vmax.f32 %v5140_v22, %v17954_v46  ;;  %v5133_v50 = vmax.f32 %v5132_v24, %v17957_v2 }
 0x62b   : > { %17948 = vst [vmem:[#allocation213_spill] sm:$0xff] %v13535_v35  ;;  %17949 = vst [vmem:[#allocation214_spill] sm:$0xff] %v13537_v47  ;;  %v5117_v36 = vmax.f32 %v5116_v13, %v13535_v35  ;;  %v5110_v32 = vmax.f32 %v5109_v30, %v13520_v21  ;;  %v17958_v13 = vld [vmem:[#allocation110_spill] sm:$0xff] }
 0x62c   : > { %v13543_v59 = vpop.f32.mrf.mxu0  ;;  %v13545_v49 = vpop.f32.mrf.mxu1  ;;  %v5149_v30 = vmax.f32 %v17959_v26, %v17958_v13  ;;  %v17965_v13 = vld [vmem:[#allocation109_spill] sm:$0xff] }
 0x62d   : > { %17952 = vst [vmem:[#allocation215_spill] sm:$0xff] %v13543_v59  ;;  %17953 = vst [vmem:[#allocation216_spill] sm:$0xff] %v13545_v49  ;;  %v5118_v33 = vmax.f32 %v5117_v36, %v13529_v44  ;;  %v5125_v1 = vmax.f32 %v5124_v37, %v13543_v59  ;;  %5111 = vmax.xlane.f32.xlu0 %v5110_v32  ;;  %v17962_v37 = vld [vmem:[#allocation107_spill] sm:$0xff] }
 0x62e   : > { %v13550_v31 = vpop.f32.mrf.mxu0  ;;  %v13552_v54 = vpop.f32.mrf.mxu1  ;;  %v5142_v59 = vmax.f32 %v5141_v42, %v17962_v37  ;;  %v5150_v26 = vmax.f32 %v5149_v30, %v17965_v13 }
 0x62f   : > { %17955 = vst [vmem:[#allocation217_spill] sm:$0xff] %v13550_v31  ;;  %17956 = vst [vmem:[#allocation218_spill] sm:$0xff] %v13552_v54  ;;  %v5119_v21 = vmax.f32 %v5118_v33, %v13537_v47  ;;  %v5126_v35 = vmax.f32 %v5125_v1, %v13550_v31  ;;  %v17966_v33 = vld [vmem:[#allocation114_spill] sm:$0xff]  ;;  %v17967_v47 = vld [vmem:[#allocation112_spill] sm:$0xff] }
 0x630   : > { %v13559_v16 = vpop.f32.mrf.mxu0  ;;  %v13561_v36 = vpop.f32.mrf.mxu1  ;;  %v5158_v1 = vmax.f32 %v17967_v47, %v17966_v33  ;;  %v17974_v33 = vld [vmem:[#allocation111_spill] sm:$0xff]  ;;  %v17975_v47 = vld [vmem:[#allocation113_spill] sm:$0xff] }
 0x631   : > { %17960 = vst [vmem:[#allocation219_spill] sm:$0xff] %v13559_v16  ;;  %17961 = vst [vmem:[#allocation220_spill] sm:$0xff] %v13561_v36  ;;  %v5134_v32 = vmax.f32 %v5133_v50, %v13559_v16  ;;  %5120 = vmax.xlane.f32.xlu1 %v5119_v21  ;;  %v5127_v22 = vmax.f32 %v5126_v35, %v13545_v49  ;;  %v17970_v35 = vld [vmem:[#allocation118_spill] sm:$0xff]  ;;  %v17971_v49 = vld [vmem:[#allocation116_spill] sm:$0xff] }
 0x632   : > { %v13566_v44 = vpop.f32.mrf.mxu0  ;;  %v13568_v24 = vpop.f32.mrf.mxu1  ;;  %v5167_v37 = vmax.f32 %v17971_v49, %v17970_v35 }
 0x633   : > { %17963 = vst [vmem:[#allocation221_spill] sm:$0xff] %v13566_v44  ;;  %17964 = vst [vmem:[#allocation222_spill] sm:$0xff] %v13568_v24  ;;  %v5135_v31 = vmax.f32 %v5134_v32, %v13566_v44  ;;  %v5128_v46 = vmax.f32 %v5127_v22, %v13552_v54  ;;  %v5151_v32 = vmax.f32 %v5150_v26, %v17974_v33 }
 0x634   : > { %v13575_v2 = vpop.f32.mrf.mxu0  ;;  %v13577_v50 = vpop.f32.mrf.mxu1  ;;  %v5159_v22 = vmax.f32 %v5158_v1, %v17975_v47  ;;  %v17981_v1 = vld [vmem:[#allocation115_spill] sm:$0xff] }
 0x635   : > { %17968 = vst [vmem:[#allocation223_spill] sm:$0xff] %v13575_v2  ;;  %17969 = vst [vmem:[#allocation224_spill] sm:$0xff] %v13577_v50  ;;  %v5136_v21 = vmax.f32 %v5135_v31, %v13561_v36  ;;  %v5143_v42 = vmax.f32 %v5142_v59, %v13575_v2  ;;  %5129 = vmax.xlane.f32.xlu0 %v5128_v46  ;;  %v17978_v36 = vld [vmem:[#allocation117_spill] sm:$0xff] }
 0x636   : > { %v13583_v30 = vpop.f32.mrf.mxu0  ;;  %v13585_v13 = vpop.f32.mrf.mxu1  ;;  %v5168_v35 = vmax.f32 %v5167_v37, %v17978_v36  ;;  %v5160_v47 = vmax.f32 %v5159_v22, %v17981_v1  ;;  %v17991_v1 = vld [vmem:[#allocation124_spill] sm:$0xff] }
 0x637   : > { %17972 = vst [vmem:[#allocation225_spill] sm:$0xff] %v13583_v30  ;;  %17973 = vst [vmem:[#allocation226_spill] sm:$0xff] %v13585_v13  ;;  %v5137_v54 = vmax.f32 %v5136_v21, %v13568_v24  ;;  %v5144_v44 = vmax.f32 %v5143_v42, %v13583_v30  ;;  %v17982_v21 = vld [vmem:[#allocation122_spill] sm:$0xff]  ;;  %v17983_v24 = vld [vmem:[#allocation120_spill] sm:$0xff] }
 0x638   : > { %v13591_v16 = vpop.f32.mrf.mxu0  ;;  %v13593_v31 = vpop.f32.mrf.mxu1  ;;  %v5176_v42 = vmax.f32 %v17983_v24, %v17982_v21  ;;  %v17989_v21 = vld [vmem:[#allocation121_spill] sm:$0xff] }
 0x639   : > { %17976 = vst [vmem:[#allocation227_spill] sm:$0xff] %v13591_v16  ;;  %17977 = vst [vmem:[#allocation228_spill] sm:$0xff] %v13593_v31  ;;  %v5152_v46 = vmax.f32 %v5151_v32, %v13591_v16  ;;  %5138 = vmax.xlane.f32.xlu1 %v5137_v54  ;;  %v5145_v59 = vmax.f32 %v5144_v44, %v13577_v50  ;;  %v17986_v32 = vld [vmem:[#allocation119_spill] sm:$0xff] }
 0x63a   : > { %v13598_v49 = vpop.f32.mrf.mxu0  ;;  %v13600_v26 = vpop.f32.mrf.mxu1  ;;  %v5169_v50 = vmax.f32 %v5168_v35, %v17986_v32  ;;  %v5177_v24 = vmax.f32 %v5176_v42, %v17989_v21 }
 0x63b   : > { %17979 = vst [vmem:[#allocation229_spill] sm:$0xff] %v13598_v49  ;;  %17980 = vst [vmem:[#allocation230_spill] sm:$0xff] %v13600_v26  ;;  %v5153_v33 = vmax.f32 %v5152_v46, %v13598_v49  ;;  %v5146_v30 = vmax.f32 %v5145_v59, %v13585_v13  ;;  %v17990_v46 = vld [vmem:[#allocation126_spill] sm:$0xff] }
 0x63c   : > { %v13607_v2 = vpop.f32.mrf.mxu0  ;;  %v13609_v54 = vpop.f32.mrf.mxu1  ;;  %v5185_v59 = vmax.f32 %v17991_v1, %v17990_v46  ;;  %v17998_v46 = vld [vmem:[#allocation123_spill] sm:$0xff] }
 0x63d   : > { %17984 = vst [vmem:[#allocation231_spill] sm:$0xff] %v13607_v2  ;;  %17985 = vst [vmem:[#allocation232_spill] sm:$0xff] %v13609_v54  ;;  %v5154_v44 = vmax.f32 %v5153_v33, %v13593_v31  ;;  %v5161_v37 = vmax.f32 %v5160_v47, %v13607_v2  ;;  %5147 = vmax.xlane.f32.xlu0 %v5146_v30  ;;  %v17994_v30 = vld [vmem:[#allocation130_spill] sm:$0xff]  ;;  %v17995_v31 = vld [vmem:[#allocation128_spill] sm:$0xff] }
 0x63e   : > { %v13614_v36 = vpop.f32.mrf.mxu0  ;;  %v13616_v22 = vpop.f32.mrf.mxu1  ;;  %v5194_v32 = vmax.f32 %v17995_v31, %v17994_v30 }
 0x63f   : > { %17987 = vst [vmem:[#allocation233_spill] sm:$0xff] %v13614_v36  ;;  %17988 = vst [vmem:[#allocation234_spill] sm:$0xff] %v13616_v22  ;;  %v5155_v13 = vmax.f32 %v5154_v44, %v13600_v26  ;;  %v5162_v49 = vmax.f32 %v5161_v37, %v13614_v36  ;;  %v5178_v44 = vmax.f32 %v5177_v24, %v17998_v46  ;;  %v17999_v26 = vld [vmem:[#allocation125_spill] sm:$0xff]  ;;  %v18007_v46 = vld [vmem:[#allocation132_spill] sm:$0xff] }
 0x640   : > { %v13623_v16 = vpop.f32.mrf.mxu0  ;;  %v13625_v33 = vpop.f32.mrf.mxu1  ;;  %v5186_v37 = vmax.f32 %v5185_v59, %v17999_v26  ;;  %v18005_v59 = vld [vmem:[#allocation127_spill] sm:$0xff] }
 0x641   : > { %17992 = vst [vmem:[#allocation235_spill] sm:$0xff] %v13623_v16  ;;  %17993 = vst [vmem:[#allocation236_spill] sm:$0xff] %v13625_v33  ;;  %v5170_v47 = vmax.f32 %v5169_v50, %v13623_v16  ;;  %5156 = vmax.xlane.f32.xlu1 %v5155_v13  ;;  %v5163_v35 = vmax.f32 %v5162_v49, %v13609_v54  ;;  %v18002_v54 = vld [vmem:[#allocation129_spill] sm:$0xff] }
 0x642   : > { %v13631_v42 = vpop.f32.mrf.mxu0  ;;  %v13633_v21 = vpop.f32.mrf.mxu1  ;;  %v5195_v30 = vmax.f32 %v5194_v32, %v18002_v54  ;;  %v5187_v26 = vmax.f32 %v5186_v37, %v18005_v59 }
 0x643   : > { %17996 = vst [vmem:[#allocation237_spill] sm:$0xff] %v13631_v42  ;;  %17997 = vst [vmem:[#allocation238_spill] sm:$0xff] %v13633_v21  ;;  %v5171_v1 = vmax.f32 %v5170_v47, %v13631_v42  ;;  %v5164_v36 = vmax.f32 %v5163_v35, %v13616_v22  ;;  %v18006_v47 = vld [vmem:[#allocation134_spill] sm:$0xff] }
 0x644   : > { %v13639_v2 = vpop.f32.mrf.mxu0  ;;  %v13641_v13 = vpop.f32.mrf.mxu1  ;;  %v5203_v35 = vmax.f32 %v18007_v46, %v18006_v47  ;;  %v18013_v47 = vld [vmem:[#allocation133_spill] sm:$0xff] }
 0x645   : > { %18000 = vst [vmem:[#allocation239_spill] sm:$0xff] %v13639_v2  ;;  %18001 = vst [vmem:[#allocation240_spill] sm:$0xff] %v13641_v13  ;;  %v5172_v49 = vmax.f32 %v5171_v1, %v13625_v33  ;;  %v5179_v50 = vmax.f32 %v5178_v44, %v13639_v2  ;;  %5165 = vmax.xlane.f32.xlu0 %v5164_v36  ;;  %v18010_v44 = vld [vmem:[#allocation131_spill] sm:$0xff] }
 0x646   : > { %v13646_v31 = vpop.f32.mrf.mxu0  ;;  %v13648_v24 = vpop.f32.mrf.mxu1  ;;  %v5196_v33 = vmax.f32 %v5195_v30, %v18010_v44  ;;  %v5204_v46 = vmax.f32 %v5203_v35, %v18013_v47  ;;  %v18018_v30 = vld [vmem:[#allocation142_spill] sm:$0xff] }
 0x647   : > { %18003 = vst [vmem:[#allocation241_spill] sm:$0xff] %v13646_v31  ;;  %18004 = vst [vmem:[#allocation242_spill] sm:$0xff] %v13648_v24  ;;  %v5173_v22 = vmax.f32 %v5172_v49, %v13633_v21  ;;  %v5180_v42 = vmax.f32 %v5179_v50, %v13646_v31  ;;  %v18014_v49 = vld [vmem:[#allocation138_spill] sm:$0xff]  ;;  %v18015_v21 = vld [vmem:[#allocation136_spill] sm:$0xff] }
 0x648   : > { %v13655_v16 = vpop.f32.mrf.mxu0  ;;  %v13657_v1 = vpop.f32.mrf.mxu1  ;;  %v5212_v50 = vmax.f32 %v18015_v21, %v18014_v49  ;;  %v18022_v49 = vld [vmem:[#allocation135_spill] sm:$0xff] }
 0x649   : > { %18008 = vst [vmem:[#allocation243_spill] sm:$0xff] %v13655_v16  ;;  %18009 = vst [vmem:[#allocation244_spill] sm:$0xff] %v13657_v1  ;;  %v5181_v36 = vmax.f32 %v5180_v42, %v13641_v13  ;;  %v5188_v32 = vmax.f32 %v5187_v26, %v13655_v16  ;;  %5174 = vmax.xlane.f32.xlu1 %v5173_v22  ;;  %v18019_v13 = vld [vmem:[#allocation140_spill] sm:$0xff] }
 0x64a   : > { %v13662_v54 = vpop.f32.mrf.mxu0  ;;  %v13664_v37 = vpop.f32.mrf.mxu1  ;;  %v5221_v44 = vmax.f32 %v18019_v13, %v18018_v30 }
 0x64b   : > { %18011 = vst [vmem:[#allocation245_spill] sm:$0xff] %v13662_v54  ;;  %18012 = vst [vmem:[#allocation246_spill] sm:$0xff] %v13664_v37  ;;  %v5182_v59 = vmax.f32 %v5181_v36, %v13648_v24  ;;  %v5189_v31 = vmax.f32 %v5188_v32, %v13662_v54  ;;  %v5205_v36 = vmax.f32 %v5204_v46, %v18022_v49  ;;  %v18023_v24 = vld [vmem:[#allocation137_spill] sm:$0xff] }
 0x64c   : > { %v13671_v2 = vpop.f32.mrf.mxu0  ;;  %v13673_v42 = vpop.f32.mrf.mxu1  ;;  %v5213_v32 = vmax.f32 %v5212_v50, %v18023_v24  ;;  %v18029_v50 = vld [vmem:[#allocation139_spill] sm:$0xff] }
 0x64d   : > { %18016 = vst [vmem:[#allocation247_spill] sm:$0xff] %v13671_v2  ;;  %18017 = vst [vmem:[#allocation248_spill] sm:$0xff] %v13673_v42  ;;  %v5190_v26 = vmax.f32 %v5189_v31, %v13657_v1  ;;  %v5197_v22 = vmax.f32 %v5196_v33, %v13671_v2  ;;  %5183 = vmax.xlane.f32.xlu0 %v5182_v59  ;;  %v18026_v1 = vld [vmem:[#allocation141_spill] sm:$0xff] }
 0x64e   : > { %v13679_v35 = vpop.f32.mrf.mxu0  ;;  %v13681_v47 = vpop.f32.mrf.mxu1  ;;  %v5222_v2 = vmax.f32 %v5221_v44, %v18026_v1  ;;  %v5214_v24 = vmax.f32 %v5213_v32, %v18029_v50  ;;  %v18037_v50 = vld [vmem:[#allocation145_spill] sm:$0xff] }
 0x64f   : > { %18020 = vst [vmem:[#allocation249_spill] sm:$0xff] %v13679_v35  ;;  %18021 = vst [vmem:[#allocation250_spill] sm:$0xff] %v13681_v47  ;;  %v5191_v21 = vmax.f32 %v5190_v26, %v13664_v37  ;;  %v5198_v54 = vmax.f32 %v5197_v22, %v13679_v35  ;;  %v18030_v26 = vld [vmem:[#allocation146_spill] sm:$0xff]  ;;  %v18031_v37 = vld [vmem:[#allocation144_spill] sm:$0xff] }
 0x650   : > { %v13687_v16 = vpop.f32.mrf.mxu0  ;;  %v13689_v31 = vpop.f32.mrf.mxu1  ;;  %v5230_v22 = vmax.f32 %v18031_v37, %v18030_v26 }
 0x651   : > { %18024 = vst [vmem:[#allocation251_spill] sm:$0xff] %v13687_v16  ;;  %18025 = vst [vmem:[#allocation252_spill] sm:$0xff] %v13689_v31  ;;  %v5199_v33 = vmax.f32 %v5198_v54, %v13673_v42  ;;  %v5206_v59 = vmax.f32 %v5205_v36, %v13687_v16  ;;  %5192 = vmax.xlane.f32.xlu0 %v5191_v21  ;;  %v18034_v36 = vld [vmem:[#allocation143_spill] sm:$0xff] }
 0x652   : > { %v13694_v30 = vpop.f32.mrf.mxu0  ;;  %v13696_v46 = vpop.f32.mrf.mxu1  ;;  %v5223_v42 = vmax.f32 %v5222_v2, %v18034_v36  ;;  %v5231_v26 = vmax.f32 %v5230_v22, %v18037_v50 }
 0x653   : > { %18027 = vst [vmem:[#allocation253_spill] sm:$0xff] %v13694_v30  ;;  %18028 = vst [vmem:[#allocation254_spill] sm:$0xff] %v13696_v46  ;;  %v5200_v49 = vmax.f32 %v5199_v33, %v13681_v47  ;;  %v5207_v35 = vmax.f32 %v5206_v59, %v13694_v30  ;;  %v18038_v33 = vld [vmem:[#allocation150_spill] sm:$0xff]  ;;  %v18039_v47 = vld [vmem:[#allocation148_spill] sm:$0xff] }
 0x654   : > { %v13703_v13 = vpop.f32.mrf.mxu0  ;;  %v13705_v54 = vpop.f32.mrf.mxu1  ;;  %v5239_v59 = vmax.f32 %v18039_v47, %v18038_v33  ;;  %v18045_v33 = vld [vmem:[#allocation147_spill] sm:$0xff] }
 0x655   : > { %18032 = vst [vmem:[#allocation255_spill] sm:$0xff] %v13703_v13  ;;  %18033 = vst [vmem:[#allocation256_spill] sm:$0xff] %v13705_v54  ;;  %v5208_v21 = vmax.f32 %v5207_v35, %v13689_v31  ;;  %v5215_v44 = vmax.f32 %v5214_v24, %v13703_v13  ;;  %5201 = vmax.xlane.f32.xlu0 %v5200_v49  ;;  %v18042_v49 = vld [vmem:[#allocation152_spill] sm:$0xff] }
 0x656   : > { %v13710_v16 = vpop.f32.mrf.mxu0  ;;  %v13712_v32 = vpop.f32.mrf.mxu1  ;;  %v5248_v31 = vmax.f32 %v18042_v49, %v13292_v63 }
 0x657   : > { %18035 = vst [vmem:[#allocation143_spill] sm:$0xff] %v13710_v16  ;;  %18036 = vst [vmem:[#allocation257_spill] sm:$0xff] %v13712_v32  ;;  %v5209_v30 = vmax.f32 %v5208_v21, %v13696_v46  ;;  %v5216_v37 = vmax.f32 %v5215_v44, %v13710_v16  ;;  %v5232_v21 = vmax.f32 %v5231_v26, %v18045_v33  ;;  %v18046_v46 = vld [vmem:[#allocation149_spill] sm:$0xff] }
 0x658   : > { %v13719_v1 = vpop.f32.mrf.mxu0  ;;  %v13721_v35 = vpop.f32.mrf.mxu1  ;;  %v5240_v44 = vmax.f32 %v5239_v59, %v18046_v46  ;;  %v18052_v59 = vld [vmem:[#allocation151_spill] sm:$0xff] }
 0x659   : > { %18040 = vst [vmem:[#allocation258_spill] sm:$0xff] %v13719_v1  ;;  %18041 = vst [vmem:[#allocation259_spill] sm:$0xff] %v13721_v35  ;;  %v5217_v24 = vmax.f32 %v5216_v37, %v13705_v54  ;;  %v5224_v2 = vmax.f32 %v5223_v42, %v13719_v1  ;;  %5210 = vmax.xlane.f32.xlu0 %v5209_v30  ;;  %v18049_v54 = vld [vmem:[#allocation153_spill] sm:$0xff] }
 0x65a   : > { %v13727_v22 = vpop.f32.mrf.mxu0  ;;  %v13729_v13 = vpop.f32.mrf.mxu1  ;;  %v5249_v63 = vmax.f32 %v5248_v31, %v18049_v54  ;;  %v5241_v46 = vmax.f32 %v5240_v44, %v18052_v59 }
 0x65b   : > { %18043 = vst [vmem:[#allocation260_spill] sm:$0xff] %v13727_v22  ;;  %18044 = vst [vmem:[#allocation261_spill] sm:$0xff] %v13729_v13  ;;  %v5218_v16 = vmax.f32 %v5217_v24, %v13712_v32  ;;  %v5225_v47 = vmax.f32 %v5224_v2, %v13727_v22  ;;  %v18053_v24 = vld [vmem:[#allocation158_spill] sm:$0xff]  ;;  %v18054_v32 = vld [vmem:[#allocation156_spill] sm:$0xff] }
 0x65c   : > { %v13735_v50 = vpop.f32.mrf.mxu0  ;;  %v13737_v37 = vpop.f32.mrf.mxu1  ;;  %v5257_v2 = vmax.f32 %v18054_v32, %v18053_v24  ;;  %v18060_v24 = vld [vmem:[#allocation157_spill] sm:$0xff] }
 0x65d   : > { %18047 = vst [vmem:[#allocation262_spill] sm:$0xff] %v13735_v50  ;;  %18048 = vst [vmem:[#allocation263_spill] sm:$0xff] %v13737_v37  ;;  %v5226_v42 = vmax.f32 %v5225_v47, %v13721_v35  ;;  %v5233_v30 = vmax.f32 %v5232_v21, %v13735_v50  ;;  %5219 = vmax.xlane.f32.xlu0 %v5218_v16  ;;  %v18057_v21 = vld [vmem:[#allocation155_spill] sm:$0xff] }
 0x65e   : > { %v13742_v49 = vpop.f32.mrf.mxu0  ;;  %v13744_v26 = vpop.f32.mrf.mxu1  ;;  %v5250_v35 = vmax.f32 %v5249_v63, %v18057_v21  ;;  %v5258_v32 = vmax.f32 %v5257_v2, %v18060_v24  ;;  %v18067_v2 = vld [vmem:[#allocation159_spill] sm:$0xff] }
 0x65f   : > { %18050 = vst [vmem:[#allocation264_spill] sm:$0xff] %v13742_v49  ;;  %18051 = vst [vmem:[#allocation265_spill] sm:$0xff] %v13744_v26  ;;  %v5227_v33 = vmax.f32 %v5226_v42, %v13729_v13  ;;  %v5234_v22 = vmax.f32 %v5233_v30, %v13742_v49  ;;  %v18061_v42 = vld [vmem:[#allocation162_spill] sm:$0xff]  ;;  %v18062_v13 = vld [vmem:[#allocation160_spill] sm:$0xff] }
 0x660   : > { %v13751_v1 = vpop.f32.mrf.mxu0  ;;  %v13753_v47 = vpop.f32.mrf.mxu1  ;;  %v5266_v30 = vmax.f32 %v18062_v13, %v18061_v42  ;;  %v5259_v24 = vmax.f32 %v5258_v32, %v18067_v2  ;;  %v18068_v42 = vld [vmem:[#allocation161_spill] sm:$0xff]  ;;  %v18073_v32 = vld [vmem:[#allocation163_spill] sm:$0xff] }
 0x661   : > { %18055 = vst [vmem:[#allocation266_spill] sm:$0xff] %v13751_v1  ;;  %18056 = vst [vmem:[#allocation267_spill] sm:$0xff] %v13753_v47  ;;  %v5235_v16 = vmax.f32 %v5234_v22, %v13737_v37  ;;  %v5242_v31 = vmax.f32 %v5241_v46, %v13751_v1  ;;  %5228 = vmax.xlane.f32.xlu0 %v5227_v33 }
 0x662   : > { %v13758_v54 = vpop.f32.mrf.mxu0  ;;  %v13760_v44 = vpop.f32.mrf.mxu1  ;;  %v5267_v13 = vmax.f32 %v5266_v30, %v18068_v42 }
 0x663   : > { %18058 = vst [vmem:[#allocation268_spill] sm:$0xff] %v13758_v54  ;;  %18059 = vst [vmem:[#allocation269_spill] sm:$0xff] %v13760_v44  ;;  %v5236_v59 = vmax.f32 %v5235_v16, %v13744_v26  ;;  %v5243_v49 = vmax.f32 %v5242_v31, %v13758_v54  ;;  %v18148_v54 = vld [vmem:[#allocation88_spill] sm:$0xff] }
 0x664   : > { %v13767_v50 = vpop.f32.mrf.mxu0  ;;  %v13769_v22 = vpop.f32.mrf.mxu1  ;;  %v5268_v2 = vmax.f32 %v5267_v13, %v18073_v32 }
 0x665   : > { %18063 = vst [vmem:[#allocation270_spill] sm:$0xff] %v13767_v50  ;;  %18064 = vst [vmem:[#allocation271_spill] sm:$0xff] %v13769_v22  ;;  %v5244_v46 = vmax.f32 %v5243_v49, %v13753_v47  ;;  %v5251_v63 = vmax.f32 %v5250_v35, %v13767_v50  ;;  %5237 = vmax.xlane.f32.xlu1 %v5236_v59 }
 0x666   : > { %v13773_v33 = vpop.f32.mrf.mxu0  ;;  %v13775_v37 = vpop.f32.mrf.mxu1 }
 0x667   : > { %18065 = vst [vmem:[#allocation272_spill] sm:$0xff] %v13773_v33  ;;  %18066 = vst [vmem:[#allocation273_spill] sm:$0xff] %v13775_v37  ;;  %v5245_v16 = vmax.f32 %v5244_v46, %v13760_v44  ;;  %v5252_v31 = vmax.f32 %v5251_v63, %v13773_v33 }
 0x668   : > { %v13781_v26 = vpop.f32.mrf.mxu0  ;;  %v13783_v21 = vpop.f32.mrf.mxu1 }
 0x669   : > { %18069 = vst [vmem:[#allocation274_spill] sm:$0xff] %v13781_v26  ;;  %18070 = vst [vmem:[#allocation275_spill] sm:$0xff] %v13783_v21  ;;  %v5253_v49 = vmax.f32 %v5252_v31, %v13769_v22  ;;  %v5260_v35 = vmax.f32 %v5259_v24, %v13781_v26  ;;  %5246 = vmax.xlane.f32.xlu0 %v5245_v16 }
 0x66a   : > { %v13787_v59 = vpop.f32.mrf.mxu0  ;;  %v13789_v47 = vpop.f32.mrf.mxu1 }
 0x66b   : > { %18071 = vst [vmem:[#allocation276_spill] sm:$0xff] %v13787_v59  ;;  %18072 = vst [vmem:[#allocation277_spill] sm:$0xff] %v13789_v47  ;;  %v5254_v30 = vmax.f32 %v5253_v49, %v13775_v37  ;;  %v5261_v46 = vmax.f32 %v5260_v35, %v13787_v59 }
 0x66c   : > { %v13794_v63 = vpop.f32.mrf.mxu0  ;;  %v13798_v31 = vpop.f32.mrf.mxu1 }
 0x66d   : > { %18074 = vst [vmem:[#allocation278_spill] sm:$0xff] %v13794_v63  ;;  %v5262_v44 = vmax.f32 %v5261_v46, %v13783_v21  ;;  %v5269_v42 = vmax.f32 %v5268_v2, %v13794_v63  ;;  %5255 = vmax.xlane.f32.xlu0 %v5254_v30  ;;  %18075 = vst [vmem:[#allocation279_spill] sm:$0xff] %v13798_v31  ;;  %v10473_v46 = vld [vmem:[#allocation2 + $0xe0] sm:$0xff]   ;;  %v10474_v2 = vld [vmem:[#allocation2 + $0xd8] sm:$0xff]   ;;  %v5275_v30 = vmax.f32 %v13314_v60, %v13318_v3 }
 0x66e   : > { %v13800_v24 = vpop.f32.mrf.mxu0  ;;  %v13805_v49 = vpop.f32.mrf.mxu1  ;;  %v18084_v3 = vld [vmem:[#allocation171_spill] sm:$0xff] }
 0x66f   : > { %18076 = vst [vmem:[#allocation280_spill] sm:$0xff] %v13800_v24  ;;  %v5263_v16 = vmax.f32 %v5262_v44, %v13789_v47  ;;  %v5270_v22 = vmax.f32 %v5269_v42, %v13800_v24  ;;  %18077 = vst [vmem:[#allocation281_spill] sm:$0xff] %v13805_v49  ;;  %v5276_v42 = vmax.f32 %v5275_v30, %v13316_v38  ;;  %v13829_v30 = vpop.permute.xlu1 %6825 }
 0x670   : > { %v13812_v44 = vpop.f32.mrf.mxu0  ;;  %18086 = vst [vmem:[#allocation287_spill] sm:$0xff] %v13829_v30 }
 0x671   : > { %v5271_v13 = vmax.f32 %v5270_v22, %v13798_v31  ;;  %5264 = vmax.xlane.f32.xlu1 %v5263_v16  ;;  %18078 = vst [vmem:[#allocation282_spill] sm:$0xff] %v13812_v44  ;;  %v5284_v22 = vmax.f32 %v13325_v53, %v13329_v17  ;;  %v13827_v31 = vpop.permute.xlu0 %6811 }
 0x672   : > { %v13817_v16 = vpop.f32.mrf.mxu0  ;;  %18085 = vst [vmem:[#allocation286_spill] sm:$0xff] %v13827_v31 }
 0x673   : > { %v5272_v35 = vmax.f32 %v5271_v13, %v13805_v49  ;;  %18079 = vst [vmem:[#allocation283_spill] sm:$0xff] %v13817_v16  ;;  %v18080_v13 = vld [vmem:[#allocation167_spill] sm:$0xff]  ;;  %v18081_v49 = vld [vmem:[#allocation169_spill] sm:$0xff] }
 0x674   : > { %v5285_v47 = vmax.f32 %v5284_v22, %v18081_v49  ;;  %v13822_v37 = vpop.f32.mrf.mxu0 }
 0x675   : > { %5273 = vmax.xlane.f32.xlu0 %v5272_v35  ;;  %v5277_v35 = vmax.f32 %v5276_v42, %v18080_v13  ;;  %18082 = vst [vmem:[#allocation284_spill] sm:$0xff] %v13822_v37  ;;  %v13839_v49 = vpop.permute.xlu0 %6823 }
 0x676   : > { %v5286_v60 = vmax.f32 %v5285_v47, %v18084_v3  ;;  %v13833_v38 = vpop.f32.mrf.mxu0  ;;  %18089 = vst [vmem:[#allocation290_spill] sm:$0xff] %v13839_v49  ;;  %v13843_v47 = vpop.permute.xlu1 %6809 }
 0x677   : > { %18087 = vst [vmem:[#allocation288_spill] sm:$0xff] %v13833_v38  ;;  %18091 = vst [vmem:[#allocation292_spill] sm:$0xff] %v13843_v47 }
 0x678   : > { %v5287_v53 = vmax.f32 %v5286_v60, %v13822_v37 }
 0x679   : > { %v13849_v60 = vpop.permute.xlu0 %6807 }
 0x67a   : > { %18093 = vst [vmem:[#allocation294_spill] sm:$0xff] %v13849_v60 }
 0x682   : > { %6821 = vrot.lane.b32.xlu1 %v10473_v46, %s10558_s14  ;;  %v5278_v46 = vmax.f32 %v5277_v35, %v13812_v44  ;;  %v5288_v35 = vmax.f32 %v5287_v53, %v13833_v38  ;;  %v18094_v53 = vld [vmem:[#allocation70_spill] sm:$0xff]  ;;  %v18095_v38 = vld [vmem:[#allocation72_spill] sm:$0xff] }
 0x684   : > { %v5279_v17 = vmax.f32 %v5278_v46, %v13817_v16 }
 0x68a   : > { %v13851_v37 = vpop.xlane.xlu1 %5012 }
 0x68b   : > { %6819 = vrot.lane.b32.xlu0 %v10474_v2, %s10558_s14  ;;  %v13824_v2 = vpop.f32.mrf.mxu1  ;;  %v5293_v49 = vsub.f32 %v18094_v53, %v13851_v37  ;;  %v5294_v47 = vsub.f32 %v18095_v38, %v13851_v37  ;;  %v18099_v38 = vld [vmem:[#allocation74_spill] sm:$0xff] }
 0x68c   : > { %18083 = vst [vmem:[#allocation285_spill] sm:$0xff] %v13824_v2  ;;  %v5280_v22 = vmax.f32 %v5279_v17, %v13824_v2 }
 0x68d   : > { %v13835_v42 = vpop.f32.mrf.mxu1  ;;  %v5549_v60 = vmul.f32 1.442695, %v5293_v49  ;;  %v18100_v49 = vld [vmem:[#allocation76_spill] sm:$0xff] }
 0x68e   : > { %18088 = vst [vmem:[#allocation289_spill] sm:$0xff] %v13835_v42  ;;  %v5281_v30 = vmax.f32 %v5280_v22, %v13835_v42  ;;  %v13858_v3 = vpop.xlane.xlu0 %5021  ;;  %v18096_v22 = vld [vmem:[#allocation71_spill] sm:$0xff] }
 0x68f   : > { %v13841_v44 = vpop.f32.mrf.mxu1  ;;  %v5303_v16 = vsub.f32 %v18099_v38, %v13858_v3  ;;  %9889 = vpow2.f32 %v5549_v60  ;;  %v18103_v38 = vld [vmem:[#allocation79_spill] sm:$0xff] }
 0x690   : > { %18090 = vst [vmem:[#allocation291_spill] sm:$0xff] %v13841_v44  ;;  %v5289_v46 = vmax.f32 %v5288_v35, %v13841_v44  ;;  %v5295_v35 = vsub.f32 %v18096_v22, %v13851_v37  ;;  %v18097_v44 = vld [vmem:[#allocation73_spill] sm:$0xff]  ;;  %v5304_v22 = vsub.f32 %v13034_v27, %v13858_v3 }
 0x691   : > { %v13847_v31 = vpop.f32.mrf.mxu1  ;;  %v5301_v42 = vsub.f32 %v18097_v44, %v13858_v3  ;;  %v5569_v24 = vmul.f32 1.442695, %v5303_v16 }
 0x692   : > { %18092 = vst [vmem:[#allocation293_spill] sm:$0xff] %v13847_v31  ;;  %v5290_v17 = vmax.f32 %v5289_v46, %v13847_v31  ;;  %v5551_v46 = vmul.f32 1.442695, %v5294_v47  ;;  %v18098_v31 = vld [vmem:[#allocation75_spill] sm:$0xff]  ;;  %v5553_v2 = vmul.f32 1.442695, %v5295_v35 }
 0x693   : > { %v5302_v53 = vsub.f32 %v18098_v31, %v13858_v3  ;;  %v18101_v47 = vld [vmem:[#allocation78_spill] sm:$0xff]  ;;  %v18102_v35 = vld [vmem:[#allocation77_spill] sm:$0xff] }
 0x694   : > { %9891 = vpow2.f32 %v5551_v46 }
 0x695   : > { %v5567_v44 = vmul.f32 1.442695, %v5302_v53  ;;  %9893 = vpow2.f32 %v5553_v2  ;;  %v10475_v53 = vld [vmem:[#allocation2 + $0xa0] sm:$0xff]  }
 0x696   : > { %v13882_v60 = vpop.xlane.xlu0 %5039 }
 0x6a6   : > { %5282 = vmax.xlane.f32.xlu1 %v5281_v30  ;;  %v5296_v30 = vsub.f32 %v13026_v61, %v13851_v37  ;;  %v5565_v61 = vmul.f32 1.442695, %v5301_v42 }
 0x6a8   : > { %v5555_v13 = vmul.f32 1.442695, %v5296_v30  ;;  %v5571_v30 = vmul.f32 1.442695, %v5304_v22 }
 0x6aa   : > { %5291 = vmax.xlane.f32.xlu0 %v5290_v17  ;;  %v13868_v17 = vpop.xlane.xlu1 %5030  ;;  %9895 = vpow2.f32 %v5555_v13 }
 0x6ab   : > { %v5309_v21 = vsub.f32 %v18100_v49, %v13868_v17  ;;  %v5310_v31 = vsub.f32 %v18101_v47, %v13868_v17  ;;  %v5311_v63 = vsub.f32 %v18102_v35, %v13868_v17  ;;  %v5312_v27 = vsub.f32 %v13050_v48, %v13868_v17 }
 0x6ac   : > { %9897 = vpow2.f32 %v5565_v61  ;;  %v5313_v42 = vsub.f32 %v13367_v62, %v13868_v17  ;;  %v5314_v2 = vsub.f32 %v13374_v39, %v13868_v17  ;;  %v5317_v48 = vsub.f32 %v18103_v38, %v13882_v60  ;;  %v18104_v61 = vld [vmem:[#allocation80_spill] sm:$0xff] }
 0x6ad   : > { %v5581_v46 = vmul.f32 1.442695, %v5309_v21  ;;  %9899 = vpow2.f32 %v5567_v44  ;;  %v5583_v16 = vmul.f32 1.442695, %v5310_v31  ;;  %v5585_v13 = vmul.f32 1.442695, %v5311_v63 }
 0x6ae   : > { %9901 = vpow2.f32 %v5569_v24  ;;  %v5587_v22 = vmul.f32 1.442695, %v5312_v27  ;;  %v5318_v49 = vsub.f32 %v18104_v61, %v13882_v60  ;;  %v13893_v62 = vpop.xlane.xlu1 %5048  ;;  %v5589_v21 = vmul.f32 1.442695, %v5313_v42  ;;  %v10476_v24 = vld [vmem:[#allocation2 + $0xd0] sm:$0xff]  }
 0x6af   : > { %9903 = vpow2.f32 %v5571_v30  ;;  %v5319_v39 = vsub.f32 %v13054_v12, %v13882_v60  ;;  %v5591_v44 = vmul.f32 1.442695, %v5314_v2  ;;  %v5320_v63 = vsub.f32 %v13058_v51, %v13882_v60  ;;  %v18105_v30 = vld [vmem:[#allocation81_spill] sm:$0xff] }
 0x6b0   : > { %9905 = vpow2.f32 %v5581_v46  ;;  %v5597_v47 = vmul.f32 1.442695, %v5317_v48  ;;  %v5325_v31 = vsub.f32 %v13060_v52, %v13893_v62  ;;  %v5599_v35 = vmul.f32 1.442695, %v5318_v49  ;;  %v13906_v46 = vpop.eup %9889  ;;  %v10477_v52 = vld [vmem:[#allocation2 + $0x90] sm:$0xff]  }
 0x6b1   : > { %9907 = vpow2.f32 %v5583_v16  ;;  %v5326_v27 = vsub.f32 %v18105_v30, %v13893_v62  ;;  %v5601_v12 = vmul.f32 1.442695, %v5319_v39  ;;  %v5327_v42 = vsub.f32 %v13062_v28, %v13893_v62  ;;  %18106 = vst [vmem:[#allocation70_spill] sm:$0xff] %v13906_v46  ;;  %v13910_v16 = vpop.xlane.xlu0 %5057  ;;  %v10478_v28 = vld [vmem:[#allocation2 + $0x98] sm:$0xff]   ;;  %v10479_v30 = vld [vmem:[#allocation2 + $0xc8] sm:$0xff]  }
 0x6b2   : > { %9909 = vpow2.f32 %v5585_v13  ;;  %v5603_v51 = vmul.f32 1.442695, %v5320_v63  ;;  %v5328_v2 = vsub.f32 %v13074_v19, %v13893_v62  ;;  %v5329_v13 = vsub.f32 %v13399_v7, %v13893_v62  ;;  %v18112_v63 = vld [vmem:[#allocation83_spill] sm:$0xff] }
 0x6b3   : > { %9911 = vpow2.f32 %v5587_v22  ;;  %v5613_v38 = vmul.f32 1.442695, %v5325_v31  ;;  %v5330_v19 = vsub.f32 %v13406_v15, %v13893_v62  ;;  %v5615_v22 = vmul.f32 1.442695, %v5326_v27 }
 0x6b4   : > { %9913 = vpow2.f32 %v5589_v21  ;;  %v5617_v49 = vmul.f32 1.442695, %v5327_v42  ;;  %v18110_v21 = vld [vmem:[#allocation82_spill] sm:$0xff]  ;;  %v5619_v7 = vmul.f32 1.442695, %v5328_v2  ;;  %v5336_v42 = vsub.f32 %v13082_v8, %v13910_v16 }
 0x6b5   : > { %9915 = vpow2.f32 %v5591_v44  ;;  %v5333_v39 = vsub.f32 %v18110_v21, %v13910_v16  ;;  %v5621_v15 = vmul.f32 1.442695, %v5329_v13  ;;  %v13957_v21 = vpop.xlane.xlu0 %5075 }
 0x6b6   : > { %9917 = vpow2.f32 %v5597_v47  ;;  %v13930_v47 = vpop.xlane.xlu1 %5066 }
 0x6b7   : > { %6805 = vrot.lane.b32.xlu1 %v10475_v53, %s10558_s14  ;;  %v13913_v53 = vpop.eup %9891  ;;  %9919 = vpow2.f32 %v5599_v35  ;;  %v5335_v35 = vsub.f32 %v13078_v4, %v13910_v16  ;;  %v5629_v2 = vmul.f32 1.442695, %v5333_v39  ;;  %v5343_v8 = vsub.f32 %v13086_v40, %v13930_v47 }
 0x6b8   : > { %18107 = vst [vmem:[#allocation72_spill] sm:$0xff] %v13913_v53  ;;  %v13918_v48 = vpop.eup %9893  ;;  %9921 = vpow2.f32 %v5601_v12  ;;  %v5623_v12 = vmul.f32 1.442695, %v5330_v19  ;;  %v5346_v40 = vsub.f32 %v13439_v58, %v13930_v47 }
 0x6b9   : > { %18108 = vst [vmem:[#allocation71_spill] sm:$0xff] %v13918_v48  ;;  %v13922_v61 = vpop.eup %9895  ;;  %9923 = vpow2.f32 %v5603_v51  ;;  %v5633_v19 = vmul.f32 1.442695, %v5335_v35  ;;  %v18122_v35 = vld [vmem:[#allocation84_spill] sm:$0xff] }
 0x6ba   : > { %18109 = vst [vmem:[#allocation73_spill] sm:$0xff] %v13922_v61  ;;  %v13926_v44 = vpop.eup %9897  ;;  %9925 = vpow2.f32 %v5613_v38  ;;  %v5342_v38 = vsub.f32 %v13096_v14, %v13930_v47  ;;  %v5345_v14 = vsub.f32 %v13431_v9, %v13930_v47  ;;  %v18124_v9 = vld [vmem:[#allocation85_spill] sm:$0xff] }
 0x6bb   : > { %6817 = vrot.lane.b32.xlu1 %v10476_v24, %s10558_s14  ;;  %18111 = vst [vmem:[#allocation75_spill] sm:$0xff] %v13926_v44  ;;  %v5334_v24 = vsub.f32 %v18112_v63, %v13910_v16  ;;  %v13932_v31 = vpop.eup %9899  ;;  %9927 = vpow2.f32 %v5615_v22 }
 0x6bc   : > { %18113 = vst [vmem:[#allocation74_spill] sm:$0xff] %v13932_v31  ;;  %v13937_v27 = vpop.eup %9901  ;;  %9929 = vpow2.f32 %v5617_v49  ;;  %v5635_v49 = vmul.f32 1.442695, %v5336_v42  ;;  %v5653_v58 = vmul.f32 1.442695, %v5345_v14 }
 0x6bd   : > { %18114 = vst [vmem:[#allocation76_spill] sm:$0xff] %v13937_v27  ;;  %v13941_v51 = vpop.eup %9903  ;;  %9931 = vpow2.f32 %v5619_v7  ;;  %v5631_v4 = vmul.f32 1.442695, %v5334_v24  ;;  %v5647_v24 = vmul.f32 1.442695, %v5342_v38  ;;  %v5351_v38 = vsub.f32 %v13102_v6, %v13957_v21 }
 0x6be   : > { %18115 = vst [vmem:[#allocation78_spill] sm:$0xff] %v13941_v51  ;;  %v13945_v13 = vpop.eup %9905  ;;  %9933 = vpow2.f32 %v5621_v15 }
 0x6bf   : > { %6801 = vrot.lane.b32.xlu1 %v10477_v52, %s10558_s14  ;;  %v5341_v52 = vsub.f32 %v13084_v18, %v13930_v47  ;;  %18116 = vst [vmem:[#allocation77_spill] sm:$0xff] %v13945_v13  ;;  %9935 = vpow2.f32 %v5623_v12  ;;  %v5344_v18 = vsub.f32 %v13098_v45, %v13930_v47  ;;  %v5649_v45 = vmul.f32 1.442695, %v5343_v8 }
 0x6c0   : > { %6803 = vrot.lane.b32.xlu0 %v10478_v28, %s10558_s14  ;;  %v13949_v28 = vpop.eup %9907  ;;  %9937 = vpow2.f32 %v5629_v2  ;;  %v5350_v2 = vsub.f32 %v18124_v9, %v13957_v21  ;;  %v5655_v8 = vmul.f32 1.442695, %v5346_v40  ;;  %v5665_v40 = vmul.f32 1.442695, %v5351_v38 }
 0x6c1   : > { %18117 = vst [vmem:[#allocation79_spill] sm:$0xff] %v13949_v28  ;;  %v13953_v22 = vpop.eup %9909  ;;  %v5645_v7 = vmul.f32 1.442695, %v5341_v52  ;;  %9939 = vpow2.f32 %v5631_v4  ;;  %v5651_v42 = vmul.f32 1.442695, %v5344_v18  ;;  %v13975_v52 = vpop.xlane.xlu1 %5084 }
 0x6c2   : > { %18118 = vst [vmem:[#allocation80_spill] sm:$0xff] %v13953_v22  ;;  %v13959_v39 = vpop.eup %9911  ;;  %9941 = vpow2.f32 %v5633_v19  ;;  %v5357_v9 = vsub.f32 %v13108_v55, %v13975_v52  ;;  %v5663_v14 = vmul.f32 1.442695, %v5350_v2  ;;  %v5358_v6 = vsub.f32 %v13120_v34, %v13975_v52 }
 0x6c3   : > { %18119 = vst [vmem:[#allocation81_spill] sm:$0xff] %v13959_v39  ;;  %v13963_v63 = vpop.eup %9913  ;;  %9943 = vpow2.f32 %v5635_v49  ;;  %v5352_v49 = vsub.f32 %v13106_v0, %v13957_v21  ;;  %v5359_v0 = vsub.f32 %v13110_v56, %v13975_v52  ;;  %v5360_v55 = vsub.f32 %v13122_v10, %v13975_v52 }
 0x6c4   : > { %6815 = vrot.lane.b32.xlu0 %v10479_v30, %s10558_s14  ;;  %18120 = vst [vmem:[#allocation82_spill] sm:$0xff] %v13963_v63  ;;  %v13967_v15 = vpop.eup %9915  ;;  %v5349_v30 = vsub.f32 %v18122_v35, %v13957_v21  ;;  %9945 = vpow2.f32 %v5645_v7  ;;  %v5361_v34 = vsub.f32 %v13463_v5, %v13975_v52  ;;  %v5677_v2 = vmul.f32 1.442695, %v5357_v9  ;;  %v18136_v5 = vld [vmem:[#allocation87_spill] sm:$0xff] }
 0x6c5   : > { %18121 = vst [vmem:[#allocation83_spill] sm:$0xff] %v13967_v15  ;;  %v13971_v12 = vpop.eup %9917  ;;  %9947 = vpow2.f32 %v5647_v24  ;;  %v5362_v56 = vsub.f32 %v13470_v57, %v13975_v52  ;;  %v5679_v38 = vmul.f32 1.442695, %v5358_v6  ;;  %v5681_v10 = vmul.f32 1.442695, %v5359_v0  ;;  %v14019_v33 = vpop.xlane.xlu1 %5102 }
 0x6c6   : > { %18123 = vst [vmem:[#allocation84_spill] sm:$0xff] %v13971_v12  ;;  %v13977_v4 = vpop.eup %9919  ;;  %9949 = vpow2.f32 %v5649_v45  ;;  %v5661_v35 = vmul.f32 1.442695, %v5349_v30  ;;  %v5667_v45 = vmul.f32 1.442695, %v5352_v49  ;;  %v14001_v30 = vpop.xlane.xlu0 %5093  ;;  %v18134_v49 = vld [vmem:[#allocation86_spill] sm:$0xff] }
 0x6c7   : > { %18125 = vst [vmem:[#allocation85_spill] sm:$0xff] %v13977_v4  ;;  %v13981_v19 = vpop.eup %9921  ;;  %9951 = vpow2.f32 %v5651_v42  ;;  %v5365_v59 = vsub.f32 %v18134_v49, %v14001_v30  ;;  %v5366_v9 = vsub.f32 %v18136_v5, %v14001_v30  ;;  %v5685_v57 = vmul.f32 1.442695, %v5361_v34 }
 0x6c8   : > { %18126 = vst [vmem:[#allocation295_spill] sm:$0xff] %v13981_v19  ;;  %v13985_v18 = vpop.eup %9923  ;;  %9953 = vpow2.f32 %v5653_v58  ;;  %v5367_v6 = vsub.f32 %v13126_v25, %v14001_v30  ;;  %v5687_v0 = vmul.f32 1.442695, %v5362_v56  ;;  %v5373_v5 = vsub.f32 %v13132_v29, %v14019_v33 }
 0x6c9   : > { %18127 = vst [vmem:[#allocation296_spill] sm:$0xff] %v13985_v18  ;;  %v13989_v32 = vpop.eup %9925  ;;  %9955 = vpow2.f32 %v5655_v8  ;;  %v5693_v49 = vmul.f32 1.442695, %v5365_v59  ;;  %v5695_v34 = vmul.f32 1.442695, %v5366_v9  ;;  %v5374_v25 = vsub.f32 %v13144_v11, %v14019_v33 }
 0x6ca   : > { %18128 = vst [vmem:[#allocation297_spill] sm:$0xff] %v13989_v32  ;;  %v13993_v7 = vpop.eup %9927  ;;  %9957 = vpow2.f32 %v5661_v35  ;;  %v5683_v35 = vmul.f32 1.442695, %v5360_v55  ;;  %v5697_v56 = vmul.f32 1.442695, %v5367_v6  ;;  %v5376_v29 = vsub.f32 %v13146_v43, %v14019_v33 }
 0x6cb   : > { %18129 = vst [vmem:[#allocation298_spill] sm:$0xff] %v13993_v7  ;;  %v13997_v24 = vpop.eup %9929  ;;  %9959 = vpow2.f32 %v5663_v14  ;;  %v5377_v11 = vsub.f32 %v13495_v20, %v14019_v33  ;;  %v5709_v9 = vmul.f32 1.442695, %v5373_v5  ;;  %v18150_v20 = vld [vmem:[#allocation90_spill] sm:$0xff] }
 0x6cc   : > { %18130 = vst [vmem:[#allocation299_spill] sm:$0xff] %v13997_v24  ;;  %v14003_v42 = vpop.eup %9931  ;;  %9961 = vpow2.f32 %v5665_v40 }
 0x6cd   : > { %18131 = vst [vmem:[#allocation300_spill] sm:$0xff] %v14003_v42  ;;  %v14007_v58 = vpop.eup %9933  ;;  %9963 = vpow2.f32 %v5667_v45  ;;  %v5368_v45 = vsub.f32 %v13130_v23, %v14001_v30  ;;  %v5375_v23 = vsub.f32 %v13134_v41, %v14019_v33  ;;  %v18146_v41 = vld [vmem:[#allocation205_spill] sm:$0xff] }
 0x6ce   : > { %18132 = vst [vmem:[#allocation301_spill] sm:$0xff] %v14007_v58  ;;  %v14011_v8 = vpop.eup %9935  ;;  %9965 = vpow2.f32 %v5677_v2  ;;  %v5378_v6 = vsub.f32 %v18146_v41, %v14019_v33  ;;  %v18153_v41 = vld [vmem:[#allocation89_spill] sm:$0xff] }
 0x6cf   : > { %18133 = vst [vmem:[#allocation302_spill] sm:$0xff] %v14011_v8  ;;  %v14015_v26 = vpop.eup %9937  ;;  %9967 = vpow2.f32 %v5679_v38  ;;  %v5699_v59 = vmul.f32 1.442695, %v5368_v45  ;;  %v5713_v43 = vmul.f32 1.442695, %v5375_v23 }
 0x6d0   : > { %18135 = vst [vmem:[#allocation86_spill] sm:$0xff] %v14015_v26  ;;  %v14021_v14 = vpop.eup %9939  ;;  %9969 = vpow2.f32 %v5681_v10  ;;  %v14045_v10 = vpop.xlane.xlu0 %5111 }
 0x6d1   : > { %18137 = vst [vmem:[#allocation87_spill] sm:$0xff] %v14021_v14  ;;  %v14025_v40 = vpop.eup %9941  ;;  %9971 = vpow2.f32 %v5683_v35  ;;  %18143 = vst [vmem:[#allocation308_spill] sm:$0xff] %v14045_v10  ;;  %v5381_v1 = vsub.f32 %v18148_v54, %v14045_v10  ;;  %v5382_v5 = vsub.f32 %v18150_v20, %v14045_v10  ;;  %v5719_v54 = vmul.f32 1.442695, %v5378_v6 }
 0x6d2   : > { %18138 = vst [vmem:[#allocation303_spill] sm:$0xff] %v14025_v40  ;;  %v14029_v55 = vpop.eup %9943  ;;  %9973 = vpow2.f32 %v5685_v57 }
 0x6d3   : > { %18139 = vst [vmem:[#allocation304_spill] sm:$0xff] %v14029_v55  ;;  %v14033_v50 = vpop.eup %9945  ;;  %9975 = vpow2.f32 %v5687_v0  ;;  %v5711_v0 = vmul.f32 1.442695, %v5374_v25  ;;  %v5717_v25 = vmul.f32 1.442695, %v5377_v11 }
 0x6d4   : > { %18140 = vst [vmem:[#allocation305_spill] sm:$0xff] %v14033_v50  ;;  %v14037_v2 = vpop.eup %9947  ;;  %9977 = vpow2.f32 %v5693_v49  ;;  %v5715_v49 = vmul.f32 1.442695, %v5376_v29  ;;  %v5725_v20 = vmul.f32 1.442695, %v5381_v1 }
 0x6d5   : > { %18141 = vst [vmem:[#allocation306_spill] sm:$0xff] %v14037_v2  ;;  %v14041_v38 = vpop.eup %9949  ;;  %9979 = vpow2.f32 %v5695_v34  ;;  %v5727_v11 = vmul.f32 1.442695, %v5382_v5  ;;  %v18166_v5 = vld [vmem:[#allocation211_spill] sm:$0xff] }
 0x6d6   : > { %18142 = vst [vmem:[#allocation307_spill] sm:$0xff] %v14041_v38  ;;  %v14047_v35 = vpop.eup %9951  ;;  %9981 = vpow2.f32 %v5697_v56  ;;  %v5383_v56 = vsub.f32 %v18153_v41, %v14045_v10 }
 0x6d7   : > { %18144 = vst [vmem:[#allocation309_spill] sm:$0xff] %v14047_v35  ;;  %v14051_v57 = vpop.eup %9953  ;;  %9983 = vpow2.f32 %v5699_v59 }
 0x6d8   : > { %18145 = vst [vmem:[#allocation310_spill] sm:$0xff] %v14051_v57  ;;  %v14055_v45 = vpop.eup %9955  ;;  %v14063_v57 = vpop.xlane.xlu1 %5120  ;;  %9985 = vpow2.f32 %v5709_v9  ;;  %v18159_v9 = vld [vmem:[#allocation94_spill] sm:$0xff]  ;;  %v5729_v6 = vmul.f32 1.442695, %v5383_v56 }
 0x6d9   : > { %18147 = vst [vmem:[#allocation205_spill] sm:$0xff] %v14055_v45  ;;  %v14059_v35 = vpop.eup %9957  ;;  %18151 = vst [vmem:[#allocation90_spill] sm:$0xff] %v14063_v57  ;;  %9987 = vpow2.f32 %v5711_v0  ;;  %v18155_v45 = vld [vmem:[#allocation91_spill] sm:$0xff]  ;;  %v5390_v41 = vsub.f32 %v18159_v9, %v14063_v57  ;;  %v18161_v0 = vld [vmem:[#allocation93_spill] sm:$0xff]  ;;  %v5393_v9 = vsub.f32 %v18166_v5, %v14063_v57 }
 0x6da   : > { %18149 = vst [vmem:[#allocation88_spill] sm:$0xff] %v14059_v35  ;;  %v14065_v34 = vpop.eup %9959  ;;  %v5384_v59 = vsub.f32 %v18155_v45, %v14045_v10  ;;  %9989 = vpow2.f32 %v5713_v43  ;;  %v18157_v35 = vld [vmem:[#allocation92_spill] sm:$0xff]  ;;  %v5391_v45 = vsub.f32 %v18161_v0, %v14063_v57  ;;  %v18168_v0 = vld [vmem:[#allocation213_spill] sm:$0xff] }
 0x6db   : > { %18152 = vst [vmem:[#allocation311_spill] sm:$0xff] %v14065_v34  ;;  %v14069_v23 = vpop.eup %9961  ;;  %v5389_v55 = vsub.f32 %v18157_v35, %v14063_v57  ;;  %9991 = vpow2.f32 %v5715_v49  ;;  %v18163_v35 = vld [vmem:[#allocation95_spill] sm:$0xff] }
 0x6dc   : > { %18154 = vst [vmem:[#allocation89_spill] sm:$0xff] %v14069_v23  ;;  %v14073_v29 = vpop.eup %9963  ;;  %9993 = vpow2.f32 %v5717_v25  ;;  %v5731_v1 = vmul.f32 1.442695, %v5384_v59  ;;  %v5392_v43 = vsub.f32 %v18163_v35, %v14063_v57  ;;  %v5745_v35 = vmul.f32 1.442695, %v5391_v45 }
 0x6dd   : > { %18156 = vst [vmem:[#allocation91_spill] sm:$0xff] %v14073_v29  ;;  %v14077_v34 = vpop.eup %9965  ;;  %9995 = vpow2.f32 %v5719_v54  ;;  %v5741_v25 = vmul.f32 1.442695, %v5389_v55  ;;  %v5743_v54 = vmul.f32 1.442695, %v5390_v41  ;;  %v18172_v55 = vld [vmem:[#allocation98_spill] sm:$0xff] }
 0x6de   : > { %18158 = vst [vmem:[#allocation92_spill] sm:$0xff] %v14077_v34  ;;  %v14081_v23 = vpop.eup %9967  ;;  %v14089_v34 = vpop.xlane.xlu0 %5129  ;;  %9997 = vpow2.f32 %v5725_v20  ;;  %v5747_v20 = vmul.f32 1.442695, %v5392_v43  ;;  %v5749_v41 = vmul.f32 1.442695, %v5393_v9 }
 0x6df   : > { %18160 = vst [vmem:[#allocation94_spill] sm:$0xff] %v14081_v23  ;;  %v14085_v10 = vpop.eup %9969  ;;  %18164 = vst [vmem:[#allocation95_spill] sm:$0xff] %v14089_v34  ;;  %9999 = vpow2.f32 %v5727_v11  ;;  %v18170_v23 = vld [vmem:[#allocation96_spill] sm:$0xff]  ;;  %v5398_v5 = vsub.f32 %v18172_v55, %v14089_v34 }
 0x6e0   : > { %18162 = vst [vmem:[#allocation93_spill] sm:$0xff] %v14085_v10  ;;  %v14091_v49 = vpop.eup %9971  ;;  %v5394_v10 = vsub.f32 %v18168_v0, %v14063_v57  ;;  %10001 = vpow2.f32 %v5729_v6  ;;  %v5397_v29 = vsub.f32 %v18170_v23, %v14089_v34  ;;  %v18175_v0 = vld [vmem:[#allocation97_spill] sm:$0xff]  ;;  %v18182_v57 = vld [vmem:[#allocation102_spill] sm:$0xff] }
 0x6e1   : > { %18165 = vst [vmem:[#allocation312_spill] sm:$0xff] %v14091_v49  ;;  %v14095_v56 = vpop.eup %9973  ;;  %10003 = vpow2.f32 %v5731_v1  ;;  %v5399_v6 = vsub.f32 %v18175_v0, %v14089_v34  ;;  %v18178_v1 = vld [vmem:[#allocation99_spill] sm:$0xff]  ;;  %v5759_v0 = vmul.f32 1.442695, %v5398_v5 }
 0x6e2   : > { %18167 = vst [vmem:[#allocation211_spill] sm:$0xff] %v14095_v56  ;;  %v14099_v59 = vpop.eup %9975  ;;  %v14107_v56 = vpop.xlane.xlu1 %5138  ;;  %10005 = vpow2.f32 %v5741_v25  ;;  %v5751_v23 = vmul.f32 1.442695, %v5394_v10  ;;  %v5400_v43 = vsub.f32 %v18178_v1, %v14089_v34  ;;  %v5757_v55 = vmul.f32 1.442695, %v5397_v29 }
 0x6e3   : > { %18169 = vst [vmem:[#allocation213_spill] sm:$0xff] %v14099_v59  ;;  %v14103_v49 = vpop.eup %9977  ;;  %18173 = vst [vmem:[#allocation98_spill] sm:$0xff] %v14107_v56  ;;  %v14113_v45 = vpop.xlane.xlu0 %5147  ;;  %10007 = vpow2.f32 %v5743_v54  ;;  %v5406_v38 = vsub.f32 %v18182_v57, %v14107_v56  ;;  %v5761_v10 = vmul.f32 1.442695, %v5399_v6  ;;  %v18184_v54 = vld [vmem:[#allocation101_spill] sm:$0xff]  ;;  %v18188_v57 = vld [vmem:[#allocation219_spill] sm:$0xff] }
 0x6e4   : > { %18171 = vst [vmem:[#allocation96_spill] sm:$0xff] %v14103_v49  ;;  %v14109_v11 = vpop.eup %9979  ;;  %18176 = vst [vmem:[#allocation97_spill] sm:$0xff] %v14113_v45  ;;  %10009 = vpow2.f32 %v5745_v35  ;;  %v5407_v1 = vsub.f32 %v18184_v54, %v14107_v56  ;;  %v5763_v35 = vmul.f32 1.442695, %v5400_v43  ;;  %v18190_v54 = vld [vmem:[#allocation221_spill] sm:$0xff]  ;;  %v18192_v43 = vld [vmem:[#allocation104_spill] sm:$0xff] }
 0x6e5   : > { %18174 = vst [vmem:[#allocation313_spill] sm:$0xff] %v14109_v11  ;;  %v14115_v59 = vpop.eup %9981  ;;  %v18180_v11 = vld [vmem:[#allocation100_spill] sm:$0xff]  ;;  %10011 = vpow2.f32 %v5747_v20  ;;  %v5775_v34 = vmul.f32 1.442695, %v5406_v38 }
 0x6e6   : > { %18177 = vst [vmem:[#allocation314_spill] sm:$0xff] %v14115_v59  ;;  %v14119_v49 = vpop.eup %9983  ;;  %v5405_v25 = vsub.f32 %v18180_v11, %v14107_v56  ;;  %10013 = vpow2.f32 %v5749_v41  ;;  %v18186_v11 = vld [vmem:[#allocation103_spill] sm:$0xff] }
 0x6e7   : > { %18179 = vst [vmem:[#allocation99_spill] sm:$0xff] %v14119_v49  ;;  %v14123_v9 = vpop.eup %9985  ;;  %v14131_v49 = vpop.xlane.xlu0 %5165  ;;  %10015 = vpow2.f32 %v5751_v23  ;;  %v5408_v20 = vsub.f32 %v18186_v11, %v14107_v56  ;;  %v5777_v23 = vmul.f32 1.442695, %v5407_v1  ;;  %v5413_v11 = vsub.f32 %v18192_v43, %v14113_v45 }
 0x6e8   : > { %18181 = vst [vmem:[#allocation100_spill] sm:$0xff] %v14123_v9  ;;  %v14127_v59 = vpop.eup %9987  ;;  %10017 = vpow2.f32 %v5757_v55  ;;  %v5773_v41 = vmul.f32 1.442695, %v5405_v25  ;;  %v5410_v9 = vsub.f32 %v18190_v54, %v14107_v56  ;;  %v18197_v54 = vld [vmem:[#allocation105_spill] sm:$0xff] }
 0x6e9   : > { %18183 = vst [vmem:[#allocation102_spill] sm:$0xff] %v14127_v59  ;;  %v14133_v29 = vpop.eup %9989  ;;  %v5409_v59 = vsub.f32 %v18188_v57, %v14107_v56  ;;  %10019 = vpow2.f32 %v5759_v0  ;;  %v5779_v25 = vmul.f32 1.442695, %v5408_v20  ;;  %v18195_v57 = vld [vmem:[#allocation106_spill] sm:$0xff]  ;;  %v18202_v20 = vld [vmem:[#allocation223_spill] sm:$0xff] }
 0x6ea   : > { %18185 = vst [vmem:[#allocation101_spill] sm:$0xff] %v14133_v29  ;;  %v14137_v5 = vpop.eup %9991  ;;  %10021 = vpow2.f32 %v5761_v10  ;;  %v5414_v0 = vsub.f32 %v18195_v57, %v14113_v45  ;;  %v5415_v10 = vsub.f32 %v18197_v54, %v14113_v45  ;;  %v5783_v43 = vmul.f32 1.442695, %v5410_v9  ;;  %v18204_v54 = vld [vmem:[#allocation225_spill] sm:$0xff] }
 0x6eb   : > { %18187 = vst [vmem:[#allocation103_spill] sm:$0xff] %v14137_v5  ;;  %v14141_v6 = vpop.eup %9993  ;;  %v14149_v5 = vpop.xlane.xlu0 %5183  ;;  %10023 = vpow2.f32 %v5763_v35  ;;  %v5781_v38 = vmul.f32 1.442695, %v5409_v59  ;;  %v5417_v57 = vsub.f32 %v18202_v20, %v14113_v45  ;;  %v18209_v20 = vld [vmem:[#allocation110_spill] sm:$0xff] }
 0x6ec   : > { %18189 = vst [vmem:[#allocation219_spill] sm:$0xff] %v14141_v6  ;;  %v14145_v29 = vpop.eup %9995  ;;  %18193 = vst [vmem:[#allocation104_spill] sm:$0xff] %v14149_v5  ;;  %10025 = vpow2.f32 %v5773_v41  ;;  %v5789_v41 = vmul.f32 1.442695, %v5413_v11 }
 0x6ed   : > { %18191 = vst [vmem:[#allocation221_spill] sm:$0xff] %v14145_v29  ;;  %v14151_v55 = vpop.eup %9997  ;;  %10027 = vpow2.f32 %v5775_v34  ;;  %v18199_v29 = vld [vmem:[#allocation107_spill] sm:$0xff]  ;;  %v5791_v34 = vmul.f32 1.442695, %v5414_v0  ;;  %v5797_v0 = vmul.f32 1.442695, %v5417_v57 }
 0x6ee   : > { %18194 = vst [vmem:[#allocation315_spill] sm:$0xff] %v14151_v55  ;;  %v14155_v6 = vpop.eup %9999  ;;  %v5416_v56 = vsub.f32 %v18199_v29, %v14113_v45  ;;  %v14163_v55 = vpop.xlane.xlu1 %5156  ;;  %10029 = vpow2.f32 %v5777_v23  ;;  %v5793_v29 = vmul.f32 1.442695, %v5415_v10  ;;  %v18217_v57 = vld [vmem:[#allocation229_spill] sm:$0xff] }
 0x6ef   : > { %18196 = vst [vmem:[#allocation106_spill] sm:$0xff] %v14155_v6  ;;  %v14159_v1 = vpop.eup %10001  ;;  %18200 = vst [vmem:[#allocation107_spill] sm:$0xff] %v14163_v55  ;;  %10031 = vpow2.f32 %v5779_v25  ;;  %v18206_v6 = vld [vmem:[#allocation108_spill] sm:$0xff]  ;;  %v5422_v25 = vsub.f32 %v18209_v20, %v14163_v55 }
 0x6f0   : > { %18198 = vst [vmem:[#allocation105_spill] sm:$0xff] %v14159_v1  ;;  %v14165_v35 = vpop.eup %10003  ;;  %v5418_v1 = vsub.f32 %v18204_v54, %v14113_v45  ;;  %10033 = vpow2.f32 %v5781_v38  ;;  %v5421_v5 = vsub.f32 %v18206_v6, %v14163_v55  ;;  %v5795_v11 = vmul.f32 1.442695, %v5416_v56  ;;  %v18211_v54 = vld [vmem:[#allocation109_spill] sm:$0xff]  ;;  %v18215_v56 = vld [vmem:[#allocation227_spill] sm:$0xff] }
 0x6f1   : > { %18201 = vst [vmem:[#allocation316_spill] sm:$0xff] %v14165_v35  ;;  %v14169_v59 = vpop.eup %10005  ;;  %v14177_v35 = vpop.xlane.xlu0 %5192  ;;  %10035 = vpow2.f32 %v5783_v43  ;;  %v5423_v38 = vsub.f32 %v18211_v54, %v14163_v55  ;;  %v5425_v43 = vsub.f32 %v18215_v56, %v14163_v55  ;;  %v5807_v54 = vmul.f32 1.442695, %v5422_v25 }
 0x6f2   : > { %18203 = vst [vmem:[#allocation223_spill] sm:$0xff] %v14169_v59  ;;  %v14173_v9 = vpop.eup %10007  ;;  %18207 = vst [vmem:[#allocation108_spill] sm:$0xff] %v14177_v35  ;;  %10037 = vpow2.f32 %v5789_v41  ;;  %v5799_v6 = vmul.f32 1.442695, %v5418_v1  ;;  %v5805_v20 = vmul.f32 1.442695, %v5421_v5  ;;  %v5426_v41 = vsub.f32 %v18217_v57, %v14163_v55 }
 0x6f3   : > { %18205 = vst [vmem:[#allocation225_spill] sm:$0xff] %v14173_v9  ;;  %v14179_v23 = vpop.eup %10009  ;;  %10039 = vpow2.f32 %v5791_v34  ;;  %v18213_v9 = vld [vmem:[#allocation111_spill] sm:$0xff]  ;;  %v5809_v1 = vmul.f32 1.442695, %v5423_v38  ;;  %v18219_v34 = vld [vmem:[#allocation112_spill] sm:$0xff]  ;;  %v18224_v57 = vld [vmem:[#allocation114_spill] sm:$0xff] }
 0x6f4   : > { %18208 = vst [vmem:[#allocation317_spill] sm:$0xff] %v14179_v23  ;;  %v14183_v59 = vpop.eup %10011  ;;  %v5424_v45 = vsub.f32 %v18213_v9, %v14163_v55  ;;  %10041 = vpow2.f32 %v5793_v29  ;;  %v5429_v9 = vsub.f32 %v18219_v34, %v14131_v49  ;;  %v18222_v5 = vld [vmem:[#allocation172_spill] sm:$0xff]  ;;  %v5813_v25 = vmul.f32 1.442695, %v5425_v43 }
 0x6f5   : > { %18210 = vst [vmem:[#allocation110_spill] sm:$0xff] %v14183_v59  ;;  %v14187_v10 = vpop.eup %10013  ;;  %10043 = vpow2.f32 %v5795_v11  ;;  %v5297_v56 = vsub.f32 %v18222_v5, %v13851_v37  ;;  %v5815_v34 = vmul.f32 1.442695, %v5426_v41  ;;  %v18232_v41 = vld [vmem:[#allocation180_spill] sm:$0xff] }
 0x6f6   : > { %18212 = vst [vmem:[#allocation109_spill] sm:$0xff] %v14187_v10  ;;  %v14191_v23 = vpop.eup %10015  ;;  %10045 = vpow2.f32 %v5797_v0  ;;  %v5811_v11 = vmul.f32 1.442695, %v5424_v45  ;;  %v5430_v0 = vsub.f32 %v18224_v57, %v14131_v49  ;;  %v5821_v45 = vmul.f32 1.442695, %v5429_v9  ;;  %v18231_v57 = vld [vmem:[#allocation176_spill] sm:$0xff] }
 0x6f7   : > { %18214 = vst [vmem:[#allocation111_spill] sm:$0xff] %v14191_v23  ;;  %v14195_v59 = vpop.eup %10017  ;;  %v14203_v23 = vpop.xlane.xlu0 %5201  ;;  %10047 = vpow2.f32 %v5799_v6  ;;  %v18229_v6 = vld [vmem:[#allocation175_spill] sm:$0xff] }
 0x6f8   : > { %18216 = vst [vmem:[#allocation227_spill] sm:$0xff] %v14195_v59  ;;  %v14199_v10 = vpop.eup %10019  ;;  %18220 = vst [vmem:[#allocation112_spill] sm:$0xff] %v14203_v23  ;;  %10049 = vpow2.f32 %v5805_v20  ;;  %v5300_v43 = vsub.f32 %v18229_v6, %v13851_v37  ;;  %v18236_v6 = vld [vmem:[#allocation178_spill] sm:$0xff] }
 0x6f9   : > { %18218 = vst [vmem:[#allocation229_spill] sm:$0xff] %v14199_v10  ;;  %v14205_v29 = vpop.eup %10021  ;;  %10051 = vpow2.f32 %v5807_v54  ;;  %v18226_v10 = vld [vmem:[#allocation174_spill] sm:$0xff]  ;;  %v5315_v54 = vsub.f32 %v18232_v41, %v13868_v17 }
 0x6fa   : > { %18221 = vst [vmem:[#allocation318_spill] sm:$0xff] %v14205_v29  ;;  %v14209_v59 = vpop.eup %10023  ;;  %v5298_v55 = vsub.f32 %v18226_v10, %v13851_v37  ;;  %v18227_v29 = vld [vmem:[#allocation173_spill] sm:$0xff]  ;;  %10053 = vpow2.f32 %v5809_v1  ;;  %v5557_v10 = vmul.f32 1.442695, %v5297_v56  ;;  %v18238_v41 = vld [vmem:[#allocation186_spill] sm:$0xff] }
 0x6fb   : > { %18223 = vst [vmem:[#allocation172_spill] sm:$0xff] %v14209_v59  ;;  %v14213_v38 = vpop.eup %10025  ;;  %v5299_v23 = vsub.f32 %v18227_v29, %v13851_v37  ;;  %v5305_v59 = vsub.f32 %v18231_v57, %v13858_v3  ;;  %10055 = vpow2.f32 %v5811_v11  ;;  %v5823_v29 = vmul.f32 1.442695, %v5430_v0  ;;  %v18239_v56 = vld [vmem:[#allocation113_spill] sm:$0xff] }
 0x6fc   : > { %18225 = vst [vmem:[#allocation114_spill] sm:$0xff] %v14213_v38  ;;  %v14219_v5 = vpop.eup %10027  ;;  %10057 = vpow2.f32 %v5813_v25  ;;  %v5559_v37 = vmul.f32 1.442695, %v5298_v55  ;;  %v5331_v11 = vsub.f32 %v18238_v41, %v13893_v62  ;;  %v5563_v25 = vmul.f32 1.442695, %v5300_v43  ;;  %v18241_v55 = vld [vmem:[#allocation177_spill] sm:$0xff] }
 0x6fd   : > { %18228 = vst [vmem:[#allocation174_spill] sm:$0xff] %v14219_v5  ;;  %v14223_v20 = vpop.eup %10029  ;;  %v14231_v5 = vpop.xlane.xlu0 %5210  ;;  %10059 = vpow2.f32 %v5815_v34  ;;  %v5561_v9 = vmul.f32 1.442695, %v5299_v23  ;;  %v5307_v23 = vsub.f32 %v18241_v55, %v13858_v3  ;;  %v5573_v34 = vmul.f32 1.442695, %v5305_v59  ;;  %v18244_v41 = vld [vmem:[#allocation192_spill] sm:$0xff] }
 0x6fe   : > { %18230 = vst [vmem:[#allocation173_spill] sm:$0xff] %v14223_v20  ;;  %v14229_v38 = vpop.eup %10031  ;;  %18234 = vst [vmem:[#allocation176_spill] sm:$0xff] %v14231_v5  ;;  %v5306_v20 = vsub.f32 %v18236_v6, %v13858_v3  ;;  %10061 = vpow2.f32 %v5821_v45  ;;  %v14245_v5 = vmul.f32 1.442695, %v5315_v54  ;;  %v5347_v35 = vsub.f32 %v18244_v41, %v13930_v47  ;;  %v18245_v45 = vld [vmem:[#allocation115_spill] sm:$0xff] }
 0x6ff   : > { %18233 = vst [vmem:[#allocation175_spill] sm:$0xff] %v14229_v38  ;;  %v14233_v1 = vpop.eup %10033  ;;  %v5431_v38 = vsub.f32 %v18239_v56, %v14131_v49  ;;  %10063 = vpow2.f32 %v5557_v10  ;;  %v5432_v43 = vsub.f32 %v18245_v45, %v14131_v49  ;;  %v6061_v54 = vadd.f32 %v13913_v53, %v13906_v46  ;;  %v18247_v59 = vld [vmem:[#allocation179_spill] sm:$0xff]  ;;  %v18253_v53 = vld [vmem:[#allocation233_spill] sm:$0xff] }
 0x700   : > { %18235 = vst [vmem:[#allocation180_spill] sm:$0xff] %v14233_v1  ;;  %v14237_v57 = vpop.eup %10035  ;;  %10065 = vpow2.f32 %v5823_v29  ;;  %v5308_v10 = vsub.f32 %v18247_v59, %v13858_v3  ;;  %v5575_v55 = vmul.f32 1.442695, %v5306_v20  ;;  %v18249_v41 = vld [vmem:[#allocation231_spill] sm:$0xff]  ;;  %v5434_v3 = vsub.f32 %v18253_v53, %v14131_v49 }
 0x701   : > { %18237 = vst [vmem:[#allocation178_spill] sm:$0xff] %v14237_v57  ;;  %v14243_v0 = vpop.eup %10037  ;;  %v18243_v57 = vld [vmem:[#allocation182_spill] sm:$0xff]  ;;  %10067 = vpow2.f32 %v5559_v37  ;;  %v5825_v8 = vmul.f32 1.442695, %v5431_v38  ;;  %v14269_v29 = vpop.xlane.xlu0 %5219  ;;  %v18252_v37 = vld [vmem:[#allocation188_spill] sm:$0xff]  ;;  %v6070_v38 = vadd.f32 %v13932_v31, %v13926_v44  ;;  %v6062_v46 = vadd.f32 %v13918_v48, %v6061_v54 }
 0x702   : > { %18240 = vst [vmem:[#allocation186_spill] sm:$0xff] %v14243_v0  ;;  %v14249_v6 = vpop.eup %10039  ;;  %v5321_v1 = vsub.f32 %v18243_v57, %v13882_v60  ;;  %v14265_v57 = vmul.f32 1.442695, %v5331_v11  ;;  %v5433_v0 = vsub.f32 %v18249_v41, %v14131_v49  ;;  %10069 = vpow2.f32 %v5561_v9  ;;  %18250 = vst [vmem:[#allocation192_spill] sm:$0xff] %v14269_v29  ;;  %v18256_v41 = vld [vmem:[#allocation198_spill] sm:$0xff] }
 0x703   : > { %18242 = vst [vmem:[#allocation113_spill] sm:$0xff] %v14249_v6  ;;  %v14257_v56 = vpop.eup %10041  ;;  %10071 = vpow2.f32 %v5573_v34  ;;  %v5577_v20 = vmul.f32 1.442695, %v5307_v23  ;;  %v14279_v11 = vmul.f32 1.442695, %v5347_v35  ;;  %v18258_v35 = vld [vmem:[#allocation181_spill] sm:$0xff] }
 0x704   : > { %18246 = vst [vmem:[#allocation177_spill] sm:$0xff] %v14257_v56  ;;  %v14263_v6 = vpop.eup %10043  ;;  %10073 = vpow2.f32 %v5563_v25  ;;  %v5579_v53 = vmul.f32 1.442695, %v5308_v10  ;;  %v5829_v23 = vmul.f32 1.442695, %v5433_v0  ;;  %v6079_v25 = vadd.f32 %v13949_v28, %v13945_v13  ;;  %v18260_v31 = vld [vmem:[#allocation194_spill] sm:$0xff] }
 0x705   : > { %18248 = vst [vmem:[#allocation182_spill] sm:$0xff] %v14263_v6  ;;  %v14271_v45 = vpop.eup %10045  ;;  %v5827_v6 = vmul.f32 1.442695, %v5432_v43  ;;  %10075 = vpow2.f32 %v5575_v55  ;;  %v5316_v43 = vsub.f32 %v18258_v35, %v13868_v17  ;;  %v5831_v55 = vmul.f32 1.442695, %v5434_v3  ;;  %v18263_v17 = vld [vmem:[#allocation184_spill] sm:$0xff]  ;;  %v14307_v28 = vpop.xlane.xlu0 %5228 }
 0x706   : > { %18251 = vst [vmem:[#allocation115_spill] sm:$0xff] %v14271_v45  ;;  %v14277_v59 = vpop.eup %10047  ;;  %v5363_v45 = vsub.f32 %v18256_v41, %v13975_v52  ;;  %10077 = vpow2.f32 %v5825_v8  ;;  %v18261_v41 = vld [vmem:[#allocation204_spill] sm:$0xff]  ;;  %v6071_v8 = vadd.f32 %v13937_v27, %v6070_v38  ;;  %v5322_v0 = vsub.f32 %v18263_v17, %v13882_v60  ;;  %v18264_v35 = vld [vmem:[#allocation183_spill] sm:$0xff] }
 0x707   : > { %18254 = vst [vmem:[#allocation179_spill] sm:$0xff] %v14277_v59  ;;  %v14283_v9 = vpop.eup %10049  ;;  %v5379_v54 = vsub.f32 %v18261_v41, %v14019_v33  ;;  %10079 = vpow2.f32 %v5577_v20  ;;  %v5323_v13 = vsub.f32 %v18264_v35, %v13882_v60  ;;  %v6063_v3 = vadd.f32 %v13922_v61, %v6062_v46  ;;  %v18266_v20 = vld [vmem:[#allocation185_spill] sm:$0xff]  ;;  %v18268_v38 = vld [vmem:[#allocation200_spill] sm:$0xff] }
 0x708   : > { %18255 = vst [vmem:[#allocation231_spill] sm:$0xff] %v14283_v9  ;;  %v14288_v34 = vpop.eup %10051  ;;  %10081 = vpow2.f32 %v5827_v6  ;;  %v14311_v59 = vmul.f32 1.442695, %v5363_v45  ;;  %v5324_v6 = vsub.f32 %v18266_v20, %v13882_v60  ;;  %v5595_v27 = vmul.f32 1.442695, %v5316_v43  ;;  %v18270_v46 = vld [vmem:[#allocation140_spill] sm:$0xff] }
 0x709   : > { %18257 = vst [vmem:[#allocation188_spill] sm:$0xff] %v14288_v34  ;;  %v14294_v44 = vpop.eup %10053  ;;  %10083 = vpow2.f32 %v5579_v53  ;;  %v6080_v35 = vadd.f32 %v13953_v22, %v6079_v25  ;;  %v5605_v45 = vmul.f32 1.442695, %v5321_v1  ;;  %v5485_v53 = vsub.f32 %v18270_v46, %v14307_v28  ;;  %v18274_v1 = vld [vmem:[#allocation141_spill] sm:$0xff] }
 0x70a   : > { %18259 = vst [vmem:[#allocation233_spill] sm:$0xff] %v14294_v44  ;;  %v14300_v10 = vpop.eup %10055  ;;  %10085 = vpow2.f32 %v5829_v23  ;;  %v6072_v60 = vadd.f32 %v13941_v51, %v6071_v8  ;;  %v5607_v20 = vmul.f32 1.442695, %v5322_v0  ;;  %v18272_v23 = vld [vmem:[#allocation142_spill] sm:$0xff]  ;;  %v5488_v0 = vsub.f32 %v18034_v36, %v14307_v28 }
 0x70b   : > { %18262 = vst [vmem:[#allocation198_spill] sm:$0xff] %v14300_v10  ;;  %v14309_v48 = vpop.eup %10057  ;;  %10087 = vpow2.f32 %v5831_v55  ;;  %v5486_v43 = vsub.f32 %v18272_v23, %v14307_v28  ;;  %v5487_v55 = vsub.f32 %v18274_v1, %v14307_v28  ;;  %v6081_v8 = vadd.f32 %v13959_v39, %v6080_v35  ;;  %v18279_v35 = vld [vmem:[#allocation260_spill] sm:$0xff] }
 0x70c   : > { %18265 = vst [vmem:[#allocation181_spill] sm:$0xff] %v14309_v48  ;;  %v14316_v41 = vpop.eup %10059  ;;  %v14323_v48 = vmul.f32 1.442695, %v5379_v54  ;;  %10089 = vpow2.f32 %v14245_v5  ;;  %v5611_v54 = vmul.f32 1.442695, %v5324_v6  ;;  %v18277_v5 = vld [vmem:[#allocation258_spill] sm:$0xff]  ;;  %v6097_v36 = vadd.f32 %v13993_v7, %v13989_v32 }
 0x70d   : > { %18267 = vst [vmem:[#allocation194_spill] sm:$0xff] %v14316_v41  ;;  %v14321_v56 = vpop.eup %10061  ;;  %v5609_v41 = vmul.f32 1.442695, %v5323_v13  ;;  %10091 = vpow2.f32 %v5595_v27  ;;  %v6088_v13 = vadd.f32 %v13977_v4, %v13971_v12  ;;  %v5489_v6 = vsub.f32 %v18277_v5, %v14307_v28  ;;  %v14352_v27 = vpop.xlane.xlu1 %5174 }
 0x70e   : > { %18269 = vst [vmem:[#allocation204_spill] sm:$0xff] %v14321_v56  ;;  %v14327_v61 = vpop.eup %10063  ;;  %10093 = vpow2.f32 %v5605_v45  ;;  %v5933_v1 = vmul.f32 1.442695, %v5485_v53  ;;  %v5490_v12 = vsub.f32 %v18279_v35, %v14307_v28  ;;  %v5935_v4 = vmul.f32 1.442695, %v5486_v43  ;;  %v18282_v35 = vld [vmem:[#allocation187_spill] sm:$0xff] }
 0x70f   : > { %18271 = vst [vmem:[#allocation184_spill] sm:$0xff] %v14327_v61  ;;  %v14332_v17 = vpop.eup %10065  ;;  %v6064_v25 = vadd.f32 %v14327_v61, %v6063_v3  ;;  %10095 = vpow2.f32 %v5607_v20  ;;  %v5937_v53 = vmul.f32 1.442695, %v5487_v55  ;;  %v6082_v51 = vadd.f32 %v13963_v63, %v6081_v8 }
 0x710   : > { %18273 = vst [vmem:[#allocation183_spill] sm:$0xff] %v14332_v17  ;;  %v14338_v46 = vpop.eup %10067  ;;  %10097 = vpow2.f32 %v5609_v41  ;;  %v5939_v20 = vmul.f32 1.442695, %v5488_v0  ;;  %v5332_v43 = vsub.f32 %v18282_v35, %v13893_v62  ;;  %v5943_v41 = vmul.f32 1.442695, %v5490_v12  ;;  %v18289_v35 = vld [vmem:[#allocation191_spill] sm:$0xff] }
 0x711   : > { %18275 = vst [vmem:[#allocation185_spill] sm:$0xff] %v14338_v46  ;;  %v14345_v23 = vpop.eup %10069  ;;  %v6065_v3 = vadd.f32 %v14338_v46, %v6064_v25  ;;  %10099 = vpow2.f32 %v5611_v54  ;;  %v6098_v55 = vadd.f32 %v13997_v24, %v6097_v36  ;;  %v18285_v54 = vld [vmem:[#allocation190_spill] sm:$0xff]  ;;  %v14376_v0 = vpop.xlane.xlu1 %5237  ;;  %v6083_v12 = vadd.f32 %v13967_v15, %v6082_v51 }
 0x712   : > { %18276 = vst [vmem:[#allocation200_spill] sm:$0xff] %v14345_v23  ;;  %v14350_v22 = vpop.eup %10071  ;;  %10101 = vpow2.f32 %v5933_v1  ;;  %v5338_v8 = vsub.f32 %v18285_v54, %v13910_v16  ;;  %v5627_v36 = vmul.f32 1.442695, %v5332_v43  ;;  %v5340_v54 = vsub.f32 %v18289_v35, %v13910_v16  ;;  %v18294_v43 = vld [vmem:[#allocation146_spill] sm:$0xff] }
 0x713   : > { %18278 = vst [vmem:[#allocation140_spill] sm:$0xff] %v14350_v22  ;;  %v14358_v39 = vpop.eup %10073  ;;  %v6066_v45 = vadd.f32 %v14345_v23, %v6065_v3  ;;  %v6073_v25 = vadd.f32 %v14350_v22, %v6072_v60  ;;  %v5941_v3 = vmul.f32 1.442695, %v5489_v6  ;;  %10103 = vpow2.f32 %v5935_v4  ;;  %v18287_v6 = vld [vmem:[#allocation189_spill] sm:$0xff]  ;;  %v18357_v22 = vld [vmem:[#allocation159_spill] sm:$0xff] }
 0x714   : > { %18280 = vst [vmem:[#allocation142_spill] sm:$0xff] %v14358_v39  ;;  %v14362_v5 = vpop.eup %10075  ;;  %10105 = vpow2.f32 %v5937_v53  ;;  %v5339_v1 = vsub.f32 %v18287_v6, %v13910_v16  ;;  %v18292_v53 = vld [vmem:[#allocation144_spill] sm:$0xff]  ;;  %v6099_v51 = vadd.f32 %v14003_v42, %v6098_v55  ;;  %v5494_v35 = vsub.f32 %v18294_v43, %v14376_v0  ;;  %v18297_v55 = vld [vmem:[#allocation147_spill] sm:$0xff] }
 0x715   : > { %18281 = vst [vmem:[#allocation141_spill] sm:$0xff] %v14362_v5  ;;  %v14367_v61 = vpop.eup %10077  ;;  %v6067_v32 = vadd.f32 %v14358_v39, %v6066_v45  ;;  %v6074_v7 = vadd.f32 %v14362_v5, %v6073_v25  ;;  %v6089_v25 = vadd.f32 %v13981_v19, %v6088_v13  ;;  %10107 = vpow2.f32 %v5939_v20 }
 0x716   : > { %18283 = vst [vmem:[#allocation258_spill] sm:$0xff] %v14367_v61  ;;  %v14371_v60 = vpop.eup %10079  ;;  %10109 = vpow2.f32 %v5941_v3  ;;  %v5493_v6 = vsub.f32 %v18292_v53, %v14376_v0  ;;  %v5639_v20 = vmul.f32 1.442695, %v5338_v8  ;;  %v5641_v3 = vmul.f32 1.442695, %v5339_v1 }
 0x717   : > { %18284 = vst [vmem:[#allocation260_spill] sm:$0xff] %v14371_v60  ;;  %v14378_v62 = vpop.eup %10081  ;;  %6068 = vadd.xlane.f32.xlu1 %v6067_v32  ;;  %v6075_v45 = vadd.f32 %v14371_v60, %v6074_v7  ;;  %v18291_v7 = vsub.f32 %v18252_v37, %v13910_v16  ;;  %10111 = vpow2.f32 %v5943_v41  ;;  %v18295_v16 = vld [vmem:[#allocation145_spill] sm:$0xff]  ;;  %v5643_v53 = vmul.f32 1.442695, %v5340_v54  ;;  %v18301_v54 = vld [vmem:[#allocation264_spill] sm:$0xff] }
 0x718   : > { %18286 = vst [vmem:[#allocation187_spill] sm:$0xff] %v14378_v62  ;;  %v14384_v4 = vpop.eup %10083  ;;  %10113 = vpow2.f32 %v14265_v57  ;;  %v5495_v37 = vsub.f32 %v18295_v16, %v14376_v0  ;;  %v6106_v41 = vadd.f32 %v14021_v14, %v14015_v26  ;;  %v5496_v8 = vsub.f32 %v18297_v55, %v14376_v0  ;;  %v18299_v57 = vld [vmem:[#allocation262_spill] sm:$0xff] }
 0x719   : > { %18288 = vst [vmem:[#allocation190_spill] sm:$0xff] %v14384_v4  ;;  %v14389_v24 = vpop.eup %10085  ;;  %v6076_v32 = vadd.f32 %v14384_v4, %v6075_v45  ;;  %v5637_v13 = vmul.f32 1.442695, %v18291_v7  ;;  %v6090_v45 = vadd.f32 %v13985_v18, %v6089_v25  ;;  %10115 = vpow2.f32 %v5627_v36  ;;  %v18353_v4 = vld [vmem:[#allocation118_spill] sm:$0xff] }
 0x71a   : > { %18290 = vst [vmem:[#allocation189_spill] sm:$0xff] %v14389_v24  ;;  %v14397_v19 = vpop.eup %10087  ;;  %v5497_v1 = vsub.f32 %v18299_v57, %v14376_v0  ;;  %v6100_v36 = vadd.f32 %v14007_v58, %v6099_v51  ;;  %v5498_v26 = vsub.f32 %v18301_v54, %v14376_v0  ;;  %v5951_v14 = vmul.f32 1.442695, %v5494_v35  ;;  %v18304_v57 = vld [vmem:[#allocation193_spill] sm:$0xff]  ;;  %v18306_v35 = vld [vmem:[#allocation116_spill] sm:$0xff] }
 0x71b   : > { %18293 = vst [vmem:[#allocation191_spill] sm:$0xff] %v14397_v19  ;;  %6077 = vadd.xlane.f32.xlu0 %v6076_v32  ;;  %v14406_v7 = vpop.eup %10089  ;;  %10117 = vpow2.f32 %v5637_v13  ;;  %v5949_v32 = vmul.f32 1.442695, %v5493_v6  ;;  %v5953_v13 = vmul.f32 1.442695, %v5495_v37  ;;  %v5348_v51 = vsub.f32 %v18304_v57, %v13930_v47  ;;  %v18308_v47 = vld [vmem:[#allocation196_spill] sm:$0xff]  ;;  %v14442_v57 = vpop.xlane.xlu0 %5246 }
 0x71c   : > { %18296 = vst [vmem:[#allocation144_spill] sm:$0xff] %v14406_v7  ;;  %v14412_v43 = vpop.eup %10091  ;;  %v6084_v25 = vadd.f32 %v14406_v7, %v6083_v12  ;;  %10119 = vpow2.f32 %v5639_v20  ;;  %v5955_v6 = vmul.f32 1.442695, %v5496_v8  ;;  %v6115_v20 = vadd.f32 %v14037_v2, %v14033_v50  ;;  %v18327_v7 = vld [vmem:[#allocation151_spill] sm:$0xff] }
 0x71d   : > { %18298 = vst [vmem:[#allocation146_spill] sm:$0xff] %v14412_v43  ;;  %v14417_v16 = vpop.eup %10093  ;;  %10121 = vpow2.f32 %v5641_v3  ;;  %v5957_v3 = vmul.f32 1.442695, %v5497_v1  ;;  %v5959_v8 = vmul.f32 1.442695, %v5498_v26  ;;  %v18311_v1 = vld [vmem:[#allocation197_spill] sm:$0xff] }
 0x71e   : > { %18300 = vst [vmem:[#allocation145_spill] sm:$0xff] %v14417_v16  ;;  %v14422_v42 = vpop.eup %10095  ;;  %v6085_v55 = vadd.f32 %v14412_v43, %v6084_v25  ;;  %v6091_v12 = vadd.f32 %v14417_v16, %v6090_v45  ;;  %10123 = vpow2.f32 %v5643_v53  ;;  %v6107_v53 = vadd.f32 %v14025_v40, %v6106_v41 }
 0x71f   : > { %18302 = vst [vmem:[#allocation147_spill] sm:$0xff] %v14422_v42  ;;  %v14426_v18 = vpop.eup %10097  ;;  %10125 = vpow2.f32 %v5949_v32  ;;  %v5354_v25 = vsub.f32 %v18308_v47, %v13957_v21  ;;  %v5659_v41 = vmul.f32 1.442695, %v5348_v51  ;;  %v18314_v47 = vld [vmem:[#allocation307_spill] sm:$0xff]  ;;  %v14480_v43 = vpop.xlane.xlu0 %5255 }
 0x720   : > { %18303 = vst [vmem:[#allocation262_spill] sm:$0xff] %v14426_v18  ;;  %v14432_v54 = vpop.eup %10099  ;;  %6086 = vadd.xlane.f32.xlu1 %v6085_v55  ;;  %v6092_v45 = vadd.f32 %v14422_v42, %v6091_v12  ;;  %10127 = vpow2.f32 %v5951_v14  ;;  %v18310_v55 = vld [vmem:[#allocation195_spill] sm:$0xff]  ;;  %v5356_v12 = vsub.f32 %v18311_v1, %v13957_v21  ;;  %v18313_v14 = vld [vmem:[#allocation302_spill] sm:$0xff]  ;;  %v6116_v40 = vadd.f32 %v18314_v47, %v6115_v20  ;;  %v18320_v20 = vld [vmem:[#allocation149_spill] sm:$0xff] }
 0x721   : > { %18305 = vst [vmem:[#allocation264_spill] sm:$0xff] %v14432_v54  ;;  %v14437_v37 = vpop.eup %10101  ;;  %10129 = vpow2.f32 %v5953_v13  ;;  %v5355_v32 = vsub.f32 %v18310_v55, %v13957_v21  ;;  %v6101_v26 = vadd.f32 %v18313_v14, %v6100_v36  ;;  %v18316_v13 = vsub.f32 %v18260_v31, %v13957_v21  ;;  %v18317_v55 = vld [vmem:[#allocation148_spill] sm:$0xff] }
 0x722   : > { %18307 = vst [vmem:[#allocation193_spill] sm:$0xff] %v14437_v37  ;;  %v14444_v50 = vpop.eup %10103  ;;  %v6093_v58 = vadd.f32 %v14426_v18, %v6092_v45  ;;  %10131 = vpow2.f32 %v5955_v6  ;;  %v5501_v1 = vsub.f32 %v18317_v55, %v14442_v57  ;;  %v5671_v36 = vmul.f32 1.442695, %v5354_v25  ;;  %v18319_v6 = vld [vmem:[#allocation150_spill] sm:$0xff]  ;;  %v18325_v55 = vld [vmem:[#allocation88_spill] sm:$0xff] }
 0x723   : > { %18309 = vst [vmem:[#allocation116_spill] sm:$0xff] %v14444_v50  ;;  %v14451_v2 = vpop.eup %10105  ;;  %10133 = vpow2.f32 %v5957_v3  ;;  %v5669_v45 = vmul.f32 1.442695, %v18316_v13  ;;  %v5502_v51 = vsub.f32 %v18319_v6, %v14442_v57  ;;  %v5503_v47 = vsub.f32 %v18320_v20, %v14442_v57  ;;  %v14546_v5 = vpop.xlane.xlu0 %5273 }
 0x724   : > { %18312 = vst [vmem:[#allocation196_spill] sm:$0xff] %v14451_v2  ;;  %v14455_v16 = vpop.eup %10107  ;;  %v6094_v42 = vadd.f32 %v14432_v54, %v6093_v58  ;;  %10135 = vpow2.f32 %v5959_v8  ;;  %v18322_v58 = vld [vmem:[#allocation304_spill] sm:$0xff]  ;;  %v5673_v31 = vmul.f32 1.442695, %v5355_v32  ;;  %v5675_v21 = vmul.f32 1.442695, %v5356_v12 }
 0x725   : > { %18315 = vst [vmem:[#allocation195_spill] sm:$0xff] %v14455_v16  ;;  %v14463_v18 = vpop.eup %10109  ;;  %v6108_v3 = vadd.f32 %v18322_v58, %v6107_v53  ;;  %10137 = vpow2.f32 %v14279_v11  ;;  %v18324_v8 = vld [vmem:[#allocation309_spill] sm:$0xff]  ;;  %v18326_v54 = vld [vmem:[#allocation311_spill] sm:$0xff]  ;;  %v5504_v20 = vsub.f32 %v18327_v7, %v14442_v57  ;;  %v18329_v11 = vld [vmem:[#allocation266_spill] sm:$0xff]  ;;  %v5965_v12 = vmul.f32 1.442695, %v5501_v1 }
 0x726   : > { %18318 = vst [vmem:[#allocation197_spill] sm:$0xff] %v14463_v18  ;;  %v14469_v14 = vpop.eup %10111  ;;  %6095 = vadd.xlane.f32.xlu0 %v6094_v42  ;;  %10139 = vpow2.f32 %v5659_v41  ;;  %v6117_v25 = vadd.f32 %v18324_v8, %v6116_v40  ;;  %v6124_v6 = vadd.f32 %v18326_v54, %v18325_v55  ;;  %v5505_v32 = vsub.f32 %v18329_v11, %v14442_v57  ;;  %v18331_v40 = vld [vmem:[#allocation268_spill] sm:$0xff]  ;;  %v18335_v1 = vld [vmem:[#allocation310_spill] sm:$0xff] }
 0x727   : > { %18321 = vst [vmem:[#allocation148_spill] sm:$0xff] %v14469_v14  ;;  %v14473_v13 = vpop.eup %10113  ;;  %10141 = vpow2.f32 %v5669_v45  ;;  %v5506_v55 = vsub.f32 %v18331_v40, %v14442_v57  ;;  %v5967_v54 = vmul.f32 1.442695, %v5502_v51  ;;  %v5969_v8 = vmul.f32 1.442695, %v5503_v47  ;;  %v18336_v40 = vld [vmem:[#allocation154_spill] sm:$0xff] }
 0x728   : > { %18323 = vst [vmem:[#allocation150_spill] sm:$0xff] %v14473_v13  ;;  %v14482_v42 = vpop.eup %10115  ;;  %v6102_v53 = vadd.f32 %v14473_v13, %v6101_v26  ;;  %10143 = vpow2.f32 %v5671_v36  ;;  %v18333_v26 = vld [vmem:[#allocation152_spill] sm:$0xff]  ;;  %v6118_v13 = vadd.f32 %v18335_v1, %v6117_v25  ;;  %v5971_v36 = vmul.f32 1.442695, %v5504_v20  ;;  %v18341_v25 = vld [vmem:[#allocation155_spill] sm:$0xff] }
 0x729   : > { %18328 = vst [vmem:[#allocation149_spill] sm:$0xff] %v14482_v42  ;;  %v14487_v41 = vpop.eup %10117  ;;  %10145 = vpow2.f32 %v5673_v31  ;;  %v5509_v45 = vsub.f32 %v18333_v26, %v14480_v43  ;;  %v5510_v51 = vsub.f32 %v18336_v40, %v14480_v43  ;;  %v18338_v31 = vld [vmem:[#allocation153_spill] sm:$0xff]  ;;  %v5512_v20 = vsub.f32 %v18341_v25, %v14480_v43  ;;  %v14512_v40 = vpop.xlane.xlu1 %5264 }
 0x72a   : > { %18330 = vst [vmem:[#allocation151_spill] sm:$0xff] %v14487_v41  ;;  %v14491_v7 = vpop.eup %10119  ;;  %v6103_v58 = vadd.f32 %v14482_v42, %v6102_v53  ;;  %v6109_v63 = vadd.f32 %v14487_v41, %v6108_v3  ;;  %10147 = vpow2.f32 %v5675_v21  ;;  %v5973_v3 = vmul.f32 1.442695, %v5505_v32  ;;  %v18340_v42 = vld [vmem:[#allocation89_spill] sm:$0xff] }
 0x72b   : > { %18332 = vst [vmem:[#allocation266_spill] sm:$0xff] %v14491_v7  ;;  %v14497_v11 = vpop.eup %10121  ;;  %10149 = vpow2.f32 %v5965_v12  ;;  %v5511_v41 = vsub.f32 %v18338_v31, %v14480_v43  ;;  %v6125_v15 = vadd.f32 %v18340_v42, %v6124_v6  ;;  %v5975_v21 = vmul.f32 1.442695, %v5506_v55 }
 0x72c   : > { %18334 = vst [vmem:[#allocation268_spill] sm:$0xff] %v14497_v11  ;;  %v14502_v47 = vpop.eup %10123  ;;  %6104 = vadd.xlane.f32.xlu1 %v6103_v58  ;;  %v6110_v53 = vadd.f32 %v14491_v7, %v6109_v63  ;;  %10151 = vpow2.f32 %v5967_v54  ;;  %v18343_v58 = vld [vmem:[#allocation270_spill] sm:$0xff]  ;;  %v5981_v12 = vmul.f32 1.442695, %v5509_v45  ;;  %v18345_v7 = vld [vmem:[#allocation205_spill] sm:$0xff]  ;;  %v18346_v54 = vld [vmem:[#allocation272_spill] sm:$0xff] }
 0x72d   : > { %18337 = vst [vmem:[#allocation152_spill] sm:$0xff] %v14502_v47  ;;  %v14507_v26 = vpop.eup %10125  ;;  %10153 = vpow2.f32 %v5969_v8  ;;  %v5513_v32 = vsub.f32 %v18343_v58, %v14480_v43  ;;  %v6119_v6 = vadd.f32 %v18345_v7, %v6118_v13  ;;  %v5514_v55 = vsub.f32 %v18346_v54, %v14480_v43  ;;  %v18348_v8 = vld [vmem:[#allocation156_spill] sm:$0xff]  ;;  %v18350_v13 = vld [vmem:[#allocation158_spill] sm:$0xff]  ;;  %v18351_v7 = vld [vmem:[#allocation157_spill] sm:$0xff] }
 0x72e   : > { %18339 = vst [vmem:[#allocation154_spill] sm:$0xff] %v14507_v26  ;;  %v14514_v1 = vpop.eup %10127  ;;  %v6111_v63 = vadd.f32 %v14497_v11, %v6110_v53  ;;  %10155 = vpow2.f32 %v5971_v36  ;;  %v5983_v25 = vmul.f32 1.442695, %v5510_v51  ;;  %v5985_v53 = vmul.f32 1.442695, %v5511_v41  ;;  %v18354_v41 = vld [vmem:[#allocation91_spill] sm:$0xff] }
 0x72f   : > { %18342 = vst [vmem:[#allocation153_spill] sm:$0xff] %v14514_v1  ;;  %v14519_v31 = vpop.eup %10129  ;;  %10157 = vpow2.f32 %v5973_v3  ;;  %v5517_v11 = vsub.f32 %v18348_v8, %v14512_v40  ;;  %v5987_v45 = vmul.f32 1.442695, %v5512_v20  ;;  %v5518_v36 = vsub.f32 %v18350_v13, %v14512_v40 }
 0x730   : > { %18344 = vst [vmem:[#allocation155_spill] sm:$0xff] %v14519_v31  ;;  %v14524_v42 = vpop.eup %10131  ;;  %v6112_v60 = vadd.f32 %v14502_v47, %v6111_v63  ;;  %10159 = vpow2.f32 %v5975_v21  ;;  %v5519_v54 = vsub.f32 %v18351_v7, %v14512_v40  ;;  %v6126_v3 = vadd.f32 %v18354_v41, %v6125_v15  ;;  %v18356_v21 = vld [vmem:[#allocation259_spill] sm:$0xff]  ;;  %v18359_v15 = vld [vmem:[#allocation274_spill] sm:$0xff] }
 0x731   : > { %18347 = vst [vmem:[#allocation270_spill] sm:$0xff] %v14524_v42  ;;  %v14529_v58 = vpop.eup %10133  ;;  %10161 = vpow2.f32 %v5981_v12  ;;  %v5989_v8 = vmul.f32 1.442695, %v5513_v32  ;;  %v5491_v20 = vsub.f32 %v18356_v21, %v14307_v28  ;;  %v5991_v13 = vmul.f32 1.442695, %v5514_v55 }
 0x732   : > { %18349 = vst [vmem:[#allocation272_spill] sm:$0xff] %v14529_v58  ;;  %v14535_v51 = vpop.eup %10135  ;;  %6113 = vadd.xlane.f32.xlu0 %v6112_v60  ;;  %10163 = vpow2.f32 %v5983_v25  ;;  %v5520_v7 = vsub.f32 %v18357_v22, %v14512_v40  ;;  %v5521_v32 = vsub.f32 %v18359_v15, %v14512_v40  ;;  %v5997_v12 = vmul.f32 1.442695, %v5517_v11  ;;  %v18361_v25 = vld [vmem:[#allocation276_spill] sm:$0xff]  ;;  %v18365_v11 = vld [vmem:[#allocation263_spill] sm:$0xff] }
 0x733   : > { %18352 = vst [vmem:[#allocation156_spill] sm:$0xff] %v14535_v51  ;;  %v14540_v47 = vpop.eup %10137  ;;  %10165 = vpow2.f32 %v5985_v53  ;;  %v5522_v55 = vsub.f32 %v18361_v25, %v14512_v40  ;;  %v5999_v21 = vmul.f32 1.442695, %v5518_v36  ;;  %v6001_v41 = vmul.f32 1.442695, %v5519_v54  ;;  %v18366_v36 = vld [vmem:[#allocation162_spill] sm:$0xff] }
 0x734   : > { %18355 = vst [vmem:[#allocation158_spill] sm:$0xff] %v14540_v47  ;;  %v14548_v23 = vpop.eup %10139  ;;  %v6120_v60 = vadd.f32 %v14540_v47, %v6119_v6  ;;  %10167 = vpow2.f32 %v5987_v45  ;;  %v18363_v6 = vld [vmem:[#allocation160_spill] sm:$0xff]  ;;  %v5499_v45 = vsub.f32 %v18365_v11, %v14376_v0  ;;  %v6003_v47 = vmul.f32 1.442695, %v5520_v7  ;;  %v18371_v7 = vld [vmem:[#allocation163_spill] sm:$0xff] }
 0x735   : > { %18358 = vst [vmem:[#allocation157_spill] sm:$0xff] %v14548_v23  ;;  %v14553_v63 = vpop.eup %10141  ;;  %10169 = vpow2.f32 %v5989_v8  ;;  %v5525_v53 = vsub.f32 %v18363_v6, %v14546_v5  ;;  %v5526_v54 = vsub.f32 %v18366_v36, %v14546_v5  ;;  %v18368_v8 = vld [vmem:[#allocation161_spill] sm:$0xff]  ;;  %v5528_v36 = vsub.f32 %v18371_v7, %v14546_v5 }
 0x736   : > { %18360 = vst [vmem:[#allocation118_spill] sm:$0xff] %v14553_v63  ;;  %v14557_v22 = vpop.eup %10143  ;;  %v6121_v39 = vadd.f32 %v14548_v23, %v6120_v60  ;;  %v6127_v46 = vadd.f32 %v14553_v63, %v6126_v3  ;;  %10171 = vpow2.f32 %v5991_v13  ;;  %v6005_v3 = vmul.f32 1.442695, %v5521_v32  ;;  %v18370_v23 = vld [vmem:[#allocation267_spill] sm:$0xff] }
 0x737   : > { %18362 = vst [vmem:[#allocation259_spill] sm:$0xff] %v14557_v22  ;;  %v14563_v15 = vpop.eup %10145  ;;  %10173 = vpow2.f32 %v5997_v12  ;;  %v5527_v6 = vsub.f32 %v18368_v8, %v14546_v5  ;;  %v5507_v11 = vsub.f32 %v18370_v23, %v14442_v57  ;;  %v6007_v13 = vmul.f32 1.442695, %v5522_v55  ;;  %v18376_v55 = vld [vmem:[#allocation280_spill] sm:$0xff] }
 0x738   : > { %18364 = vst [vmem:[#allocation159_spill] sm:$0xff] %v14563_v15  ;;  %v14569_v25 = vpop.eup %10147  ;;  %6122 = vadd.xlane.f32.xlu1 %v6121_v39  ;;  %v6128_v60 = vadd.f32 %v14557_v22, %v6127_v46  ;;  %10175 = vpow2.f32 %v5999_v21  ;;  %v18373_v46 = vld [vmem:[#allocation278_spill] sm:$0xff]  ;;  %v6013_v12 = vmul.f32 1.442695, %v5525_v53  ;;  %v18375_v22 = vsub.f32 %v18306_v35, %v14352_v27 }
 0x739   : > { %18367 = vst [vmem:[#allocation274_spill] sm:$0xff] %v14569_v25  ;;  %v14574_v63 = vpop.eup %10149  ;;  %10177 = vpow2.f32 %v6001_v41  ;;  %v5529_v32 = vsub.f32 %v18373_v46, %v14546_v5  ;;  %v5530_v21 = vsub.f32 %v18376_v55, %v14546_v5  ;;  %v6015_v7 = vmul.f32 1.442695, %v5526_v54 }
 0x73a   : > { %18369 = vst [vmem:[#allocation276_spill] sm:$0xff] %v14574_v63  ;;  %v14580_v19 = vpop.eup %10151  ;;  %v6129_v39 = vadd.f32 %v14563_v15, %v6128_v60  ;;  %v14590_v23 = vmul.f32 1.442695, %v18375_v22  ;;  %10179 = vpow2.f32 %v6003_v47  ;;  %v6017_v60 = vmul.f32 1.442695, %v5527_v6  ;;  %v18379_v47 = vld [vmem:[#allocation261_spill] sm:$0xff] }
 0x73b   : > { %18372 = vst [vmem:[#allocation160_spill] sm:$0xff] %v14580_v19  ;;  %v14585_v8 = vpop.eup %10153  ;;  %10181 = vpow2.f32 %v6005_v3  ;;  %v6277_v53 = vadd.f32 %v14444_v50, %v14437_v37  ;;  %v5945_v15 = vmul.f32 1.442695, %v5491_v20  ;;  %v6019_v35 = vmul.f32 1.442695, %v5528_v36  ;;  %v18382_v6 = vld [vmem:[#allocation271_spill] sm:$0xff] }
 0x73c   : > { %18374 = vst [vmem:[#allocation263_spill] sm:$0xff] %v14585_v8  ;;  %v14594_v24 = vpop.eup %10155  ;;  %v6130_v41 = vadd.f32 %v14569_v25, %v6129_v39  ;;  %10183 = vpow2.f32 %v6007_v13  ;;  %v5492_v22 = vsub.f32 %v18379_v47, %v14307_v28  ;;  %v5961_v54 = vmul.f32 1.442695, %v5499_v45  ;;  %v18383_v20 = vld [vmem:[#allocation265_spill] sm:$0xff]  ;;  %v18385_v28 = vld [vmem:[#allocation275_spill] sm:$0xff] }
 0x73d   : > { %18377 = vst [vmem:[#allocation162_spill] sm:$0xff] %v14594_v24  ;;  %v14599_v46 = vpop.eup %10157  ;;  %v5977_v55 = vmul.f32 1.442695, %v5507_v11  ;;  %10185 = vpow2.f32 %v6013_v12  ;;  %v6021_v39 = vmul.f32 1.442695, %v5529_v32  ;;  %v5515_v37 = vsub.f32 %v18382_v6, %v14480_v43  ;;  %v14620_v12 = vpop.permute.xlu1 %6821 }
 0x73e   : > { %18378 = vst [vmem:[#allocation161_spill] sm:$0xff] %v14599_v46  ;;  %v14603_v62 = vpop.eup %10159  ;;  %6131 = vadd.xlane.f32.xlu0 %v6130_v41  ;;  %10187 = vpow2.f32 %v6015_v7  ;;  %v6023_v50 = vmul.f32 1.442695, %v5530_v21  ;;  %v5500_v13 = vsub.f32 %v18383_v20, %v14376_v0  ;;  %v5523_v47 = vsub.f32 %v18385_v28, %v14512_v40  ;;  %18387 = vst [vmem:[#allocation261_spill] sm:$0xff] %v14620_v12  ;;  %v18388_v21 = vld [vmem:[#allocation279_spill] sm:$0xff]  ;;  %v18389_v41 = vld [vmem:[#allocation269_spill] sm:$0xff] }
 0x73f   : > { %18380 = vst [vmem:[#allocation267_spill] sm:$0xff] %v14603_v62  ;;  %v14605_v3 = vpop.eup %10161  ;;  %10189 = vpow2.f32 %v6017_v60  ;;  %v6278_v45 = vadd.f32 %v14451_v2, %v6277_v53  ;;  %v6286_v11 = vadd.f32 %v14514_v1, %v14507_v26  ;;  %v5531_v7 = vsub.f32 %v18388_v21, %v14546_v5  ;;  %v18391_v53 = vld [vmem:[#allocation273_spill] sm:$0xff] }
 0x740   : > { %18381 = vst [vmem:[#allocation163_spill] sm:$0xff] %v14605_v3  ;;  %v14611_v36 = vpop.eup %10163  ;;  %10191 = vpow2.f32 %v6019_v35  ;;  %v5947_v0 = vmul.f32 1.442695, %v5492_v22  ;;  %v5508_v6 = vsub.f32 %v18389_v41, %v14442_v57  ;;  %v6295_v60 = vadd.f32 %v14580_v19, %v14574_v63  ;;  %v18392_v26 = vld [vmem:[#allocation277_spill] sm:$0xff] }
 0x741   : > { %18384 = vst [vmem:[#allocation278_spill] sm:$0xff] %v14611_v36  ;;  %v14618_v32 = vpop.eup %10165  ;;  %10193 = vpow2.f32 %v6021_v39  ;;  %v5516_v28 = vsub.f32 %v18391_v53, %v14480_v43  ;;  %v5524_v12 = vsub.f32 %v18392_v26, %v14512_v40  ;;  %v5963_v35 = vmul.f32 1.442695, %v5500_v13  ;;  %v18394_v57 = vld [vmem:[#allocation281_spill] sm:$0xff]  ;;  %v14646_v13 = vpop.xlane.xlu1 %5282 }
 0x742   : > { %18386 = vst [vmem:[#allocation280_spill] sm:$0xff] %v14618_v32  ;;  %v14626_v20 = vpop.eup %10167  ;;  %10195 = vpow2.f32 %v6023_v50  ;;  %v6304_v22 = vadd.f32 %v14611_v36, %v14605_v3  ;;  %v5532_v21 = vsub.f32 %v18394_v57, %v14546_v5  ;;  %v5993_v41 = vmul.f32 1.442695, %v5515_v37 }
 0x743   : > { %18390 = vst [vmem:[#allocation271_spill] sm:$0xff] %v14626_v20  ;;  %v14634_v1 = vpop.eup %10169  ;;  %10197 = vpow2.f32 %v5945_v15  ;;  %v6279_v63 = vadd.f32 %v14455_v16, %v6278_v45  ;;  %v6287_v43 = vadd.f32 %v14519_v31, %v6286_v11  ;;  %v6009_v26 = vmul.f32 1.442695, %v5523_v47  ;;  %v14653_v45 = vpop.permute.xlu0 %6819  ;;  %v18516_v16 = vld [vmem:[#allocation240_spill] sm:$0xff] }
 0x744   : > { %18393 = vst [vmem:[#allocation265_spill] sm:$0xff] %v14634_v1  ;;  %v14640_v39 = vpop.eup %10171  ;;  %v6025_v40 = vmul.f32 1.442695, %v5531_v7  ;;  %10199 = vpow2.f32 %v5947_v0  ;;  %v5979_v50 = vmul.f32 1.442695, %v5508_v6  ;;  %v6296_v5 = vadd.f32 %v14585_v8, %v6295_v60  ;;  %18399 = vst [vmem:[#allocation277_spill] sm:$0xff] %v14653_v45 }
 0x745   : > { %18395 = vst [vmem:[#allocation275_spill] sm:$0xff] %v14640_v39  ;;  %v14644_v53 = vpop.eup %10173  ;;  %10201 = vpow2.f32 %v5961_v54  ;;  %v5995_v57 = vmul.f32 1.442695, %v5516_v28  ;;  %v6011_v37 = vmul.f32 1.442695, %v5524_v12  ;;  %v6305_v11 = vadd.f32 %v14618_v32, %v6304_v22  ;;  %v18401_v12 = vld [vmem:[#allocation164_spill] sm:$0xff] }
 0x746   : > { %18396 = vst [vmem:[#allocation279_spill] sm:$0xff] %v14644_v53  ;;  %v14648_v3 = vpop.eup %10175  ;;  %10203 = vpow2.f32 %v5963_v35  ;;  %v6027_v7 = vmul.f32 1.442695, %v5532_v21  ;;  %v6280_v6 = vadd.f32 %v14463_v18, %v6279_v63  ;;  %v6288_v54 = vadd.f32 %v14524_v42, %v6287_v43  ;;  %v18403_v35 = vld [vmem:[#allocation166_spill] sm:$0xff]  ;;  %v18404_v45 = vld [vmem:[#allocation165_spill] sm:$0xff]  ;;  %v18405_v21 = vld [vmem:[#allocation167_spill] sm:$0xff] }
 0x747   : > { %18397 = vst [vmem:[#allocation269_spill] sm:$0xff] %v14648_v3  ;;  %v14651_v15 = vpop.eup %10177  ;;  %v6313_v47 = vadd.f32 %v14648_v3, %v14644_v53  ;;  %10205 = vpow2.f32 %v5977_v55  ;;  %v5533_v60 = vsub.f32 %v18401_v12, %v14646_v13  ;;  %v5534_v22 = vsub.f32 %v18403_v35, %v14646_v13  ;;  %v18407_v43 = vld [vmem:[#allocation282_spill] sm:$0xff]  ;;  %v14685_v19 = vpop.xlane.xlu0 %5291 }
 0x748   : > { %18398 = vst [vmem:[#allocation273_spill] sm:$0xff] %v14651_v15  ;;  %v14658_v0 = vpop.eup %10179  ;;  %10207 = vpow2.f32 %v5979_v50  ;;  %v5535_v32 = vsub.f32 %v18404_v45, %v14646_v13  ;;  %v5536_v53 = vsub.f32 %v18405_v21, %v14646_v13  ;;  %v6297_v63 = vadd.f32 %v14594_v24, %v6296_v5  ;;  %v18409_v45 = vld [vmem:[#allocation283_spill] sm:$0xff]  ;;  %v18410_v21 = vld [vmem:[#allocation285_spill] sm:$0xff] }
 0x749   : > { %18400 = vst [vmem:[#allocation281_spill] sm:$0xff] %v14658_v0  ;;  %v14664_v28 = vpop.eup %10181  ;;  %10209 = vpow2.f32 %v5993_v41  ;;  %v6314_v55 = vadd.f32 %v14651_v15, %v6313_v47  ;;  %v5537_v12 = vsub.f32 %v18407_v43, %v14646_v13  ;;  %v6306_v35 = vadd.f32 %v14626_v20, %v6305_v11 }
 0x74a   : > { %18402 = vst [vmem:[#allocation164_spill] sm:$0xff] %v14664_v28  ;;  %v14672_v3 = vpop.eup %10183  ;;  %10211 = vpow2.f32 %v5995_v57  ;;  %v5538_v36 = vsub.f32 %v18409_v45, %v14646_v13  ;;  %v5539_v8 = vsub.f32 %v18410_v21, %v14646_v13  ;;  %v6281_v41 = vadd.f32 %v14469_v14, %v6280_v6  ;;  %v18414_v6 = vld [vmem:[#allocation168_spill] sm:$0xff] }
 0x74b   : > { %18406 = vst [vmem:[#allocation166_spill] sm:$0xff] %v14672_v3  ;;  %v14678_v50 = vpop.eup %10185  ;;  %v6289_v47 = vadd.f32 %v14529_v58, %v6288_v54  ;;  %10213 = vpow2.f32 %v6009_v26  ;;  %v6029_v43 = vmul.f32 1.442695, %v5533_v60  ;;  %v6031_v11 = vmul.f32 1.442695, %v5534_v22  ;;  %v18416_v22 = vld [vmem:[#allocation170_spill] sm:$0xff] }
 0x74c   : > { %18408 = vst [vmem:[#allocation165_spill] sm:$0xff] %v14678_v50  ;;  %v14687_v5 = vpop.eup %10187  ;;  %10215 = vpow2.f32 %v6011_v37  ;;  %v6033_v45 = vmul.f32 1.442695, %v5535_v32  ;;  %v6298_v21 = vadd.f32 %v14599_v46, %v6297_v63  ;;  %v6315_v24 = vadd.f32 %v14658_v0, %v6314_v55  ;;  %v18490_v46 = vld [vmem:[#allocation224_spill] sm:$0xff] }
 0x74d   : > { %18411 = vst [vmem:[#allocation167_spill] sm:$0xff] %v14687_v5  ;;  %v14691_v15 = vpop.eup %10189  ;;  %v6322_v57 = vadd.f32 %v14687_v5, %v14678_v50  ;;  %10217 = vpow2.f32 %v6025_v40  ;;  %v5541_v54 = vsub.f32 %v18414_v6, %v14685_v19  ;;  %v6307_v60 = vadd.f32 %v14634_v1, %v6306_v35  ;;  %v18494_v58 = vld [vmem:[#allocation132_spill] sm:$0xff] }
 0x74e   : > { %18412 = vst [vmem:[#allocation282_spill] sm:$0xff] %v14691_v15  ;;  %v14695_v20 = vpop.eup %10191  ;;  %10219 = vpow2.f32 %v6027_v7  ;;  %v5542_v32 = vsub.f32 %v18416_v22, %v14685_v19  ;;  %v6290_v63 = vadd.f32 %v14535_v51, %v6289_v47  ;;  %v6035_v55 = vmul.f32 1.442695, %v5536_v53  ;;  %v18419_v7 = vld [vmem:[#allocation169_spill] sm:$0xff]  ;;  %v18497_v51 = vld [vmem:[#allocation228_spill] sm:$0xff] }
 0x74f   : > { %18413 = vst [vmem:[#allocation283_spill] sm:$0xff] %v14695_v20  ;;  %v14701_v26 = vpop.eup %10193  ;;  %v6323_v37 = vadd.f32 %v14691_v15, %v6322_v57  ;;  %10221 = vpow2.f32 %v6029_v43  ;;  %v6037_v40 = vmul.f32 1.442695, %v5537_v12  ;;  %v6039_v0 = vmul.f32 1.442695, %v5538_v36  ;;  %v18511_v14 = vld [vmem:[#allocation136_spill] sm:$0xff] }
 0x750   : > { %18415 = vst [vmem:[#allocation285_spill] sm:$0xff] %v14701_v26  ;;  %v14707_v50 = vpop.eup %10195  ;;  %10223 = vpow2.f32 %v6031_v11  ;;  %v5543_v35 = vsub.f32 %v18419_v7, %v14685_v19  ;;  %v6299_v1 = vadd.f32 %v14603_v62, %v6298_v21  ;;  %v6316_v47 = vadd.f32 %v14664_v28, %v6315_v24  ;;  %v18422_v11 = vld [vmem:[#allocation171_spill] sm:$0xff]  ;;  %v18426_v28 = vld [vmem:[#allocation289_spill] sm:$0xff]  ;;  %v18493_v62 = vld [vmem:[#allocation176_spill] sm:$0xff] }
 0x751   : > { %18417 = vst [vmem:[#allocation168_spill] sm:$0xff] %v14707_v50  ;;  %v14710_v5 = vpop.eup %10197  ;;  %v6324_v6 = vadd.f32 %v14695_v20, %v6323_v37  ;;  %v6045_v43 = vmul.f32 1.442695, %v5541_v54  ;;  %v6308_v12 = vadd.f32 %v14640_v39, %v6307_v60  ;;  %10225 = vpow2.f32 %v6033_v45  ;;  %v18425_v54 = vld [vmem:[#allocation284_spill] sm:$0xff] }
 0x752   : > { %18418 = vst [vmem:[#allocation170_spill] sm:$0xff] %v14710_v5  ;;  %v14715_v57 = vpop.eup %10199  ;;  %v6282_v22 = vadd.f32 %v14710_v5, %v6281_v41  ;;  %v5544_v36 = vsub.f32 %v18422_v11, %v14685_v19  ;;  %v6047_v37 = vmul.f32 1.442695, %v5542_v32  ;;  %10227 = vpow2.f32 %v6035_v55 }
 0x753   : > { %18420 = vst [vmem:[#allocation169_spill] sm:$0xff] %v14715_v57  ;;  %v14720_v53 = vpop.eup %10201  ;;  %v6325_v21 = vadd.f32 %v14701_v26, %v6324_v6  ;;  %10229 = vpow2.f32 %v6037_v40  ;;  %v5545_v60 = vsub.f32 %v18425_v54, %v14685_v19  ;;  %v6049_v45 = vmul.f32 1.442695, %v5543_v35 }
 0x754   : > { %18421 = vst [vmem:[#allocation319_spill] sm:$0xff] %v14720_v53  ;;  %v14725_v15 = vpop.eup %10203  ;;  %v6283_v7 = vadd.f32 %v14715_v57, %v6282_v22  ;;  %v6291_v41 = vadd.f32 %v14720_v53, %v6290_v63  ;;  %v5540_v11 = vsub.f32 %v18426_v28, %v14646_v13  ;;  %v6317_v6 = vadd.f32 %v14672_v3, %v6316_v47  ;;  %v18429_v53 = vld [vmem:[#allocation288_spill] sm:$0xff]  ;;  %v18432_v47 = vld [vmem:[#allocation117_spill] sm:$0xff] }
 0x755   : > { %18423 = vst [vmem:[#allocation171_spill] sm:$0xff] %v14725_v15  ;;  %v14730_v24 = vpop.eup %10205  ;;  %10231 = vpow2.f32 %v6045_v43  ;;  %v6041_v40 = vmul.f32 1.442695, %v5539_v8  ;;  %v5546_v54 = vsub.f32 %v18429_v53, %v14685_v19  ;;  %v6051_v35 = vmul.f32 1.442695, %v5544_v36  ;;  %v18433_v8 = vld [vmem:[#allocation291_spill] sm:$0xff] }
 0x756   : > { %18424 = vst [vmem:[#allocation320_spill] sm:$0xff] %v14730_v24  ;;  %v14736_v32 = vpop.eup %10207  ;;  %6284 = vadd.xlane.f32.xlu0 %v6283_v7  ;;  %v6292_v22 = vadd.f32 %v14725_v15, %v6291_v41  ;;  %v6300_v63 = vadd.f32 %v14730_v24, %v6299_v1  ;;  %10233 = vpow2.f32 %v6047_v37  ;;  %v6326_v7 = vadd.f32 %v14707_v50, %v6325_v21  ;;  %v18477_v3 = vld [vmem:[#allocation128_spill] sm:$0xff] }
 0x757   : > { %18427 = vst [vmem:[#allocation284_spill] sm:$0xff] %v14736_v32  ;;  %v14741_v55 = vpop.eup %10209  ;;  %10235 = vpow2.f32 %v6039_v0  ;;  %v5439_v43 = vsub.f32 %v18432_v47, %v14352_v27  ;;  %v5547_v41 = vsub.f32 %v18433_v8, %v14685_v19  ;;  %v6053_v53 = vmul.f32 1.442695, %v5545_v60  ;;  %v18437_v60 = vld [vmem:[#allocation293_spill] sm:$0xff] }
 0x758   : > { %18428 = vst [vmem:[#allocation289_spill] sm:$0xff] %v14741_v55  ;;  %v14745_v26 = vpop.eup %10211  ;;  %v6301_v13 = vadd.f32 %v14736_v32, %v6300_v63  ;;  %v6309_v28 = vadd.f32 %v14741_v55, %v6308_v12  ;;  %10237 = vpow2.f32 %v6049_v45  ;;  %v6043_v37 = vmul.f32 1.442695, %v5540_v11  ;;  %v18436_v63 = vld [vmem:[#allocation119_spill] sm:$0xff] }
 0x759   : > { %18430 = vst [vmem:[#allocation288_spill] sm:$0xff] %v14745_v26  ;;  %v14750_v1 = vpop.eup %10213  ;;  %10239 = vpow2.f32 %v14590_v23  ;;  %v5440_v47 = vsub.f32 %v18436_v63, %v14352_v27  ;;  %v6055_v8 = vmul.f32 1.442695, %v5546_v54  ;;  %v5548_v45 = vsub.f32 %v18437_v60, %v14685_v19  ;;  %v18442_v63 = vld [vmem:[#allocation212_spill] sm:$0xff]  ;;  %v18443_v54 = vld [vmem:[#allocation235_spill] sm:$0xff] }
 0x75a   : > { %18431 = vst [vmem:[#allocation321_spill] sm:$0xff] %v14750_v1  ;;  %v14756_v36 = vpop.eup %10215  ;;  %6293 = vadd.xlane.f32.xlu0 %v6292_v22  ;;  %6302 = vadd.xlane.f32.xlu1 %v6301_v13  ;;  %v6310_v12 = vadd.f32 %v14745_v26, %v6309_v28  ;;  %v6318_v0 = vadd.f32 %v14750_v1, %v6317_v6  ;;  %10241 = vpow2.f32 %v6051_v35  ;;  %v18441_v28 = vld [vmem:[#allocation90_spill] sm:$0xff]  ;;  %v6057_v19 = vmul.f32 1.442695, %v5547_v41 }
 0x75b   : > { %18434 = vst [vmem:[#allocation117_spill] sm:$0xff] %v14756_v36  ;;  %v14761_v21 = vpop.eup %10217  ;;  %v18439_v23 = vsub.f32 %v18353_v4, %v14352_v27  ;;  %10243 = vpow2.f32 %v6041_v40  ;;  %v5395_v35 = vsub.f32 %v18442_v63, %v18441_v28  ;;  %v5441_v1 = vsub.f32 %v18443_v54, %v14352_v27  ;;  %v18445_v4 = vld [vmem:[#allocation237_spill] sm:$0xff] }
 0x75c   : > { %18435 = vst [vmem:[#allocation291_spill] sm:$0xff] %v14761_v21  ;;  %v14767_v55 = vpop.eup %10219  ;;  %v6319_v13 = vadd.f32 %v14756_v36, %v6318_v0  ;;  %v6327_v11 = vadd.f32 %v14761_v21, %v6326_v7  ;;  %10245 = vpow2.f32 %v6053_v53  ;;  %v5841_v24 = vmul.f32 1.442695, %v5439_v43  ;;  %v18446_v7 = vld [vmem:[#allocation104_spill] sm:$0xff] }
 0x75d   : > { %18438 = vst [vmem:[#allocation119_spill] sm:$0xff] %v14767_v55  ;;  %v5839_v22 = vmul.f32 1.442695, %v18439_v23  ;;  %v14774_v6 = vpop.eup %10221  ;;  %v5442_v23 = vsub.f32 %v18445_v4, %v14352_v27  ;;  %10247 = vpow2.f32 %v6043_v37  ;;  %v18447_v0 = vld [vmem:[#allocation120_spill] sm:$0xff]  ;;  %v6059_v53 = vmul.f32 1.442695, %v5548_v45 }
 0x75e   : > { %18440 = vst [vmem:[#allocation293_spill] sm:$0xff] %v14774_v6  ;;  %v14780_v60 = vpop.eup %10223  ;;  %6311 = vadd.xlane.f32.xlu0 %v6310_v12  ;;  %6320 = vadd.xlane.f32.xlu1 %v6319_v13  ;;  %v6328_v40 = vadd.f32 %v14767_v55, %v6327_v11  ;;  %v5445_v21 = vsub.f32 %v18447_v0, %v18446_v7  ;;  %10249 = vpow2.f32 %v6055_v8  ;;  %v5843_v54 = vmul.f32 1.442695, %v5440_v47  ;;  %v18449_v4 = vld [vmem:[#allocation122_spill] sm:$0xff]  ;;  %v18450_v12 = vld [vmem:[#allocation121_spill] sm:$0xff]  ;;  %v18452_v37 = vld [vmem:[#allocation308_spill] sm:$0xff] }
 0x75f   : > { %18444 = vst [vmem:[#allocation90_spill] sm:$0xff] %v14780_v60  ;;  %v6331_v63 = vadd.f32 %v14780_v60, %v14774_v6  ;;  %v14789_v41 = vpop.eup %10225  ;;  %10251 = vpow2.f32 %v5839_v22  ;;  %v5446_v43 = vsub.f32 %v18449_v4, %v18446_v7  ;;  %v5447_v13 = vsub.f32 %v18450_v12, %v18446_v7  ;;  %v18453_v55 = vld [vmem:[#allocation207_spill] sm:$0xff] }
 0x760   : > { %18448 = vst [vmem:[#allocation212_spill] sm:$0xff] %v14789_v41  ;;  %v14795_v11 = vpop.eup %10227  ;;  %v5845_v8 = vmul.f32 1.442695, %v5441_v1  ;;  %10253 = vpow2.f32 %v6057_v19  ;;  %v5847_v22 = vmul.f32 1.442695, %v5442_v23  ;;  %v18455_v47 = vld [vmem:[#allocation123_spill] sm:$0xff]  ;;  %v5451_v25 = vsub.f32 %v18516_v16, %v18446_v7 }
 0x761   : > { %18451 = vst [vmem:[#allocation235_spill] sm:$0xff] %v14795_v11  ;;  %v6332_v36 = vadd.f32 %v14789_v41, %v6331_v63  ;;  %v14800_v45 = vpop.eup %10229  ;;  %10255 = vpow2.f32 %v5841_v24  ;;  %v5448_v6 = vsub.f32 %v18455_v47, %v18446_v7  ;;  %v18456_v4 = vld [vmem:[#allocation239_spill] sm:$0xff]  ;;  %v14808_v26 = vmul.f32 1.442695, %v5395_v35  ;;  %v18459_v24 = vld [vmem:[#allocation241_spill] sm:$0xff] }
 0x762   : > { %18454 = vst [vmem:[#allocation237_spill] sm:$0xff] %v14800_v45  ;;  %v5449_v60 = vsub.f32 %v18456_v4, %v18446_v7  ;;  %6329 = vadd.xlane.f32.xlu0 %v6328_v40  ;;  %v14806_v12 = vpop.eup %10231  ;;  %v5853_v0 = vmul.f32 1.442695, %v5445_v21  ;;  %10257 = vpow2.f32 %v6059_v53  ;;  %v5450_v23 = vsub.f32 %v18459_v24, %v18446_v7  ;;  %v18461_v40 = vld [vmem:[#allocation108_spill] sm:$0xff]  ;;  %v18464_v24 = vld [vmem:[#allocation126_spill] sm:$0xff]  ;;  %v18528_v7 = vld [vmem:[#allocation225_spill] sm:$0xff] }
 0x763   : > { %18457 = vst [vmem:[#allocation120_spill] sm:$0xff] %v14806_v12  ;;  %v6333_v1 = vadd.f32 %v14795_v11, %v6332_v36  ;;  %v14811_v19 = vpop.eup %10233  ;;  %10259 = vpow2.f32 %v5843_v54  ;;  %v5855_v63 = vmul.f32 1.442695, %v5446_v43  ;;  %v5857_v47 = vmul.f32 1.442695, %v5447_v13  ;;  %v18462_v4 = vld [vmem:[#allocation124_spill] sm:$0xff] }
 0x764   : > { %18458 = vst [vmem:[#allocation122_spill] sm:$0xff] %v14811_v19  ;;  %v14815_v41 = vpop.eup %10235  ;;  %10261 = vpow2.f32 %v5845_v8  ;;  %v5453_v32 = vsub.f32 %v18462_v4, %v18461_v40  ;;  %v6340_v36 = vadd.f32 %v14811_v19, %v14806_v12  ;;  %v5859_v53 = vmul.f32 1.442695, %v5448_v6  ;;  %v18466_v8 = vld [vmem:[#allocation125_spill] sm:$0xff]  ;;  %v18468_v12 = vld [vmem:[#allocation95_spill] sm:$0xff] }
 0x765   : > { %18460 = vst [vmem:[#allocation121_spill] sm:$0xff] %v14815_v41  ;;  %v6334_v35 = vadd.f32 %v14800_v45, %v6333_v1  ;;  %v14822_v21 = vpop.eup %10237  ;;  %10263 = vpow2.f32 %v5847_v22  ;;  %v5861_v54 = vmul.f32 1.442695, %v5449_v60  ;;  %v5454_v43 = vsub.f32 %v18464_v24, %v18461_v40  ;;  %v18469_v19 = vld [vmem:[#allocation215_spill] sm:$0xff] }
 0x766   : > { %18463 = vst [vmem:[#allocation308_spill] sm:$0xff] %v14822_v21  ;;  %v14826_v13 = vpop.eup %10239  ;;  %10265 = vpow2.f32 %v5853_v0  ;;  %v5455_v11 = vsub.f32 %v18466_v8, %v18461_v40  ;;  %v6341_v1 = vadd.f32 %v14822_v21, %v6340_v36  ;;  %v5863_v6 = vmul.f32 1.442695, %v5450_v23  ;;  %v18470_v60 = vld [vmem:[#allocation127_spill] sm:$0xff]  ;;  %v18474_v21 = vld [vmem:[#allocation245_spill] sm:$0xff] }
 0x767   : > { %18465 = vst [vmem:[#allocation207_spill] sm:$0xff] %v14826_v13  ;;  %v6335_v4 = vadd.f32 %v14815_v41, %v6334_v35  ;;  %v14832_v45 = vpop.eup %10241  ;;  %10267 = vpow2.f32 %v5855_v63  ;;  %v5456_v24 = vsub.f32 %v18470_v60, %v18461_v40  ;;  %v18472_v0 = vld [vmem:[#allocation243_spill] sm:$0xff]  ;;  %v5869_v50 = vmul.f32 1.442695, %v5453_v32 }
 0x768   : > { %18467 = vst [vmem:[#allocation123_spill] sm:$0xff] %v14832_v45  ;;  %v14838_v15 = vpop.eup %10243  ;;  %10269 = vpow2.f32 %v5857_v47  ;;  %v5457_v8 = vsub.f32 %v18472_v0, %v18461_v40  ;;  %v6342_v35 = vadd.f32 %v14832_v45, %v6341_v1  ;;  %v5458_v22 = vsub.f32 %v18474_v21, %v18461_v40  ;;  %v18476_v47 = vld [vmem:[#allocation112_spill] sm:$0xff] }
 0x769   : > { %18471 = vst [vmem:[#allocation239_spill] sm:$0xff] %v14838_v15  ;;  %v14843_v36 = vpop.eup %10245  ;;  %10271 = vpow2.f32 %v5859_v53  ;;  %v5871_v63 = vmul.f32 1.442695, %v5454_v43  ;;  %v6336_v23 = vadd.f32 %v14838_v15, %v6335_v4  ;;  %v5873_v60 = vmul.f32 1.442695, %v5455_v11  ;;  %v18479_v53 = vld [vmem:[#allocation130_spill] sm:$0xff] }
 0x76a   : > { %18473 = vst [vmem:[#allocation241_spill] sm:$0xff] %v14843_v36  ;;  %v14848_v41 = vpop.eup %10247  ;;  %10273 = vpow2.f32 %v5861_v54  ;;  %v5461_v39 = vsub.f32 %v18477_v3, %v18476_v47  ;;  %v6343_v32 = vadd.f32 %v14843_v36, %v6342_v35  ;;  %v5875_v1 = vmul.f32 1.442695, %v5456_v24  ;;  %v18481_v11 = vld [vmem:[#allocation129_spill] sm:$0xff]  ;;  %v18483_v35 = vld [vmem:[#allocation98_spill] sm:$0xff]  ;;  %v18484_v36 = vld [vmem:[#allocation220_spill] sm:$0xff] }
 0x76b   : > { %18475 = vst [vmem:[#allocation108_spill] sm:$0xff] %v14848_v41  ;;  %v14853_v0 = vpop.eup %10249  ;;  %10275 = vpow2.f32 %v5863_v6  ;;  %v5462_v45 = vsub.f32 %v18479_v53, %v18476_v47  ;;  %v6337_v21 = vadd.f32 %v14848_v41, %v6336_v23  ;;  %v5877_v4 = vmul.f32 1.442695, %v5457_v8  ;;  %v18485_v53 = vld [vmem:[#allocation131_spill] sm:$0xff] }
 0x76c   : > { %18478 = vst [vmem:[#allocation124_spill] sm:$0xff] %v14853_v0  ;;  %v14858_v43 = vpop.eup %10251  ;;  %10277 = vpow2.f32 %v5869_v50  ;;  %v5463_v54 = vsub.f32 %v18481_v11, %v18476_v47  ;;  %v6344_v3 = vadd.f32 %v14853_v0, %v6343_v32  ;;  %v5411_v6 = vsub.f32 %v18484_v36, %v18483_v35  ;;  %v18487_v50 = vld [vmem:[#allocation247_spill] sm:$0xff]  ;;  %v18489_v0 = vld [vmem:[#allocation97_spill] sm:$0xff] }
 0x76d   : > { %18480 = vst [vmem:[#allocation126_spill] sm:$0xff] %v14858_v43  ;;  %v14863_v15 = vpop.eup %10253  ;;  %10279 = vpow2.f32 %v5871_v63  ;;  %v5879_v24 = vmul.f32 1.442695, %v5458_v22  ;;  %v5464_v20 = vsub.f32 %v18485_v53, %v18476_v47  ;;  %6338 = vadd.xlane.f32.xlu1 %v6337_v21  ;;  %v5465_v8 = vsub.f32 %v18487_v50, %v18476_v47  ;;  %v18491_v22 = vld [vmem:[#allocation249_spill] sm:$0xff] }
 0x76e   : > { %18482 = vst [vmem:[#allocation125_spill] sm:$0xff] %v14863_v15  ;;  %v14869_v23 = vpop.eup %10255  ;;  %10281 = vpow2.f32 %v5873_v60  ;;  %v5885_v11 = vmul.f32 1.442695, %v5461_v39  ;;  %v6345_v32 = vadd.f32 %v14863_v15, %v6344_v3  ;;  %v5419_v36 = vsub.f32 %v18490_v46, %v18489_v0  ;;  %v18496_v15 = vld [vmem:[#allocation107_spill] sm:$0xff] }
 0x76f   : > { %18486 = vst [vmem:[#allocation95_spill] sm:$0xff] %v14869_v23  ;;  %v14874_v41 = vpop.eup %10257  ;;  %10283 = vpow2.f32 %v5875_v1  ;;  %v5466_v63 = vsub.f32 %v18491_v22, %v18476_v47  ;;  %v5887_v53 = vmul.f32 1.442695, %v5462_v45  ;;  %v5889_v60 = vmul.f32 1.442695, %v5463_v54  ;;  %v18498_v1 = vld [vmem:[#allocation134_spill] sm:$0xff] }
 0x770   : > { %18488 = vst [vmem:[#allocation215_spill] sm:$0xff] %v14874_v41  ;;  %v14880_v21 = vpop.eup %10259  ;;  %10285 = vpow2.f32 %v5877_v4  ;;  %v5469_v50 = vsub.f32 %v18494_v58, %v18493_v62  ;;  %v6346_v39 = vadd.f32 %v14874_v41, %v6345_v32  ;;  %v5427_v5 = vsub.f32 %v18497_v51, %v18496_v15  ;;  %v18500_v58 = vld [vmem:[#allocation133_spill] sm:$0xff]  ;;  %v18502_v41 = vld [vmem:[#allocation232_spill] sm:$0xff] }
 0x771   : > { %18492 = vst [vmem:[#allocation127_spill] sm:$0xff] %v14880_v21  ;;  %v14885_v3 = vpop.eup %10261  ;;  %10287 = vpow2.f32 %v5879_v24  ;;  %v5891_v46 = vmul.f32 1.442695, %v5464_v20  ;;  %v5470_v22 = vsub.f32 %v18498_v1, %v18493_v62  ;;  %v14893_v31 = vmul.f32 1.442695, %v5411_v6  ;;  %v18503_v24 = vld [vmem:[#allocation135_spill] sm:$0xff] }
 0x772   : > { %18495 = vst [vmem:[#allocation243_spill] sm:$0xff] %v14885_v3  ;;  %v14891_v45 = vpop.eup %10263  ;;  %10289 = vpow2.f32 %v5885_v11  ;;  %v5893_v4 = vmul.f32 1.442695, %v5465_v8  ;;  %v5471_v54 = vsub.f32 %v18500_v58, %v18493_v62  ;;  %6347 = vadd.xlane.f32.xlu0 %v6346_v39  ;;  %v5435_v51 = vsub.f32 %v18502_v41, %v14131_v49  ;;  %v18506_v8 = vld [vmem:[#allocation251_spill] sm:$0xff]  ;;  %v18508_v41 = vld [vmem:[#allocation253_spill] sm:$0xff] }
 0x773   : > { %18499 = vst [vmem:[#allocation245_spill] sm:$0xff] %v14891_v45  ;;  %v14897_v32 = vpop.eup %10265  ;;  %10291 = vpow2.f32 %v5887_v53  ;;  %v5895_v20 = vmul.f32 1.442695, %v5466_v63  ;;  %v5472_v1 = vsub.f32 %v18503_v24, %v18493_v62  ;;  %v14905_v6 = vmul.f32 1.442695, %v5419_v36  ;;  %v18510_v24 = vld [vmem:[#allocation236_spill] sm:$0xff] }
 0x774   : > { %18501 = vst [vmem:[#allocation128_spill] sm:$0xff] %v14897_v32  ;;  %v14903_v42 = vpop.eup %10267  ;;  %10293 = vpow2.f32 %v5889_v60  ;;  %v5473_v11 = vsub.f32 %v18506_v8, %v18493_v62  ;;  %v5901_v58 = vmul.f32 1.442695, %v5469_v50  ;;  %v14911_v57 = vmul.f32 1.442695, %v5427_v5 }
 0x775   : > { %18504 = vst [vmem:[#allocation130_spill] sm:$0xff] %v14903_v42  ;;  %18505 = vst [vmem:[#allocation129_spill] sm:$0xff] %v14905_v6  ;;  %v14909_v39 = vpop.eup %10269  ;;  %10295 = vpow2.f32 %v5891_v46  ;;  %v5474_v63 = vsub.f32 %v18508_v41, %v18493_v62  ;;  %v5903_v53 = vmul.f32 1.442695, %v5470_v22  ;;  %v5443_v36 = vsub.f32 %v18510_v24, %v14352_v27  ;;  %v18514_v46 = vld [vmem:[#allocation138_spill] sm:$0xff] }
 0x776   : > { %18507 = vst [vmem:[#allocation98_spill] sm:$0xff] %v14909_v39  ;;  %v14915_v18 = vpop.eup %10271  ;;  %10297 = vpow2.f32 %v5893_v4  ;;  %v5905_v60 = vmul.f32 1.442695, %v5471_v54  ;;  %v5477_v8 = vsub.f32 %v18511_v14, %v14269_v29  ;;  %v14923_v2 = vmul.f32 1.442695, %v5435_v51  ;;  %v18517_v54 = vld [vmem:[#allocation137_spill] sm:$0xff] }
 0x777   : > { %18509 = vst [vmem:[#allocation220_spill] sm:$0xff] %v14915_v18  ;;  %v14921_v50 = vpop.eup %10273  ;;  %10299 = vpow2.f32 %v5895_v20  ;;  %v5907_v5 = vmul.f32 1.442695, %v5472_v1  ;;  %v5478_v41 = vsub.f32 %v18514_v46, %v14269_v29  ;;  %v5909_v4 = vmul.f32 1.442695, %v5473_v11  ;;  %v18519_v51 = vld [vmem:[#allocation244_spill] sm:$0xff] }
 0x778   : > { %18512 = vst [vmem:[#allocation131_spill] sm:$0xff] %v14921_v50  ;;  %18513 = vst [vmem:[#allocation247_spill] sm:$0xff] %v14923_v2  ;;  %v14927_v22 = vpop.eup %10275  ;;  %10301 = vpow2.f32 %v5901_v58  ;;  %v5479_v24 = vsub.f32 %v18517_v54, %v14269_v29  ;;  %v5459_v50 = vsub.f32 %v18519_v51, %v18461_v40  ;;  %v5911_v20 = vmul.f32 1.442695, %v5474_v63  ;;  %v18520_v1 = vld [vmem:[#allocation139_spill] sm:$0xff]  ;;  %v18523_v11 = vld [vmem:[#allocation92_spill] sm:$0xff] }
 0x779   : > { %18515 = vst [vmem:[#allocation97_spill] sm:$0xff] %v14927_v22  ;;  %v14933_v14 = vpop.eup %10277  ;;  %10303 = vpow2.f32 %v5903_v53  ;;  %v5480_v46 = vsub.f32 %v18520_v1, %v14269_v29  ;;  %v14941_v22 = vmul.f32 1.442695, %v5443_v36  ;;  %v5917_v16 = vmul.f32 1.442695, %v5477_v8  ;;  %v18524_v58 = vld [vmem:[#allocation94_spill] sm:$0xff] }
 0x77a   : > { %18518 = vst [vmem:[#allocation224_spill] sm:$0xff] %v14933_v14  ;;  %v14939_v2 = vpop.eup %10279  ;;  %10305 = vpow2.f32 %v5905_v60  ;;  %v6133_v18 = vadd.f32 %v18524_v58, %v18523_v11  ;;  %v18526_v39 = vld [vmem:[#allocation255_spill] sm:$0xff]  ;;  %v5919_v53 = vmul.f32 1.442695, %v5478_v41  ;;  %v18530_v36 = vld [vmem:[#allocation248_spill] sm:$0xff]  ;;  %v18540_v42 = vld [vmem:[#allocation174_spill] sm:$0xff] }
 0x77b   : > { %18521 = vst [vmem:[#allocation249_spill] sm:$0xff] %v14939_v2  ;;  %18522 = vst [vmem:[#allocation176_spill] sm:$0xff] %v14941_v22  ;;  %v14945_v54 = vpop.eup %10281  ;;  %10307 = vpow2.f32 %v5907_v5  ;;  %v5481_v51 = vsub.f32 %v18526_v39, %v14269_v29  ;;  %v18527_v63 = vld [vmem:[#allocation223_spill] sm:$0xff]  ;;  %v5467_v45 = vsub.f32 %v18530_v36, %v18476_v47  ;;  %v5921_v11 = vmul.f32 1.442695, %v5479_v24  ;;  %v18536_v36 = vld [vmem:[#allocation93_spill] sm:$0xff] }
 0x77c   : > { %18525 = vst [vmem:[#allocation132_spill] sm:$0xff] %v14945_v54  ;;  %v6169_v6 = vadd.f32 %v18528_v7, %v18527_v63  ;;  %v14951_v1 = vpop.eup %10283  ;;  %10309 = vpow2.f32 %v5909_v4  ;;  %v18531_v60 = vld [vmem:[#allocation143_spill] sm:$0xff]  ;;  %v14959_v5 = vmul.f32 1.442695, %v5451_v25  ;;  %v14961_v22 = vmul.f32 1.442695, %v5459_v50 }
 0x77d   : > { %18529 = vst [vmem:[#allocation107_spill] sm:$0xff] %v14951_v1  ;;  %v5482_v8 = vsub.f32 %v18531_v60, %v14269_v29  ;;  %v14957_v58 = vpop.eup %10285  ;;  %10311 = vpow2.f32 %v5911_v20  ;;  %v5923_v39 = vmul.f32 1.442695, %v5480_v46  ;;  %v10480_v63 = vld [vmem:[#allocation2 + $0xc0] sm:$0xff]   ;;  %v6134_v4 = vadd.f32 %v18536_v36, %v6133_v18  ;;  %v18537_v7 = vld [vmem:[#allocation100_spill] sm:$0xff] }
 0x77e   : > { %18532 = vst [vmem:[#allocation228_spill] sm:$0xff] %v14957_v58  ;;  %18533 = vst [vmem:[#allocation134_spill] sm:$0xff] %v14959_v5  ;;  %v14963_v41 = vpop.eup %10287  ;;  %10313 = vpow2.f32 %v5917_v16  ;;  %6813 = vrot.lane.b32.xlu1 %v10480_v63, %s10558_s14  ;;  %v18538_v47 = vld [vmem:[#allocation102_spill] sm:$0xff]  ;;  %v5925_v50 = vmul.f32 1.442695, %v5481_v51 }
 0x77f   : > { %18534 = vst [vmem:[#allocation133_spill] sm:$0xff] %v14961_v22  ;;  %18535 = vst [vmem:[#allocation232_spill] sm:$0xff] %v14963_v41  ;;  %v6151_v60 = vadd.f32 %v18538_v47, %v18537_v7  ;;  %v18539_v24 = vld [vmem:[#allocation114_spill] sm:$0xff]  ;;  %v14971_v25 = vpop.eup %10289  ;;  %10315 = vpow2.f32 %v5919_v53  ;;  %v18543_v41 = vld [vmem:[#allocation317_spill] sm:$0xff]  ;;  %v14978_v63 = vmul.f32 1.442695, %v5467_v45 }
 0x780   : > { %v6187_v58 = vadd.f32 %v18540_v42, %v18539_v24  ;;  %18541 = vst [vmem:[#allocation135_spill] sm:$0xff] %v14971_v25  ;;  %v18542_v20 = vld [vmem:[#allocation202_spill] sm:$0xff]  ;;  %v6170_v16 = vadd.f32 %v18543_v41, %v6169_v6  ;;  %v14976_v5 = vpop.eup %10291  ;;  %10317 = vpow2.f32 %v5921_v11  ;;  %v5927_v18 = vmul.f32 1.442695, %v5482_v8  ;;  %v18546_v7 = vld [vmem:[#allocation201_spill] sm:$0xff]  ;;  %v18548_v53 = vld [vmem:[#allocation203_spill] sm:$0xff] }
 0x781   : > { %v5370_v46 = vsub.f32 %v18542_v20, %v14001_v30  ;;  %18544 = vst [vmem:[#allocation251_spill] sm:$0xff] %v14976_v5  ;;  %18545 = vst [vmem:[#allocation253_spill] sm:$0xff] %v14978_v63  ;;  %v5371_v47 = vsub.f32 %v18546_v7, %v14001_v30  ;;  %v14982_v36 = vpop.eup %10293  ;;  %10319 = vpow2.f32 %v5923_v39  ;;  %v5372_v51 = vsub.f32 %v18548_v53, %v14001_v30  ;;  %v18549_v24 = vld [vmem:[#allocation96_spill] sm:$0xff]  ;;  %v18550_v42 = vld [vmem:[#allocation313_spill] sm:$0xff] }
 0x782   : > { %18547 = vst [vmem:[#allocation236_spill] sm:$0xff] %v14982_v36  ;;  %v6142_v20 = vadd.f32 %v18550_v42, %v18549_v24  ;;  %v18551_v6 = vld [vmem:[#allocation199_spill] sm:$0xff]  ;;  %v14990_v22 = vpop.eup %10295  ;;  %v10481_v45 = vld [vmem:[#allocation2 + $0x80] sm:$0xff]   ;;  %v18553_v7 = vsub.f32 %v18268_v38, %v14001_v30  ;;  %v18554_v8 = vld [vmem:[#allocation312_spill] sm:$0xff]  ;;  %10321 = vpow2.f32 %v5925_v50 }
 0x783   : > { %v5364_v41 = vsub.f32 %v18551_v6, %v13975_v52  ;;  %18552 = vst [vmem:[#allocation136_spill] sm:$0xff] %v14990_v22  ;;  %6797 = vrot.lane.b32.xlu1 %v10481_v45, %s10558_s14  ;;  %v6135_v39 = vadd.f32 %v18554_v8, %v6134_v4  ;;  %v18555_v63 = vld [vmem:[#allocation101_spill] sm:$0xff]  ;;  %v14999_v25 = vpop.eup %10297  ;;  %v18558_v24 = vld [vmem:[#allocation252_spill] sm:$0xff]  ;;  %v5703_v6 = vmul.f32 1.442695, %v5370_v46  ;;  %v18559_v42 = vld [vmem:[#allocation110_spill] sm:$0xff]  ;;  %10323 = vpow2.f32 %v5927_v18 }
 0x784   : > { %v5701_v11 = vmul.f32 1.442695, %v18553_v7  ;;  %v6152_v36 = vadd.f32 %v18555_v63, %v6151_v60  ;;  %v18556_v53 = vld [vmem:[#allocation173_spill] sm:$0xff]  ;;  %18557 = vst [vmem:[#allocation138_spill] sm:$0xff] %v14999_v25  ;;  %v5475_v52 = vsub.f32 %v18558_v24, %v18493_v62  ;;  %v6171_v22 = vadd.f32 %v18559_v42, %v6170_v16  ;;  %v15004_v45 = vpop.eup %10299  ;;  %v18561_v30 = vld [vmem:[#allocation256_spill] sm:$0xff]  ;;  %v18562_v60 = vld [vmem:[#allocation214_spill] sm:$0xff] }
 0x785   : > { %v6188_v5 = vadd.f32 %v18556_v53, %v6187_v58  ;;  %18560 = vst [vmem:[#allocation240_spill] sm:$0xff] %v15004_v45  ;;  %v5483_v38 = vsub.f32 %v18561_v30, %v14269_v29  ;;  %v5705_v4 = vmul.f32 1.442695, %v5371_v47  ;;  %v5396_v7 = vsub.f32 %v18562_v60, %v18441_v28  ;;  %v15010_v58 = vpop.eup %10301  ;;  %v18564_v63 = vld [vmem:[#allocation314_spill] sm:$0xff]  ;;  %v18567_v42 = vld [vmem:[#allocation211_spill] sm:$0xff]  ;;  %v18571_v28 = vld [vmem:[#allocation109_spill] sm:$0xff] }
 0x786   : > { %18563 = vst [vmem:[#allocation137_spill] sm:$0xff] %v15010_v58  ;;  %v5707_v53 = vmul.f32 1.442695, %v5372_v51  ;;  %v6143_v8 = vadd.f32 %v18564_v63, %v6142_v20  ;;  %v5691_v24 = vmul.f32 1.442695, %v5364_v41  ;;  %v18565_v50 = vld [vmem:[#allocation206_spill] sm:$0xff]  ;;  %v15015_v16 = vpop.eup %10303  ;;  %10325 = vpow2.f32 %v5701_v11 }
 0x787   : > { %v5380_v46 = vsub.f32 %v18565_v50, %v14019_v33  ;;  %18566 = vst [vmem:[#allocation244_spill] sm:$0xff] %v15015_v16  ;;  %v6136_v45 = vadd.f32 %v18567_v42, %v6135_v39  ;;  %v18568_v30 = vld [vmem:[#allocation103_spill] sm:$0xff]  ;;  %v15020_v29 = vpop.eup %10305  ;;  %10327 = vpow2.f32 %v5703_v6  ;;  %v6172_v51 = vadd.f32 %v18571_v28, %v6171_v22  ;;  %v18572_v20 = vld [vmem:[#allocation222_spill] sm:$0xff] }
 0x788   : > { %v6153_v18 = vadd.f32 %v18568_v30, %v6152_v36  ;;  %v18569_v47 = vld [vmem:[#allocation175_spill] sm:$0xff]  ;;  %18570 = vst [vmem:[#allocation139_spill] sm:$0xff] %v15020_v29  ;;  %v5412_v41 = vsub.f32 %v18572_v20, %v18483_v35  ;;  %v6205_v33 = vadd.f32 %v14288_v34, %v14283_v9  ;;  %v15027_v60 = vpop.eup %10307  ;;  %v15029_v11 = vmul.f32 1.442695, %v5475_v52  ;;  %v18575_v20 = vld [vmem:[#allocation209_spill] sm:$0xff]  ;;  %v15057_v30 = vpop.permute.xlu1 %6805 }
 0x789   : > { %v6189_v25 = vadd.f32 %v18569_v47, %v6188_v5  ;;  %v15031_v39 = vmul.f32 1.442695, %v5483_v38  ;;  %v10482_v36 = vld [vmem:[#allocation2 + $0x88] sm:$0xff]   ;;  %10329 = vpow2.f32 %v5705_v4  ;;  %v5755_v5 = vmul.f32 1.442695, %v5396_v7  ;;  %v15034_v6 = vpop.eup %10309  ;;  %v18577_v52 = vld [vmem:[#allocation213_spill] sm:$0xff] }
 0x78a   : > { %6799 = vrot.lane.b32.xlu0 %v10482_v36, %s10558_s14  ;;  %18573 = vst [vmem:[#allocation255_spill] sm:$0xff] %v15034_v6  ;;  %10331 = vpow2.f32 %v5707_v53  ;;  %v18574_v22 = vld [vmem:[#allocation99_spill] sm:$0xff]  ;;  %v5723_v35 = vmul.f32 1.442695, %v5380_v46  ;;  %v5386_v28 = vsub.f32 %v18575_v20, %v18452_v37  ;;  %v15041_v42 = vpop.eup %10311  ;;  %v15045_v38 = vadd.f32 %v18577_v52, %v6136_v45  ;;  %v18579_v7 = vld [vmem:[#allocation180_spill] sm:$0xff] }
 0x78b   : > { %v15037_v50 = vadd.f32 %v18574_v22, %v6143_v8  ;;  %18576 = vst [vmem:[#allocation248_spill] sm:$0xff] %v15041_v42  ;;  %10333 = vpow2.f32 %v14311_v59  ;;  %v18578_v36 = vld [vmem:[#allocation219_spill] sm:$0xff]  ;;  %v6190_v9 = vadd.f32 %v18579_v7, %v6189_v25  ;;  %v15049_v34 = vpop.eup %10313  ;;  %v5787_v46 = vmul.f32 1.442695, %v5412_v41  ;;  %v18583_v59 = vld [vmem:[#allocation208_spill] sm:$0xff]  ;;  %v18584_v25 = vld [vmem:[#allocation210_spill] sm:$0xff] }
 0x78c   : > { %v6154_v4 = vadd.f32 %v18578_v36, %v6153_v18  ;;  %18580 = vst [vmem:[#allocation143_spill] sm:$0xff] %v15049_v34  ;;  %10335 = vpow2.f32 %v5691_v24  ;;  %v18581_v8 = vld [vmem:[#allocation111_spill] sm:$0xff]  ;;  %v6206_v20 = vadd.f32 %v14294_v44, %v6205_v33  ;;  %v15055_v47 = vpop.eup %10315  ;;  %v5387_v45 = vsub.f32 %v18583_v59, %v18452_v37  ;;  %v18590_v59 = vld [vmem:[#allocation221_spill] sm:$0xff]  ;;  %v18591_v44 = vld [vmem:[#allocation178_spill] sm:$0xff] }
 0x78d   : > { %v15052_v53 = vadd.f32 %v18581_v8, %v6172_v51  ;;  %18582 = vst [vmem:[#allocation202_spill] sm:$0xff] %v15055_v47  ;;  %10337 = vpow2.f32 %v14808_v26  ;;  %v5388_v18 = vsub.f32 %v18584_v25, %v18452_v37  ;;  %v18585_v24 = vsub.f32 %v18453_v55, %v18452_v37  ;;  %v15067_v7 = vpop.eup %10317  ;;  %v18587_v33 = vld [vmem:[#allocation315_spill] sm:$0xff]  ;;  %v18588_v8 = vld [vmem:[#allocation106_spill] sm:$0xff] }
 0x78e   : > { %18586 = vst [vmem:[#allocation201_spill] sm:$0xff] %v15067_v7  ;;  %10339 = vpow2.f32 %v5755_v5  ;;  %v5735_v41 = vmul.f32 1.442695, %v5386_v28  ;;  %v6160_v36 = vadd.f32 %v18588_v8, %v18587_v33  ;;  %v6223_v26 = vadd.f32 %v14858_v43, %v14826_v13  ;;  %v15073_v52 = vpop.eup %10319  ;;  %v18592_v37 = vld [vmem:[#allocation186_spill] sm:$0xff]  ;;  %v18594_v33 = vld [vmem:[#allocation217_spill] sm:$0xff] }
 0x78f   : > { %v5733_v51 = vmul.f32 1.442695, %v18585_v24  ;;  %18589 = vst [vmem:[#allocation203_spill] sm:$0xff] %v15073_v52  ;;  %10341 = vpow2.f32 %v14323_v48  ;;  %v15077_v25 = vadd.f32 %v18590_v59, %v6154_v4  ;;  %v15080_v55 = vadd.f32 %v18591_v44, %v6190_v9  ;;  %v18593_v24 = vld [vmem:[#allocation113_spill] sm:$0xff]  ;;  %v15090_v48 = vpop.eup %10321  ;;  %v18597_v44 = vld [vmem:[#allocation230_spill] sm:$0xff] }
 0x790   : > { %v6196_v5 = vadd.f32 %v18593_v24, %v18592_v37  ;;  %10343 = vpow2.f32 %v5723_v35  ;;  %v6207_v28 = vadd.f32 %v14300_v10, %v6206_v20  ;;  %v5402_v8 = vsub.f32 %v18594_v33, %v18468_v12  ;;  %18596 = vst [vmem:[#allocation199_spill] sm:$0xff] %v15090_v48  ;;  %v15095_v37 = vpop.eup %10323  ;;  %v18599_v35 = vld [vmem:[#allocation105_spill] sm:$0xff]  ;;  %v18600_v33 = vld [vmem:[#allocation216_spill] sm:$0xff] }
 0x791   : > { %v18595_v13 = vsub.f32 %v18469_v19, %v18468_v12  ;;  %10345 = vpow2.f32 %v14893_v31  ;;  %v5737_v4 = vmul.f32 1.442695, %v5387_v45  ;;  %v5739_v9 = vmul.f32 1.442695, %v5388_v18  ;;  %18598 = vst [vmem:[#allocation252_spill] sm:$0xff] %v15095_v37  ;;  %v18601_v31 = vld [vmem:[#allocation218_spill] sm:$0xff] }
 0x792   : > { %v5428_v59 = vsub.f32 %v18597_v44, %v18496_v15  ;;  %10347 = vpow2.f32 %v5787_v46  ;;  %v6161_v20 = vadd.f32 %v18599_v35, %v6160_v36  ;;  %v5403_v24 = vsub.f32 %v18600_v33, %v18468_v12  ;;  %v18602_v18 = vld [vmem:[#allocation227_spill] sm:$0xff]  ;;  %v18603_v10 = vld [vmem:[#allocation229_spill] sm:$0xff] }
 0x793   : > { %v5765_v43 = vmul.f32 1.442695, %v18595_v13  ;;  %v6224_v19 = vadd.f32 %v14869_v23, %v6223_v26  ;;  %v15101_v13 = vpop.permute.xlu1 %6817  ;;  %10349 = vpow2.f32 %v5733_v51  ;;  %v5404_v45 = vsub.f32 %v18601_v31, %v18468_v12  ;;  %v18604_v44 = vld [vmem:[#allocation177_spill] sm:$0xff]  ;;  %v15108_v22 = vpop.eup %10325  ;;  %v18608_v12 = vld [vmem:[#allocation238_spill] sm:$0xff] }
 0x794   : > { %v6178_v63 = vadd.f32 %v18603_v10, %v18602_v18  ;;  %v6197_v15 = vadd.f32 %v18604_v44, %v6196_v5  ;;  %18605 = vst [vmem:[#allocation256_spill] sm:$0xff] %v15108_v22  ;;  %v18606_v46 = vld [vmem:[#allocation181_spill] sm:$0xff]  ;;  %v5767_v35 = vmul.f32 1.442695, %v5402_v8  ;;  %v6241_v26 = vadd.f32 %v14939_v2, %v14933_v14  ;;  %v15113_v33 = vpop.eup %10327  ;;  %v18610_v44 = vld [vmem:[#allocation316_spill] sm:$0xff]  ;;  %v15127_v14 = vpop.permute.xlu0 %6803 }
 0x795   : > { %v6208_v36 = vadd.f32 %v18606_v46, %v6207_v28  ;;  %10351 = vpow2.f32 %v5765_v43  ;;  %18607 = vst [vmem:[#allocation214_spill] sm:$0xff] %v15113_v33  ;;  %v5819_v51 = vmul.f32 1.442695, %v5428_v59  ;;  %v5444_v31 = vsub.f32 %v18608_v12, %v14352_v27  ;;  %v18612_v59 = vld [vmem:[#allocation318_spill] sm:$0xff] }
 0x796   : > { %10353 = vpow2.f32 %v5735_v41  ;;  %v6214_v23 = vadd.f32 %v14332_v17, %v14321_v56  ;;  %v15119_v5 = vpop.eup %10329  ;;  %v15122_v28 = vadd.f32 %v18610_v44, %v6161_v20  ;;  %v5769_v43 = vmul.f32 1.442695, %v5403_v24  ;;  %v18613_v12 = vld [vmem:[#allocation182_spill] sm:$0xff] }
 0x797   : > { %18609 = vst [vmem:[#allocation206_spill] sm:$0xff] %v15119_v5  ;;  %10355 = vpow2.f32 %v5737_v4  ;;  %v6225_v8 = vadd.f32 %v14880_v21, %v6224_v19  ;;  %v15125_v46 = vpop.eup %10331  ;;  %v5771_v41 = vmul.f32 1.442695, %v5404_v45  ;;  %v6179_v27 = vadd.f32 %v18612_v59, %v6178_v63  ;;  %v18615_v17 = vld [vmem:[#allocation194_spill] sm:$0xff]  ;;  %v15141_v18 = vpop.permute.xlu1 %6801 }
 0x798   : > { %18611 = vst [vmem:[#allocation222_spill] sm:$0xff] %v15125_v46  ;;  %10357 = vpow2.f32 %v5739_v9  ;;  %v6198_v2 = vadd.f32 %v18613_v12, %v6197_v15  ;;  %v15131_v56 = vpop.eup %10333  ;;  %v15134_v4 = vadd.f32 %v18615_v17, %v6208_v36  ;;  %v18616_v24 = vld [vmem:[#allocation226_spill] sm:$0xff]  ;;  %v6242_v19 = vadd.f32 %v14945_v54, %v6241_v26  ;;  %v18640_v12 = vld [vmem:[#allocation251_spill] sm:$0xff] }
 0x799   : > { %18614 = vst [vmem:[#allocation209_spill] sm:$0xff] %v15131_v56  ;;  %10359 = vpow2.f32 %v5767_v35  ;;  %v5420_v20 = vsub.f32 %v18616_v24, %v18489_v0  ;;  %v15139_v21 = vpop.eup %10335  ;;  %v6145_v63 = vadd.f32 %v15108_v22, %v15037_v50  ;;  %v5851_v9 = vmul.f32 1.442695, %v5444_v31  ;;  %v18619_v0 = vld [vmem:[#allocation246_spill] sm:$0xff]  ;;  %v18622_v50 = vld [vmem:[#allocation172_spill] sm:$0xff] }
 0x79a   : > { %18617 = vst [vmem:[#allocation208_spill] sm:$0xff] %v15139_v21  ;;  %10361 = vpow2.f32 %v14911_v57  ;;  %v6215_v45 = vadd.f32 %v14367_v61, %v6214_v23  ;;  %v15147_v15 = vpop.eup %10337  ;;  %v6226_v35 = vadd.f32 %v14885_v3, %v6225_v8  ;;  %v5460_v36 = vsub.f32 %v18619_v0, %v18461_v40  ;;  %v18620_v26 = vld [vmem:[#allocation234_spill] sm:$0xff]  ;;  %v18623_v57 = vld [vmem:[#allocation115_spill] sm:$0xff]  ;;  %v18633_v61 = vld [vmem:[#allocation129_spill] sm:$0xff] }
 0x79b   : > { %18618 = vst [vmem:[#allocation210_spill] sm:$0xff] %v15147_v15  ;;  %10363 = vpow2.f32 %v5819_v51  ;;  %v5436_v24 = vsub.f32 %v18620_v26, %v14131_v49  ;;  %v15154_v17 = vpop.eup %10339  ;;  %v6180_v22 = vadd.f32 %v18622_v50, %v6179_v27  ;;  %v6199_v31 = vadd.f32 %v18623_v57, %v6198_v2  ;;  %v18625_v40 = vld [vmem:[#allocation130_spill] sm:$0xff]  ;;  %v15167_v26 = vpop.permute.xlu0 %6815  ;;  %v18627_v27 = vld [vmem:[#allocation176_spill] sm:$0xff]  ;;  %v18628_v2 = vld [vmem:[#allocation187_spill] sm:$0xff] }
 0x79c   : > { %18621 = vst [vmem:[#allocation217_spill] sm:$0xff] %v15154_v17  ;;  %10365 = vpow2.f32 %v5769_v43  ;;  %v6259_v23 = vadd.f32 %v15015_v16, %v15010_v58  ;;  %v15160_v54 = vpop.eup %10341  ;;  %v5803_v51 = vmul.f32 1.442695, %v5420_v20  ;;  %v6243_v8 = vadd.f32 %v14951_v1, %v6242_v19  ;;  %v18629_v58 = vld [vmem:[#allocation254_spill] sm:$0xff]  ;;  %v18631_v20 = vld [vmem:[#allocation245_spill] sm:$0xff] }
 0x79d   : > { %18624 = vst [vmem:[#allocation230_spill] sm:$0xff] %v15160_v54  ;;  %10367 = vpow2.f32 %v5771_v41  ;;  %v6232_v0 = vadd.f32 %v18625_v40, %v14897_v32  ;;  %v15165_v49 = vpop.eup %10343  ;;  %v6146_v43 = vadd.f32 %v15113_v33, %v6145_v63  ;;  %v6216_v3 = vadd.f32 %v18628_v2, %v6215_v45  ;;  %v18634_v63 = vld [vmem:[#allocation179_spill] sm:$0xff]  ;;  %v18635_v2 = vld [vmem:[#allocation104_spill] sm:$0xff] }
 0x79e   : > { %18626 = vst [vmem:[#allocation216_spill] sm:$0xff] %v15165_v49  ;;  %10369 = vpow2.f32 %v18627_v27  ;;  %v5476_v57 = vsub.f32 %v18629_v58, %v18493_v62  ;;  %v15174_v41 = vpop.eup %10345  ;;  %v15177_v19 = vadd.f32 %v18631_v20, %v6226_v35  ;;  %v5883_v16 = vmul.f32 1.442695, %v5460_v36  ;;  %v18636_v62 = vld [vmem:[#allocation242_spill] sm:$0xff]  ;;  %v18639_v20 = vld [vmem:[#allocation135_spill] sm:$0xff] }
 0x79f   : > { %18630 = vst [vmem:[#allocation218_spill] sm:$0xff] %v15174_v41  ;;  %10371 = vpow2.f32 %v5851_v9  ;;  %v5835_v32 = vmul.f32 1.442695, %v5436_v24  ;;  %v15179_v40 = vpop.eup %10347  ;;  %v15183_v27 = vadd.f32 %v18634_v63, %v6199_v31  ;;  %v6260_v45 = vadd.f32 %v15020_v29, %v6259_v23  ;;  %v18637_v9 = vld [vmem:[#allocation228_spill] sm:$0xff]  ;;  %v18638_v36 = vld [vmem:[#allocation98_spill] sm:$0xff]  ;;  %v18642_v31 = vld [vmem:[#allocation133_spill] sm:$0xff] }
 0x7a0   : > { %18632 = vst [vmem:[#allocation229_spill] sm:$0xff] %v15179_v40  ;;  %v6069_v1 = vpop.xlane.xlu1 %6068  ;;  %10373 = vpow2.f32 %v18633_v61  ;;  %v5452_v58 = vsub.f32 %v18636_v62, %v18635_v2  ;;  %v15188_v33 = vpop.eup %10349  ;;  %v6244_v35 = vadd.f32 %v18637_v9, %v6243_v8  ;;  %v6233_v24 = vadd.f32 %v18638_v36, %v6232_v0  ;;  %v18643_v23 = vld [vmem:[#allocation189_spill] sm:$0xff] }
 0x7a1   : > { %10375 = vrcp.f32 %v6069_v1  ;;  %v6250_v59 = vadd.f32 %v18640_v12, %v18639_v20  ;;  %v6147_v61 = vadd.f32 %v15119_v5, %v6146_v43  ;;  %v6217_v29 = vadd.f32 %v18643_v23, %v6216_v3  ;;  %v18645_v3 = vld [vmem:[#allocation112_spill] sm:$0xff] }
 0x7a2   : > { %v15194_v50 = vpop.eup %10351  ;;  %10377 = vpow2.f32 %v18642_v31  ;;  %v5915_v63 = vmul.f32 1.442695, %v5476_v57  ;;  %v6138_v1 = vadd.f32 %v15131_v56, %v15045_v38  ;;  %v6163_v8 = vadd.f32 %v15188_v33, %v15122_v28  ;;  %v18646_v57 = vld [vmem:[#allocation250_spill] sm:$0xff]  ;;  %v18648_v38 = vld [vmem:[#allocation220_spill] sm:$0xff] }
 0x7a3   : > { %18641 = vst [vmem:[#allocation238_spill] sm:$0xff] %v15194_v50  ;;  %v15199_v2 = vpop.eup %10353  ;;  %v6181_v0 = vadd.f32 %v15194_v50, %v6180_v22  ;;  %10379 = vpow2.f32 %v5803_v51  ;;  %v6261_v43 = vadd.f32 %v15027_v60, %v6260_v45  ;;  %v5867_v31 = vmul.f32 1.442695, %v5452_v58  ;;  %v18649_v20 = vld [vmem:[#allocation236_spill] sm:$0xff] }
 0x7a4   : > { %v15206_v62 = vpop.eup %10355  ;;  %v6078_v9 = vpop.xlane.xlu0 %6077  ;;  %10381 = vpow2.f32 %v5883_v16  ;;  %v5468_v23 = vsub.f32 %v18646_v57, %v18645_v3  ;;  %v6234_v56 = vadd.f32 %v18648_v38, %v6233_v24  ;;  %v6251_v28 = vadd.f32 %v18649_v20, %v6250_v59  ;;  %v18651_v3 = vld [vmem:[#allocation247_spill] sm:$0xff] }
 0x7a5   : > { %18644 = vst [vmem:[#allocation316_spill] sm:$0xff] %v15206_v62  ;;  %v15211_v5 = vpop.eup %10357  ;;  %10383 = vrcp.f32 %v6078_v9  ;;  %v6268_v22 = vadd.f32 %v15055_v47, %v15049_v34  ;;  %v6148_v16 = vadd.f32 %v15125_v46, %v6147_v61  ;;  %v6174_v45 = vadd.f32 %v15147_v15, %v15052_v53  ;;  %v18655_v15 = vld [vmem:[#allocation257_spill] sm:$0xff]  ;;  %v18658_v46 = vld [vmem:[#allocation136_spill] sm:$0xff] }
 0x7a6   : > { %18647 = vst [vmem:[#allocation226_spill] sm:$0xff] %v15211_v5  ;;  %v15217_v51 = vpop.eup %10359  ;;  %v6156_v58 = vadd.f32 %v15160_v54, %v15077_v25  ;;  %10385 = vpow2.f32 %v18651_v3  ;;  %v6139_v24 = vadd.f32 %v15139_v21, %v6138_v1  ;;  %v6164_v59 = vadd.f32 %v15199_v2, %v6163_v8  ;;  %v18654_v25 = vld [vmem:[#allocation192_spill] sm:$0xff]  ;;  %v18657_v1 = vld [vmem:[#allocation131_spill] sm:$0xff] }
 0x7a7   : > { %18650 = vst [vmem:[#allocation246_spill] sm:$0xff] %v15217_v51  ;;  %v15225_v9 = vpop.eup %10361  ;;  %v6182_v57 = vadd.f32 %v15217_v51, %v6181_v0  ;;  %10387 = vpow2.f32 %v5835_v32  ;;  %6149 = vadd.xlane.f32.xlu1 %v6148_v16  ;;  %v6262_v53 = vadd.f32 %v15034_v6, %v6261_v43  ;;  %v5899_v61 = vmul.f32 1.442695, %v5468_v23  ;;  %v18660_v43 = vld [vmem:[#allocation134_spill] sm:$0xff] }
 0x7a8   : > { %18652 = vst [vmem:[#allocation234_spill] sm:$0xff] %v15225_v9  ;;  %v15230_v34 = vpop.eup %10363  ;;  %10389 = vpow2.f32 %v15029_v11  ;;  %v5484_v3 = vsub.f32 %v18655_v15, %v18654_v25  ;;  %v6235_v8 = vadd.f32 %v18657_v1, %v6234_v56  ;;  %v6252_v0 = vadd.f32 %v18658_v46, %v6251_v28  ;;  %v18664_v25 = vld [vmem:[#allocation191_spill] sm:$0xff] }
 0x7a9   : > { %18653 = vst [vmem:[#allocation176_spill] sm:$0xff] %v15230_v34  ;;  %v15236_v54 = vpop.eup %10365  ;;  %6140 = vadd.xlane.f32.xlu0 %v6139_v24  ;;  %10391 = vpow2.f32 %v5915_v63  ;;  %v6269_v32 = vadd.f32 %v15067_v7, %v6268_v22  ;;  %v6087_v16 = vpop.xlane.xlu1 %6086  ;;  %v6175_v11 = vadd.f32 %v15154_v17, %v6174_v45  ;;  %v6157_v23 = vadd.f32 %v15165_v49, %v6156_v58 }
 0x7aa   : > { %18656 = vst [vmem:[#allocation254_spill] sm:$0xff] %v15236_v54  ;;  %v15241_v21 = vpop.eup %10367  ;;  %v6192_v15 = vadd.f32 %v15174_v41, %v15080_v55  ;;  %10393 = vpow2.f32 %v18660_v43  ;;  %v6165_v56 = vadd.f32 %v15206_v62, %v6164_v59  ;;  %v6210_v63 = vadd.f32 %v15225_v9, %v15134_v4  ;;  %v18663_v55 = vld [vmem:[#allocation232_spill] sm:$0xff]  ;;  %v18666_v4 = vld [vmem:[#allocation97_spill] sm:$0xff]  ;;  %v18686_v41 = vld [vmem:[#allocation75_spill] sm:$0xff] }
 0x7ab   : > { %18659 = vst [vmem:[#allocation129_spill] sm:$0xff] %v15241_v21  ;;  %v15248_v24 = vpop.eup %10369  ;;  %v6183_v28 = vadd.f32 %v15236_v54, %v6182_v57  ;;  %10395 = vpow2.f32 %v5867_v31  ;;  %6176 = vadd.xlane.f32.xlu1 %v6175_v11  ;;  %v6245_v58 = vadd.f32 %v18663_v55, %v6244_v35  ;;  %v6218_v43 = vadd.f32 %v18664_v25, %v6217_v29  ;;  %v18667_v31 = vld [vmem:[#allocation253_spill] sm:$0xff]  ;;  %v18668_v35 = vld [vmem:[#allocation138_spill] sm:$0xff]  ;;  %v18671_v9 = vld [vmem:[#allocation72_spill] sm:$0xff] }
 0x7ac   : > { %18661 = vst [vmem:[#allocation104_spill] sm:$0xff] %v15248_v24  ;;  %v15254_v22 = vpop.eup %10371  ;;  %10397 = vrcp.f32 %v6087_v16  ;;  %v6228_v45 = vadd.f32 %v15248_v24, %v15177_v19  ;;  %v15263_v59 = vadd.f32 %v15041_v42, %v6262_v53  ;;  %v15266_v57 = vadd.f32 %v18666_v4, %v6235_v8  ;;  %v18687_v55 = vld [vmem:[#allocation78_spill] sm:$0xff]  ;;  %v18802_v25 = vld [vmem:[#allocation263_spill] sm:$0xff] }
 0x7ad   : > { %18662 = vst [vmem:[#allocation242_spill] sm:$0xff] %v15254_v22  ;;  %v15260_v7 = vpop.eup %10373  ;;  %6158 = vadd.xlane.f32.xlu0 %v6157_v23  ;;  %10399 = vpow2.f32 %v18667_v31  ;;  %v15269_v16 = vmul.f32 1.442695, %v5484_v3  ;;  %v6193_v19 = vadd.f32 %v15179_v40, %v6192_v15  ;;  %v6253_v24 = vadd.f32 %v18668_v35, %v6252_v0  ;;  %v18694_v4 = vld [vmem:[#allocation190_spill] sm:$0xff] }
 0x7ae   : > { %18665 = vst [vmem:[#allocation98_spill] sm:$0xff] %v15260_v7  ;;  %v10376_v11 = vpop.eup %10375  ;;  %10401 = vpow2.f32 %v5899_v61  ;;  %v6270_v29 = vadd.f32 %v15073_v52, %v6269_v32  ;;  %v6166_v53 = vadd.f32 %v15211_v5, %v6165_v56  ;;  %v6211_v23 = vadd.f32 %v15230_v34, %v6210_v63  ;;  %v18673_v63 = vld [vmem:[#allocation70_spill] sm:$0xff]  ;;  %v18675_v34 = vld [vmem:[#allocation71_spill] sm:$0xff]  ;;  %v18804_v5 = vld [vmem:[#allocation156_spill] sm:$0xff] }
 0x7af   : > { %v15274_v6 = vpop.eup %10377  ;;  %v6184_v8 = vadd.f32 %v15241_v21, %v6183_v28  ;;  %10403 = vpow2.f32 %v15031_v39  ;;  %v6096_v31 = vpop.xlane.xlu0 %6095  ;;  %v6382_v15 = vmul.f32 %v10376_v11, %v18671_v9  ;;  %6194 = vadd.xlane.f32.xlu1 %v6193_v19  ;;  %v6229_v61 = vadd.f32 %v15254_v22, %v6228_v45  ;;  %v18674_v39 = vld [vmem:[#allocation73_spill] sm:$0xff]  ;;  %v18678_v22 = vld [vmem:[#allocation184_spill] sm:$0xff]  ;;  %v18818_v52 = vld [vmem:[#allocation286_spill] sm:$0xff] }
 0x7b0   : > { %18669 = vst [vmem:[#allocation251_spill] sm:$0xff] %v15274_v6  ;;  %v15280_v3 = vpop.eup %10379  ;;  %v6201_v0 = vadd.f32 %v15260_v7, %v15183_v27  ;;  %v6246_v32 = vadd.f32 %v15274_v6, %v6245_v58  ;;  %10405 = vrcp.f32 %v6096_v31  ;;  %v6381_v28 = vmul.f32 %v10376_v11, %v18673_v63  ;;  %v18676_v19 = vld [vmem:[#allocation185_spill] sm:$0xff]  ;;  %v18680_v58 = vld [vmem:[#allocation142_spill] sm:$0xff]  ;;  %v18682_v31 = vld [vmem:[#allocation200_spill] sm:$0xff] }
 0x7b1   : > { %18670 = vst [vmem:[#allocation133_spill] sm:$0xff] %v15280_v3  ;;  %v15287_v56 = vpop.eup %10381  ;;  %6167 = vadd.xlane.f32.xlu0 %v6166_v53  ;;  %v15291_v42 = vmul.f32 %v10376_v11, %v18674_v39  ;;  %v15294_v35 = vmul.f32 %v10376_v11, %v18675_v34  ;;  %v15297_v45 = vmul.f32 %v10376_v11, %v18676_v19  ;;  %v18685_v63 = vld [vmem:[#allocation74_spill] sm:$0xff]  ;;  %v18688_v19 = vld [vmem:[#allocation76_spill] sm:$0xff] }
 0x7b2   : > { %18672 = vst [vmem:[#allocation112_spill] sm:$0xff] %v15287_v56  ;;  %v10384_v9 = vpop.eup %10383  ;;  %v15300_v27 = vmul.f32 %v10376_v11, %v18678_v22  ;;  %v15303_v6 = vmul.f32 %v10376_v11, %v18680_v58  ;;  %v15306_v7 = vmul.f32 %v10376_v11, %v18682_v31  ;;  %v18690_v58 = vld [vmem:[#allocation141_spill] sm:$0xff]  ;;  %v18692_v11 = vld [vmem:[#allocation140_spill] sm:$0xff] }
 0x7b3   : > { %18677 = vst [vmem:[#allocation250_spill] sm:$0xff] %v15297_v45  ;;  %v15308_v53 = vpop.eup %10385  ;;  %v6390_v39 = vmul.f32 %v10384_v9, %v18685_v63  ;;  %v6389_v34 = vmul.f32 %v10384_v9, %v18686_v41  ;;  %v15313_v40 = vmul.f32 %v10384_v9, %v18687_v55  ;;  %v15316_v1 = vmul.f32 %v10384_v9, %v18688_v19  ;;  %v18696_v63 = vld [vmem:[#allocation260_spill] sm:$0xff] }
 0x7b4   : > { %18679 = vst [vmem:[#allocation220_spill] sm:$0xff] %v15300_v27  ;;  %18681 = vst [vmem:[#allocation236_spill] sm:$0xff] %v15303_v6  ;;  %v15318_v22 = vpop.eup %10387  ;;  %6212 = vadd.xlane.f32.xlu1 %v6211_v23  ;;  %v15321_v54 = vmul.f32 %v10384_v9, %v18690_v58  ;;  %v15324_v31 = vmul.f32 %v10384_v9, %v18692_v11  ;;  %v15327_v21 = vmul.f32 %v10384_v9, %v18694_v4  ;;  %v18710_v27 = vld [vmem:[#allocation83_spill] sm:$0xff] }
 0x7b5   : > { %18683 = vst [vmem:[#allocation247_spill] sm:$0xff] %v15306_v7  ;;  %18684 = vst [vmem:[#allocation192_spill] sm:$0xff] %v15308_v53  ;;  %v15330_v41 = vmul.f32 %v10384_v9, %v18696_v63  ;;  %v15332_v55 = vpop.eup %10389  ;;  %v6638_v17 = vpack.c.bf16 %v6390_v39, %v6382_v15  ;;  %v6637_v19 = vpack.c.bf16 %v6389_v34, %v6381_v28  ;;  %6185 = vadd.xlane.f32.xlu0 %v6184_v8  ;;  %v6105_v11 = vpop.xlane.xlu1 %6104  ;;  %v18702_v9 = vld [vmem:[#allocation240_spill] sm:$0xff] }
 0x7b6   : > { %18689 = vst [vmem:[#allocation257_spill] sm:$0xff] %v15318_v22  ;;  %18691 = vst [vmem:[#allocation136_spill] sm:$0xff] %v15321_v54  ;;  %v15338_v62 = vpop.eup %10391  ;;  %v6202_v39 = vadd.f32 %v15280_v3, %v6201_v0  ;;  %v6219_v34 = vadd.f32 %v15308_v53, %v6218_v43  ;;  %v6271_v63 = vadd.f32 %v15090_v48, %v6270_v29  ;;  %10407 = vrcp.f32 %v6105_v11  ;;  %v18720_v54 = vld [vmem:[#allocation296_spill] sm:$0xff]  ;;  %v10485_v53 = vld [vmem:[#allocation2 + $0x1b8] sm:$0xff]  }
 0x7b7   : > { %18693 = vst [vmem:[#allocation134_spill] sm:$0xff] %v15324_v31  ;;  %18695 = vst [vmem:[#allocation253_spill] sm:$0xff] %v15327_v21  ;;  %v15348_v28 = vpop.eup %10393  ;;  %6989 = vmatprep.mubr.bf16.mxu0 %v6638_v17  ;;  %v6264_v15 = vadd.f32 %v15332_v55, %v15263_v59  ;;  %v6254_v4 = vadd.f32 %v18702_v9, %v6253_v24  ;;  %10409 = vpow2.f32 %v15269_v16  ;;  %v10498_v3 = vld [vmem:[#allocation2 + $0x118] sm:$0xff]  }
 0x7b8   : > { %18697 = vst [vmem:[#allocation72_spill] sm:$0xff] %v15330_v41  ;;  %18698 = vst [vmem:[#allocation70_spill] sm:$0xff] %v15332_v55  ;;  %v15353_v58 = vpop.eup %10395  ;;  %6990 = vmatmul.mubr.bf16.vlgmr.msra.gmra.mxu0 %v6637_v19  ;;  %6230 = vadd.xlane.f32.xlu1 %v6229_v61  ;;  %v6237_v8 = vadd.f32 %v15348_v28, %v15266_v57  ;;  %v6247_v29 = vadd.f32 %v15287_v56, %v6246_v32  ;;  %v18706_v57 = vld [vmem:[#allocation79_spill] sm:$0xff]  ;;  %v18707_v32 = vld [vmem:[#allocation77_spill] sm:$0xff] }
 0x7b9   : > { %18699 = vst [vmem:[#allocation73_spill] sm:$0xff] %v15338_v62  ;;  %18700 = vst [vmem:[#allocation71_spill] sm:$0xff] %v15348_v28  ;;  %v10398_v17 = vpop.eup %10397  ;;  %6203 = vadd.xlane.f32.xlu0 %v6202_v39  ;;  %v6220_v61 = vadd.f32 %v15318_v22, %v6219_v34  ;;  %v6272_v19 = vadd.f32 %v15095_v37, %v6271_v63  ;;  %v6265_v24 = vadd.f32 %v15338_v62, %v6264_v15  ;;  %v18708_v41 = vld [vmem:[#allocation81_spill] sm:$0xff]  ;;  %v18709_v63 = vld [vmem:[#allocation80_spill] sm:$0xff] }
 0x7ba   : > { %18701 = vst [vmem:[#allocation185_spill] sm:$0xff] %v15353_v58  ;;  %v15361_v43 = vpop.eup %10399  ;;  %v6398_v23 = vmul.f32 %v10398_v17, %v18706_v57  ;;  %v6238_v16 = vadd.f32 %v15353_v58, %v6237_v8  ;;  %v6397_v7 = vmul.f32 %v10398_v17, %v18707_v32  ;;  %v15376_v34 = vmul.f32 %v10398_v17, %v18708_v41  ;;  %v18714_v8 = vld [vmem:[#allocation146_spill] sm:$0xff]  ;;  %v18719_v41 = vld [vmem:[#allocation84_spill] sm:$0xff]  ;;  %v18721_v55 = vld [vmem:[#allocation295_spill] sm:$0xff] }
 0x7bb   : > { %18703 = vst [vmem:[#allocation184_spill] sm:$0xff] %v15361_v43  ;;  %v15364_v0 = vpop.eup %10401  ;;  %v6114_v11 = vpop.xlane.xlu0 %6113  ;;  %v6255_v39 = vadd.f32 %v15361_v43, %v6254_v4  ;;  %v15379_v6 = vmul.f32 %v10398_v17, %v18709_v63  ;;  %v15382_v57 = vmul.f32 %v10398_v17, %v18710_v27  ;;  %v15388_v31 = vmul.f32 %v10398_v17, %v18714_v8  ;;  %v18716_v4 = vld [vmem:[#allocation144_spill] sm:$0xff]  ;;  %v18722_v27 = vld [vmem:[#allocation147_spill] sm:$0xff]  ;;  %v18724_v43 = vld [vmem:[#allocation145_spill] sm:$0xff] }
 0x7bc   : > { %18704 = vst [vmem:[#allocation142_spill] sm:$0xff] %v15364_v0  ;;  %v15368_v59 = vpop.eup %10403  ;;  %6248 = vadd.xlane.f32.xlu1 %v6247_v29  ;;  %10411 = vrcp.f32 %v6114_v11  ;;  %v18712_v29 = vld [vmem:[#allocation82_spill] sm:$0xff]  ;;  %v15391_v11 = vmul.f32 %v10398_v17, %v18716_v4  ;;  %v18726_v56 = vld [vmem:[#allocation264_spill] sm:$0xff] }
 0x7bd   : > { %18705 = vst [vmem:[#allocation200_spill] sm:$0xff] %v15368_v59  ;;  %6221 = vadd.xlane.f32.xlu0 %v6220_v61  ;;  %v10406_v21 = vpop.eup %10405  ;;  %18711 = vst [vmem:[#allocation74_spill] sm:$0xff] %v15382_v57  ;;  %v15385_v15 = vmul.f32 %v10398_v17, %v18712_v29  ;;  %v18718_v61 = vld [vmem:[#allocation85_spill] sm:$0xff]  ;;  %v18728_v4 = vld [vmem:[#allocation262_spill] sm:$0xff] }
 0x7be   : > { %18715 = vst [vmem:[#allocation78_spill] sm:$0xff] %v15388_v31  ;;  %18717 = vst [vmem:[#allocation76_spill] sm:$0xff] %v15391_v11  ;;  %v6406_v32 = vmul.f32 %v10406_v21, %v18718_v61  ;;  %v6405_v45 = vmul.f32 %v10406_v21, %v18719_v41  ;;  %v15396_v63 = vmul.f32 %v10406_v21, %v18720_v54  ;;  %v18737_v54 = vld [vmem:[#allocation301_spill] sm:$0xff]  ;;  %v18799_v37 = vld [vmem:[#allocation162_spill] sm:$0xff] }
 0x7bf   : > { %18713 = vst [vmem:[#allocation75_spill] sm:$0xff] %v15385_v15  ;;  %v15399_v62 = vmul.f32 %v10406_v21, %v18721_v55  ;;  %v15402_v29 = vmul.f32 %v10406_v21, %v18722_v27  ;;  %v15405_v8 = vmul.f32 %v10406_v21, %v18724_v43  ;;  %v15408_v17 = vmul.f32 %v10406_v21, %v18726_v56  ;;  %v18731_v56 = vld [vmem:[#allocation298_spill] sm:$0xff]  ;;  %v18746_v15 = vld [vmem:[#allocation303_spill] sm:$0xff] }
 0x7c0   : > { %6266 = vadd.xlane.f32.xlu1 %v6265_v24  ;;  %v15411_v61 = vmul.f32 %v10406_v21, %v18728_v4  ;;  %v6646_v41 = vpack.c.bf16 %v6406_v32, %v6398_v23  ;;  %v6645_v28 = vpack.c.bf16 %v6405_v45, %v6397_v7  ;;  %v6256_v45 = vadd.f32 %v15364_v0, %v6255_v39  ;;  %v18732_v21 = vld [vmem:[#allocation297_spill] sm:$0xff]  ;;  %v18734_v39 = vld [vmem:[#allocation299_spill] sm:$0xff] }
 0x7c1   : > { %18723 = vst [vmem:[#allocation141_spill] sm:$0xff] %v15402_v29  ;;  %18725 = vst [vmem:[#allocation140_spill] sm:$0xff] %v15405_v8  ;;  %6239 = vadd.xlane.f32.xlu0 %v6238_v16  ;;  %v6123_v24 = vpop.xlane.xlu1 %6122  ;;  %v6273_v23 = vadd.f32 %v15368_v59, %v6272_v19 }
 0x7c2   : > { %18727 = vst [vmem:[#allocation190_spill] sm:$0xff] %v15408_v17  ;;  %18729 = vst [vmem:[#allocation260_spill] sm:$0xff] %v15411_v61  ;;  %6997 = vmatprep.mubr.bf16.mxu0 %v6646_v41  ;;  %10413 = vrcp.f32 %v6123_v24  ;;  %v18733_v41 = vld [vmem:[#allocation300_spill] sm:$0xff]  ;;  %v18735_v24 = vld [vmem:[#allocation302_spill] sm:$0xff] }
 0x7c3   : > { %6998 = vmatmul.mubr.bf16.gmra.mxu0 %v6645_v28  ;;  %v10408_v16 = vpop.eup %10407  ;;  %v18745_v17 = vld [vmem:[#allocation304_spill] sm:$0xff] }
 0x7c4   : > { %v15427_v32 = vpop.eup %10409  ;;  %v6414_v43 = vmul.f32 %v10408_v16, %v18731_v56  ;;  %v6413_v55 = vmul.f32 %v10408_v16, %v18732_v21  ;;  %v15433_v7 = vmul.f32 %v10408_v16, %v18733_v41  ;;  %v15436_v19 = vmul.f32 %v10408_v16, %v18734_v39  ;;  %v18741_v56 = vld [vmem:[#allocation150_spill] sm:$0xff]  ;;  %v18743_v21 = vld [vmem:[#allocation87_spill] sm:$0xff] }
 0x7c5   : > { %6257 = vadd.xlane.f32.xlu0 %v6256_v45  ;;  %18730 = vst [vmem:[#allocation79_spill] sm:$0xff] %v15427_v32  ;;  %v6274_v27 = vadd.f32 %v15427_v32, %v6273_v23  ;;  %v15439_v45 = vmul.f32 %v10408_v16, %v18735_v24  ;;  %v15442_v11 = vmul.f32 %v10408_v16, %v18737_v54  ;;  %v18739_v23 = vld [vmem:[#allocation149_spill] sm:$0xff]  ;;  %v18744_v41 = vld [vmem:[#allocation86_spill] sm:$0xff]  ;;  %v18749_v54 = vld [vmem:[#allocation151_spill] sm:$0xff] }
 0x7c6   : > { %v15445_v61 = vmul.f32 %v10408_v16, %v18739_v23  ;;  %v18747_v24 = vld [vmem:[#allocation266_spill] sm:$0xff]  ;;  %v18751_v23 = vld [vmem:[#allocation152_spill] sm:$0xff] }
 0x7c7   : > { %v6132_v4 = vpop.xlane.xlu0 %6131  ;;  %18736 = vst [vmem:[#allocation77_spill] sm:$0xff] %v15439_v45  ;;  %18738 = vst [vmem:[#allocation81_spill] sm:$0xff] %v15442_v11  ;;  %v18769_v45 = vld [vmem:[#allocation91_spill] sm:$0xff] }
 0x7c8   : > { %10415 = vrcp.f32 %v6132_v4  ;;  %18740 = vst [vmem:[#allocation80_spill] sm:$0xff] %v15445_v61  ;;  %v15448_v4 = vmul.f32 %v10408_v16, %v18741_v56  ;;  %v18753_v16 = vld [vmem:[#allocation268_spill] sm:$0xff] }
 0x7c9   : > { %6275 = vadd.xlane.f32.xlu0 %v6274_v27  ;;  %v10412_v28 = vpop.eup %10411 }
 0x7ca   : > { %18742 = vst [vmem:[#allocation83_spill] sm:$0xff] %v15448_v4  ;;  %v6422_v27 = vmul.f32 %v10412_v28, %v18743_v21  ;;  %v6421_v31 = vmul.f32 %v10412_v28, %v18744_v41  ;;  %v15453_v39 = vmul.f32 %v10412_v28, %v18745_v17  ;;  %v15456_v8 = vmul.f32 %v10412_v28, %v18746_v15  ;;  %v18761_v4 = vld [vmem:[#allocation310_spill] sm:$0xff] }
 0x7cb   : > { %v15459_v57 = vmul.f32 %v10412_v28, %v18747_v24  ;;  %v15462_v29 = vmul.f32 %v10412_v28, %v18749_v54  ;;  %v15465_v59 = vmul.f32 %v10412_v28, %v18751_v23  ;;  %v15468_v56 = vmul.f32 %v10412_v28, %v18753_v16  ;;  %v18756_v16 = vld [vmem:[#allocation305_spill] sm:$0xff]  ;;  %v18758_v23 = vld [vmem:[#allocation307_spill] sm:$0xff] }
 0x7cc   : > { %v6654_v21 = vpack.c.bf16 %v6422_v27, %v6414_v43  ;;  %v6653_v41 = vpack.c.bf16 %v6421_v31, %v6413_v55  ;;  %v10483_v31 = vld [vmem:[#allocation2 + $0x178] sm:$0xff]   ;;  %v18755_v43 = vld [vmem:[#allocation306_spill] sm:$0xff] }
 0x7cd   : > { %18748 = vst [vmem:[#allocation82_spill] sm:$0xff] %v15459_v57  ;;  %18750 = vst [vmem:[#allocation146_spill] sm:$0xff] %v15462_v29  ;;  %v10484_v24 = vld [vmem:[#allocation2 + $0x1f8] sm:$0xff]  }
 0x7ce   : > { %18752 = vst [vmem:[#allocation144_spill] sm:$0xff] %v15465_v59  ;;  %18754 = vst [vmem:[#allocation85_spill] sm:$0xff] %v15468_v56  ;;  %7005 = vmatprep.mubr.bf16.mxu0 %v6654_v21  ;;  %v18757_v54 = vld [vmem:[#allocation309_spill] sm:$0xff] }
 0x7cf   : > { %7006 = vmatmul.mubr.bf16.gmra.mxu0 %v6653_v41  ;;  %v10414_v55 = vpop.eup %10413  ;;  %v18759_v21 = vld [vmem:[#allocation205_spill] sm:$0xff] }
 0x7d0   : > { %v6430_v27 = vmul.f32 %v10414_v55, %v18755_v43  ;;  %v6429_v15 = vmul.f32 %v10414_v55, %v18756_v16  ;;  %v15487_v17 = vmul.f32 %v10414_v55, %v18757_v54  ;;  %v15490_v61 = vmul.f32 %v10414_v55, %v18758_v23  ;;  %v18763_v56 = vld [vmem:[#allocation157_spill] sm:$0xff]  ;;  %v18765_v16 = vld [vmem:[#allocation158_spill] sm:$0xff]  ;;  %v18768_v54 = vld [vmem:[#allocation88_spill] sm:$0xff] }
 0x7d1   : > { %6859 = vrot.lane.b32.xlu1 %v10483_v31, %s10558_s14  ;;  %v15493_v41 = vmul.f32 %v10414_v55, %v18759_v21  ;;  %v15496_v31 = vmul.f32 %v10414_v55, %v18761_v4  ;;  %v15499_v43 = vmul.f32 %v10414_v55, %v18763_v56  ;;  %v15502_v59 = vmul.f32 %v10414_v55, %v18765_v16  ;;  %v18770_v57 = vld [vmem:[#allocation89_spill] sm:$0xff]  ;;  %v18771_v21 = vld [vmem:[#allocation259_spill] sm:$0xff]  ;;  %v18773_v4 = vld [vmem:[#allocation118_spill] sm:$0xff] }
 0x7d2   : > { %v18775_v56 = vld [vmem:[#allocation274_spill] sm:$0xff]  ;;  %v18777_v55 = vld [vmem:[#allocation159_spill] sm:$0xff] }
 0x7d3   : > { %18760 = vst [vmem:[#allocation84_spill] sm:$0xff] %v15493_v41  ;;  %18762 = vst [vmem:[#allocation296_spill] sm:$0xff] %v15496_v31  ;;  %v10497_v31 = vld [vmem:[#allocation2 + $0x160] sm:$0xff]  }
 0x7d4   : > { %18764 = vst [vmem:[#allocation295_spill] sm:$0xff] %v15499_v43  ;;  %18766 = vst [vmem:[#allocation147_spill] sm:$0xff] %v15502_v59  ;;  %v18787_v59 = vld [vmem:[#allocation197_spill] sm:$0xff]  ;;  %v18792_v43 = vld [vmem:[#allocation154_spill] sm:$0xff] }
 0x7d5   : > { %6891 = vrot.lane.b32.xlu1 %v10484_v24, %s10558_s14  ;;  %v10416_v28 = vpop.eup %10415  ;;  %v18767_v24 = vld [vmem:[#allocation311_spill] sm:$0xff] }
 0x7d6   : > { %v6438_v11 = vmul.f32 %v10416_v28, %v18767_v24  ;;  %v6437_v29 = vmul.f32 %v10416_v28, %v18768_v54  ;;  %v15507_v23 = vmul.f32 %v10416_v28, %v18769_v45  ;;  %v15510_v32 = vmul.f32 %v10416_v28, %v18770_v57 }
 0x7d7   : > { %v15513_v0 = vmul.f32 %v10416_v28, %v18771_v21  ;;  %v15516_v58 = vmul.f32 %v10416_v28, %v18773_v4  ;;  %v15519_v48 = vmul.f32 %v10416_v28, %v18775_v56  ;;  %v15522_v16 = vmul.f32 %v10416_v28, %v18777_v55  ;;  %v10489_v56 = vld [vmem:[#allocation2 + $0x170] sm:$0xff]   ;;  %v18780_v4 = vld [vmem:[#allocation193_spill] sm:$0xff]  ;;  %v10496_v21 = vld [vmem:[#allocation2 + $0x1a0] sm:$0xff]  }
 0x7d8   : > { %v6662_v24 = vpack.c.bf16 %v6438_v11, %v6430_v27  ;;  %v6661_v54 = vpack.c.bf16 %v6437_v29, %v6429_v15  ;;  %v10487_v29 = vld [vmem:[#allocation2 + $0x138] sm:$0xff]   ;;  %v10488_v27 = vld [vmem:[#allocation2 + $0x1b0] sm:$0xff]   ;;  %v10490_v11 = vld [vmem:[#allocation2 + $0x128] sm:$0xff]  }
 0x7d9   : > { %18772 = vst [vmem:[#allocation145_spill] sm:$0xff] %v15513_v0  ;;  %18774 = vst [vmem:[#allocation264_spill] sm:$0xff] %v15516_v58  ;;  %6875 = vrot.lane.b32.xlu1 %v10485_v53, %s10558_s14  ;;  %v10486_v53 = vld [vmem:[#allocation2 + $0x130] sm:$0xff]  }
 0x7da   : > { %18776 = vst [vmem:[#allocation262_spill] sm:$0xff] %v15519_v48  ;;  %18778 = vst [vmem:[#allocation298_spill] sm:$0xff] %v15522_v16  ;;  %7013 = vmatprep.mubr.bf16.mxu0 %v6662_v24  ;;  %v10491_v24 = vld [vmem:[#allocation2 + $0x1f0] sm:$0xff]  }
 0x7db   : > { %7014 = vmatmul.mubr.bf16.gmra.mxu0 %v6661_v54  ;;  %v18798_v0 = vld [vmem:[#allocation276_spill] sm:$0xff] }
 0x7dd   : > { %6841 = vrot.lane.b32.xlu1 %v10486_v53, %s10558_s14 }
 0x7df   : > { %6843 = vrot.lane.b32.xlu0 %v10487_v29, %s10558_s14  ;;  %v6285_v15 = vpop.xlane.xlu0 %6284  ;;  %v10492_v29 = vld [vmem:[#allocation2 + $0x1a8] sm:$0xff]  }
 0x7e0   : > { %10417 = vrcp.f32 %v6285_v15  ;;  %v10493_v15 = vld [vmem:[#allocation2 + $0x168] sm:$0xff]  }
 0x7e1   : > { %6873 = vrot.lane.b32.xlu1 %v10488_v27, %s10558_s14 }
 0x7e3   : > { %6857 = vrot.lane.b32.xlu0 %v10489_v56, %s10558_s14  ;;  %v6294_v55 = vpop.xlane.xlu0 %6293  ;;  %v6303_v28 = vpop.xlane.xlu1 %6302  ;;  %v10494_v56 = vld [vmem:[#allocation2 + $0x120] sm:$0xff]  }
 0x7e4   : > { %10419 = vrcp.f32 %v6294_v55  ;;  %v18779_v55 = vld [vmem:[#allocation116_spill] sm:$0xff] }
 0x7e5   : > { %6839 = vrot.lane.b32.xlu1 %v10490_v11, %s10558_s14  ;;  %10421 = vrcp.f32 %v6303_v28  ;;  %v10495_v28 = vld [vmem:[#allocation2 + $0x1e8] sm:$0xff]  }
 0x7e7   : > { %6889 = vrot.lane.b32.xlu0 %v10491_v24, %s10558_s14  ;;  %v6312_v54 = vpop.xlane.xlu0 %6311  ;;  %v6321_v53 = vpop.xlane.xlu1 %6320 }
 0x7e8   : > { %10423 = vrcp.f32 %v6312_v54 }
 0x7e9   : > { %6871 = vrot.lane.b32.xlu1 %v10492_v29, %s10558_s14  ;;  %10425 = vrcp.f32 %v6321_v53  ;;  %v18781_v53 = vld [vmem:[#allocation195_spill] sm:$0xff] }
 0x7eb   : > { %6855 = vrot.lane.b32.xlu0 %v10493_v15, %s10558_s14  ;;  %v6330_v27 = vpop.xlane.xlu0 %6329 }
 0x7ec   : > { %10427 = vrcp.f32 %v6330_v27  ;;  %v18783_v27 = vld [vmem:[#allocation196_spill] sm:$0xff] }
 0x7ed   : > { %6837 = vrot.lane.b32.xlu1 %v10494_v56, %s10558_s14  ;;  %v10418_v11 = vpop.eup %10417  ;;  %v18785_v56 = vld [vmem:[#allocation148_spill] sm:$0xff] }
 0x7ee   : > { %v6574_v24 = vmul.f32 %v10418_v11, %v18779_v55  ;;  %v6573_v54 = vmul.f32 %v10418_v11, %v18780_v4  ;;  %v15551_v29 = vmul.f32 %v10418_v11, %v18781_v53  ;;  %v15556_v45 = vmul.f32 %v10418_v11, %v18783_v27  ;;  %v18789_v55 = vld [vmem:[#allocation169_spill] sm:$0xff]  ;;  %v18793_v27 = vld [vmem:[#allocation270_spill] sm:$0xff] }
 0x7ef   : > { %6887 = vrot.lane.b32.xlu0 %v10495_v28, %s10558_s14  ;;  %v15559_v57 = vmul.f32 %v10418_v11, %v18785_v56  ;;  %v15562_v28 = vmul.f32 %v10418_v11, %v18787_v59  ;;  %v15565_v16 = vmul.f32 %v10418_v11, %v18789_v55  ;;  %v18795_v59 = vld [vmem:[#allocation155_spill] sm:$0xff]  ;;  %v18797_v55 = vld [vmem:[#allocation160_spill] sm:$0xff] }
 0x7f0   : > { %18782 = vst [vmem:[#allocation297_spill] sm:$0xff] %v15551_v29  ;;  %18784 = vst [vmem:[#allocation300_spill] sm:$0xff] %v15556_v45  ;;  %v10499_v45 = vld [vmem:[#allocation2 + $0x1e0] sm:$0xff]   ;;  %v18814_v29 = vld [vmem:[#allocation279_spill] sm:$0xff] }
 0x7f1   : > { %6869 = vrot.lane.b32.xlu1 %v10496_v21, %s10558_s14  ;;  %v15553_v15 = vpop.eup %10419  ;;  %18786 = vst [vmem:[#allocation299_spill] sm:$0xff] %v15559_v57  ;;  %18788 = vst [vmem:[#allocation302_spill] sm:$0xff] %v15562_v28  ;;  %v18791_v21 = vld [vmem:[#allocation153_spill] sm:$0xff] }
 0x7f2   : > { %18790 = vst [vmem:[#allocation301_spill] sm:$0xff] %v15565_v16  ;;  %v15567_v4 = vpop.eup %10421  ;;  %v6582_v53 = vmul.f32 %v15553_v15, %v18791_v21  ;;  %v6581_v48 = vmul.f32 %v15553_v15, %v18792_v43  ;;  %v15576_v56 = vmul.f32 %v15553_v15, %v18793_v27  ;;  %v15580_v58 = vmul.f32 %v15553_v15, %v18795_v59  ;;  %v18936_v16 = vld [vmem:[#allocation183_spill] sm:$0xff] }
 0x7f3   : > { %6853 = vrot.lane.b32.xlu0 %v10497_v31, %s10558_s14  ;;  %v6590_v41 = vmul.f32 %v15567_v4, %v18797_v55  ;;  %v15586_v21 = vmul.f32 %v15567_v4, %v18798_v0  ;;  %v15590_v43 = vmul.f32 %v15567_v4, %v18799_v37  ;;  %v18800_v31 = vld [vmem:[#allocation170_spill] sm:$0xff]  ;;  %v15604_v37 = vmul.f32 %v15567_v4, %v18802_v25  ;;  %v18811_v25 = vld [vmem:[#allocation163_spill] sm:$0xff] }
 0x7f4   : > { %18794 = vst [vmem:[#allocation149_spill] sm:$0xff] %v15576_v56  ;;  %18796 = vst [vmem:[#allocation150_spill] sm:$0xff] %v15580_v58  ;;  %v15593_v22 = vmul.f32 %v10418_v11, %v18800_v31  ;;  %v6734_v27 = vpack.c.bf16 %v6582_v53, %v6574_v24  ;;  %v6733_v9 = vpack.c.bf16 %v6581_v48, %v6573_v54  ;;  %v18806_v48 = vld [vmem:[#allocation272_spill] sm:$0xff]  ;;  %v18810_v31 = vld [vmem:[#allocation278_spill] sm:$0xff] }
 0x7f5   : > { %6835 = vrot.lane.b32.xlu1 %v10498_v3, %s10558_s14  ;;  %v15600_v0 = vpop.eup %10423  ;;  %18803 = vst [vmem:[#allocation86_spill] sm:$0xff] %v15604_v37  ;;  %v15608_v11 = vmul.f32 %v15553_v15, %v18804_v5  ;;  %v15612_v24 = vmul.f32 %v15553_v15, %v18806_v48  ;;  %v18808_v3 = vld [vmem:[#allocation267_spill] sm:$0xff]  ;;  %v18813_v58 = vld [vmem:[#allocation269_spill] sm:$0xff] }
 0x7f6   : > { %18801 = vst [vmem:[#allocation87_spill] sm:$0xff] %v15593_v22  ;;  %v15616_v54 = vmul.f32 %v15567_v4, %v18808_v3  ;;  %v15618_v53 = vpop.eup %10425  ;;  %7085 = vmatprep.mubr.bf16.mxu1 %v6734_v27  ;;  %v6598_v55 = vmul.f32 %v15600_v0, %v18810_v31  ;;  %v6597_v59 = vmul.f32 %v15600_v0, %v18811_v25  ;;  %v18812_v5 = vld [vmem:[#allocation271_spill] sm:$0xff]  ;;  %v6339_v56 = vpop.xlane.xlu1 %6338  ;;  %v18815_v31 = vld [vmem:[#allocation280_spill] sm:$0xff]  ;;  %v18816_v25 = vld [vmem:[#allocation161_spill] sm:$0xff] }
 0x7f7   : > { %18805 = vst [vmem:[#allocation304_spill] sm:$0xff] %v15608_v11  ;;  %18807 = vst [vmem:[#allocation303_spill] sm:$0xff] %v15612_v24  ;;  %6885 = vrot.lane.b32.xlu0 %v10499_v45, %s10558_s14  ;;  %v15627_v48 = vmul.f32 %v15600_v0, %v18812_v5  ;;  %7086 = vmatmul.mubr.bf16.vlgmr.msra.gmra.mxu1 %v6733_v9  ;;  %v6606_v3 = vmul.f32 %v15618_v53, %v18813_v58  ;;  %v10500_v9 = vld [vmem:[#allocation2 + $0x198] sm:$0xff]   ;;  %10429 = vrcp.f32 %v6339_v56  ;;  %v18822_v58 = vld [vmem:[#allocation283_spill] sm:$0xff] }
 0x7f8   : > { %18809 = vst [vmem:[#allocation266_spill] sm:$0xff] %v15616_v54  ;;  %v15633_v27 = vmul.f32 %v15618_v53, %v18814_v29  ;;  %v15637_v49 = vmul.f32 %v15600_v0, %v18815_v31  ;;  %v15641_v45 = vmul.f32 %v15567_v4, %v18816_v25  ;;  %9072 = vmatpush3.bf16.msra.mxu1 %v18818_v52  ;;  %v18819_v29 = vld [vmem:[#allocation281_spill] sm:$0xff]  ;;  %v18820_v31 = vld [vmem:[#allocation287_spill] sm:$0xff]  ;;  %v18826_v52 = vld [vmem:[#allocation282_spill] sm:$0xff] }
 0x7f9   : > { %v6742_v5 = vpack.c.bf16 %v6598_v55, %v6590_v41  ;;  %6867 = vrot.lane.b32.xlu1 %v10500_v9, %s10558_s14  ;;  %v15649_v47 = vmul.f32 %v15618_v53, %v18819_v29  ;;  %v10428_v50 = vpop.eup %10427  ;;  %9073 = vmatprep.subr.bf16.mxu1 %v18820_v31  ;;  %v6741_v51 = vpack.c.bf16 %v6597_v59, %v15586_v21  ;;  %v18821_v55 = vld [vmem:[#allocation167_spill] sm:$0xff]  ;;  %v10501_v29 = vld [vmem:[#allocation2 + $0x158] sm:$0xff]   ;;  %v10502_v24 = vld [vmem:[#allocation2 + $0x110] sm:$0xff]  }
 0x7fa   : > { %18817 = vst [vmem:[#allocation151_spill] sm:$0xff] %v15641_v45  ;;  %v6614_v9 = vmul.f32 %v10428_v50, %v18821_v55  ;;  %v15662_v31 = vmul.f32 %v10428_v50, %v18822_v58  ;;  %v18823_v21 = vld [vmem:[#allocation273_spill] sm:$0xff]  ;;  %v15670_v57 = vmul.f32 %v10428_v50, %v18826_v52  ;;  %v18827_v41 = vld [vmem:[#allocation275_spill] sm:$0xff]  ;;  %v18832_v52 = vld [vmem:[#allocation166_spill] sm:$0xff] }
 0x7fb   : > { %7093 = vmatprep.mubr.bf16.mxu1 %v6742_v5  ;;  %6851 = vrot.lane.b32.xlu0 %v10501_v29, %s10558_s14  ;;  %v15666_v59 = vmul.f32 %v15618_v53, %v18823_v21  ;;  %v18825_v25 = vld [vmem:[#allocation165_spill] sm:$0xff]  ;;  %v15674_v5 = vmul.f32 %v15600_v0, %v18827_v41  ;;  %v18831_v29 = vld [vmem:[#allocation292_spill] sm:$0xff]  ;;  %v6348_v28 = vpop.xlane.xlu0 %6347  ;;  %v15686_v21 = vmul.f32 %v15618_v53, %v18832_v52  ;;  %v18834_v41 = vld [vmem:[#allocation290_spill] sm:$0xff] }
 0x7fc   : > { %v6613_v37 = vmul.f32 %v10428_v50, %v18825_v25  ;;  %v18829_v56 = vld [vmem:[#allocation265_spill] sm:$0xff]  ;;  %9074 = vmatpush3.bf16.msra.mxu1 %v18831_v29  ;;  %v6750_v58 = vpack.c.bf16 %v6614_v9, %v6606_v3  ;;  %10431 = vrcp.f32 %v6348_v28  ;;  %v18835_v29 = vld [vmem:[#allocation168_spill] sm:$0xff]  ;;  %v18843_v3 = vld [vmem:[#allocation319_spill] sm:$0xff] }
 0x7fd   : > { %18824 = vst [vmem:[#allocation152_spill] sm:$0xff] %v15666_v59  ;;  %18828 = vst [vmem:[#allocation268_spill] sm:$0xff] %v15674_v5  ;;  %v15678_v55 = vmul.f32 %v15600_v0, %v18829_v56  ;;  %6833 = vrot.lane.b32.xlu1 %v10502_v24, %s10558_s14  ;;  %9075 = vmatprep.subr.bf16.mxu1 %v18834_v41  ;;  %v10503_v24 = vld [vmem:[#allocation2 + $0x1d8] sm:$0xff]   ;;  %v15697_v25 = vmul.f32 %v10428_v50, %v18835_v29  ;;  %v18837_v52 = vld [vmem:[#allocation164_spill] sm:$0xff] }
 0x7fe   : > { %18833 = vst [vmem:[#allocation305_spill] sm:$0xff] %v15686_v21  ;;  %v15701_v11 = vmul.f32 %v15618_v53, %v18837_v52  ;;  %v18839_v28 = vld [vmem:[#allocation285_spill] sm:$0xff]  ;;  %v18841_v56 = vld [vmem:[#allocation171_spill] sm:$0xff]  ;;  %v15712_v9 = vmul.f32 %v15553_v15, %v18843_v3  ;;  %v18847_v45 = vld [vmem:[#allocation288_spill] sm:$0xff] }
 0x7ff   : > { %18830 = vst [vmem:[#allocation306_spill] sm:$0xff] %v15678_v55  ;;  %6883 = vrot.lane.b32.xlu0 %v10503_v24, %s10558_s14  ;;  %18836 = vst [vmem:[#allocation309_spill] sm:$0xff] %v15697_v25  ;;  %v15704_v41 = vmul.f32 %v10428_v50, %v18839_v28  ;;  %v15708_v59 = vmul.f32 %v15553_v15, %v18841_v56  ;;  %7094 = vmatmul.mubr.bf16.gmra.mxu1 %v6741_v51  ;;  %v18845_v24 = vld [vmem:[#allocation284_spill] sm:$0xff]  ;;  %v18851_v54 = vld [vmem:[#allocation294_spill] sm:$0xff] }
 0x800   : > { %18838 = vst [vmem:[#allocation307_spill] sm:$0xff] %v15701_v11  ;;  %18844 = vst [vmem:[#allocation157_spill] sm:$0xff] %v15712_v9  ;;  %v15716_v29 = vmul.f32 %v15567_v4, %v18845_v24  ;;  %v15720_v52 = vmul.f32 %v15600_v0, %v18847_v45  ;;  %v18849_v55 = vld [vmem:[#allocation320_spill] sm:$0xff]  ;;  %9076 = vmatpush3.bf16.msra.mxu1 %v18851_v54  ;;  %7101 = vmatprep.mubr.bf16.mxu1 %v6750_v58  ;;  %v18852_v3 = vld [vmem:[#allocation261_spill] sm:$0xff] }
 0x801   : > { %18840 = vst [vmem:[#allocation205_spill] sm:$0xff] %v15704_v41  ;;  %18842 = vst [vmem:[#allocation310_spill] sm:$0xff] %v15708_v59  ;;  %v15724_v28 = vmul.f32 %v15567_v4, %v18849_v55  ;;  %9077 = vmatprep.subr.bf16.mxu1 %v18852_v3  ;;  %v10504_v45 = vld [vmem:[#allocation2 + $0x190] sm:$0xff]   ;;  %v18853_v55 = vld [vmem:[#allocation289_spill] sm:$0xff] }
 0x802   : > { %18846 = vst [vmem:[#allocation158_spill] sm:$0xff] %v15716_v29  ;;  %18848 = vst [vmem:[#allocation311_spill] sm:$0xff] %v15720_v52  ;;  %6865 = vrot.lane.b32.xlu1 %v10504_v45, %s10558_s14  ;;  %v15741_v58 = vmul.f32 %v15600_v0, %v18853_v55  ;;  %v10505_v24 = vld [vmem:[#allocation2 + $0x150] sm:$0xff]   ;;  %v18855_v15 = vld [vmem:[#allocation117_spill] sm:$0xff]  ;;  %v6749_v0 = vpack.c.bf16 %v6613_v37, %v15633_v27 }
 0x803   : > { %18850 = vst [vmem:[#allocation88_spill] sm:$0xff] %v15724_v28  ;;  %6849 = vrot.lane.b32.xlu0 %v10505_v24, %s10558_s14  ;;  %v15746_v56 = vmul.f32 %v15618_v53, %v18855_v15  ;;  %v18857_v3 = vld [vmem:[#allocation119_spill] sm:$0xff]  ;;  %v18859_v45 = vld [vmem:[#allocation321_spill] sm:$0xff]  ;;  %v18865_v24 = vld [vmem:[#allocation122_spill] sm:$0xff] }
 0x804   : > { %18854 = vst [vmem:[#allocation91_spill] sm:$0xff] %v15741_v58  ;;  %v15749_v51 = vmul.f32 %v10428_v50, %v18857_v3  ;;  %v15753_v4 = vmul.f32 %v15618_v53, %v18859_v45  ;;  %v18861_v22 = vld [vmem:[#allocation291_spill] sm:$0xff]  ;;  %9078 = vmatpush3.bf16.msra.mxu1 %v15057_v30  ;;  %v18863_v3 = vld [vmem:[#allocation277_spill] sm:$0xff]  ;;  %v18864_v45 = vld [vmem:[#allocation90_spill] sm:$0xff] }
 0x805   : > { %18856 = vst [vmem:[#allocation89_spill] sm:$0xff] %v15746_v56  ;;  %v15756_v54 = vmul.f32 %v10428_v50, %v18861_v22  ;;  %9079 = vmatprep.subr.bf16.mxu1 %v18863_v3  ;;  %v10506_v53 = vld [vmem:[#allocation2 + $0x108] sm:$0xff]   ;;  %v10507_v50 = vld [vmem:[#allocation2 + $0x1d0] sm:$0xff]   ;;  %v10430_v22 = vpop.eup %10429  ;;  %v18866_v15 = vld [vmem:[#allocation293_spill] sm:$0xff] }
 0x806   : > { %18858 = vst [vmem:[#allocation259_spill] sm:$0xff] %v15749_v51  ;;  %18860 = vst [vmem:[#allocation118_spill] sm:$0xff] %v15753_v4  ;;  %6831 = vrot.lane.b32.xlu1 %v10506_v53, %s10558_s14  ;;  %v10508_v30 = vld [vmem:[#allocation2 + $0x188] sm:$0xff]   ;;  %v6622_v3 = vmul.f32 %v10430_v22, %v18864_v45  ;;  %v6621_v55 = vmul.f32 %v10430_v22, %v18866_v15  ;;  %v18868_v15 = vpack.c.bf16 %v15313_v40, %v15291_v42  ;;  %v18929_v52 = vld [vmem:[#allocation214_spill] sm:$0xff] }
 0x807   : > { %18862 = vst [vmem:[#allocation274_spill] sm:$0xff] %v15756_v54  ;;  %6881 = vrot.lane.b32.xlu0 %v10507_v50, %s10558_s14  ;;  %7102 = vmatmul.mubr.bf16.gmra.mxu1 %v6749_v0  ;;  %v10509_v27 = vld [vmem:[#allocation2 + $0x148] sm:$0xff]   ;;  %v18867_v50 = vld [vmem:[#allocation120_spill] sm:$0xff]  ;;  %v10510_v54 = vld [vmem:[#allocation2 + $0x100] sm:$0xff]   ;;  %v18871_v42 = vpack.c.bf16 %v15399_v62, %v15379_v6 }
 0x808   : > { %9080 = vmatpush3.bf16.msra.mxu1 %v15127_v14  ;;  %v6814_v14 = vpop.permute.xlu1 %6813  ;;  %v18872_v40 = vld [vmem:[#allocation235_spill] sm:$0xff]  ;;  %v18880_v6 = vld [vmem:[#allocation308_spill] sm:$0xff]  ;;  %v18939_v21 = vld [vmem:[#allocation258_spill] sm:$0xff] }
 0x809   : > { %9081 = vmatprep.subr.bf16.mxu1 %v15101_v13  ;;  %v10432_v37 = vpop.eup %10431  ;;  %v6800_v13 = vpop.permute.xlu0 %6799  ;;  %v15797_v45 = vmul.f32 %v10430_v22, %v18872_v40  ;;  %v18933_v9 = vld [vmem:[#allocation127_spill] sm:$0xff]  ;;  %v18938_v41 = vld [vmem:[#allocation204_spill] sm:$0xff] }
 0x80a   : > { %6863 = vrot.lane.b32.xlu1 %v10508_v30, %s10558_s14  ;;  %v6630_v53 = vmul.f32 %v10432_v37, %v18865_v24  ;;  %v6629_v4 = vmul.f32 %v10432_v37, %v18867_v50  ;;  %v10513_v24 = vld [vmem:[#allocation2 + $0x180] sm:$0xff]   ;;  %v18874_v50 = vld [vmem:[#allocation121_spill] sm:$0xff]  ;;  %v15815_v62 = vmul.f32 %v10432_v37, %v18880_v6  ;;  %v18895_v6 = vpack.c.bf16 %v15510_v32, %v15490_v61 }
 0x80b   : > { %6847 = vrot.lane.b32.xlu0 %v10509_v27, %s10558_s14  ;;  %v10511_v27 = vld [vmem:[#allocation2 + $0x1c8] sm:$0xff]   ;;  %v18896_v61 = vld [vmem:[#allocation313_spill] sm:$0xff] }
 0x80c   : > { %9082 = vmatpush3.bf16.msra.mxu1 %v15141_v18  ;;  %v6758_v0 = vpack.c.bf16 %v6630_v53, %v6622_v3  ;;  %v6757_v30 = vpack.c.bf16 %v6629_v4, %v6621_v55  ;;  %v10512_v18 = vld [vmem:[#allocation2 + $0x140] sm:$0xff]   ;;  %v18870_v55 = vpack.c.bf16 %v15396_v63, %v15376_v34  ;;  %v18873_v3 = vld [vmem:[#allocation212_spill] sm:$0xff]  ;;  %v18879_v34 = vld [vmem:[#allocation123_spill] sm:$0xff] }
 0x80d   : > { %9083 = vmatprep.subr.bf16.mxu1 %v15167_v26  ;;  %v6798_v26 = vpop.permute.xlu1 %6797  ;;  %v10514_v4 = vld [vmem:[#allocation2 + $0x1c0] sm:$0xff]   ;;  %v15800_v53 = vmul.f32 %v10430_v22, %v18873_v3  ;;  %v15812_v63 = vmul.f32 %v10432_v37, %v18879_v34 }
 0x80e   : > { %6829 = vrot.lane.b32.xlu1 %v10510_v54, %s10558_s14  ;;  %7109 = vmatprep.mubr.bf16.mxu1 %v6758_v0  ;;  %v18869_v54 = vpack.c.bf16 %v15316_v1, %v15294_v35  ;;  %v18878_v35 = vpack.c.bf16 %v15453_v39, %v15433_v7  ;;  %v18881_v0 = vld [vmem:[#allocation124_spill] sm:$0xff]  ;;  %v18889_v7 = vld [vmem:[#allocation239_spill] sm:$0xff] }
 0x80f   : > { %6879 = vrot.lane.b32.xlu0 %v10511_v27, %s10558_s14  ;;  %7110 = vmatmul.mubr.bf16.gmra.mxu1 %v6757_v30  ;;  %v15818_v30 = vmul.f32 %v10432_v37, %v18881_v0  ;;  %v18883_v27 = vld [vmem:[#allocation241_spill] sm:$0xff]  ;;  %v15830_v39 = vmul.f32 %v10430_v22, %v18889_v7 }
 0x810   : > { %9084 = vmatpush3.bf16.msra.mxu1 %v6800_v13  ;;  %7150 = vmatprep.mubr.bf16.mxu1 %v18868_v15  ;;  %v18876_v13 = vld [vmem:[#allocation237_spill] sm:$0xff]  ;;  %v15821_v15 = vmul.f32 %v10432_v37, %v18883_v27 }
 0x811   : > { %9085 = vmatprep.subr.bf16.mxu1 %v6814_v14  ;;  %v15803_v14 = vmul.f32 %v10430_v22, %v18874_v50  ;;  %v15806_v1 = vmul.f32 %v10430_v22, %v18876_v13  ;;  %18882 = vst [vmem:[#allocation193_spill] sm:$0xff] %v15818_v30  ;;  %18890 = vst [vmem:[#allocation197_spill] sm:$0xff] %v15830_v39 }
 0x812   : > { %6861 = vrot.lane.b32.xlu1 %v10513_v24, %s10558_s14  ;;  %18884 = vst [vmem:[#allocation195_spill] sm:$0xff] %v15821_v15  ;;  %v18887_v24 = vld [vmem:[#allocation215_spill] sm:$0xff]  ;;  %v18932_v15 = vld [vmem:[#allocation126_spill] sm:$0xff] }
 0x813   : > { %6845 = vrot.lane.b32.xlu0 %v10512_v18, %s10558_s14  ;;  %18875 = vst [vmem:[#allocation159_spill] sm:$0xff] %v15803_v14  ;;  %18877 = vst [vmem:[#allocation116_spill] sm:$0xff] %v15806_v1  ;;  %v18885_v18 = vld [vmem:[#allocation108_spill] sm:$0xff]  ;;  %v18930_v1 = vld [vmem:[#allocation186_spill] sm:$0xff] }
 0x814   : > { %9086 = vmatpush3.bf16.msra.mxu1 %v6798_v26  ;;  %v15824_v26 = vmul.f32 %v10430_v22, %v18885_v18  ;;  %v18934_v14 = vld [vmem:[#allocation207_spill] sm:$0xff] }
 0x816   : > { %18886 = vst [vmem:[#allocation196_spill] sm:$0xff] %v15824_v26 }
 0x817   : > { %6877 = vrot.lane.b32.xlu0 %v10514_v4, %s10558_s14  ;;  %7151 = vmatmul.mubr.bf16.vlgmr.msra.gmra.mxu1 %v18869_v54  ;;  %v15827_v4 = vmul.f32 %v10432_v37, %v18887_v24  ;;  %v18891_v54 = vld [vmem:[#allocation125_spill] sm:$0xff] }
 0x818   : > { %7158 = vmatprep.mubr.bf16.mxu1 %v18870_v55  ;;  %v15833_v55 = vmul.f32 %v10432_v37, %v18891_v54  ;;  %v18893_v37 = vpack.c.bf16 %v15456_v8, %v15436_v19  ;;  %v18897_v54 = vld [vmem:[#allocation99_spill] sm:$0xff] }
 0x819   : > { %18888 = vst [vmem:[#allocation148_spill] sm:$0xff] %v15827_v4 }
 0x81a   : > { %18892 = vst [vmem:[#allocation169_spill] sm:$0xff] %v15833_v55 }
 0x81f   : > { %7159 = vmatmul.mubr.bf16.gmra.mxu1 %v18871_v42 }
 0x820   : > { %7166 = vmatprep.mubr.bf16.mxu1 %v18878_v35  ;;  %v18894_v35 = vpack.c.bf16 %v15507_v23, %v15487_v17 }
 0x827   : > { %7167 = vmatmul.mubr.bf16.gmra.mxu1 %v18893_v37 }
 0x828   : > { %7174 = vmatprep.mubr.bf16.mxu1 %v18894_v35  ;;  %v18898_v35 = vld [vmem:[#allocation96_spill] sm:$0xff] }
 0x82f   : > { %7175 = vmatmul.mubr.bf16.gmra.mxu1 %v18895_v6  ;;  %v18899_v6 = vld [vmem:[#allocation314_spill] sm:$0xff] }
 0x830   : > { %v6150_v34 = vpop.xlane.xlu1 %6149 }
 0x831   : > { %10433 = vrcp.f32 %v6150_v34 }
 0x832   : > { %v6141_v0 = vpop.xlane.xlu0 %6140 }
 0x833   : > { %10435 = vrcp.f32 %v6141_v0 }
 0x834   : > { %v6177_v27 = vpop.xlane.xlu1 %6176 }
 0x836   : > { %v6159_v18 = vpop.xlane.xlu0 %6158 }
 0x837   : > { %10437 = vrcp.f32 %v6159_v18  ;;  %v18900_v18 = vld [vmem:[#allocation94_spill] sm:$0xff] }
 0x838   : > { %v6195_v24 = vpop.xlane.xlu1 %6194 }
 0x83a   : > { %v6168_v7 = vpop.xlane.xlu0 %6167 }
 0x83b   : > { %10439 = vrcp.f32 %v6168_v7  ;;  %v18901_v7 = vld [vmem:[#allocation312_spill] sm:$0xff] }
 0x83c   : > { %10441 = vrcp.f32 %v6177_v27 }
 0x83d   : > { %10443 = vrcp.f32 %v6195_v24  ;;  %v6213_v8 = vpop.xlane.xlu1 %6212 }
 0x83e   : > { %10445 = vrcp.f32 %v6213_v8  ;;  %v6186_v19 = vpop.xlane.xlu0 %6185  ;;  %v15856_v17 = vpop.eup %10433 }
 0x83f   : > { %10447 = vrcp.f32 %v6186_v19  ;;  %v6454_v32 = vmul.f32 %v15856_v17, %v18896_v61  ;;  %v6456_v37 = vmul.f32 %v15856_v17, %v18897_v54  ;;  %v6453_v34 = vmul.f32 %v15856_v17, %v18898_v35  ;;  %v18902_v19 = vld [vmem:[#allocation92_spill] sm:$0xff]  ;;  %v18903_v61 = vld [vmem:[#allocation93_spill] sm:$0xff] }
 0x840   : > { %v15858_v23 = vpop.eup %10435  ;;  %v6455_v0 = vmul.f32 %v15856_v17, %v18899_v6 }
 0x841   : > { %v6231_v27 = vpop.xlane.xlu1 %6230  ;;  %v6446_v24 = vmul.f32 %v15858_v23, %v18900_v18  ;;  %v6448_v8 = vmul.f32 %v15858_v23, %v18901_v7  ;;  %v6445_v22 = vmul.f32 %v15858_v23, %v18902_v19  ;;  %v6447_v13 = vmul.f32 %v15858_v23, %v18903_v61  ;;  %v18904_v61 = vld [vmem:[#allocation102_spill] sm:$0xff] }
 0x842   : > { %v6204_v54 = vpop.xlane.xlu0 %6203 }
 0x843   : > { %10449 = vrcp.f32 %v6204_v54  ;;  %v6670_v50 = vpack.c.bf16 %v6454_v32, %v6446_v24  ;;  %v6672_v35 = vpack.c.bf16 %v6456_v37, %v6448_v8  ;;  %v6669_v3 = vpack.c.bf16 %v6453_v34, %v6445_v22  ;;  %v18905_v32 = vld [vmem:[#allocation103_spill] sm:$0xff]  ;;  %v18906_v37 = vld [vmem:[#allocation100_spill] sm:$0xff] }
 0x844   : > { %10451 = vrcp.f32 %v6231_v27  ;;  %v6671_v6 = vpack.c.bf16 %v6455_v0, %v6447_v13  ;;  %v15876_v40 = vpop.eup %10437  ;;  %v18907_v0 = vld [vmem:[#allocation106_spill] sm:$0xff]  ;;  %v18908_v24 = vld [vmem:[#allocation315_spill] sm:$0xff] }
 0x845   : > { %7021 = vmatprep.mubr.bf16.mxu0 %v6670_v50  ;;  %7182 = vmatprep.mubr.bf16.mxu1 %v6672_v35  ;;  %v6249_v18 = vpop.xlane.xlu1 %6248  ;;  %v6462_v54 = vmul.f32 %v15876_v40, %v18904_v61  ;;  %v6464_v22 = vmul.f32 %v15876_v40, %v18905_v32  ;;  %v6461_v13 = vmul.f32 %v15876_v40, %v18906_v37  ;;  %v18909_v35 = vld [vmem:[#allocation105_spill] sm:$0xff] }
 0x846   : > { %10453 = vrcp.f32 %v6249_v18  ;;  %7022 = vmatmul.mubr.bf16.gmra.mxu0 %v6669_v3  ;;  %7183 = vmatmul.mubr.bf16.gmra.mxu1 %v6671_v6  ;;  %v6222_v7 = vpop.xlane.xlu0 %6221  ;;  %v18910_v61 = vld [vmem:[#allocation101_spill] sm:$0xff] }
 0x847   : > { %10455 = vrcp.f32 %v6222_v7  ;;  %v6463_v32 = vmul.f32 %v15876_v40, %v18910_v61 }
 0x848   : > { %v15878_v19 = vpop.eup %10439 }
 0x849   : > { %v15886_v34 = vpop.eup %10441  ;;  %v6267_v50 = vpop.xlane.xlu1 %6266  ;;  %v6470_v3 = vmul.f32 %v15878_v19, %v18907_v0  ;;  %v6472_v27 = vmul.f32 %v15878_v19, %v18610_v44  ;;  %v6469_v8 = vmul.f32 %v15878_v19, %v18908_v24  ;;  %v6471_v6 = vmul.f32 %v15878_v19, %v18909_v35  ;;  %v18911_v24 = vld [vmem:[#allocation225_spill] sm:$0xff]  ;;  %v18912_v35 = vld [vmem:[#allocation110_spill] sm:$0xff] }
 0x84a   : > { %v15896_v18 = vpop.eup %10443  ;;  %10457 = vrcp.f32 %v6267_v50  ;;  %v6240_v7 = vpop.xlane.xlu0 %6239  ;;  %v6478_v26 = vmul.f32 %v15886_v34, %v18911_v24  ;;  %v6480_v4 = vmul.f32 %v15886_v34, %v18912_v35  ;;  %v18913_v50 = vld [vmem:[#allocation223_spill] sm:$0xff] }
 0x84b   : > { %v15900_v37 = vpop.eup %10445  ;;  %10459 = vrcp.f32 %v6240_v7  ;;  %v6678_v0 = vpack.c.bf16 %v6470_v3, %v6462_v54  ;;  %v6680_v42 = vpack.c.bf16 %v6472_v27, %v6464_v22  ;;  %v6677_v39 = vpack.c.bf16 %v6469_v8, %v6461_v13  ;;  %v18914_v22 = vld [vmem:[#allocation172_spill] sm:$0xff]  ;;  %v18915_v3 = vld [vmem:[#allocation317_spill] sm:$0xff] }
 0x84c   : > { %v15902_v44 = vpop.eup %10447  ;;  %v6679_v55 = vpack.c.bf16 %v6471_v6, %v6463_v32  ;;  %v6477_v56 = vmul.f32 %v15886_v34, %v18913_v50  ;;  %v6479_v27 = vmul.f32 %v15886_v34, %v18915_v3  ;;  %v18916_v6 = vld [vmem:[#allocation227_spill] sm:$0xff]  ;;  %v18917_v32 = vld [vmem:[#allocation174_spill] sm:$0xff] }
 0x84d   : > { %7029 = vmatprep.mubr.bf16.mxu0 %v6678_v0  ;;  %7190 = vmatprep.mubr.bf16.mxu1 %v6680_v42  ;;  %v6860_v61 = vpop.permute.xlu1 %6859  ;;  %v6486_v54 = vmul.f32 %v15902_v44, %v18603_v10  ;;  %v6488_v13 = vmul.f32 %v15902_v44, %v18914_v22  ;;  %v6485_v7 = vmul.f32 %v15902_v44, %v18916_v6  ;;  %v18918_v42 = vld [vmem:[#allocation175_spill] sm:$0xff]  ;;  %v18919_v50 = vld [vmem:[#allocation318_spill] sm:$0xff]  ;;  %v18921_v6 = vld [vmem:[#allocation173_spill] sm:$0xff] }
 0x84e   : > { %7030 = vmatmul.mubr.bf16.gmra.mxu0 %v6677_v39  ;;  %7191 = vmatmul.mubr.bf16.gmra.mxu1 %v6679_v55  ;;  %v6258_v8 = vpop.xlane.xlu0 %6257  ;;  %v6494_v0 = vmul.f32 %v15896_v18, %v18917_v32  ;;  %v6496_v24 = vmul.f32 %v15896_v18, %v18918_v42  ;;  %v6487_v22 = vmul.f32 %v15902_v44, %v18919_v50  ;;  %v18920_v39 = vld [vmem:[#allocation114_spill] sm:$0xff]  ;;  %v18922_v32 = vld [vmem:[#allocation188_spill] sm:$0xff] }
 0x84f   : > { %10461 = vrcp.f32 %v6258_v8  ;;  %9183 = vmatprep.subr.bf16.mxu0 %v6860_v61  ;;  %v6686_v10 = vpack.c.bf16 %v6486_v54, %v6478_v26  ;;  %v6688_v35 = vpack.c.bf16 %v6488_v13, %v6480_v4  ;;  %v15928_v55 = vmul.f32 %v15896_v18, %v18920_v39  ;;  %v18923_v61 = vld [vmem:[#allocation198_spill] sm:$0xff]  ;;  %v18924_v13 = vld [vmem:[#allocation113_spill] sm:$0xff] }
 0x850   : > { %v15924_v3 = vpop.eup %10449  ;;  %v15932_v51 = vmul.f32 %v15896_v18, %v18921_v6  ;;  %v15936_v42 = vmul.f32 %v15900_v37, %v18922_v32  ;;  %v15940_v26 = vmul.f32 %v15900_v37, %v18923_v61  ;;  %v18925_v50 = vld [vmem:[#allocation182_spill] sm:$0xff]  ;;  %v18926_v6 = vld [vmem:[#allocation231_spill] sm:$0xff]  ;;  %v6685_v58 = vpack.c.bf16 %v6485_v7, %v6477_v56  ;;  %v18927_v61 = vld [vmem:[#allocation233_spill] sm:$0xff] }
 0x851   : > { %v15942_v4 = vpop.eup %10451  ;;  %7037 = vmatprep.mubr.bf16.mxu0 %v6686_v10  ;;  %7198 = vmatprep.mubr.bf16.mxu1 %v6688_v35  ;;  %v6892_v54 = vpop.permute.xlu1 %6891  ;;  %v6502_v8 = vmul.f32 %v15924_v3, %v18924_v13  ;;  %v6504_v39 = vmul.f32 %v15924_v3, %v18925_v50  ;;  %v15950_v28 = vmul.f32 %v15900_v37, %v18926_v6  ;;  %v18928_v10 = vld [vmem:[#allocation213_spill] sm:$0xff] }
 0x852   : > { %v6276_v32 = vpop.xlane.xlu0 %6275  ;;  %9295 = vmatprep.subr.bf16.mxu1 %v6892_v54  ;;  %v15954_v29 = vmul.f32 %v15900_v37, %v18927_v61  ;;  %v15958_v35 = vmul.f32 %v15858_v23, %v18928_v10  ;;  %v15962_v13 = vmul.f32 %v15856_v17, %v18929_v52  ;;  %v6687_v6 = vpack.c.bf16 %v6487_v22, %v6479_v27  ;;  %v18931_v56 = vld [vmem:[#allocation177_spill] sm:$0xff]  ;;  %v18935_v27 = vld [vmem:[#allocation95_spill] sm:$0xff] }
 0x853   : > { %v15964_v50 = vpop.eup %10453  ;;  %10463 = vrcp.f32 %v6276_v32  ;;  %v6501_v54 = vmul.f32 %v15924_v3, %v18930_v1  ;;  %v6503_v7 = vmul.f32 %v15924_v3, %v18931_v56  ;;  %v15974_v10 = vmul.f32 %v15942_v4, %v18932_v15  ;;  %v18937_v15 = vld [vmem:[#allocation187_spill] sm:$0xff] }
 0x854   : > { %v15970_v61 = vpop.eup %10455  ;;  %v15978_v52 = vmul.f32 %v15942_v4, %v18933_v9  ;;  %v15982_v32 = vmul.f32 %v15942_v4, %v18934_v14  ;;  %v15986_v1 = vmul.f32 %v15942_v4, %v18935_v27  ;;  %v6694_v56 = vpack.c.bf16 %v6502_v8, %v6494_v0  ;;  %v18940_v8 = vld [vmem:[#allocation249_spill] sm:$0xff] }
 0x855   : > { %v6876_v22 = vpop.permute.xlu1 %6875  ;;  %v6696_v30 = vpack.c.bf16 %v6504_v39, %v6496_v24  ;;  %v6518_v59 = vmul.f32 %v15970_v61, %v18936_v16  ;;  %v6520_v11 = vmul.f32 %v15970_v61, %v18937_v15  ;;  %v15994_v14 = vmul.f32 %v15970_v61, %v18938_v41  ;;  %v18942_v15 = vld [vmem:[#allocation224_spill] sm:$0xff] }
 0x856   : > { %7038 = vmatmul.mubr.bf16.gmra.mxu0 %v6685_v58  ;;  %7199 = vmatmul.mubr.bf16.gmra.mxu1 %v6687_v6  ;;  %v6844_v9 = vpop.permute.xlu0 %6843  ;;  %v15998_v27 = vmul.f32 %v15970_v61, %v18939_v21  ;;  %v6693_v16 = vpack.c.bf16 %v6501_v54, %v15928_v55  ;;  %v6695_v58 = vpack.c.bf16 %v6503_v7, %v15932_v51  ;;  %v18941_v21 = vld [vmem:[#allocation107_spill] sm:$0xff] }
 0x857   : > { %v16002_v24 = vpop.eup %10457  ;;  %7045 = vmatprep.mubr.bf16.mxu0 %v6694_v56  ;;  %7206 = vmatprep.mubr.bf16.mxu1 %v6696_v30  ;;  %v16008_v39 = vmul.f32 %v15964_v50, %v18940_v8  ;;  %v16014_v6 = vmul.f32 %v15964_v50, %v18941_v21  ;;  %v16018_v56 = vmul.f32 %v15964_v50, %v18942_v15  ;;  %v18943_v30 = vld [vmem:[#allocation211_spill] sm:$0xff]  ;;  %v18945_v8 = vld [vmem:[#allocation130_spill] sm:$0xff] }
 0x858   : > { %v16010_v41 = vpop.eup %10459  ;;  %9296 = vmatpush3.bf16.msra.mxu1 %v6876_v22  ;;  %9184 = vmatpush3.bf16.msra.mxu0 %v6844_v9  ;;  %v16022_v55 = vmul.f32 %v15858_v23, %v18943_v30  ;;  %v6702_v54 = vpack.c.bf16 %v6518_v59, %v15936_v42  ;;  %v6704_v7 = vpack.c.bf16 %v6520_v11, %v15940_v26  ;;  %v18946_v9 = vld [vmem:[#allocation132_spill] sm:$0xff] }
 0x859   : > { %v6842_v51 = vpop.permute.xlu1 %6841  ;;  %v16028_v22 = vmul.f32 %v16010_v41, %v18945_v8  ;;  %v16032_v21 = vmul.f32 %v15964_v50, %v18946_v9  ;;  %v6703_v30 = vpack.c.bf16 %v15998_v27, %v15954_v29  ;;  %v16040_v59 = vmul.f32 %v16010_v41, %v18648_v38  ;;  %v18947_v11 = vld [vmem:[#allocation256_spill] sm:$0xff]  ;;  %v18950_v27 = vld [vmem:[#allocation221_spill] sm:$0xff] }
 0x85a   : > { %18944 = vst [vmem:[#allocation153_spill] sm:$0xff] %v16022_v55  ;;  %v6858_v0 = vpop.permute.xlu0 %6857  ;;  %v16044_v42 = vmul.f32 %v15856_v17, %v18947_v11  ;;  %v18948_v26 = vld [vmem:[#allocation128_spill] sm:$0xff]  ;;  %v16056_v29 = vmul.f32 %v16002_v24, %v15027_v60  ;;  %v16060_v38 = vmul.f32 %v15876_v40, %v18950_v27  ;;  %v16068_v11 = vmul.f32 %v15878_v19, %v15199_v2  ;;  %v18982_v55 = vld [vmem:[#allocation194_spill] sm:$0xff] }
 0x85b   : > { %9185 = vmatprep.subr.bf16.mxu0 %v6858_v0  ;;  %v16048_v8 = vmul.f32 %v16010_v41, %v18948_v26  ;;  %v18949_v9 = vld [vmem:[#allocation244_spill] sm:$0xff]  ;;  %v18953_v26 = vld [vmem:[#allocation219_spill] sm:$0xff]  ;;  %v16076_v60 = vmul.f32 %v15878_v19, %v15188_v33  ;;  %v6710_v5 = vpack.c.bf16 %v16028_v22, %v15974_v10  ;;  %v6712_v0 = vpack.c.bf16 %v16040_v59, %v15978_v52 }
 0x85c   : > { %v16052_v25 = vmul.f32 %v16002_v24, %v18949_v9  ;;  %18951 = vst [vmem:[#allocation154_spill] sm:$0xff] %v16060_v38  ;;  %v16062_v15 = vpop.eup %10461  ;;  %9186 = vmatpush3.bf16.msra.mxu0 %v6842_v51  ;;  %18952 = vst [vmem:[#allocation270_spill] sm:$0xff] %v16068_v11  ;;  %v16072_v9 = vmul.f32 %v15876_v40, %v18953_v26  ;;  %v16082_v51 = vmul.f32 %v16010_v41, %v18638_v36  ;;  %v18956_v22 = vld [vmem:[#allocation135_spill] sm:$0xff]  ;;  %v18961_v36 = vld [vmem:[#allocation109_spill] sm:$0xff] }
 0x85d   : > { %18955 = vst [vmem:[#allocation160_spill] sm:$0xff] %v16076_v60  ;;  %v6874_v27 = vpop.permute.xlu1 %6873  ;;  %v16086_v2 = vmul.f32 %v16062_v15, %v18640_v12  ;;  %v16090_v26 = vmul.f32 %v16062_v15, %v18658_v46  ;;  %v16102_v46 = vmul.f32 %v16062_v15, %v18956_v22  ;;  %v16120_v10 = vmul.f32 %v15886_v34, %v18961_v36  ;;  %v18963_v22 = vld [vmem:[#allocation238_spill] sm:$0xff]  ;;  %v18966_v38 = vld [vmem:[#allocation208_spill] sm:$0xff] }
 0x85e   : > { %18954 = vst [vmem:[#allocation155_spill] sm:$0xff] %v16072_v9  ;;  %7046 = vmatmul.mubr.bf16.gmra.mxu0 %v6693_v16  ;;  %7207 = vmatmul.mubr.bf16.gmra.mxu1 %v6695_v58  ;;  %v6890_v33 = vpop.permute.xlu0 %6889  ;;  %v16106_v16 = vmul.f32 %v16062_v15, %v18649_v20  ;;  %v18957_v58 = vld [vmem:[#allocation111_spill] sm:$0xff]  ;;  %v16124_v12 = vmul.f32 %v15902_v44, %v18963_v22  ;;  %v18965_v9 = vld [vmem:[#allocation202_spill] sm:$0xff] }
 0x85f   : > { %7053 = vmatprep.mubr.bf16.mxu0 %v6702_v54  ;;  %7214 = vmatprep.mubr.bf16.mxu1 %v6704_v7  ;;  %v16112_v59 = vmul.f32 %v15886_v34, %v18957_v58  ;;  %v18959_v54 = vld [vmem:[#allocation246_spill] sm:$0xff]  ;;  %18962 = vst [vmem:[#allocation170_spill] sm:$0xff] %v16120_v10  ;;  %v18972_v10 = vld [vmem:[#allocation179_spill] sm:$0xff] }
 0x860   : > { %v16108_v52 = vpop.eup %10463  ;;  %9297 = vmatprep.subr.bf16.mxu1 %v6890_v33  ;;  %v16116_v7 = vmul.f32 %v15902_v44, %v18959_v54  ;;  %18964 = vst [vmem:[#allocation263_spill] sm:$0xff] %v16124_v12  ;;  %v16142_v33 = vmul.f32 %v15858_v23, %v18966_v38  ;;  %v18968_v11 = vld [vmem:[#allocation222_spill] sm:$0xff]  ;;  %v18973_v54 = vld [vmem:[#allocation209_spill] sm:$0xff] }
 0x861   : > { %18958 = vst [vmem:[#allocation276_spill] sm:$0xff] %v16112_v59  ;;  %v6840_v20 = vpop.permute.xlu1 %6839  ;;  %9298 = vmatpush3.bf16.msra.mxu1 %v6874_v27  ;;  %v16134_v60 = vmul.f32 %v16108_v52, %v18965_v9  ;;  %v16146_v58 = vmul.f32 %v15856_v17, %v18968_v11  ;;  %v18970_v59 = vld [vmem:[#allocation203_spill] sm:$0xff]  ;;  %v18971_v11 = vld [vmem:[#allocation178_spill] sm:$0xff]  ;;  %v16166_v9 = vmul.f32 %v15924_v3, %v18972_v10 }
 0x862   : > { %18960 = vst [vmem:[#allocation162_spill] sm:$0xff] %v16116_v7  ;;  %v6856_v36 = vpop.permute.xlu0 %6855  ;;  %18967 = vst [vmem:[#allocation156_spill] sm:$0xff] %v16142_v33  ;;  %v16156_v27 = vmul.f32 %v16108_v52, %v18970_v59  ;;  %v16170_v12 = vmul.f32 %v15858_v23, %v18973_v54  ;;  %v18974_v7 = vld [vmem:[#allocation206_spill] sm:$0xff]  ;;  %v18976_v33 = vld [vmem:[#allocation115_spill] sm:$0xff]  ;;  %v18979_v23 = vpack.c.bf16 %v15994_v14, %v15950_v28 }
 0x863   : > { %18969 = vst [vmem:[#allocation272_spill] sm:$0xff] %v16146_v58  ;;  %9187 = vmatprep.subr.bf16.mxu0 %v6856_v36  ;;  %v16162_v36 = vmul.f32 %v15896_v18, %v18971_v11  ;;  %v16174_v59 = vmul.f32 %v15856_v17, %v18974_v7  ;;  %v16182_v11 = vmul.f32 %v15924_v3, %v18976_v33  ;;  %v18977_v58 = vld [vmem:[#allocation216_spill] sm:$0xff]  ;;  %v18980_v7 = vld [vmem:[#allocation226_spill] sm:$0xff]  ;;  %v18984_v14 = vld [vmem:[#allocation191_spill] sm:$0xff] }
 0x864   : > { %9188 = vmatpush3.bf16.msra.mxu0 %v6840_v20  ;;  %v18975_v20 = vld [vmem:[#allocation180_spill] sm:$0xff]  ;;  %v16186_v10 = vmul.f32 %v15876_v40, %v18977_v58  ;;  %v16199_v33 = vmul.f32 %v15900_v37, %v18982_v55  ;;  %v18990_v58 = vld [vmem:[#allocation181_spill] sm:$0xff] }
 0x865   : > { %v6872_v22 = vpop.permute.xlu1 %6871  ;;  %v16178_v38 = vmul.f32 %v15896_v18, %v18975_v20  ;;  %v16195_v20 = vmul.f32 %v15878_v19, %v18980_v7  ;;  %v18986_v7 = vld [vmem:[#allocation230_spill] sm:$0xff]  ;;  %v16221_v17 = vmul.f32 %v15900_v37, %v18990_v58 }
 0x866   : > { %18978 = vst [vmem:[#allocation267_spill] sm:$0xff] %v16186_v10  ;;  %7054 = vmatmul.mubr.bf16.gmra.mxu0 %v18979_v23  ;;  %7215 = vmatmul.mubr.bf16.gmra.mxu1 %v6703_v30  ;;  %v6888_v54 = vpop.permute.xlu0 %6887  ;;  %18983 = vst [vmem:[#allocation163_spill] sm:$0xff] %v16199_v33  ;;  %v16207_v30 = vmul.f32 %v15970_v61, %v18984_v14  ;;  %v16213_v55 = vmul.f32 %v15876_v40, %v18986_v7  ;;  %v18991_v14 = vld [vmem:[#allocation189_spill] sm:$0xff]  ;;  %v18999_v33 = vld [vmem:[#allocation210_spill] sm:$0xff] }
 0x867   : > { %18981 = vst [vmem:[#allocation278_spill] sm:$0xff] %v16195_v20  ;;  %7061 = vmatprep.mubr.bf16.mxu0 %v6710_v5  ;;  %7222 = vmatprep.mubr.bf16.mxu1 %v6712_v0  ;;  %v18988_v5 = vld [vmem:[#allocation316_spill] sm:$0xff]  ;;  %v16227_v23 = vmul.f32 %v15970_v61, %v18991_v14  ;;  %v18992_v10 = vld [vmem:[#allocation217_spill] sm:$0xff]  ;;  %v19001_v58 = vld [vmem:[#allocation254_spill] sm:$0xff] }
 0x868   : > { %18985 = vst [vmem:[#allocation271_spill] sm:$0xff] %v16207_v30  ;;  %9299 = vmatprep.subr.bf16.mxu1 %v6888_v54  ;;  %18987 = vst [vmem:[#allocation269_spill] sm:$0xff] %v16213_v55  ;;  %v16217_v0 = vmul.f32 %v15878_v19, %v18988_v5  ;;  %v16231_v40 = vmul.f32 %v15886_v34, %v18992_v10  ;;  %v18994_v7 = vld [vmem:[#allocation129_spill] sm:$0xff]  ;;  %v16249_v10 = vmul.f32 %v15886_v34, %v18999_v33  ;;  %v19004_v33 = vld [vmem:[#allocation131_spill] sm:$0xff] }
 0x869   : > { %v6838_v28 = vpop.permute.xlu1 %6837  ;;  %9300 = vmatpush3.bf16.msra.mxu1 %v6872_v22  ;;  %v16235_v19 = vmul.f32 %v15902_v44, %v18994_v7  ;;  %v18995_v22 = vld [vmem:[#allocation245_spill] sm:$0xff]  ;;  %v16257_v55 = vmul.f32 %v15902_v44, %v19001_v58  ;;  %v19008_v34 = vld [vmem:[#allocation240_spill] sm:$0xff] }
 0x86a   : > { %18989 = vst [vmem:[#allocation279_spill] sm:$0xff] %v16217_v0  ;;  %18993 = vst [vmem:[#allocation280_spill] sm:$0xff] %v16231_v40  ;;  %v6854_v5 = vpop.permute.xlu0 %6853  ;;  %v16241_v20 = vmul.f32 %v15942_v4, %v18995_v22  ;;  %v18997_v54 = vld [vmem:[#allocation97_spill] sm:$0xff]  ;;  %v19003_v22 = vld [vmem:[#allocation243_spill] sm:$0xff] }
 0x86b   : > { %v16245_v14 = vmul.f32 %v16010_v41, %v18997_v54  ;;  %19000 = vst [vmem:[#allocation281_spill] sm:$0xff] %v16249_v10  ;;  %9189 = vmatprep.subr.bf16.mxu0 %v6854_v5  ;;  %19002 = vst [vmem:[#allocation287_spill] sm:$0xff] %v16257_v55  ;;  %v16261_v0 = vmul.f32 %v15942_v4, %v19003_v22  ;;  %v16267_v54 = vmul.f32 %v16010_v41, %v19004_v33  ;;  %v19005_v5 = vld [vmem:[#allocation229_spill] sm:$0xff]  ;;  %v19012_v10 = vld [vmem:[#allocation98_spill] sm:$0xff] }
 0x86c   : > { %18996 = vst [vmem:[#allocation161_spill] sm:$0xff] %v16241_v20  ;;  %9190 = vmatpush3.bf16.msra.mxu0 %v6838_v28  ;;  %v16271_v7 = vmul.f32 %v15896_v18, %v19005_v5  ;;  %v19006_v30 = vld [vmem:[#allocation133_spill] sm:$0xff]  ;;  %v19007_v28 = vld [vmem:[#allocation232_spill] sm:$0xff]  ;;  %v16285_v33 = vmul.f32 %v16062_v15, %v19008_v34  ;;  %v19009_v20 = vld [vmem:[#allocation218_spill] sm:$0xff]  ;;  %v16303_v55 = vmul.f32 %v15924_v3, %v19012_v10 }
 0x86d   : > { %18998 = vst [vmem:[#allocation286_spill] sm:$0xff] %v16245_v14  ;;  %v16275_v44 = vmul.f32 %v15924_v3, %v19006_v30  ;;  %v6870_v58 = vpop.permute.xlu1 %6869  ;;  %v16281_v40 = vmul.f32 %v15964_v50, %v19007_v28  ;;  %v16289_v5 = vmul.f32 %v15896_v18, %v19009_v20  ;;  %v19010_v30 = vpack.c.bf16 %v16048_v8, %v15982_v32  ;;  %v19015_v8 = vld [vmem:[#allocation228_spill] sm:$0xff]  ;;  %v19016_v20 = vld [vmem:[#allocation138_spill] sm:$0xff] }
 0x86e   : > { %v19011_v14 = vpack.c.bf16 %v16082_v51, %v15986_v1  ;;  %v6886_v22 = vpop.permute.xlu0 %6885  ;;  %v19013_v18 = vpack.c.bf16 %v16086_v2, %v16008_v39  ;;  %v19014_v32 = vpack.c.bf16 %v16090_v26, %v16014_v6  ;;  %v16315_v51 = vmul.f32 %v15964_v50, %v19015_v8  ;;  %v19017_v39 = vld [vmem:[#allocation176_spill] sm:$0xff]  ;;  %v19019_v6 = vld [vmem:[#allocation257_spill] sm:$0xff]  ;;  %v19028_v28 = vld [vmem:[#allocation242_spill] sm:$0xff] }
 0x86f   : > { %7062 = vmatmul.mubr.bf16.gmra.mxu0 %v19010_v30  ;;  %9301 = vmatprep.subr.bf16.mxu1 %v6886_v22  ;;  %v16325_v2 = vmul.f32 %v15900_v37, %v19017_v39  ;;  %v16329_v26 = vmul.f32 %v15970_v61, %v19019_v6  ;;  %v19020_v10 = vld [vmem:[#allocation248_spill] sm:$0xff]  ;;  %v19027_v22 = vld [vmem:[#allocation199_spill] sm:$0xff] }
 0x870   : > { %7223 = vmatmul.mubr.bf16.gmra.mxu1 %v19011_v14  ;;  %7069 = vmatprep.mubr.bf16.mxu0 %v19013_v18  ;;  %v16319_v14 = vmul.f32 %v16062_v15, %v19016_v20  ;;  %v16333_v30 = vmul.f32 %v16002_v24, %v19020_v10  ;;  %v19023_v20 = vld [vmem:[#allocation234_spill] sm:$0xff]  ;;  %v19025_v3 = vld [vmem:[#allocation192_spill] sm:$0xff] }
 0x871   : > { %7230 = vmatprep.mubr.bf16.mxu1 %v19014_v32  ;;  %19018 = vst [vmem:[#allocation167_spill] sm:$0xff] %v16325_v2  ;;  %v6836_v18 = vpop.permute.xlu1 %6835  ;;  %9302 = vmatpush3.bf16.msra.mxu1 %v6870_v58  ;;  %v19022_v32 = vld [vmem:[#allocation252_spill] sm:$0xff]  ;;  %v16343_v39 = vmul.f32 %v15900_v37, %v19023_v20  ;;  %v16347_v6 = vmul.f32 %v15970_v61, %v19025_v3  ;;  %v19026_v58 = vld [vmem:[#allocation255_spill] sm:$0xff]  ;;  %v19029_v20 = vld [vmem:[#allocation185_spill] sm:$0xff] }
 0x872   : > { %19021 = vst [vmem:[#allocation283_spill] sm:$0xff] %v16333_v30  ;;  %v16339_v8 = vmul.f32 %v16108_v52, %v19022_v32  ;;  %v6852_v1 = vpop.permute.xlu0 %6851  ;;  %v16353_v34 = vmul.f32 %v16002_v24, %v19026_v58  ;;  %v16357_v32 = vmul.f32 %v16108_v52, %v19027_v22  ;;  %v16361_v37 = vmul.f32 %v15942_v4, %v19028_v28  ;;  %v19030_v58 = vld [vmem:[#allocation104_spill] sm:$0xff]  ;;  %v19031_v22 = vld [vmem:[#allocation71_spill] sm:$0xff]  ;;  %v19034_v3 = vld [vmem:[#allocation142_spill] sm:$0xff] }
 0x873   : > { %19024 = vst [vmem:[#allocation273_spill] sm:$0xff] %v16343_v39  ;;  %9191 = vmatprep.subr.bf16.mxu0 %v6852_v1  ;;  %v16369_v10 = vmul.f32 %v16010_v41, %v19029_v20  ;;  %v16373_v2 = vmul.f32 %v15942_v4, %v19030_v58  ;;  %v16379_v1 = vmul.f32 %v16010_v41, %v19031_v22  ;;  %v19032_v61 = vld [vmem:[#allocation112_spill] sm:$0xff]  ;;  %v19036_v58 = vld [vmem:[#allocation251_spill] sm:$0xff] }
 0x874   : > { %9192 = vmatpush3.bf16.msra.mxu0 %v6836_v18  ;;  %v16383_v30 = vmul.f32 %v15964_v50, %v19032_v61  ;;  %v16387_v20 = vmul.f32 %v16062_v15, %v19034_v3  ;;  %v6728_v4 = vpack.c.bf16 %v16156_v27, %v16056_v29  ;;  %v16395_v28 = vmul.f32 %v15964_v50, %v19036_v58  ;;  %v19038_v41 = vld [vmem:[#allocation184_spill] sm:$0xff]  ;;  %v19047_v50 = vld [vmem:[#allocation79_spill] sm:$0xff]  ;;  %v19051_v27 = vld [vmem:[#allocation137_spill] sm:$0xff] }
 0x875   : > { %v6868_v39 = vpop.permute.xlu1 %6867  ;;  %v16399_v22 = vmul.f32 %v16062_v15, %v19038_v41  ;;  %v19040_v61 = vpack.c.bf16 %v16102_v46, %v16018_v56  ;;  %v19041_v3 = vpack.c.bf16 %v16106_v16, %v16032_v21  ;;  %v19042_v58 = vpack.c.bf16 %v16134_v60, %v16052_v25  ;;  %v19043_v15 = vld [vmem:[#allocation143_spill] sm:$0xff]  ;;  %v19044_v46 = vld [vmem:[#allocation201_spill] sm:$0xff]  ;;  %v19049_v60 = vld [vmem:[#allocation70_spill] sm:$0xff] }
 0x876   : > { %19033 = vst [vmem:[#allocation165_spill] sm:$0xff] %v16383_v30  ;;  %19035 = vst [vmem:[#allocation282_spill] sm:$0xff] %v16387_v20  ;;  %v6884_v29 = vpop.permute.xlu0 %6883  ;;  %v6565_v56 = vmul.f32 %v16108_v52, %v19043_v15  ;;  %v6567_v41 = vmul.f32 %v16108_v52, %v19044_v46  ;;  %v16426_v25 = vmul.f32 %v16108_v52, %v19047_v50  ;;  %v19052_v18 = vld [vmem:[#allocation139_spill] sm:$0xff]  ;;  %v19053_v20 = vld [vmem:[#allocation149_spill] sm:$0xff] }
 0x877   : > { %19037 = vst [vmem:[#allocation275_spill] sm:$0xff] %v16395_v28  ;;  %19039 = vst [vmem:[#allocation265_spill] sm:$0xff] %v16399_v22  ;;  %7070 = vmatmul.mubr.bf16.gmra.mxu0 %v19040_v61  ;;  %9303 = vmatprep.subr.bf16.mxu1 %v6884_v29  ;;  %v19045_v61 = vld [vmem:[#allocation73_spill] sm:$0xff]  ;;  %v6559_v28 = vmul.f32 %v16002_v24, %v19052_v18  ;;  %v19056_v50 = vld [vmem:[#allocation136_spill] sm:$0xff] }
 0x878   : > { %7231 = vmatmul.mubr.bf16.gmra.mxu1 %v19041_v3  ;;  %7077 = vmatprep.mubr.bf16.mxu0 %v19042_v58  ;;  %v8975_v16 = vpop.f32.mrf.mxu0  ;;  %v16422_v3 = vmul.f32 %v16002_v24, %v19045_v61  ;;  %19048 = vst [vmem:[#allocation166_spill] sm:$0xff] %v16426_v25  ;;  %v19050_v58 = vld [vmem:[#allocation200_spill] sm:$0xff]  ;;  %v6557_v61 = vmul.f32 %v16002_v24, %v19051_v27 }
 0x879   : > { %7238 = vmatprep.mubr.bf16.mxu1 %v6728_v4  ;;  %v16430_v4 = vmul.f32 %v16002_v24, %v19049_v60  ;;  %v16434_v15 = vmul.f32 %v16108_v52, %v19050_v58  ;;  %v6834_v46 = vpop.permute.xlu1 %6833  ;;  %9304 = vmatpush3.bf16.msra.mxu1 %v6868_v39  ;;  %v6727_v58 = vpack.c.bf16 %v6567_v41, %v6559_v28  ;;  %v19054_v24 = vld [vmem:[#allocation297_spill] sm:$0xff] }
 0x87a   : > { %19046 = vst [vmem:[#allocation292_spill] sm:$0xff] %v16422_v3  ;;  %v8976_v21 = vpop.f32.mrf.mxu0  ;;  %v6850_v29 = vpop.permute.xlu0 %6849  ;;  %v6725_v39 = vpack.c.bf16 %v6565_v56, %v6557_v61  ;;  %v19055_v18 = vpack.c.bf16 %v19053_v20, %v19054_v24  ;;  %v19057_v3 = vld [vmem:[#allocation250_spill] sm:$0xff]  ;;  %v19060_v61 = vld [vmem:[#allocation300_spill] sm:$0xff] }
 0x87b   : > { %v6731_v60 = vpack.c.bf16 %v16434_v15, %v16430_v4  ;;  %v16444_v22 = vadd.f32 %v8976_v21, %v8975_v16  ;;  %9193 = vmatprep.subr.bf16.mxu0 %v6850_v29  ;;  %v19058_v25 = vpack.c.bf16 %v19056_v50, %v19057_v3  ;;  %v19059_v29 = vld [vmem:[#allocation150_spill] sm:$0xff]  ;;  %v19062_v3 = vpack.c.bf16 %v15627_v48, %v15590_v43  ;;  %v19204_v4 = vld [vmem:[#allocation195_spill] sm:$0xff]  ;;  %v19205_v15 = vld [vmem:[#allocation116_spill] sm:$0xff] }
 0x87c   : > { %v16446_v52 = vpop.f32.mrf.mxu0  ;;  %9194 = vmatpush3.bf16.msra.mxu0 %v6834_v46  ;;  %v19063_v24 = vld [vmem:[#allocation86_spill] sm:$0xff]  ;;  %v19065_v43 = vpack.c.bf16 %v15662_v31, %v15649_v47  ;;  %v19074_v31 = vpack.c.bf16 %v15812_v63, %v15797_v45  ;;  %v19083_v63 = vld [vmem:[#allocation81_spill] sm:$0xff] }
 0x87d   : > { %v6866_v30 = vpop.permute.xlu1 %6865  ;;  %v19066_v48 = vld [vmem:[#allocation134_spill] sm:$0xff] }
 0x87e   : > { %v6882_v27 = vpop.permute.xlu0 %6881  ;;  %v16454_v21 = vpop.f32.mrf.mxu0  ;;  %v19082_v45 = vld [vmem:[#allocation146_spill] sm:$0xff] }
 0x87f   : > { %7078 = vmatmul.mubr.bf16.gmra.mxu0 %v6725_v39  ;;  %9305 = vmatprep.subr.bf16.mxu1 %v6882_v27  ;;  %v19061_v39 = vpack.c.bf16 %v19059_v29, %v19060_v61  ;;  %v19069_v29 = vld [vmem:[#allocation141_spill] sm:$0xff]  ;;  %v19070_v61 = vld [vmem:[#allocation74_spill] sm:$0xff] }
 0x880   : > { %7239 = vmatmul.mubr.bf16.gmra.mxu1 %v6727_v58  ;;  %7311 = vmatprep.mubr.bf16.mxu0 %v19058_v25 }
 0x881   : > { %7246 = vmatprep.mubr.bf16.mxu1 %v19055_v18  ;;  %v6832_v16 = vpop.permute.xlu1 %6831  ;;  %9306 = vmatpush3.bf16.msra.mxu1 %v6866_v30  ;;  %v19064_v18 = vpack.c.bf16 %v15637_v49, %v19063_v24  ;;  %v19076_v24 = vld [vmem:[#allocation75_spill] sm:$0xff] }
 0x882   : > { %v6848_v56 = vpop.permute.xlu0 %6847 }
 0x883   : > { %9195 = vmatprep.subr.bf16.mxu0 %v6848_v56  ;;  %v8981_v28 = vpop.f32.mrf.mxu0 }
 0x884   : > { %9196 = vmatpush3.bf16.msra.mxu0 %v6832_v16 }
 0x885   : > { %v6864_v41 = vpop.permute.xlu1 %6863  ;;  %v8982_v46 = vpop.f32.mrf.mxu0 }
 0x886   : > { %v6880_v20 = vpop.permute.xlu0 %6879  ;;  %v16459_v58 = vadd.f32 %v8982_v46, %v8981_v28  ;;  %v19067_v28 = vld [vmem:[#allocation220_spill] sm:$0xff] }
 0x887   : > { %9307 = vmatprep.subr.bf16.mxu1 %v6880_v20  ;;  %v16464_v25 = vpop.f32.mrf.mxu0  ;;  %v19068_v46 = vpack.c.bf16 %v19066_v48, %v19067_v28 }
 0x888   : > { %7247 = vmatmul.mubr.bf16.gmra.mxu1 %v19061_v39  ;;  %v19071_v39 = vpack.c.bf16 %v19069_v29, %v19070_v61  ;;  %v19084_v29 = vpack.c.bf16 %v19082_v45, %v19083_v63  ;;  %v19085_v61 = vld [vmem:[#allocation253_spill] sm:$0xff]  ;;  %v19102_v45 = vld [vmem:[#allocation76_spill] sm:$0xff] }
 0x889   : > { %7254 = vmatprep.mubr.bf16.mxu1 %v19062_v3  ;;  %9308 = vmatpush3.bf16.msra.mxu1 %v6864_v41  ;;  %v6830_v30 = vpop.permute.xlu1 %6829  ;;  %v16466_v27 = vpop.f32.mrf.mxu0 }
 0x88a   : > { %v6846_v50 = vpop.permute.xlu0 %6845 }
 0x88b   : > { %9197 = vmatprep.subr.bf16.mxu0 %v6846_v50  ;;  %v19075_v50 = vld [vmem:[#allocation140_spill] sm:$0xff] }
 0x88c   : > { %9198 = vmatpush3.bf16.msra.mxu0 %v6830_v30  ;;  %v19072_v30 = vld [vmem:[#allocation152_spill] sm:$0xff] }
 0x88d   : > { %v6862_v56 = vpop.permute.xlu1 %6861  ;;  %v19073_v47 = vpack.c.bf16 %v15670_v57, %v19072_v30  ;;  %v19081_v57 = vpack.c.bf16 %v15815_v62, %v15800_v53  ;;  %v19088_v30 = vld [vmem:[#allocation145_spill] sm:$0xff]  ;;  %v19094_v53 = vld [vmem:[#allocation264_spill] sm:$0xff] }
 0x88e   : > { %v6878_v16 = vpop.permute.xlu0 %6877  ;;  %v19095_v62 = vld [vmem:[#allocation296_spill] sm:$0xff] }
 0x88f   : > { %7312 = vmatmul.mubr.bf16.vlgmr.msra.gmra.mxu0 %v19068_v46  ;;  %v8987_v41 = vpop.f32.mrf.mxu0  ;;  %9309 = vmatprep.subr.bf16.mxu1 %v6878_v16  ;;  %v19078_v16 = vld [vmem:[#allocation82_spill] sm:$0xff] }
 0x890   : > { %7255 = vmatmul.mubr.bf16.gmra.mxu1 %v19064_v18  ;;  %7319 = vmatprep.mubr.bf16.mxu0 %v19071_v39  ;;  %v19077_v18 = vpack.c.bf16 %v19075_v50, %v19076_v24  ;;  %v19086_v39 = vld [vmem:[#allocation236_spill] sm:$0xff]  ;;  %v19092_v24 = vld [vmem:[#allocation247_spill] sm:$0xff] }
 0x891   : > { %7262 = vmatprep.mubr.bf16.mxu1 %v19065_v43  ;;  %9310 = vmatpush3.bf16.msra.mxu1 %v6862_v56  ;;  %v8988_v20 = vpop.f32.mrf.mxu0  ;;  %v19079_v56 = vld [vmem:[#allocation77_spill] sm:$0xff]  ;;  %v19091_v50 = vld [vmem:[#allocation72_spill] sm:$0xff] }
 0x892   : > { %v16480_v49 = vadd.f32 %v8988_v20, %v8987_v41  ;;  %v19080_v48 = vpack.c.bf16 %v19078_v16, %v19079_v56  ;;  %v19087_v20 = vpack.c.bf16 %v19085_v61, %v19086_v39  ;;  %v19096_v16 = vpack.c.bf16 %v19094_v53, %v19095_v62  ;;  %v19097_v56 = vld [vmem:[#allocation190_spill] sm:$0xff]  ;;  %v19106_v39 = vld [vmem:[#allocation144_spill] sm:$0xff]  ;;  %v19116_v53 = vld [vmem:[#allocation155_spill] sm:$0xff] }
 0x893   : > { %v16482_v3 = vpop.f32.mrf.mxu0 }
 0x895   : > { %v16493_v43 = vpop.f32.mrf.mxu0 }
 0x897   : > { %7320 = vmatmul.mubr.bf16.gmra.mxu0 %v19077_v18  ;;  %v19093_v18 = vpack.c.bf16 %v19091_v50, %v19092_v24  ;;  %v19112_v24 = vld [vmem:[#allocation85_spill] sm:$0xff] }
 0x898   : > { %7263 = vmatmul.mubr.bf16.gmra.mxu1 %v19073_v47  ;;  %7327 = vmatprep.mubr.bf16.mxu0 %v19080_v48  ;;  %v19089_v47 = vld [vmem:[#allocation84_spill] sm:$0xff]  ;;  %v19098_v48 = vld [vmem:[#allocation78_spill] sm:$0xff] }
 0x899   : > { %7270 = vmatprep.mubr.bf16.mxu1 %v19074_v31  ;;  %v19090_v31 = vpack.c.bf16 %v19088_v30, %v19089_v47  ;;  %v19109_v47 = vld [vmem:[#allocation270_spill] sm:$0xff] }
 0x89b   : > { %v8993_v28 = vpop.f32.mrf.mxu0 }
 0x89d   : > { %v8994_v46 = vpop.f32.mrf.mxu0 }
 0x89e   : > { %v16501_v41 = vadd.f32 %v8994_v46, %v8993_v28  ;;  %v19099_v28 = vpack.c.bf16 %v19097_v56, %v19098_v48  ;;  %v19100_v46 = vpack.c.bf16 %v15962_v13, %v15958_v35  ;;  %v19115_v13 = vld [vmem:[#allocation160_spill] sm:$0xff]  ;;  %v19119_v56 = vld [vmem:[#allocation295_spill] sm:$0xff] }
 0x89f   : > { %7328 = vmatmul.mubr.bf16.gmra.mxu0 %v19084_v29  ;;  %v19104_v29 = vld [vmem:[#allocation153_spill] sm:$0xff]  ;;  %v19117_v62 = vpack.c.bf16 %v19115_v13, %v19116_v53 }
 0x8a0   : > { %7271 = vmatmul.mubr.bf16.gmra.mxu1 %v19081_v57  ;;  %7335 = vmatprep.mubr.bf16.mxu0 %v19090_v31  ;;  %v19101_v57 = vld [vmem:[#allocation260_spill] sm:$0xff]  ;;  %v19105_v61 = vpack.c.bf16 %v16044_v42, %v19104_v29  ;;  %v19110_v31 = vld [vmem:[#allocation154_spill] sm:$0xff] }
 0x8a1   : > { %7472 = vmatprep.mubr.bf16.mxu1 %v19087_v20  ;;  %v19103_v63 = vpack.c.bf16 %v19101_v57, %v19102_v45  ;;  %v19107_v20 = vld [vmem:[#allocation80_spill] sm:$0xff]  ;;  %v19111_v50 = vpack.c.bf16 %v19109_v47, %v19110_v31  ;;  %v19127_v31 = vld [vmem:[#allocation263_spill] sm:$0xff] }
 0x8a2   : > { %v19108_v30 = vpack.c.bf16 %v19106_v39, %v19107_v20  ;;  %v19124_v39 = vld [vmem:[#allocation298_spill] sm:$0xff]  ;;  %v19125_v20 = vld [vmem:[#allocation147_spill] sm:$0xff] }
 0x8a7   : > { %7336 = vmatmul.mubr.bf16.gmra.mxu0 %v19096_v16  ;;  %v19118_v16 = vld [vmem:[#allocation262_spill] sm:$0xff] }
 0x8a8   : > { %7473 = vmatmul.mubr.bf16.vlgmr.msra.gmra.mxu1 %v19093_v18  ;;  %7343 = vmatprep.mubr.bf16.mxu0 %v19100_v46  ;;  %v19113_v18 = vld [vmem:[#allocation83_spill] sm:$0xff]  ;;  %v19120_v42 = vpack.c.bf16 %v19118_v16, %v19119_v56  ;;  %v19122_v46 = vld [vmem:[#allocation276_spill] sm:$0xff] }
 0x8a9   : > { %7480 = vmatprep.mubr.bf16.mxu1 %v19099_v28  ;;  %v19114_v35 = vpack.c.bf16 %v19112_v24, %v19113_v18  ;;  %v19121_v28 = vld [vmem:[#allocation162_spill] sm:$0xff]  ;;  %v19130_v18 = vld [vmem:[#allocation272_spill] sm:$0xff] }
 0x8aa   : > { %v19123_v57 = vpack.c.bf16 %v19121_v28, %v19122_v46  ;;  %v19134_v28 = vpack.c.bf16 %v16174_v59, %v16170_v12 }
 0x8af   : > { %7344 = vmatmul.mubr.bf16.gmra.mxu0 %v19105_v61 }
 0x8b0   : > { %7481 = vmatmul.mubr.bf16.gmra.mxu1 %v19103_v63  ;;  %7351 = vmatprep.mubr.bf16.mxu0 %v19111_v50  ;;  %v19128_v50 = vld [vmem:[#allocation170_spill] sm:$0xff] }
 0x8b1   : > { %7488 = vmatprep.mubr.bf16.mxu1 %v19108_v30  ;;  %v19126_v30 = vpack.c.bf16 %v19124_v39, %v19125_v20  ;;  %v19129_v24 = vpack.c.bf16 %v19127_v31, %v19128_v50  ;;  %v19140_v39 = vld [vmem:[#allocation163_spill] sm:$0xff] }
 0x8b2   : > { %v19142_v50 = vld [vmem:[#allocation279_spill] sm:$0xff] }
 0x8b7   : > { %7352 = vmatmul.mubr.bf16.gmra.mxu0 %v19117_v62  ;;  %v9047_v48 = vpop.f32.mrf.mxu1  ;;  %v19133_v62 = vpack.c.bf16 %v16166_v9, %v16162_v36  ;;  %v19139_v36 = vld [vmem:[#allocation271_spill] sm:$0xff] }
 0x8b8   : > { %7489 = vmatmul.mubr.bf16.gmra.mxu1 %v19114_v35  ;;  %7359 = vmatprep.mubr.bf16.mxu0 %v19123_v57  ;;  %v19131_v35 = vld [vmem:[#allocation156_spill] sm:$0xff]  ;;  %v19135_v57 = vpack.c.bf16 %v16182_v11, %v16178_v38  ;;  %v19141_v20 = vpack.c.bf16 %v19139_v36, %v19140_v39  ;;  %v19145_v11 = vpack.c.bf16 %v16227_v23, %v16221_v17 }
 0x8b9   : > { %7496 = vmatprep.mubr.bf16.mxu1 %v19120_v42  ;;  %v9048_v45 = vpop.f32.mrf.mxu1  ;;  %v19132_v13 = vpack.c.bf16 %v19130_v18, %v19131_v35  ;;  %v19146_v35 = vld [vmem:[#allocation280_spill] sm:$0xff]  ;;  %v19154_v17 = vpack.c.bf16 %v16267_v54, %v16261_v0  ;;  %v19155_v23 = vpack.c.bf16 %v16275_v44, %v16271_v7  ;;  %v19158_v7 = vpack.c.bf16 %v16319_v14, %v16315_v51  ;;  %v9887_v51 = vld [vmem:[%s16991_s6 + $0x8] sm:$0xff]  }
 0x8ba   : > { %v16548_v63 = vadd.f32 %v9048_v45, %v9047_v48  ;;  %v19136_v45 = vld [vmem:[#allocation278_spill] sm:$0xff]  ;;  %9605 = vmatprep.subr.bf16.mxu0 %v9887_v51 }
 0x8bb   : > { %v9050_v29 = vpop.f32.mrf.mxu1  ;;  %9606 = vmatpush3.bf16.msra.mxu0 %v9887_v51 }
 0x8bd   : > { %v9051_v61 = vpop.f32.mrf.mxu1 }
 0x8be   : > { %v16553_v47 = vadd.f32 %v9051_v61, %v9050_v29  ;;  %v19137_v29 = vld [vmem:[#allocation267_spill] sm:$0xff] }
 0x8bf   : > { %7360 = vmatmul.mubr.bf16.gmra.mxu0 %v19129_v24  ;;  %v9053_v53 = vpop.f32.mrf.mxu1  ;;  %v19138_v61 = vpack.c.bf16 %v19136_v45, %v19137_v29  ;;  %v19143_v24 = vld [vmem:[#allocation269_spill] sm:$0xff]  ;;  %v19151_v45 = vld [vmem:[#allocation287_spill] sm:$0xff] }
 0x8c0   : > { %7497 = vmatmul.mubr.bf16.gmra.mxu1 %v19126_v30  ;;  %7367 = vmatprep.mubr.bf16.mxu0 %v19133_v62  ;;  %v19144_v18 = vpack.c.bf16 %v19142_v50, %v19143_v24  ;;  %v19149_v62 = vld [vmem:[#allocation161_spill] sm:$0xff] }
 0x8c1   : > { %7504 = vmatprep.mubr.bf16.mxu1 %v19132_v13  ;;  %v9054_v16 = vpop.f32.mrf.mxu1  ;;  %v19147_v13 = vpack.c.bf16 %v16235_v19, %v19146_v35  ;;  %v19152_v29 = vld [vmem:[#allocation281_spill] sm:$0xff] }
 0x8c2   : > { %v16564_v56 = vadd.f32 %v9054_v16, %v9053_v53  ;;  %v19148_v53 = vld [vmem:[#allocation286_spill] sm:$0xff] }
 0x8c3   : > { %v9056_v42 = vpop.f32.mrf.mxu1  ;;  %v19150_v16 = vpack.c.bf16 %v19148_v53, %v19149_v62  ;;  %v19167_v53 = vld [vmem:[#allocation304_spill] sm:$0xff]  ;;  %v19168_v62 = vld [vmem:[#allocation299_spill] sm:$0xff] }
 0x8c5   : > { %v9057_v48 = vpop.f32.mrf.mxu1 }
 0x8c6   : > { %v16569_v46 = vadd.f32 %v9057_v48, %v9056_v42 }
 0x8c7   : > { %7368 = vmatmul.mubr.bf16.gmra.mxu0 %v19135_v57  ;;  %v9059_v9 = vpop.f32.mrf.mxu1 }
 0x8c8   : > { %7505 = vmatmul.mubr.bf16.gmra.mxu1 %v19134_v28  ;;  %7375 = vmatprep.mubr.bf16.mxu0 %v19141_v20 }
 0x8c9   : > { %7512 = vmatprep.mubr.bf16.mxu1 %v19138_v61  ;;  %v9060_v30 = vpop.f32.mrf.mxu1  ;;  %v19153_v61 = vpack.c.bf16 %v19151_v45, %v19152_v29  ;;  %v19171_v45 = vld [vmem:[#allocation303_spill] sm:$0xff]  ;;  %v19172_v29 = vld [vmem:[#allocation302_spill] sm:$0xff] }
 0x8ca   : > { %v16580_v31 = vadd.f32 %v9060_v30, %v9059_v9  ;;  %v19156_v9 = vpack.c.bf16 %v16285_v33, %v16281_v40  ;;  %v19159_v40 = vld [vmem:[#allocation167_spill] sm:$0xff] }
 0x8cb   : > { %v9062_v12 = vpop.f32.mrf.mxu1  ;;  %v19160_v54 = vpack.c.bf16 %v16329_v26, %v19159_v40  ;;  %v19161_v33 = vld [vmem:[#allocation283_spill] sm:$0xff] }
 0x8cc   : > { %v19162_v50 = vpack.c.bf16 %v16339_v8, %v19161_v33 }
 0x8cd   : > { %v9063_v59 = vpop.f32.mrf.mxu1 }
 0x8ce   : > { %v16585_v38 = vadd.f32 %v9063_v59, %v9062_v12  ;;  %v19157_v59 = vpack.c.bf16 %v16303_v55, %v16289_v5  ;;  %v8980_v55 = vadd.f32 %v16454_v21, %v16446_v52  ;;  %v19165_v52 = vpack.c.bf16 %v16357_v32, %v16353_v34 }
 0x8cf   : > { %7376 = vmatmul.mubr.bf16.gmra.mxu0 %v19145_v11  ;;  %v9065_v42 = vpop.f32.mrf.mxu1  ;;  %v19163_v11 = vld [vmem:[#allocation273_spill] sm:$0xff]  ;;  %v19166_v21 = vpack.c.bf16 %v16369_v10, %v16361_v37  ;;  %v19170_v10 = vpack.c.bf16 %v16379_v1, %v16373_v2  ;;  %v8992_v2 = vadd.f32 %v16493_v43, %v16482_v3  ;;  %v19186_v3 = vld [vmem:[#allocation166_spill] sm:$0xff]  ;;  %v19187_v43 = vld [vmem:[#allocation292_spill] sm:$0xff] }
 0x8d0   : > { %7513 = vmatmul.mubr.bf16.gmra.mxu1 %v19144_v18  ;;  %7383 = vmatprep.mubr.bf16.mxu0 %v19150_v16  ;;  %v19164_v35 = vpack.c.bf16 %v16347_v6, %v19163_v11  ;;  %v19169_v16 = vpack.c.bf16 %v19167_v53, %v19168_v62  ;;  %v8986_v6 = vadd.f32 %v16466_v27, %v16464_v25  ;;  %v19175_v25 = vld [vmem:[#allocation165_spill] sm:$0xff]  ;;  %v19193_v53 = vld [vmem:[#allocation307_spill] sm:$0xff] }
 0x8d1   : > { %7520 = vmatprep.mubr.bf16.mxu1 %v19147_v13  ;;  %v9066_v48 = vpop.f32.mrf.mxu1 }
 0x8d2   : > { %v16596_v28 = vadd.f32 %v9066_v48, %v9065_v42 }
 0x8d3   : > { %v9068_v57 = vpop.f32.mrf.mxu1 }
 0x8d5   : > { %v9069_v19 = vpop.f32.mrf.mxu1 }
 0x8d6   : > { %v16610_v36 = vadd.f32 %v9069_v19, %v9068_v57  ;;  %v19177_v19 = vld [vmem:[#allocation268_spill] sm:$0xff] }
 0x8d7   : > { %7384 = vmatmul.mubr.bf16.gmra.mxu0 %v19154_v17  ;;  %v9087_v39 = vpop.f32.mrf.mxu1  ;;  %v19174_v17 = vld [vmem:[#allocation282_spill] sm:$0xff] }
 0x8d8   : > { %7521 = vmatmul.mubr.bf16.gmra.mxu1 %v19153_v61  ;;  %7391 = vmatprep.mubr.bf16.mxu0 %v19156_v9  ;;  %v19173_v61 = vpack.c.bf16 %v19171_v45, %v19172_v29  ;;  %v19176_v27 = vpack.c.bf16 %v19174_v17, %v19175_v25  ;;  %v19178_v9 = vld [vmem:[#allocation266_spill] sm:$0xff]  ;;  %v19201_v45 = vld [vmem:[#allocation157_spill] sm:$0xff]  ;;  %v19202_v29 = vld [vmem:[#allocation87_spill] sm:$0xff] }
 0x8d9   : > { %7528 = vmatprep.mubr.bf16.mxu1 %v19155_v23  ;;  %v9088_v20 = vpop.f32.mrf.mxu1  ;;  %v19207_v17 = vld [vmem:[#allocation311_spill] sm:$0xff]  ;;  %v19208_v25 = vld [vmem:[#allocation158_spill] sm:$0xff] }
 0x8da   : > { %v9089_v30 = vadd.f32 %v9088_v20, %v9087_v39  ;;  %v19179_v39 = vpack.c.bf16 %v19177_v19, %v19178_v9  ;;  %v8996_v20 = vpop.f32.mrf.mxu0 }
 0x8db   : > { %v9090_v12 = vpop.f32.mrf.mxu1 }
 0x8dc   : > { %v16616_v0 = vadd.f32 %v9089_v30, %v16444_v22 }
 0x8dd   : > { %v9091_v44 = vpop.f32.mrf.mxu1 }
 0x8de   : > { %v9092_v5 = vadd.f32 %v9091_v44, %v9090_v12  ;;  %v19181_v44 = vld [vmem:[#allocation275_spill] sm:$0xff] }
 0x8df   : > { %7392 = vmatmul.mubr.bf16.gmra.mxu0 %v19158_v7  ;;  %v9093_v24 = vpop.f32.mrf.mxu1  ;;  %v8997_v7 = vpop.f32.mrf.mxu0 }
 0x8e0   : > { %7529 = vmatmul.mubr.bf16.gmra.mxu1 %v19157_v59  ;;  %7399 = vmatprep.mubr.bf16.mxu0 %v19162_v50  ;;  %v16629_v22 = vadd.f32 %v9092_v5, %v8980_v55  ;;  %v19183_v55 = vld [vmem:[#allocation306_spill] sm:$0xff]  ;;  %v19184_v5 = vld [vmem:[#allocation151_spill] sm:$0xff] }
 0x8e1   : > { %7536 = vmatprep.mubr.bf16.mxu1 %v19160_v54  ;;  %v9094_v18 = vpop.f32.mrf.mxu1  ;;  %v19180_v54 = vld [vmem:[#allocation265_spill] sm:$0xff] }
 0x8e2   : > { %v9095_v14 = vadd.f32 %v9094_v18, %v9093_v24  ;;  %v19182_v33 = vpack.c.bf16 %v19180_v54, %v19181_v44  ;;  %v19185_v24 = vpack.c.bf16 %v19183_v55, %v19184_v5  ;;  %v19188_v18 = vpack.c.bf16 %v19186_v3, %v19187_v43  ;;  %v19210_v44 = vld [vmem:[#allocation91_spill] sm:$0xff]  ;;  %v19214_v3 = vld [vmem:[#allocation89_spill] sm:$0xff] }
 0x8e3   : > { %v9096_v26 = vpop.f32.mrf.mxu1 }
 0x8e4   : > { %v16638_v8 = vadd.f32 %v9095_v14, %v16459_v58  ;;  %v19189_v14 = vld [vmem:[#allocation309_spill] sm:$0xff] }
 0x8e5   : > { %v9097_v13 = vpop.f32.mrf.mxu1 }
 0x8e6   : > { %v9098_v42 = vadd.f32 %v9097_v13, %v9096_v26  ;;  %v19190_v26 = vld [vmem:[#allocation305_spill] sm:$0xff] }
 0x8e7   : > { %7400 = vmatmul.mubr.bf16.gmra.mxu0 %v19165_v52  ;;  %v9099_v58 = vpop.f32.mrf.mxu1  ;;  %v19191_v11 = vpack.c.bf16 %v19189_v14, %v19190_v26  ;;  %v19192_v13 = vld [vmem:[#allocation205_spill] sm:$0xff] }
 0x8e8   : > { %7537 = vmatmul.mubr.bf16.gmra.mxu1 %v19164_v35  ;;  %7407 = vmatprep.mubr.bf16.mxu0 %v19169_v16  ;;  %v16651_v48 = vadd.f32 %v9098_v42, %v8986_v6  ;;  %v8998_v35 = vadd.f32 %v8997_v7, %v8996_v20  ;;  %v19194_v62 = vpack.c.bf16 %v19192_v13, %v19193_v53  ;;  %v19195_v16 = vld [vmem:[#allocation310_spill] sm:$0xff]  ;;  %v19196_v6 = vld [vmem:[#allocation301_spill] sm:$0xff] }
 0x8e9   : > { %7544 = vmatprep.mubr.bf16.mxu1 %v19166_v21  ;;  %v9100_v57 = vpop.f32.mrf.mxu1  ;;  %v19197_v42 = vpack.c.bf16 %v19195_v16, %v19196_v6 }
 0x8ea   : > { %v9101_v34 = vadd.f32 %v9100_v57, %v9099_v58  ;;  %v19198_v58 = vld [vmem:[#allocation193_spill] sm:$0xff]  ;;  %v19199_v57 = vld [vmem:[#allocation159_spill] sm:$0xff] }
 0x8eb   : > { %v9102_v32 = vpop.f32.mrf.mxu1 }
 0x8ec   : > { %v16657_v37 = vadd.f32 %v9101_v34, %v16480_v49  ;;  %v19200_v34 = vpack.c.bf16 %v19198_v58, %v19199_v57  ;;  %v19217_v58 = vld [vmem:[#allocation118_spill] sm:$0xff] }
 0x8ed   : > { %v9103_v23 = vpop.f32.mrf.mxu1 }
 0x8ee   : > { %v9104_v1 = vadd.f32 %v9103_v23, %v9102_v32 }
 0x8ef   : > { %7408 = vmatmul.mubr.bf16.gmra.mxu0 %v19173_v61  ;;  %v9105_v49 = vpop.f32.mrf.mxu1  ;;  %v19203_v61 = vpack.c.bf16 %v19201_v45, %v19202_v29 }
 0x8f0   : > { %7545 = vmatmul.mubr.bf16.gmra.mxu1 %v19170_v10  ;;  %7415 = vmatprep.mubr.bf16.mxu0 %v19179_v39  ;;  %v16670_v30 = vadd.f32 %v9104_v1, %v8992_v2 }
 0x8f1   : > { %7552 = vmatprep.mubr.bf16.mxu1 %v19176_v27  ;;  %v9106_v12 = vpop.f32.mrf.mxu1  ;;  %v19209_v27 = vpack.c.bf16 %v19207_v17, %v19208_v25 }
 0x8f2   : > { %v9107_v59 = vadd.f32 %v9106_v12, %v9105_v49 }
 0x8f3   : > { %v9108_v40 = vpop.f32.mrf.mxu1 }
 0x8f4   : > { %v16676_v50 = vadd.f32 %v9107_v59, %v16501_v41  ;;  %v9888_v41 = vld [vmem:[%s16991_s6] sm:$0xff]  }
 0x8f5   : > { %v9109_v51 = vpop.f32.mrf.mxu1  ;;  %9607 = vmatprep.subr.bf16.mxu0 %v9888_v41 }
 0x8f6   : > { %v9110_v52 = vadd.f32 %v9109_v51, %v9108_v40  ;;  %9608 = vmatpush3.bf16.msra.mxu0 %v9888_v41 }
 0x8f7   : > { %7416 = vmatmul.mubr.bf16.gmra.mxu0 %v19185_v24  ;;  %v19213_v24 = vld [vmem:[#allocation259_spill] sm:$0xff] }
 0x8f8   : > { %7553 = vmatmul.mubr.bf16.gmra.mxu1 %v19182_v33  ;;  %7423 = vmatprep.mubr.bf16.mxu0 %v19191_v11  ;;  %v16690_v21 = vadd.f32 %v9110_v52, %v8998_v35  ;;  %v19211_v33 = vld [vmem:[#allocation88_spill] sm:$0xff]  ;;  %v19215_v43 = vpack.c.bf16 %v19213_v24, %v19214_v3 }
 0x8f9   : > { %7560 = vmatprep.mubr.bf16.mxu1 %v19188_v18  ;;  %v19212_v55 = vpack.c.bf16 %v19210_v44, %v19211_v33 }
 0x8ff   : > { %7424 = vmatmul.mubr.bf16.gmra.mxu0 %v19194_v62 }
 0x900   : > { %7561 = vmatmul.mubr.bf16.gmra.mxu1 %v6731_v60  ;;  %7431 = vmatprep.mubr.bf16.mxu0 %v19200_v34  ;;  %v19206_v60 = vpack.c.bf16 %v19204_v4, %v19205_v15 }
 0x901   : > { %7568 = vmatprep.mubr.bf16.mxu1 %v19197_v42  ;;  %v19216_v42 = vld [vmem:[#allocation274_spill] sm:$0xff] }
 0x902   : > { %v19218_v57 = vpack.c.bf16 %v19216_v42, %v19217_v58 }
 0x906   : > { %v8999_v32 = vpop.f32.mrf.mxu0  ;;  %v9111_v10 = vpop.f32.mrf.mxu1 }
 0x907   : > { %7432 = vmatmul.mubr.bf16.gmra.mxu0 %v19206_v60 }
 0x908   : > { %7569 = vmatmul.mubr.bf16.gmra.mxu1 %v19203_v61  ;;  %v9000_v23 = vpop.f32.mrf.mxu0  ;;  %v9112_v19 = vpop.f32.mrf.mxu1 }
 0x909   : > { %7576 = vmatprep.mubr.bf16.mxu1 %v19209_v27  ;;  %v9001_v9 = vadd.f32 %v9000_v23, %v8999_v32  ;;  %v9113_v39 = vadd.f32 %v9112_v19, %v9111_v10  ;;  %v19219_v32 = vld [vmem:[#allocation148_spill] sm:$0xff] }
 0x90a   : > { %v9002_v2 = vpop.f32.mrf.mxu0  ;;  %v9114_v1 = vpop.f32.mrf.mxu1  ;;  %v19220_v10 = vld [vmem:[#allocation196_spill] sm:$0xff] }
 0x90b   : > { %v16713_v20 = vadd.f32 %v9113_v39, %v9001_v9  ;;  %v19221_v45 = vpack.c.bf16 %v19219_v32, %v19220_v10 }
 0x90c   : > { %v9003_v49 = vpop.f32.mrf.mxu0  ;;  %v9115_v12 = vpop.f32.mrf.mxu1 }
 0x90d   : > { %v9004_v59 = vadd.f32 %v9003_v49, %v9002_v2  ;;  %v9116_v7 = vadd.f32 %v9115_v12, %v9114_v1  ;;  %v19222_v1 = vld [vmem:[#allocation169_spill] sm:$0xff] }
 0x90e   : > { %v9005_v40 = vpop.f32.mrf.mxu0  ;;  %v9117_v54 = vpop.f32.mrf.mxu1  ;;  %v19223_v49 = vld [vmem:[#allocation197_spill] sm:$0xff] }
 0x90f   : > { %v16718_v5 = vadd.f32 %v9116_v7, %v9004_v59  ;;  %v19224_v12 = vpack.c.bf16 %v19222_v1, %v19223_v49 }
 0x910   : > { %7577 = vmatmul.mubr.bf16.gmra.mxu1 %v19212_v55  ;;  %v9006_v18 = vpop.f32.mrf.mxu0  ;;  %v9118_v51 = vpop.f32.mrf.mxu1 }
 0x911   : > { %7584 = vmatprep.mubr.bf16.mxu1 %v19215_v43  ;;  %v9007_v14 = vadd.f32 %v9006_v18, %v9005_v40  ;;  %v9119_v26 = vadd.f32 %v9118_v51, %v9117_v54 }
 0x912   : > { %v9008_v11 = vpop.f32.mrf.mxu0  ;;  %v9120_v35 = vpop.f32.mrf.mxu1 }
 0x913   : > { %v16723_v52 = vadd.f32 %v9119_v26, %v9007_v14 }
 0x914   : > { %v9009_v41 = vpop.f32.mrf.mxu0  ;;  %v9121_v13 = vpop.f32.mrf.mxu1 }
 0x915   : > { %v9010_v53 = vadd.f32 %v9009_v41, %v9008_v11  ;;  %v9122_v62 = vadd.f32 %v9121_v13, %v9120_v35 }
 0x916   : > { %v9011_v16 = vpop.f32.mrf.mxu0  ;;  %v9123_v6 = vpop.f32.mrf.mxu1 }
 0x917   : > { %v16728_v34 = vadd.f32 %v9122_v62, %v9010_v53 }
 0x918   : > { %7585 = vmatmul.mubr.bf16.gmra.mxu1 %v19218_v57  ;;  %v9012_v29 = vpop.f32.mrf.mxu0  ;;  %v9124_v61 = vpop.f32.mrf.mxu1 }
 0x919   : > { %7592 = vmatprep.mubr.bf16.mxu1 %v19221_v45  ;;  %v9013_v4 = vadd.f32 %v9012_v29, %v9011_v16  ;;  %v9125_v15 = vadd.f32 %v9124_v61, %v9123_v6 }
 0x91a   : > { %v9014_v60 = vpop.f32.mrf.mxu0  ;;  %v9126_v17 = vpop.f32.mrf.mxu1 }
 0x91b   : > { %v16733_v25 = vadd.f32 %v9125_v15, %v9013_v4 }
 0x91c   : > { %v9015_v27 = vpop.f32.mrf.mxu0  ;;  %v9127_v23 = vpop.f32.mrf.mxu1 }
 0x91d   : > { %v9016_v19 = vadd.f32 %v9015_v27, %v9014_v60  ;;  %v9128_v9 = vadd.f32 %v9127_v23, %v9126_v17 }
 0x91e   : > { %v9017_v39 = vpop.f32.mrf.mxu0  ;;  %v9129_v2 = vpop.f32.mrf.mxu1 }
 0x91f   : > { %v16738_v59 = vadd.f32 %v9128_v9, %v9016_v19 }
 0x920   : > { %7593 = vmatmul.mubr.bf16.gmra.mxu1 %v19224_v12  ;;  %v9018_v7 = vpop.f32.mrf.mxu0  ;;  %v9130_v40 = vpop.f32.mrf.mxu1 }
 0x921   : > { %v9019_v54 = vadd.f32 %v9018_v7, %v9017_v39  ;;  %v9131_v44 = vadd.f32 %v9130_v40, %v9129_v2 }
 0x922   : > { %v9020_v33 = vpop.f32.mrf.mxu0  ;;  %v9132_v55 = vpop.f32.mrf.mxu1 }
 0x923   : > { %v16740_v24 = vadd.f32 %v9131_v44, %v9019_v54 }
 0x924   : > { %v9021_v3 = vpop.f32.mrf.mxu0  ;;  %v9133_v43 = vpop.f32.mrf.mxu1 }
 0x925   : > { %v9022_v18 = vadd.f32 %v9021_v3, %v9020_v33  ;;  %v9134_v51 = vadd.f32 %v9133_v43, %v9132_v55 }
 0x926   : > { %v9023_v14 = vpop.f32.mrf.mxu0  ;;  %v9135_v26 = vpop.f32.mrf.mxu1 }
 0x927   : > { %v16742_v11 = vadd.f32 %v9134_v51, %v9022_v18 }
 0x928   : > { %v9024_v35 = vpop.f32.mrf.mxu0  ;;  %v9136_v41 = vpop.f32.mrf.mxu1 }
 0x929   : > { %v9025_v13 = vadd.f32 %v9024_v35, %v9023_v14  ;;  %v9137_v53 = vadd.f32 %v9136_v41, %v9135_v26 }
 0x92a   : > { %v9026_v62 = vpop.f32.mrf.mxu0  ;;  %v9138_v16 = vpop.f32.mrf.mxu1 }
 0x92b   : > { %v16744_v6 = vadd.f32 %v9137_v53, %v9025_v13 }
 0x92c   : > { %v9027_v42 = vpop.f32.mrf.mxu0  ;;  %v9139_v58 = vpop.f32.mrf.mxu1 }
 0x92d   : > { %v9028_v57 = vadd.f32 %v9027_v42, %v9026_v62  ;;  %v9140_v32 = vadd.f32 %v9139_v58, %v9138_v16 }
 0x92f   : > { %v9029_v10 = vpop.f32.mrf.mxu0  ;;  %v16746_v29 = vadd.f32 %v9140_v32, %v9028_v57 }
 0x930   : > { %v9141_v45 = vpop.f32.mrf.mxu1 }
 0x931   : > { %v9030_v61 = vpop.f32.mrf.mxu0 }
 0x932   : > { %v9142_v4 = vpop.f32.mrf.mxu1  ;;  %v9031_v15 = vadd.f32 %v9030_v61, %v9029_v10 }
 0x933   : > { %v9143_v60 = vadd.f32 %v9142_v4, %v9141_v45  ;;  %v9032_v17 = vpop.f32.mrf.mxu0 }
 0x934   : > { %v9144_v27 = vpop.f32.mrf.mxu1 }
 0x935   : > { %v16748_v23 = vadd.f32 %v9143_v60, %v9031_v15  ;;  %v9033_v19 = vpop.f32.mrf.mxu0 }
 0x936   : > { %v9145_v9 = vpop.f32.mrf.mxu1  ;;  %v9034_v39 = vadd.f32 %v9033_v19, %v9032_v17 }
 0x937   : > { %v9146_v2 = vadd.f32 %v9145_v9, %v9144_v27  ;;  %v9035_v1 = vpop.f32.mrf.mxu0 }
 0x938   : > { %v9147_v49 = vpop.f32.mrf.mxu1 }
 0x939   : > { %v16750_v12 = vadd.f32 %v9146_v2, %v9034_v39  ;;  %v9036_v7 = vpop.f32.mrf.mxu0 }
 0x93a   : > { %v9148_v40 = vpop.f32.mrf.mxu1  ;;  %v9037_v54 = vadd.f32 %v9036_v7, %v9035_v1 }
 0x93b   : > { %v9149_v44 = vadd.f32 %v9148_v40, %v9147_v49  ;;  %v9038_v33 = vpop.f32.mrf.mxu0 }
 0x93c   : > { %v9150_v55 = vpop.f32.mrf.mxu1 }
 0x93d   : > { %v16752_v3 = vadd.f32 %v9149_v44, %v9037_v54  ;;  %v9039_v43 = vpop.f32.mrf.mxu0 }
 0x93e   : > { %v9151_v18 = vpop.f32.mrf.mxu1  ;;  %v9040_v51 = vadd.f32 %v9039_v43, %v9038_v33 }
 0x93f   : > { %v9152_v14 = vadd.f32 %v9151_v18, %v9150_v55  ;;  %v9041_v26 = vpop.f32.mrf.mxu0 }
 0x940   : > { %v9153_v35 = vpop.f32.mrf.mxu1 }
 0x941   : > { %v16754_v41 = vadd.f32 %v9152_v14, %v9040_v51  ;;  %v9042_v13 = vpop.f32.mrf.mxu0 }
 0x942   : > { %v9154_v53 = vpop.f32.mrf.mxu1  ;;  %v9043_v62 = vadd.f32 %v9042_v13, %v9041_v26 }
 0x943   : > { %v9155_v16 = vadd.f32 %v9154_v53, %v9153_v35  ;;  %v9044_v42 = vpop.f32.mrf.mxu0 }
 0x944   : > { %v9156_v58 = vpop.f32.mrf.mxu1 }
 0x945   : > { %v16756_v57 = vadd.f32 %v9155_v16, %v9043_v62  ;;  %v9045_v32 = vpop.f32.mrf.mxu0 }
 0x946   : > { %v9157_v10 = vpop.f32.mrf.mxu1  ;;  %v9046_v45 = vadd.f32 %v9045_v32, %v9044_v42 }
 0x947   : > { %v9158_v61 = vadd.f32 %v9157_v10, %v9156_v58 }
 0x948   : > { %v9159_v4 = vpop.f32.mrf.mxu1 }
 0x949   : > { %v16758_v15 = vadd.f32 %v9158_v61, %v9046_v45 }
 0x94a   : > { %v9160_v60 = vpop.f32.mrf.mxu1 }
 0x94b   : > { %v9161_v17 = vadd.f32 %v9160_v60, %v9159_v4 }
 0x94c   : > { %v9162_v27 = vpop.f32.mrf.mxu1 }
 0x94d   : > { %v16761_v19 = vadd.f32 %v9161_v17, %v16548_v63 }
 0x94e   : > { %v9163_v9 = vpop.f32.mrf.mxu1 }
 0x94f   : > { %v9164_v39 = vadd.f32 %v9163_v9, %v9162_v27  ;;  %v9199_v49 = vpop.f32.mrf.mxu0 }
 0x950   : > { %v9165_v2 = vpop.f32.mrf.mxu1 }
 0x951   : > { %v16764_v1 = vadd.f32 %v9164_v39, %v16553_v47  ;;  %v9200_v54 = vpop.f32.mrf.mxu0 }
 0x952   : > { %v9166_v7 = vpop.f32.mrf.mxu1 }
 0x953   : > { %v9167_v40 = vadd.f32 %v9166_v7, %v9165_v2  ;;  %v9202_v55 = vpop.f32.mrf.mxu0 }
 0x954   : > { %v9168_v44 = vpop.f32.mrf.mxu1 }
 0x955   : > { %v16767_v33 = vadd.f32 %v9167_v40, %v16564_v56  ;;  %v9203_v51 = vpop.f32.mrf.mxu0 }
 0x956   : > { %v9169_v43 = vpop.f32.mrf.mxu1 }
 0x957   : > { %v9170_v18 = vadd.f32 %v9169_v43, %v9168_v44  ;;  %v9205_v26 = vpop.f32.mrf.mxu0  ;;  %v9204_v43 = vadd.f32 %v9203_v51, %v9202_v55 }
 0x958   : > { %v9171_v63 = vpop.f32.mrf.mxu1 }
 0x959   : > { %v16770_v14 = vadd.f32 %v9170_v18, %v16569_v46  ;;  %v9206_v13 = vpop.f32.mrf.mxu0 }
 0x95a   : > { %v9172_v35 = vpop.f32.mrf.mxu1 }
 0x95b   : > { %v9173_v47 = vadd.f32 %v9172_v35, %v9171_v63  ;;  %v9208_v16 = vpop.f32.mrf.mxu0 }
 0x95c   : > { %v9174_v53 = vpop.f32.mrf.mxu1 }
 0x95d   : > { %v16773_v62 = vadd.f32 %v9173_v47, %v16580_v31  ;;  %v9209_v58 = vpop.f32.mrf.mxu0 }
 0x95e   : > { %v9175_v42 = vpop.f32.mrf.mxu1 }
 0x95f   : > { %v9176_v56 = vadd.f32 %v9175_v42, %v9174_v53  ;;  %v9211_v45 = vpop.f32.mrf.mxu0  ;;  %v7317_v42 = vadd.f32 %v9204_v43, %v16629_v22 }
 0x960   : > { %v9177_v32 = vpop.f32.mrf.mxu1 }
 0x961   : > { %v16776_v10 = vadd.f32 %v9176_v56, %v16585_v38  ;;  %v9212_v4 = vpop.f32.mrf.mxu0  ;;  %v9201_v38 = vadd.f32 %v9200_v54, %v9199_v49 }
 0x962   : > { %v9178_v61 = vpop.f32.mrf.mxu1 }
 0x963   : > { %v9179_v46 = vadd.f32 %v9178_v61, %v9177_v32  ;;  %v9214_v27 = vpop.f32.mrf.mxu0 }
 0x964   : > { %v9180_v60 = vpop.f32.mrf.mxu1 }
 0x965   : > { %v16779_v17 = vadd.f32 %v9179_v46, %v16596_v28  ;;  %v9215_v39 = vpop.f32.mrf.mxu0  ;;  %v7314_v28 = vadd.f32 %v9201_v38, %v16616_v0 }
 0x966   : > { %v9181_v9 = vpop.f32.mrf.mxu1 }
 0x967   : > { %v9182_v31 = vadd.f32 %v9181_v9, %v9180_v60  ;;  %v9217_v40 = vpop.f32.mrf.mxu0 }
 0x968   : > { %v9311_v2 = vpop.f32.mrf.mxu1 }
 0x969   : > { %v16782_v7 = vadd.f32 %v9182_v31, %v16610_v36  ;;  %v9218_v18 = vpop.f32.mrf.mxu0  ;;  %v9207_v31 = vadd.f32 %v9206_v13, %v9205_v26  ;;  %v9213_v13 = vadd.f32 %v9212_v4, %v9211_v45 }
 0x96a   : > { %v9312_v44 = vpop.f32.mrf.mxu1  ;;  %v9219_v4 = vadd.f32 %v9218_v18, %v9217_v40 }
 0x96b   : > { %19225 = vst [vmem:[#allocation290_spill] sm:$0xff] %v16782_v7  ;;  %v9313_v35 = vadd.f32 %v9312_v44, %v9311_v2  ;;  %v9220_v47 = vpop.f32.mrf.mxu0  ;;  %v9210_v7 = vadd.f32 %v9209_v58, %v9208_v16  ;;  %v7322_v0 = vadd.f32 %v9207_v31, %v16638_v8  ;;  %v9216_v16 = vadd.f32 %v9215_v39, %v9214_v27 }
 0x96c   : > { %v9314_v63 = vpop.f32.mrf.mxu1  ;;  %v7330_v8 = vadd.f32 %v9213_v13, %v16657_v37  ;;  %v7338_v37 = vadd.f32 %v9219_v4, %v16676_v50 }
 0x96d   : > { %v9221_v32 = vpop.f32.mrf.mxu0  ;;  %v7475_v46 = vadd.f32 %v9313_v35, %v7314_v28  ;;  %v7325_v22 = vadd.f32 %v9210_v7, %v16651_v48  ;;  %v7333_v48 = vadd.f32 %v9216_v16, %v16670_v30 }
 0x96e   : > { %v9315_v53 = vpop.f32.mrf.mxu1  ;;  %v9222_v27 = vadd.f32 %v9221_v32, %v9220_v47 }
 0x96f   : > { %v9316_v56 = vadd.f32 %v9315_v53, %v9314_v63  ;;  %v9223_v36 = vpop.f32.mrf.mxu0 }
 0x970   : > { %v9317_v61 = vpop.f32.mrf.mxu1  ;;  %v7341_v30 = vadd.f32 %v9222_v27, %v16690_v21 }
 0x971   : > { %v7478_v60 = vadd.f32 %v9316_v56, %v7317_v42  ;;  %v9224_v54 = vpop.f32.mrf.mxu0 }
 0x972   : > { %v9318_v9 = vpop.f32.mrf.mxu1  ;;  %v9225_v18 = vadd.f32 %v9224_v54, %v9223_v36 }
 0x973   : > { %v7601_v49 = vpack.c.bf16 %v7478_v60, %v7475_v46  ;;  %v9319_v51 = vadd.f32 %v9318_v9, %v9317_v61  ;;  %v9226_v2 = vpop.f32.mrf.mxu0 }
 0x974   : > { %v9320_v55 = vpop.f32.mrf.mxu1  ;;  %v7346_v50 = vadd.f32 %v9225_v18, %v16713_v20 }
 0x975   : > { %9609 = vmatprep.mubr.msk.bf16.mxu0 %vm3992_vm3, %v7601_v49  ;;  %v9227_v43 = vpop.f32.mrf.mxu0  ;;  %v7483_v35 = vadd.f32 %v9319_v51, %v7322_v0 }
 0x976   : > { %v9321_v44 = vpop.f32.mrf.mxu1  ;;  %v9228_v47 = vadd.f32 %v9227_v43, %v9226_v2 }
 0x977   : > { %v9322_v38 = vadd.f32 %v9321_v44, %v9320_v55  ;;  %v9229_v28 = vpop.f32.mrf.mxu0 }
 0x978   : > { %v9323_v63 = vpop.f32.mrf.mxu1  ;;  %v7349_v21 = vadd.f32 %v9228_v47, %v16718_v5 }
 0x979   : > { %v7486_v53 = vadd.f32 %v9322_v38, %v7325_v22  ;;  %v9230_v42 = vpop.f32.mrf.mxu0 }
 0x97a   : > { %v9324_v26 = vpop.f32.mrf.mxu1  ;;  %v9231_v54 = vadd.f32 %v9230_v42, %v9229_v28 }
 0x97b   : > { %v7602_v58 = vpack.c.bf16 %v7486_v53, %v7483_v35  ;;  %v9325_v61 = vadd.f32 %v9324_v26, %v9323_v63  ;;  %v9232_v46 = vpop.f32.mrf.mxu0 }
 0x97c   : > { %v9326_v56 = vpop.f32.mrf.mxu1  ;;  %v7354_v20 = vadd.f32 %v9231_v54, %v16723_v52 }
 0x97d   : > { %9610 = vmatmul.mubr.msk.bf16.vlgmr.msra.gmra.mxu0 %vm3992_vm3, %v7602_v58  ;;  %v9233_v9 = vpop.f32.mrf.mxu0  ;;  %v7491_v49 = vadd.f32 %v9325_v61, %v7330_v8 }
 0x97e   : > { %v9327_v60 = vpop.f32.mrf.mxu1  ;;  %v9234_v2 = vadd.f32 %v9233_v9, %v9232_v46 }
 0x97f   : > { %v9328_v7 = vadd.f32 %v9327_v60, %v9326_v56  ;;  %v9235_v51 = vpop.f32.mrf.mxu0 }
 0x980   : > { %v9329_v31 = vpop.f32.mrf.mxu1  ;;  %v7357_v5 = vadd.f32 %v9234_v2, %v16728_v34 }
 0x981   : > { %v7494_v55 = vadd.f32 %v9328_v7, %v7333_v48  ;;  %v9236_v44 = vpop.f32.mrf.mxu0 }
 0x982   : > { %v9330_v45 = vpop.f32.mrf.mxu1  ;;  %v9237_v42 = vadd.f32 %v9236_v44, %v9235_v51 }
 0x983   : > { %v7603_v39 = vpack.c.bf16 %v7494_v55, %v7491_v49  ;;  %v9331_v22 = vadd.f32 %v9330_v45, %v9329_v31  ;;  %v9238_v38 = vpop.f32.mrf.mxu0 }
 0x984   : > { %v9332_v0 = vpop.f32.mrf.mxu1  ;;  %v7362_v52 = vadd.f32 %v9237_v42, %v16733_v25 }
 0x985   : > { %9613 = vmatprep.mubr.msk.bf16.mxu0 %vm3992_vm3, %v7603_v39  ;;  %v9239_v53 = vpop.f32.mrf.mxu0  ;;  %v7499_v13 = vadd.f32 %v9331_v22, %v7338_v37 }
 0x986   : > { %v9333_v63 = vpop.f32.mrf.mxu1  ;;  %v9240_v46 = vadd.f32 %v9239_v53, %v9238_v38 }
 0x987   : > { %v9334_v35 = vadd.f32 %v9333_v63, %v9332_v0  ;;  %v9241_v58 = vpop.f32.mrf.mxu0 }
 0x988   : > { %v9335_v26 = vpop.f32.mrf.mxu1  ;;  %v7365_v34 = vadd.f32 %v9240_v46, %v16738_v59 }
 0x989   : > { %v7502_v16 = vadd.f32 %v9334_v35, %v7341_v30  ;;  %v9242_v56 = vpop.f32.mrf.mxu0 }
 0x98a   : > { %v9336_v40 = vpop.f32.mrf.mxu1  ;;  %v9243_v44 = vadd.f32 %v9242_v56, %v9241_v58 }
 0x98b   : > { %v7604_v32 = vpack.c.bf16 %v7502_v16, %v7499_v13  ;;  %v9337_v60 = vadd.f32 %v9336_v40, %v9335_v26  ;;  %v9244_v8 = vpop.f32.mrf.mxu0 }
 0x98c   : > { %v9338_v61 = vpop.f32.mrf.mxu1  ;;  %v7370_v25 = vadd.f32 %v9243_v44, %v16740_v24 }
 0x98d   : > { %9614 = vmatmul.mubr.msk.bf16.gmra.mxu0 %vm3992_vm3, %v7604_v32  ;;  %v9245_v31 = vpop.f32.mrf.mxu0  ;;  %v7507_v55 = vadd.f32 %v9337_v60, %v7346_v50 }
 0x98e   : > { %v9339_v48 = vpop.f32.mrf.mxu1  ;;  %v9246_v38 = vadd.f32 %v9245_v31, %v9244_v8 }
 0x98f   : > { %v9340_v7 = vadd.f32 %v9339_v48, %v9338_v61  ;;  %v9247_v4 = vpop.f32.mrf.mxu0 }
 0x990   : > { %v9341_v49 = vpop.f32.mrf.mxu1  ;;  %v7373_v59 = vadd.f32 %v9246_v38, %v16742_v11 }
 0x991   : > { %v7510_v45 = vadd.f32 %v9340_v7, %v7349_v21  ;;  %v9248_v27 = vpop.f32.mrf.mxu0 }
 0x992   : > { %v9342_v36 = vpop.f32.mrf.mxu1  ;;  %v9249_v56 = vadd.f32 %v9248_v27, %v9247_v4 }
 0x993   : > { %v7605_v43 = vpack.c.bf16 %v7510_v45, %v7507_v55  ;;  %v9343_v0 = vadd.f32 %v9342_v36, %v9341_v49  ;;  %v9250_v22 = vpop.f32.mrf.mxu0 }
 0x994   : > { %v9344_v39 = vpop.f32.mrf.mxu1  ;;  %v7378_v24 = vadd.f32 %v9249_v56, %v16744_v6 }
 0x995   : > { %9617 = vmatprep.mubr.msk.bf16.mxu0 %vm3992_vm3, %v7605_v43  ;;  %v9251_v30 = vpop.f32.mrf.mxu0  ;;  %v7515_v26 = vadd.f32 %v9343_v0, %v7354_v20 }
 0x996   : > { %v9345_v63 = vpop.f32.mrf.mxu1  ;;  %v9252_v8 = vadd.f32 %v9251_v30, %v9250_v22 }
 0x997   : > { %v9346_v37 = vadd.f32 %v9345_v63, %v9344_v39  ;;  %v9253_v16 = vpop.f32.mrf.mxu0 }
 0x998   : > { %v9347_v35 = vpop.f32.mrf.mxu1  ;;  %v7381_v11 = vadd.f32 %v9252_v8, %v16746_v29 }
 0x999   : > { %v7518_v13 = vadd.f32 %v9346_v37, %v7357_v5  ;;  %v9254_v40 = vpop.f32.mrf.mxu0 }
 0x99a   : > { %v9348_v28 = vpop.f32.mrf.mxu1  ;;  %v9255_v27 = vadd.f32 %v9254_v40, %v9253_v16 }
 0x99b   : > { %v7606_v9 = vpack.c.bf16 %v7518_v13, %v7515_v26  ;;  %v9349_v47 = vadd.f32 %v9348_v28, %v9347_v35  ;;  %v9256_v32 = vpop.f32.mrf.mxu0 }
 0x99c   : > { %v9350_v18 = vpop.f32.mrf.mxu1  ;;  %v7386_v6 = vadd.f32 %v9255_v27, %v16748_v23 }
 0x99d   : > { %9618 = vmatmul.mubr.msk.bf16.gmra.mxu0 %vm3992_vm3, %v7606_v9  ;;  %v9257_v48 = vpop.f32.mrf.mxu0  ;;  %v7523_v21 = vadd.f32 %v9349_v47, %v7362_v52 }
 0x99e   : > { %v9351_v61 = vpop.f32.mrf.mxu1  ;;  %v9258_v22 = vadd.f32 %v9257_v48, %v9256_v32 }
 0x99f   : > { %v9352_v60 = vadd.f32 %v9351_v61, %v9350_v18  ;;  %v9259_v49 = vpop.f32.mrf.mxu0 }
 0x9a0   : > { %v9353_v50 = vpop.f32.mrf.mxu1  ;;  %v7389_v29 = vadd.f32 %v9258_v22, %v16750_v12 }
 0x9a1   : > { %v7526_v7 = vadd.f32 %v9352_v60, %v7365_v34  ;;  %v9260_v55 = vpop.f32.mrf.mxu0 }
 0x9a2   : > { %v9354_v51 = vpop.f32.mrf.mxu1  ;;  %v9261_v40 = vadd.f32 %v9260_v55, %v9259_v49 }
 0x9a3   : > { %v7607_v53 = vpack.c.bf16 %v7526_v7, %v7523_v21  ;;  %v9355_v36 = vadd.f32 %v9354_v51, %v9353_v50  ;;  %v9262_v54 = vpop.f32.mrf.mxu0 }
 0x9a4   : > { %v9356_v45 = vpop.f32.mrf.mxu1  ;;  %v7394_v23 = vadd.f32 %v9261_v40, %v16752_v3 }
 0x9a5   : > { %9621 = vmatprep.mubr.msk.bf16.mxu0 %vm3992_vm3, %v7607_v53  ;;  %v9263_v39 = vpop.f32.mrf.mxu0  ;;  %v7531_v63 = vadd.f32 %v9355_v36, %v7370_v25 }
 0x9a6   : > { %v9357_v2 = vpop.f32.mrf.mxu1  ;;  %v9264_v32 = vadd.f32 %v9263_v39, %v9262_v54 }
 0x9a7   : > { %v9358_v43 = vadd.f32 %v9357_v2, %v9356_v45  ;;  %v9265_v5 = vpop.f32.mrf.mxu0 }
 0x9a8   : > { %v9359_v0 = vpop.f32.mrf.mxu1  ;;  %v7397_v12 = vadd.f32 %v9264_v32, %v16754_v41 }
 0x9a9   : > { %v7534_v20 = vadd.f32 %v9358_v43, %v7373_v59  ;;  %v9266_v37 = vpop.f32.mrf.mxu0 }
 0x9aa   : > { %v9360_v58 = vpop.f32.mrf.mxu1  ;;  %v9267_v49 = vadd.f32 %v9266_v37, %v9265_v5 }
 0x9ab   : > { %v7608_v31 = vpack.c.bf16 %v7534_v20, %v7531_v63  ;;  %v9361_v26 = vadd.f32 %v9360_v58, %v9359_v0  ;;  %v9268_v13 = vpop.f32.mrf.mxu0 }
 0x9ac   : > { %v9362_v35 = vpop.f32.mrf.mxu1 }
 0x9ad   : > { %9622 = vmatmul.mubr.msk.bf16.gmra.mxu0 %vm3992_vm3, %v7608_v31  ;;  %v9269_v46 = vpop.f32.mrf.mxu0  ;;  %v7539_v18 = vadd.f32 %v9361_v26, %v7378_v24 }
 0x9ae   : > { %v9363_v28 = vpop.f32.mrf.mxu1  ;;  %v9270_v55 = vadd.f32 %v9269_v46, %v9268_v13 }
 0x9af   : > { %v9364_v42 = vadd.f32 %v9363_v28, %v9362_v35  ;;  %v9271_v61 = vpop.f32.mrf.mxu0  ;;  %v7402_v28 = vadd.f32 %v9267_v49, %v16756_v57 }
 0x9b0   : > { %v9365_v9 = vpop.f32.mrf.mxu1  ;;  %v7405_v3 = vadd.f32 %v9270_v55, %v16758_v15 }
 0x9b1   : > { %v7542_v47 = vadd.f32 %v9364_v42, %v7381_v11  ;;  %v9272_v52 = vpop.f32.mrf.mxu0 }
 0x9b2   : > { %v9366_v4 = vpop.f32.mrf.mxu1 }
 0x9b3   : > { %v7609_v30 = vpack.c.bf16 %v7542_v47, %v7539_v18  ;;  %v9367_v60 = vadd.f32 %v9366_v4, %v9365_v9  ;;  %v9274_v50 = vpop.f32.mrf.mxu0  ;;  %v9273_v47 = vadd.f32 %v9272_v52, %v9271_v61 }
 0x9b4   : > { %v9368_v34 = vpop.f32.mrf.mxu1 }
 0x9b5   : > { %9625 = vmatprep.mubr.msk.bf16.mxu0 %vm3992_vm3, %v7609_v30  ;;  %v9275_v51 = vpop.f32.mrf.mxu0  ;;  %v7547_v38 = vadd.f32 %v9367_v60, %v7386_v6  ;;  %v7410_v22 = vadd.f32 %v9273_v47, %v16761_v19 }
 0x9b6   : > { %v9369_v21 = vpop.f32.mrf.mxu1  ;;  %v9276_v5 = vadd.f32 %v9275_v51, %v9274_v50 }
 0x9b7   : > { %v9370_v7 = vadd.f32 %v9369_v21, %v9368_v34  ;;  %v9277_v45 = vpop.f32.mrf.mxu0 }
 0x9b8   : > { %v9371_v44 = vpop.f32.mrf.mxu1  ;;  %v7413_v57 = vadd.f32 %v9276_v5, %v16764_v1 }
 0x9b9   : > { %v7550_v53 = vadd.f32 %v9370_v7, %v7389_v29  ;;  %v9278_v36 = vpop.f32.mrf.mxu0 }
 0x9ba   : > { %v9372_v16 = vpop.f32.mrf.mxu1  ;;  %v9279_v29 = vadd.f32 %v9278_v36, %v9277_v45 }
 0x9bb   : > { %v7610_v48 = vpack.c.bf16 %v7550_v53, %v7547_v38  ;;  %v9373_v25 = vadd.f32 %v9372_v16, %v9371_v44  ;;  %v9280_v59 = vpop.f32.mrf.mxu0 }
 0x9bc   : > { %v9374_v2 = vpop.f32.mrf.mxu1  ;;  %v7418_v38 = vadd.f32 %v9279_v29, %v16767_v33  ;;  %v7854_v29 = vld [vmem:[%s16835_s20 + $0x20] sm:$0xff] }
 0x9bd   : > { %9626 = vmatmul.mubr.msk.bf16.gmra.mxu0 %vm3992_vm3, %v7610_v48  ;;  %v9281_v63 = vpop.f32.mrf.mxu0  ;;  %v7555_v58 = vadd.f32 %v9373_v25, %v7394_v23 }
 0x9be   : > { %v9375_v43 = vpop.f32.mrf.mxu1  ;;  %v9282_v61 = vadd.f32 %v9281_v63, %v9280_v59 }
 0x9bf   : > { %v9376_v0 = vadd.f32 %v9375_v43, %v9374_v2  ;;  %v9283_v39 = vpop.f32.mrf.mxu0 }
 0x9c0   : > { %v9377_v20 = vpop.f32.mrf.mxu1  ;;  %v7421_v19 = vadd.f32 %v9282_v61, %v16770_v14 }
 0x9c1   : > { %v7558_v56 = vadd.f32 %v9376_v0, %v7397_v12  ;;  %v9284_v24 = vpop.f32.mrf.mxu0 }
 0x9c2   : > { %v9378_v8 = vpop.f32.mrf.mxu1  ;;  %v9285_v2 = vadd.f32 %v9284_v24, %v9283_v39 }
 0x9c3   : > { %v7611_v54 = vpack.c.bf16 %v7558_v56, %v7555_v58  ;;  %v9379_v35 = vadd.f32 %v9378_v8, %v9377_v20  ;;  %v9286_v13 = vpop.f32.mrf.mxu0 }
 0x9c4   : > { %v9380_v31 = vpop.f32.mrf.mxu1  ;;  %v7426_v12 = vadd.f32 %v9285_v2, %v16773_v62 }
 0x9c5   : > { %9629 = vmatprep.mubr.msk.bf16.mxu0 %vm3992_vm3, %v7611_v54  ;;  %v7563_v42 = vadd.f32 %v9379_v35, %v7402_v28  ;;  %v9287_v30 = vpop.f32.mrf.mxu0  ;;  %v19226_v35 = vld [vmem:[#allocation290_spill] sm:$0xff] }
 0x9c6   : > { %v9381_v26 = vpop.f32.mrf.mxu1  ;;  %v9288_v45 = vadd.f32 %v9287_v30, %v9286_v13  ;;  %v7853_v13 = vld [vmem:[%s16835_s20 + $0x18] sm:$0xff] }
 0x9c7   : > { %v9382_v41 = vadd.f32 %v9381_v26, %v9380_v31  ;;  %v9289_v50 = vpop.f32.mrf.mxu0 }
 0x9c8   : > { %v9383_v11 = vpop.f32.mrf.mxu1  ;;  %v7429_v33 = vadd.f32 %v9288_v45, %v16776_v10  ;;  %v7858_v45 = vld [vmem:[%s16835_s20 + $0x40] sm:$0xff] }
 0x9c9   : > { %v7566_v9 = vadd.f32 %v9382_v41, %v7405_v3  ;;  %v9290_v53 = vpop.f32.mrf.mxu0 }
 0x9ca   : > { %v9384_v18 = vpop.f32.mrf.mxu1  ;;  %v9291_v8 = vadd.f32 %v9290_v53, %v9289_v50 }
 0x9cb   : > { %v7612_v37 = vpack.c.bf16 %v7566_v9, %v7563_v42  ;;  %v9385_v4 = vadd.f32 %v9384_v18, %v9383_v11  ;;  %v9292_v25 = vpop.f32.mrf.mxu0  ;;  %v7852_v11 = vld [vmem:[%s16835_s20 + $0x10] sm:$0xff]  ;;  %v7850_v18 = vld [vmem:[%s16835_s20] sm:$0xff] }
 0x9cc   : > { %v9386_v46 = vpop.f32.mrf.mxu1  ;;  %v7434_v62 = vadd.f32 %v9291_v8, %v16779_v17  ;;  %v16840_v17 = vld [vmem:[%s16992_s7] ss:$0 sm:$0xff] }
 0x9cd   : > { %9630 = vmatmul.mubr.msk.bf16.gmra.mxu0 %vm3992_vm3, %v7612_v37  ;;  %v7571_v60 = vadd.f32 %v9385_v4, %v7410_v22  ;;  %v9293_v0 = vpop.f32.mrf.mxu0  ;;  %v7851_v22 = vld [vmem:[%s16835_s20 + $0x8] sm:$0xff] }
 0x9ce   : > { %v9387_v27 = vpop.f32.mrf.mxu1  ;;  %v9294_v49 = vadd.f32 %v9293_v0, %v9292_v25 }
 0x9cf   : > { %v9388_v15 = vadd.f32 %v9387_v27, %v9386_v46 }
 0x9d0   : > { %v9389_v34 = vpop.f32.mrf.mxu1  ;;  %v7437_v10 = vadd.f32 %v9294_v49, %v19226_v35 }
 0x9d1   : > { %v7574_v21 = vadd.f32 %v9388_v15, %v7413_v57 }
 0x9d2   : > { %v9390_v6 = vpop.f32.mrf.mxu1 }
 0x9d3   : > { %v7613_v52 = vpack.c.bf16 %v7574_v21, %v7571_v60  ;;  %v9391_v51 = vadd.f32 %v9390_v6, %v9389_v34  ;;  %v7856_v60 = vld [vmem:[%s16835_s20 + $0x30] sm:$0xff] }
 0x9d4   : > { %v9392_v7 = vpop.f32.mrf.mxu1 }
 0x9d5   : > { %9633 = vmatprep.mubr.msk.bf16.mxu0 %vm3992_vm3, %v7613_v52  ;;  %v7579_v40 = vadd.f32 %v9391_v51, %v7418_v38 }
 0x9d6   : > { %v9393_v44 = vpop.f32.mrf.mxu1 }
 0x9d7   : > { %v9394_v1 = vadd.f32 %v9393_v44, %v9392_v7  ;;  %v7857_v7 = vld [vmem:[%s16835_s20 + $0x38] sm:$0xff] }
 0x9d8   : > { %v9395_v16 = vpop.f32.mrf.mxu1 }
 0x9d9   : > { %v7582_v32 = vadd.f32 %v9394_v1, %v7421_v19  ;;  %v7855_v19 = vld [vmem:[%s16835_s20 + $0x28] sm:$0xff] }
 0x9da   : > { %v9396_v48 = vpop.f32.mrf.mxu1 }
 0x9db   : > { %v7614_v36 = vpack.c.bf16 %v7582_v32, %v7579_v40  ;;  %v9397_v43 = vadd.f32 %v9396_v48, %v9395_v16  ;;  %v7860_v32 = vld [vmem:[%s16835_s20 + $0x50] sm:$0xff] }
 0x9dc   : > { %v9398_v59 = vpop.f32.mrf.mxu1 }
 0x9dd   : > { %9634 = vmatmul.mubr.msk.bf16.gmra.mxu0 %vm3992_vm3, %v7614_v36  ;;  %v7587_v20 = vadd.f32 %v9397_v43, %v7426_v12  ;;  %v7861_v43 = vld [vmem:[%s16835_s20 + $0x58] sm:$0xff] }
 0x9de   : > { %v9399_v23 = vpop.f32.mrf.mxu1 }
 0x9df   : > { %v9400_v14 = vadd.f32 %v9399_v23, %v9398_v59 }
 0x9e0   : > { %v9401_v63 = vpop.f32.mrf.mxu1 }
 0x9e1   : > { %v7590_v58 = vadd.f32 %v9400_v14, %v7429_v33  ;;  %v7859_v14 = vld [vmem:[%s16835_s20 + $0x48] sm:$0xff] }
 0x9e2   : > { %v9402_v56 = vpop.f32.mrf.mxu1 }
 0x9e3   : > { %v7615_v55 = vpack.c.bf16 %v7590_v58, %v7587_v20  ;;  %v9403_v39 = vadd.f32 %v9402_v56, %v9401_v63  ;;  %v7864_v56 = vld [vmem:[%s16835_s20 + $0x70] sm:$0xff] }
 0x9e4   : > { %v9404_v54 = vpop.f32.mrf.mxu1 }
 0x9e5   : > { %9637 = vmatprep.mubr.msk.bf16.mxu0 %vm3992_vm3, %v7615_v55  ;;  %v7595_v28 = vadd.f32 %v9403_v39, %v7434_v62  ;;  %v7862_v55 = vld [vmem:[%s16835_s20 + $0x60] sm:$0xff]  ;;  %v7865_v62 = vld [vmem:[%s16835_s20 + $0x78] sm:$0xff] }
 0x9e6   : > { %v9405_v31 = vpop.f32.mrf.mxu1 }
 0x9e7   : > { %v9406_v26 = vadd.f32 %v9405_v31, %v9404_v54 }
 0x9e9   : > { %v7598_v3 = vadd.f32 %v9406_v26, %v7437_v10 }
 0x9eb   : > { %v7616_v41 = vpack.c.bf16 %v7598_v3, %v7595_v28  ;;  %v7863_v28 = vld [vmem:[%s16835_s20 + $0x68] sm:$0xff] }
 0x9ed   : > { %9638 = vmatmul.mubr.msk.bf16.gmra.mxu0 %vm3992_vm3, %v7616_v41 }
 0xa3d   : > { %v9611_v24 = vpop.f32.mrf.mxu0 }
 0xa3e   : > { %v7731_v42 = vadd.f32 %v9611_v24, %v16840_v17 }
 0xa3f   : > { %v7722_v9 = vpop.f32.mrf.mxu0 }
 0xa40   : > { %v7884_v47 = vadd.f32 %v7852_v11, %v7731_v42  ;;  %v7723_v5 = vadd.f32 %v16840_v17, %v7722_v9  ;;  %v7868_v42 = vld [vmem:[%s16835_s20 + $0x90] sm:$0xff] }
 0xa41   : > { %v9612_v37 = vpop.f32.mrf.mxu0 }
 0xa42   : > { %7916 = vst.msk [vmem:[%s10645_s22 + $0x10] sm:$0xff] %vm3992_vm3, %v7884_v47  ;;  %v7882_v46 = vadd.f32 %v7850_v18, %v7723_v5  ;;  %v7734_v4 = vadd.f32 %v9612_v37, %v16840_v17  ;;  %v7866_v47 = vld [vmem:[%s16835_s20 + $0x80] sm:$0xff] }
 0xa43   : > { %v7725_v27 = vpop.f32.mrf.mxu0 }
 0xa44   : > { %7914 = vst.msk [vmem:[%s10645_s22] sm:$0xff] %vm3992_vm3, %v7882_v46  ;;  %v7885_v57 = vadd.f32 %v7853_v13, %v7734_v4  ;;  %v7726_v15 = vadd.f32 %v16840_v17, %v7725_v27  ;;  %v7869_v46 = vld [vmem:[%s16835_s20 + $0x98] sm:$0xff] }
 0xa46   : > { %7917 = vst.msk [vmem:[%s10645_s22 + $0x18] sm:$0xff] %vm3992_vm3, %v7885_v57  ;;  %v7883_v30 = vadd.f32 %v7851_v22, %v7726_v15  ;;  %v7867_v57 = vld [vmem:[%s16835_s20 + $0x88] sm:$0xff] }
 0xa48   : > { %7915 = vst.msk [vmem:[%s10645_s22 + $0x8] sm:$0xff] %vm3992_vm3, %v7883_v30 }
 0xa4d   : > { %v9615_v34 = vpop.f32.mrf.mxu0 }
 0xa4e   : > { %v7747_v21 = vadd.f32 %v9615_v34, %v16840_v17 }
 0xa4f   : > { %v7738_v6 = vpop.f32.mrf.mxu0 }
 0xa50   : > { %v7888_v61 = vadd.f32 %v7856_v60, %v7747_v21  ;;  %v7739_v52 = vadd.f32 %v16840_v17, %v7738_v6  ;;  %v7872_v21 = vld [vmem:[%s16835_s20 + $0xb0] sm:$0xff] }
 0xa51   : > { %v9616_v50 = vpop.f32.mrf.mxu0 }
 0xa52   : > { %7920 = vst.msk [vmem:[%s10645_s22 + $0x30] sm:$0xff] %vm3992_vm3, %v7888_v61  ;;  %v7886_v51 = vadd.f32 %v7854_v29, %v7739_v52  ;;  %v7750_v44 = vadd.f32 %v9616_v50, %v16840_v17  ;;  %v7870_v61 = vld [vmem:[%s16835_s20 + $0xa0] sm:$0xff] }
 0xa53   : > { %v7741_v38 = vpop.f32.mrf.mxu0 }
 0xa54   : > { %7918 = vst.msk [vmem:[%s10645_s22 + $0x20] sm:$0xff] %vm3992_vm3, %v7886_v51  ;;  %v7889_v1 = vadd.f32 %v7857_v7, %v7750_v44  ;;  %v7742_v53 = vadd.f32 %v16840_v17, %v7741_v38  ;;  %v7873_v51 = vld [vmem:[%s16835_s20 + $0xb8] sm:$0xff] }
 0xa56   : > { %7921 = vst.msk [vmem:[%s10645_s22 + $0x38] sm:$0xff] %vm3992_vm3, %v7889_v1  ;;  %v7887_v16 = vadd.f32 %v7855_v19, %v7742_v53  ;;  %v7871_v1 = vld [vmem:[%s16835_s20 + $0xa8] sm:$0xff] }
 0xa58   : > { %7919 = vst.msk [vmem:[%s10645_s22 + $0x28] sm:$0xff] %vm3992_vm3, %v7887_v16 }
 0xa5d   : > { %v9619_v40 = vpop.f32.mrf.mxu0 }
 0xa5e   : > { %v7763_v48 = vadd.f32 %v9619_v40, %v16840_v17 }
 0xa5f   : > { %v7754_v2 = vpop.f32.mrf.mxu0 }
 0xa60   : > { %v7892_v36 = vadd.f32 %v7860_v32, %v7763_v48  ;;  %v7755_v25 = vadd.f32 %v16840_v17, %v7754_v2  ;;  %v7876_v48 = vld [vmem:[%s16835_s20 + $0xd0] sm:$0xff] }
 0xa61   : > { %v9620_v59 = vpop.f32.mrf.mxu0 }
 0xa62   : > { %7924 = vst.msk [vmem:[%s10645_s22 + $0x50] sm:$0xff] %vm3992_vm3, %v7892_v36  ;;  %v7890_v23 = vadd.f32 %v7858_v45, %v7755_v25  ;;  %v7766_v12 = vadd.f32 %v9620_v59, %v16840_v17  ;;  %v7874_v36 = vld [vmem:[%s16835_s20 + $0xc0] sm:$0xff] }
 0xa63   : > { %v7757_v33 = vpop.f32.mrf.mxu0 }
 0xa64   : > { %7922 = vst.msk [vmem:[%s10645_s22 + $0x40] sm:$0xff] %vm3992_vm3, %v7890_v23  ;;  %v7893_v0 = vadd.f32 %v7861_v43, %v7766_v12  ;;  %v7758_v63 = vadd.f32 %v16840_v17, %v7757_v33  ;;  %v7877_v23 = vld [vmem:[%s16835_s20 + $0xd8] sm:$0xff] }
 0xa66   : > { %7925 = vst.msk [vmem:[%s10645_s22 + $0x58] sm:$0xff] %vm3992_vm3, %v7893_v0  ;;  %v7891_v20 = vadd.f32 %v7859_v14, %v7758_v63  ;;  %v7875_v0 = vld [vmem:[%s16835_s20 + $0xc8] sm:$0xff] }
 0xa68   : > { %7923 = vst.msk [vmem:[%s10645_s22 + $0x48] sm:$0xff] %vm3992_vm3, %v7891_v20 }
 0xa6d   : > { %v9623_v58 = vpop.f32.mrf.mxu0 }
 0xa6e   : > { %v7779_v8 = vadd.f32 %v9623_v58, %v16840_v17 }
 0xa6f   : > { %v7770_v49 = vpop.f32.mrf.mxu0 }
 0xa70   : > { %v7896_v54 = vadd.f32 %v7864_v56, %v7779_v8  ;;  %v7771_v39 = vadd.f32 %v16840_v17, %v7770_v49  ;;  %v7880_v8 = vld [vmem:[%s16835_s20 + $0xf0] sm:$0xff] }
 0xa71   : > { %v9624_v31 = vpop.f32.mrf.mxu0 }
 0xa72   : > { %7928 = vst.msk [vmem:[%s10645_s22 + $0x70] sm:$0xff] %vm3992_vm3, %v7896_v54  ;;  %v7894_v35 = vadd.f32 %v7862_v55, %v7771_v39  ;;  %v7782_v10 = vadd.f32 %v9624_v31, %v16840_v17  ;;  %v7878_v54 = vld [vmem:[%s16835_s20 + $0xe0] sm:$0xff] }
 0xa73   : > { %v7773_v26 = vpop.f32.mrf.mxu0 }
 0xa74   : > { %7926 = vst.msk [vmem:[%s10645_s22 + $0x60] sm:$0xff] %vm3992_vm3, %v7894_v35  ;;  %v7897_v3 = vadd.f32 %v7865_v62, %v7782_v10  ;;  %v7774_v41 = vadd.f32 %v16840_v17, %v7773_v26  ;;  %v7881_v35 = vld [vmem:[%s16835_s20 + $0xf8] sm:$0xff] }
 0xa76   : > { %7929 = vst.msk [vmem:[%s10645_s22 + $0x78] sm:$0xff] %vm3992_vm3, %v7897_v3  ;;  %v7895_v24 = vadd.f32 %v7863_v28, %v7774_v41  ;;  %v7879_v3 = vld [vmem:[%s16835_s20 + $0xe8] sm:$0xff] }
 0xa78   : > { %7927 = vst.msk [vmem:[%s10645_s22 + $0x68] sm:$0xff] %vm3992_vm3, %v7895_v24 }
 0xa7d   : > { %v9627_v11 = vpop.f32.mrf.mxu0 }
 0xa7e   : > { %v7795_v9 = vadd.f32 %v9627_v11, %v16840_v17 }
 0xa7f   : > { %v7786_v18 = vpop.f32.mrf.mxu0 }
 0xa80   : > { %v7900_v5 = vadd.f32 %v7868_v42, %v7795_v9  ;;  %v7787_v37 = vadd.f32 %v16840_v17, %v7786_v18 }
 0xa81   : > { %v9628_v13 = vpop.f32.mrf.mxu0 }
 0xa82   : > { %7932 = vst.msk [vmem:[%s10645_s22 + $0x90] sm:$0xff] %vm3992_vm3, %v7900_v5  ;;  %v7898_v4 = vadd.f32 %v7866_v47, %v7787_v37  ;;  %v7798_v27 = vadd.f32 %v9628_v13, %v16840_v17 }
 0xa83   : > { %v7789_v22 = vpop.f32.mrf.mxu0 }
 0xa84   : > { %7930 = vst.msk [vmem:[%s10645_s22 + $0x80] sm:$0xff] %vm3992_vm3, %v7898_v4  ;;  %v7901_v15 = vadd.f32 %v7869_v46, %v7798_v27  ;;  %v7790_v30 = vadd.f32 %v16840_v17, %v7789_v22 }
 0xa86   : > { %7933 = vst.msk [vmem:[%s10645_s22 + $0x98] sm:$0xff] %vm3992_vm3, %v7901_v15  ;;  %v7899_v34 = vadd.f32 %v7867_v57, %v7790_v30 }
 0xa88   : > { %7931 = vst.msk [vmem:[%s10645_s22 + $0x88] sm:$0xff] %vm3992_vm3, %v7899_v34 }
 0xa8d   : > { %v9631_v60 = vpop.f32.mrf.mxu0 }
 0xa8e   : > { %v7811_v6 = vadd.f32 %v9631_v60, %v16840_v17 }
 0xa8f   : > { %v7802_v29 = vpop.f32.mrf.mxu0 }
 0xa90   : > { %v7904_v52 = vadd.f32 %v7872_v21, %v7811_v6  ;;  %v7803_v50 = vadd.f32 %v16840_v17, %v7802_v29 }
 0xa91   : > { %v9632_v7 = vpop.f32.mrf.mxu0 }
 0xa92   : > { %7936 = vst.msk [vmem:[%s10645_s22 + $0xb0] sm:$0xff] %vm3992_vm3, %v7904_v52  ;;  %v7902_v44 = vadd.f32 %v7870_v61, %v7803_v50  ;;  %v7814_v38 = vadd.f32 %v9632_v7, %v16840_v17 }
 0xa93   : > { %v7805_v19 = vpop.f32.mrf.mxu0 }
 0xa94   : > { %7934 = vst.msk [vmem:[%s10645_s22 + $0xa0] sm:$0xff] %vm3992_vm3, %v7902_v44  ;;  %v7905_v53 = vadd.f32 %v7873_v51, %v7814_v38  ;;  %v7806_v16 = vadd.f32 %v16840_v17, %v7805_v19 }
 0xa96   : > { %7937 = vst.msk [vmem:[%s10645_s22 + $0xb8] sm:$0xff] %vm3992_vm3, %v7905_v53  ;;  %v7903_v40 = vadd.f32 %v7871_v1, %v7806_v16 }
 0xa98   : > { %7935 = vst.msk [vmem:[%s10645_s22 + $0xa8] sm:$0xff] %vm3992_vm3, %v7903_v40 }
 0xa9d   : > { %v9635_v32 = vpop.f32.mrf.mxu0 }
 0xa9e   : > { %v7827_v2 = vadd.f32 %v9635_v32, %v16840_v17 }
 0xa9f   : > { %v7818_v45 = vpop.f32.mrf.mxu0 }
 0xaa0   : > { %v7908_v25 = vadd.f32 %v7876_v48, %v7827_v2  ;;  %v7819_v59 = vadd.f32 %v16840_v17, %v7818_v45 }
 0xaa1   : > { %v9636_v43 = vpop.f32.mrf.mxu0 }
 0xaa2   : > { %7940 = vst.msk [vmem:[%s10645_s22 + $0xd0] sm:$0xff] %vm3992_vm3, %v7908_v25  ;;  %v7906_v12 = vadd.f32 %v7874_v36, %v7819_v59  ;;  %v7830_v33 = vadd.f32 %v9636_v43, %v16840_v17 }
 0xaa3   : > { %v7821_v14 = vpop.f32.mrf.mxu0 }
 0xaa4   : > { %7938 = vst.msk [vmem:[%s10645_s22 + $0xc0] sm:$0xff] %vm3992_vm3, %v7906_v12  ;;  %v7909_v63 = vadd.f32 %v7877_v23, %v7830_v33  ;;  %v7822_v20 = vadd.f32 %v16840_v17, %v7821_v14 }
 0xaa6   : > { %7941 = vst.msk [vmem:[%s10645_s22 + $0xd8] sm:$0xff] %vm3992_vm3, %v7909_v63  ;;  %v7907_v58 = vadd.f32 %v7875_v0, %v7822_v20 }
 0xaa8   : > { %7939 = vst.msk [vmem:[%s10645_s22 + $0xc8] sm:$0xff] %vm3992_vm3, %v7907_v58 }
 0xaad   : > { %v9639_v56 = vpop.f32.mrf.mxu0 }
 0xaae   : > { %v7843_v49 = vadd.f32 %v9639_v56, %v16840_v17 }
 0xaaf   : > { %v7834_v55 = vpop.f32.mrf.mxu0 }
 0xab0   : > { %v7912_v39 = vadd.f32 %v7880_v8, %v7843_v49  ;;  %v7835_v31 = vadd.f32 %v16840_v17, %v7834_v55 }
 0xab1   : > { %v9640_v62 = vpop.f32.mrf.mxu0 }
 0xab2   : > { %7944 = vst.msk [vmem:[%s10645_s22 + $0xf0] sm:$0xff] %vm3992_vm3, %v7912_v39  ;;  %v7910_v10 = vadd.f32 %v7878_v54, %v7835_v31  ;;  %v7846_v26 = vadd.f32 %v9640_v62, %v16840_v17 }
 0xab3   : > { %v7837_v28 = vpop.f32.mrf.mxu0 }
 0xab4   : > { %7942 = vst.msk [vmem:[%s10645_s22 + $0xe0] sm:$0xff] %vm3992_vm3, %v7910_v10  ;;  %v7913_v41 = vadd.f32 %v7881_v35, %v7846_v26  ;;  %v7838_v24 = vadd.f32 %v16840_v17, %v7837_v28 }
 0xab6   : > { %7945 = vst.msk [vmem:[%s10645_s22 + $0xf8] sm:$0xff] %vm3992_vm3, %v7913_v41  ;;  %v7911_v11 = vadd.f32 %v7879_v3, %v7838_v24 }
 0xab8   : > { %7943 = vst.msk [vmem:[%s10645_s22 + $0xe8] sm:$0xff] %vm3992_vm3, %v7911_v11 }
 0xab9 PF: > { %s18_s9 = sadd.s32 1, %s10553_s9   ;;  %s19227_s27 = smov %s10545_s29 }
 0xaba   : > { %p15_p8 = scmp.ge.s32.totalorder %s18_s9, 10   ;;  %s19228_s28 = smov %s10549_s30 }
 0xabb   : > { %s19229_s29 = smov %s19232_s10  ;;  %s19230_s30 = smov %s19236_s11 }
 0xabc   :  { %17 = sbr.rel (!%p15_p8) target bundleno = 3 (0x3), region = 90 }

</bundles_post_ra>
